<compile_context>
chip_gen: v6e
topology: v6e:2x2x1
jax: 0.10.0
libtpu: 0.0.40
codegen_flags: <defaults>
</compile_context>

<pallas_src>
import jax
import jax.numpy as jnp
from jax.experimental import pallas as pl
from jax.experimental.pallas import tpu as pltpu


# ------------------------------ Pallas GEMM ---------------------------------

def _round_up(x, m):
    return -(-x // m) * m


def pallas_matmul(a, b, *, apply_tanh=False):
    """C = A @ B on the MXU. Operands cast to bf16, f32 accumulation.
    Optionally fuses tanh into the store epilogue. Returns f32 (M, N)."""
    a = a.astype(jnp.bfloat16)
    b = b.astype(jnp.bfloat16)
    M, K = a.shape
    K2, N = b.shape
    assert K == K2

    # ---- per-layer tile selection --------------------------------------
    tn = min(512, _round_up(N, 128))
    tk = min(2048, _round_up(K, 128))
    rm = _round_up(M, 16)                  # bf16 sublane packing = 16 rows
    if rm <= 128:
        tm = rm                            # tiny layer: single M tile
    elif rm <= 512:
        tm = _round_up(rm // 2, 16)        # 2 M tiles -> both v7x TensorCores busy
    else:
        tm = 256
    Mp, Kp, Np = _round_up(M, tm), _round_up(K, tk), _round_up(N, tn)

    if (Mp, Kp) != (M, K):
        a = jnp.pad(a, ((0, Mp - M), (0, Kp - K)))
    if (Kp, Np) != (K, N):
        b = jnp.pad(b, ((0, Kp - K), (0, Np - N)))   # constant-folded (weights)

    def kernel(a_ref, b_ref, o_ref, acc_ref):
        @pl.when(pl.program_id(2) == 0)
        def _init():
            acc_ref[...] = jnp.zeros_like(acc_ref)

        acc_ref[...] += jnp.dot(a_ref[...], b_ref[...],
                                preferred_element_type=jnp.float32)

        @pl.when(pl.program_id(2) == pl.num_programs(2) - 1)
        def _store():
            r = acc_ref[...]
            if apply_tanh:
                r = jnp.tanh(r)            # EUP slot; essentially free
            o_ref[...] = r.astype(o_ref.dtype)

    out = pl.pallas_call(
        kernel,
        out_shape=jax.ShapeDtypeStruct((Mp, Np), jnp.float32),
        grid_spec=pltpu.PrefetchScalarGridSpec(
            num_scalar_prefetch=0,
            grid=(Mp // tm, Np // tn, Kp // tk),
            in_specs=[pl.BlockSpec((tm, tk), lambda i, j, k: (i, k)),
                      pl.BlockSpec((tk, tn), lambda i, j, k: (k, j))],
            out_specs=pl.BlockSpec((tm, tn), lambda i, j, k: (i, j)),
            scratch_shapes=[pltpu.VMEM((tm, tn), jnp.float32)]),
        compiler_params=pltpu.CompilerParams(
            dimension_semantics=("parallel", "parallel", "arbitrary"),
            vmem_limit_bytes=32 * 1024 * 1024),
    )(a, b)
    if (Mp, Np) != (M, N):
        out = out[:M, :N]
    return out


# --------------------------- BatchNorm + ReLU --------------------------------

def _bn_relu_kernel(x_ref, scale_ref, shift_ref, o_ref):
    y = x_ref[...] * scale_ref[...] + shift_ref[...]      # f32 VPU math (v5e-safe)
    o_ref[...] = jnp.maximum(y, 0.0).astype(o_ref.dtype)


def bn_relu(x_nhwc, gamma, beta, eps=1e-5):
    """Training-mode BatchNorm2d (biased batch variance, like nn.BatchNorm2d in
    train()) + ReLU. Output is bf16, feeding the next GEMM directly."""
    N, H, W, C = x_nhwc.shape
    M = N * H * W
    x2 = x_nhwc.reshape(M, C).astype(jnp.float32)
    # single fused pass for sum / sum-of-squares
    s = jnp.sum(x2, axis=0)
    ss = jnp.sum(x2 * x2, axis=0)
    mean = s / M
    var = jnp.maximum(ss / M - mean * mean, 0.0)
    scale = gamma * jax.lax.rsqrt(var + eps)
    shift = beta - mean * scale
    # TODO(synk): fold this channel reduction into the GEMM epilogue (per-tile
    # partial sums); needs masking of the union-GEMM border rows to stay exact.

    # lane-dense layout: make the last dim a multiple of 128 when C < 128
    if C < 128 and 128 % C == 0 and M % (128 // C) == 0:
        rep = 128 // C
        xr = x2.reshape(M // rep, 128)
        sc = jnp.tile(scale, rep).reshape(1, 128)
        sh = jnp.tile(shift, rep).reshape(1, 128)
    else:
        xr, sc, sh = x2, scale.reshape(1, C), shift.reshape(1, C)

    out = pl.pallas_call(
        _bn_relu_kernel,
        out_shape=jax.ShapeDtypeStruct(xr.shape, jnp.bfloat16),
    )(xr, sc, sh)
    return out.reshape(N, H, W, C)


# --------------------------- ConvTranspose layers -----------------------------

def conv_t_first(x_nhwc, b_mat, kernel_size, cout):
    """ConvTranspose2d on a 1x1 input with stride 1, pad 0 == plain matmul."""
    n = x_nhwc.shape[0]
    a = x_nhwc.reshape(n, -1)                       # (n, Cin)
    out = pallas_matmul(a, b_mat)                   # (n, K*K*Cout), f32
    return out.reshape(n, kernel_size, kernel_size, cout)


def conv_t_subpixel(x_nhwc, b_all, cout, *, apply_tanh=False):
    """ConvTranspose2d(K=4, stride=2, pad=1) via 2x2 sub-pixel phases.

    out[n, 2m+ry, 2q+rx, co] = sum_{dy,dx,ci} xp[n, m+ry+dy, q+rx+dx, ci]
                                              * w[ci, co, 3-ry-2*dy, 3-rx-2*dx]
    with xp = x padded by 1 on each spatial side. One 'union' im2col over window
    starts (p, q) in [0,H]x[0,W] serves all four phases; the four phase
    sub-kernels are packed side by side in b_all (4*Cin, 4*Cout).
    """
    n, h, w, cin = x_nhwc.shape
    xp = jnp.pad(x_nhwc, ((0, 0), (1, 1), (1, 1), (0, 0)))
    pats = [xp[:, dy:dy + h + 1, dx:dx + w + 1, :]
            for dy in (0, 1) for dx in (0, 1)]
    a = jnp.stack(pats, axis=3).reshape(n * (h + 1) * (w + 1), 4 * cin)  # bf16

    c = pallas_matmul(a, b_all, apply_tanh=apply_tanh)   # (n*(h+1)*(w+1), 4*cout)
    c = c.reshape(n, h + 1, w + 1, 2, 2, cout)

    # gather each phase's HxW window, then interleave to (n, 2h, 2w, cout)
    phases = [[c[:, ry:ry + h, rx:rx + w, ry, rx, :] for rx in (0, 1)]
              for ry in (0, 1)]
    p = jnp.stack([jnp.stack(row, axis=0) for row in phases], axis=0)  # (2,2,n,h,w,c)
    return p.transpose(2, 3, 0, 4, 1, 5).reshape(n, 2 * h, 2 * w, cout)


# ----------------------------- Weight preparation -----------------------------

def _prep_first_weight(w):
    """(Cin,Cout,K,K) -> (Cin, K*K*Cout) with columns ordered (ky, kx, co)."""
    cin, cout, k, _ = w.shape
    return w.transpose(0, 2, 3, 1).reshape(cin, k * k * cout).astype(jnp.bfloat16)


def _prep_subpixel_weight(w):
    """(Cin,Cout,4,4) -> (4*Cin, 4*Cout): phase sub-kernels side by side,
    rows ordered (dy, dx, ci), columns ordered (phase=2*ry+rx, co)."""
    cin, cout, k, _ = w.shape
    assert k == 4
    cols = []
    for ry in (0, 1):
        for rx in (0, 1):
            taps = [w[:, :, 3 - ry - 2 * dy, 3 - rx - 2 * dx]
                    for dy in (0, 1) for dx in (0, 1)]        # each (cin, cout)
            cols.append(jnp.stack(taps, axis=0).reshape(4 * cin, cout))
    return jnp.concatenate(cols, axis=1).astype(jnp.bfloat16)  # (4*cin, 4*cout)


# ------------------------------ DCGAN Generator -------------------------------

# (Cin, Cout, kernel, stride, padding) — matches nn.Sequential in class G
LAYER_CFG = [
    (100, 512, 4, 1, 0),
    (512, 256, 4, 2, 1),
    (256, 128, 4, 2, 1),
    (128, 64, 4, 2, 1),
    (64, 3, 4, 2, 1),
]


def init_params(key):
    """Raw params: PyTorch-layout ConvTranspose2d weights + BN gamma/beta."""
    params = []
    for i, (cin, cout, k, s, p) in enumerate(LAYER_CFG):
        key, wk = jax.random.split(key)
        w = jax.random.normal(wk, (cin, cout, k, k), jnp.float32) * 0.02
        if i < len(LAYER_CFG) - 1:
            gamma = jnp.ones((cout,), jnp.float32)   # BatchNorm2d default init
            beta = jnp.zeros((cout,), jnp.float32)
        else:
            gamma = beta = None
        params.append((w, gamma, beta))
    return params


def prepare_params(params):
    """One-time rearrangement of weights into bf16 GEMM matrices."""
    prepared = []
    for i, (w, gamma, beta) in enumerate(params):
        b_mat = _prep_first_weight(w) if i == 0 else _prep_subpixel_weight(w)
        prepared.append((b_mat, gamma, beta))
    return prepared


def generator_forward(x_nchw, prepared):
    x = jnp.transpose(x_nchw, (0, 2, 3, 1)).astype(jnp.bfloat16)   # NCHW -> NHWC
    n_layers = len(LAYER_CFG)
    for i, ((cin, cout, k, s, p), (b_mat, gamma, beta)) in enumerate(
            zip(LAYER_CFG, prepared)):
        last = i == n_layers - 1
        if i == 0:
            x = conv_t_first(x, b_mat, k, cout)                     # f32 out
        else:
            x = conv_t_subpixel(x, b_mat, cout, apply_tanh=last)    # f32 out
        if not last:
            x = bn_relu(x, gamma, beta)                             # bf16 out
    return jnp.transpose(x, (0, 3, 1, 2))                           # NHWC -> NCHW


# ----------------------------------- Main --------------------------------------

if __name__ == "__main__":
    key = jax.random.PRNGKey(0)
    pkey, zkey = jax.random.split(key)
    prepared = prepare_params(init_params(pkey))

    # Generator latent input: (batch=2, 100, 1, 1) as the DCGAN G expects.
    z = jax.random.normal(zkey, (2, 100, 1, 1), jnp.float32)

    fwd = jax.jit(lambda x: generator_forward(x, prepared))
    out = fwd(z)
    jax.block_until_ready(out)

    assert out.shape == (2, 3, 64, 64), out.shape
    assert bool(jnp.all(jnp.isfinite(out)))
    print("KERNEL_OK")
</pallas_src>

<mosaic_0001>
module attributes {stable_mosaic.version = 11 : i64} {
  func.func @kernel(%arg0: i32, %arg1: i32, %arg2: i32, %arg3: memref<16x128xbf16, #tpu.memory_space<vmem>>, %arg4: memref<128x512xbf16, #tpu.memory_space<vmem>>, %arg5: memref<16x512xf32, #tpu.memory_space<vmem>>, %arg6: memref<16x512xf32, #tpu.memory_space<vmem>>) attributes {dimension_semantics = [#tpu.dimension_semantics<parallel>, #tpu.dimension_semantics<parallel>, #tpu.dimension_semantics<arbitrary>], iteration_bounds = array<i64: 1, 16, 1>, scalar_prefetch = 0 : i64, scratch_operands = 1 : i64, tpu.core_type = #tpu.core_type<tc>, window_params = [{transform_indices = @transform_0, window_bounds = array<i64: 16, 128>}, {transform_indices = @transform_1, window_bounds = array<i64: 128, 512>}, {transform_indices = @transform_2, window_bounds = array<i64: 16, 512>}]} {
    %c0_i32 = arith.constant 0 : i32
    %0 = arith.cmpi eq, %arg2, %c0_i32 : i32
    %1 = arith.extui %0 : i1 to i32
    %c0_i32_0 = arith.constant 0 : i32
    %2 = arith.cmpi ne, %1, %c0_i32_0 : i32
    scf.if %2 {
      %cst_10 = arith.constant 0.000000e+00 : f32
      %12 = vector.broadcast %cst_10 : f32 to vector<16x512xf32>
      %c0_11 = arith.constant 0 : index
      %c0_12 = arith.constant 0 : index
      %13 = vector.load %arg6[%c0_11, %c0_12] : memref<16x512xf32, #tpu.memory_space<vmem>>, vector<16x512xf32>
      tpu.vector_store %arg6[%c0_11, %c0_12], %12 {strides = array<i32>} : memref<16x512xf32, #tpu.memory_space<vmem>>, vector<16x512xf32>,
    } else {
    }
    %c0 = arith.constant 0 : index
    %c0_1 = arith.constant 0 : index
    %3 = vector.load %arg6[%c0, %c0_1] : memref<16x512xf32, #tpu.memory_space<vmem>>, vector<16x512xf32>
    %c0_2 = arith.constant 0 : index
    %c0_3 = arith.constant 0 : index
    %4 = vector.load %arg3[%c0_2, %c0_3] : memref<16x128xbf16, #tpu.memory_space<vmem>>, vector<16x128xbf16>
    %c0_4 = arith.constant 0 : index
    %c0_5 = arith.constant 0 : index
    %5 = vector.load %arg4[%c0_4, %c0_5] : memref<128x512xbf16, #tpu.memory_space<vmem>>, vector<128x512xbf16>
    %cst = arith.constant dense<0.000000e+00> : vector<16x512xf32>
    %6 = tpu.matmul %4, %5, %cst {dimension_numbers = #tpu.dot_dimension_numbers<[1], [0], [0], [1], [0, 0, 1, 1], [], []>} : vector<16x128xbf16>, vector<128x512xbf16>, vector<16x512xf32> -> vector<16x512xf32>
    %7 = arith.addf %3, %6 : vector<16x512xf32>
    %c0_6 = arith.constant 0 : index
    %c0_7 = arith.constant 0 : index
    %8 = vector.load %arg6[%c0_6, %c0_7] : memref<16x512xf32, #tpu.memory_space<vmem>>, vector<16x512xf32>
    tpu.vector_store %arg6[%c0_6, %c0_7], %7 {strides = array<i32>} : memref<16x512xf32, #tpu.memory_space<vmem>>, vector<16x512xf32>,
    %c0_i32_8 = arith.constant 0 : i32
    %9 = arith.cmpi eq, %arg2, %c0_i32_8 : i32
    %10 = arith.extui %9 : i1 to i32
    %c0_i32_9 = arith.constant 0 : i32
    %11 = arith.cmpi ne, %10, %c0_i32_9 : i32
    scf.if %11 {
      %c0_10 = arith.constant 0 : index
      %c0_11 = arith.constant 0 : index
      %12 = vector.load %arg6[%c0_10, %c0_11] : memref<16x512xf32, #tpu.memory_space<vmem>>, vector<16x512xf32>
      %c0_12 = arith.constant 0 : index
      %c0_13 = arith.constant 0 : index
      %13 = vector.load %arg5[%c0_12, %c0_13] : memref<16x512xf32, #tpu.memory_space<vmem>>, vector<16x512xf32>
      tpu.vector_store %arg5[%c0_12, %c0_13], %12 {strides = array<i32>} : memref<16x512xf32, #tpu.memory_space<vmem>>, vector<16x512xf32>,
    } else {
    }
    return
  }
  func.func @transform_0(%arg0: i32, %arg1: i32, %arg2: i32) -> (i32, i32) {
    %c0_i32 = arith.constant 0 : i32
    return %arg0, %arg2 : i32, i32
  }
  func.func @transform_1(%arg0: i32, %arg1: i32, %arg2: i32) -> (i32, i32) {
    %c0_i32 = arith.constant 0 : i32
    return %arg2, %arg1 : i32, i32
  }
  func.func @transform_2(%arg0: i32, %arg1: i32, %arg2: i32) -> (i32, i32) {
    %c0_i32 = arith.constant 0 : i32
    return %arg0, %arg1 : i32, i32
  }
}

module attributes {stable_mosaic.version = 11 : i64} {
  func.func @_bn_relu_kernel(%arg0: memref<32x512xf32, #tpu.memory_space<vmem>>, %arg1: memref<1x512xf32, #tpu.memory_space<vmem>>, %arg2: memref<1x512xf32, #tpu.memory_space<vmem>>, %arg3: memref<32x512xbf16, #tpu.memory_space<vmem>>) attributes {dimension_semantics = [], scalar_prefetch = 0 : i64, scratch_operands = 0 : i64, tpu.core_type = #tpu.core_type<tc>} {
    %c0 = arith.constant 0 : index
    %c0_0 = arith.constant 0 : index
    %0 = vector.load %arg0[%c0, %c0_0] : memref<32x512xf32, #tpu.memory_space<vmem>>, vector<32x512xf32>
    %c0_1 = arith.constant 0 : index
    %c0_2 = arith.constant 0 : index
    %1 = vector.load %arg1[%c0_1, %c0_2] : memref<1x512xf32, #tpu.memory_space<vmem>>, vector<1x512xf32>
    %2 = vector.broadcast %1 : vector<1x512xf32> to vector<32x512xf32>
    %3 = arith.mulf %0, %2 : vector<32x512xf32>
    %c0_3 = arith.constant 0 : index
    %c0_4 = arith.constant 0 : index
    %4 = vector.load %arg2[%c0_3, %c0_4] : memref<1x512xf32, #tpu.memory_space<vmem>>, vector<1x512xf32>
    %5 = vector.broadcast %4 : vector<1x512xf32> to vector<32x512xf32>
    %6 = arith.addf %3, %5 : vector<32x512xf32>
    %cst = arith.constant 0.000000e+00 : f32
    %7 = vector.broadcast %cst : f32 to vector<32x512xf32>
    %8 = arith.maximumf %6, %7 : vector<32x512xf32>
    %9 = arith.truncf %8 : vector<32x512xf32> to vector<32x512xbf16>
    %c0_5 = arith.constant 0 : index
    %c0_6 = arith.constant 0 : index
    %10 = vector.load %arg3[%c0_5, %c0_6] : memref<32x512xbf16, #tpu.memory_space<vmem>>, vector<32x512xbf16>
    tpu.vector_store %arg3[%c0_5, %c0_6], %9 {strides = array<i32>} : memref<32x512xbf16, #tpu.memory_space<vmem>>, vector<32x512xbf16>,
    return
  }
}

module attributes {stable_mosaic.version = 11 : i64} {
  func.func @kernel(%arg0: i32, %arg1: i32, %arg2: i32, %arg3: memref<64x2048xbf16, #tpu.memory_space<vmem>>, %arg4: memref<2048x512xbf16, #tpu.memory_space<vmem>>, %arg5: memref<64x512xf32, #tpu.memory_space<vmem>>, %arg6: memref<64x512xf32, #tpu.memory_space<vmem>>) attributes {dimension_semantics = [#tpu.dimension_semantics<parallel>, #tpu.dimension_semantics<parallel>, #tpu.dimension_semantics<arbitrary>], iteration_bounds = array<i64: 1, 2, 1>, scalar_prefetch = 0 : i64, scratch_operands = 1 : i64, tpu.core_type = #tpu.core_type<tc>, window_params = [{transform_indices = @transform_0, window_bounds = array<i64: 64, 2048>}, {transform_indices = @transform_1, window_bounds = array<i64: 2048, 512>}, {transform_indices = @transform_2, window_bounds = array<i64: 64, 512>}]} {
    %c0_i32 = arith.constant 0 : i32
    %0 = arith.cmpi eq, %arg2, %c0_i32 : i32
    %1 = arith.extui %0 : i1 to i32
    %c0_i32_0 = arith.constant 0 : i32
    %2 = arith.cmpi ne, %1, %c0_i32_0 : i32
    scf.if %2 {
      %cst_10 = arith.constant 0.000000e+00 : f32
      %12 = vector.broadcast %cst_10 : f32 to vector<64x512xf32>
      %c0_11 = arith.constant 0 : index
      %c0_12 = arith.constant 0 : index
      %13 = vector.load %arg6[%c0_11, %c0_12] : memref<64x512xf32, #tpu.memory_space<vmem>>, vector<64x512xf32>
      tpu.vector_store %arg6[%c0_11, %c0_12], %12 {strides = array<i32>} : memref<64x512xf32, #tpu.memory_space<vmem>>, vector<64x512xf32>,
    } else {
    }
    %c0 = arith.constant 0 : index
    %c0_1 = arith.constant 0 : index
    %3 = vector.load %arg6[%c0, %c0_1] : memref<64x512xf32, #tpu.memory_space<vmem>>, vector<64x512xf32>
    %c0_2 = arith.constant 0 : index
    %c0_3 = arith.constant 0 : index
    %4 = vector.load %arg3[%c0_2, %c0_3] : memref<64x2048xbf16, #tpu.memory_space<vmem>>, vector<64x2048xbf16>
    %c0_4 = arith.constant 0 : index
    %c0_5 = arith.constant 0 : index
    %5 = vector.load %arg4[%c0_4, %c0_5] : memref<2048x512xbf16, #tpu.memory_space<vmem>>, vector<2048x512xbf16>
    %cst = arith.constant dense<0.000000e+00> : vector<64x512xf32>
    %6 = tpu.matmul %4, %5, %cst {dimension_numbers = #tpu.dot_dimension_numbers<[1], [0], [0], [1], [0, 0, 1, 1], [], []>} : vector<64x2048xbf16>, vector<2048x512xbf16>, vector<64x512xf32> -> vector<64x512xf32>
    %7 = arith.addf %3, %6 : vector<64x512xf32>
    %c0_6 = arith.constant 0 : index
    %c0_7 = arith.constant 0 : index
    %8 = vector.load %arg6[%c0_6, %c0_7] : memref<64x512xf32, #tpu.memory_space<vmem>>, vector<64x512xf32>
    tpu.vector_store %arg6[%c0_6, %c0_7], %7 {strides = array<i32>} : memref<64x512xf32, #tpu.memory_space<vmem>>, vector<64x512xf32>,
    %c0_i32_8 = arith.constant 0 : i32
    %9 = arith.cmpi eq, %arg2, %c0_i32_8 : i32
    %10 = arith.extui %9 : i1 to i32
    %c0_i32_9 = arith.constant 0 : i32
    %11 = arith.cmpi ne, %10, %c0_i32_9 : i32
    scf.if %11 {
      %c0_10 = arith.constant 0 : index
      %c0_11 = arith.constant 0 : index
      %12 = vector.load %arg6[%c0_10, %c0_11] : memref<64x512xf32, #tpu.memory_space<vmem>>, vector<64x512xf32>
      %c0_12 = arith.constant 0 : index
      %c0_13 = arith.constant 0 : index
      %13 = vector.load %arg5[%c0_12, %c0_13] : memref<64x512xf32, #tpu.memory_space<vmem>>, vector<64x512xf32>
      tpu.vector_store %arg5[%c0_12, %c0_13], %12 {strides = array<i32>} : memref<64x512xf32, #tpu.memory_space<vmem>>, vector<64x512xf32>,
    } else {
    }
    return
  }
  func.func @transform_0(%arg0: i32, %arg1: i32, %arg2: i32) -> (i32, i32) {
    %c0_i32 = arith.constant 0 : i32
    return %arg0, %arg2 : i32, i32
  }
  func.func @transform_1(%arg0: i32, %arg1: i32, %arg2: i32) -> (i32, i32) {
    %c0_i32 = arith.constant 0 : i32
    return %arg2, %arg1 : i32, i32
  }
  func.func @transform_2(%arg0: i32, %arg1: i32, %arg2: i32) -> (i32, i32) {
    %c0_i32 = arith.constant 0 : i32
    return %arg0, %arg1 : i32, i32
  }
}

module attributes {stable_mosaic.version = 11 : i64} {
  func.func @_bn_relu_kernel(%arg0: memref<128x256xf32, #tpu.memory_space<vmem>>, %arg1: memref<1x256xf32, #tpu.memory_space<vmem>>, %arg2: memref<1x256xf32, #tpu.memory_space<vmem>>, %arg3: memref<128x256xbf16, #tpu.memory_space<vmem>>) attributes {dimension_semantics = [], scalar_prefetch = 0 : i64, scratch_operands = 0 : i64, tpu.core_type = #tpu.core_type<tc>} {
    %c0 = arith.constant 0 : index
    %c0_0 = arith.constant 0 : index
    %0 = vector.load %arg0[%c0, %c0_0] : memref<128x256xf32, #tpu.memory_space<vmem>>, vector<128x256xf32>
    %c0_1 = arith.constant 0 : index
    %c0_2 = arith.constant 0 : index
    %1 = vector.load %arg1[%c0_1, %c0_2] : memref<1x256xf32, #tpu.memory_space<vmem>>, vector<1x256xf32>
    %2 = vector.broadcast %1 : vector<1x256xf32> to vector<128x256xf32>
    %3 = arith.mulf %0, %2 : vector<128x256xf32>
    %c0_3 = arith.constant 0 : index
    %c0_4 = arith.constant 0 : index
    %4 = vector.load %arg2[%c0_3, %c0_4] : memref<1x256xf32, #tpu.memory_space<vmem>>, vector<1x256xf32>
    %5 = vector.broadcast %4 : vector<1x256xf32> to vector<128x256xf32>
    %6 = arith.addf %3, %5 : vector<128x256xf32>
    %cst = arith.constant 0.000000e+00 : f32
    %7 = vector.broadcast %cst : f32 to vector<128x256xf32>
    %8 = arith.maximumf %6, %7 : vector<128x256xf32>
    %9 = arith.truncf %8 : vector<128x256xf32> to vector<128x256xbf16>
    %c0_5 = arith.constant 0 : index
    %c0_6 = arith.constant 0 : index
    %10 = vector.load %arg3[%c0_5, %c0_6] : memref<128x256xbf16, #tpu.memory_space<vmem>>, vector<128x256xbf16>
    tpu.vector_store %arg3[%c0_5, %c0_6], %9 {strides = array<i32>} : memref<128x256xbf16, #tpu.memory_space<vmem>>, vector<128x256xbf16>,
    return
  }
}

module attributes {stable_mosaic.version = 11 : i64} {
  func.func @kernel(%arg0: i32, %arg1: i32, %arg2: i32, %arg3: memref<96x1024xbf16, #tpu.memory_space<vmem>>, %arg4: memref<1024x512xbf16, #tpu.memory_space<vmem>>, %arg5: memref<96x512xf32, #tpu.memory_space<vmem>>, %arg6: memref<96x512xf32, #tpu.memory_space<vmem>>) attributes {dimension_semantics = [#tpu.dimension_semantics<parallel>, #tpu.dimension_semantics<parallel>, #tpu.dimension_semantics<arbitrary>], iteration_bounds = array<i64: 2, 1, 1>, scalar_prefetch = 0 : i64, scratch_operands = 1 : i64, tpu.core_type = #tpu.core_type<tc>, window_params = [{transform_indices = @transform_0, window_bounds = array<i64: 96, 1024>}, {transform_indices = @transform_1, window_bounds = array<i64: 1024, 512>}, {transform_indices = @transform_2, window_bounds = array<i64: 96, 512>}]} {
    %c0_i32 = arith.constant 0 : i32
    %0 = arith.cmpi eq, %arg2, %c0_i32 : i32
    %1 = arith.extui %0 : i1 to i32
    %c0_i32_0 = arith.constant 0 : i32
    %2 = arith.cmpi ne, %1, %c0_i32_0 : i32
    scf.if %2 {
      %cst_10 = arith.constant 0.000000e+00 : f32
      %12 = vector.broadcast %cst_10 : f32 to vector<96x512xf32>
      %c0_11 = arith.constant 0 : index
      %c0_12 = arith.constant 0 : index
      %13 = vector.load %arg6[%c0_11, %c0_12] : memref<96x512xf32, #tpu.memory_space<vmem>>, vector<96x512xf32>
      tpu.vector_store %arg6[%c0_11, %c0_12], %12 {strides = array<i32>} : memref<96x512xf32, #tpu.memory_space<vmem>>, vector<96x512xf32>,
    } else {
    }
    %c0 = arith.constant 0 : index
    %c0_1 = arith.constant 0 : index
    %3 = vector.load %arg6[%c0, %c0_1] : memref<96x512xf32, #tpu.memory_space<vmem>>, vector<96x512xf32>
    %c0_2 = arith.constant 0 : index
    %c0_3 = arith.constant 0 : index
    %4 = vector.load %arg3[%c0_2, %c0_3] : memref<96x1024xbf16, #tpu.memory_space<vmem>>, vector<96x1024xbf16>
    %c0_4 = arith.constant 0 : index
    %c0_5 = arith.constant 0 : index
    %5 = vector.load %arg4[%c0_4, %c0_5] : memref<1024x512xbf16, #tpu.memory_space<vmem>>, vector<1024x512xbf16>
    %cst = arith.constant dense<0.000000e+00> : vector<96x512xf32>
    %6 = tpu.matmul %4, %5, %cst {dimension_numbers = #tpu.dot_dimension_numbers<[1], [0], [0], [1], [0, 0, 1, 1], [], []>} : vector<96x1024xbf16>, vector<1024x512xbf16>, vector<96x512xf32> -> vector<96x512xf32>
    %7 = arith.addf %3, %6 : vector<96x512xf32>
    %c0_6 = arith.constant 0 : index
    %c0_7 = arith.constant 0 : index
    %8 = vector.load %arg6[%c0_6, %c0_7] : memref<96x512xf32, #tpu.memory_space<vmem>>, vector<96x512xf32>
    tpu.vector_store %arg6[%c0_6, %c0_7], %7 {strides = array<i32>} : memref<96x512xf32, #tpu.memory_space<vmem>>, vector<96x512xf32>,
    %c0_i32_8 = arith.constant 0 : i32
    %9 = arith.cmpi eq, %arg2, %c0_i32_8 : i32
    %10 = arith.extui %9 : i1 to i32
    %c0_i32_9 = arith.constant 0 : i32
    %11 = arith.cmpi ne, %10, %c0_i32_9 : i32
    scf.if %11 {
      %c0_10 = arith.constant 0 : index
      %c0_11 = arith.constant 0 : index
      %12 = vector.load %arg6[%c0_10, %c0_11] : memref<96x512xf32, #tpu.memory_space<vmem>>, vector<96x512xf32>
      %c0_12 = arith.constant 0 : index
      %c0_13 = arith.constant 0 : index
      %13 = vector.load %arg5[%c0_12, %c0_13] : memref<96x512xf32, #tpu.memory_space<vmem>>, vector<96x512xf32>
      tpu.vector_store %arg5[%c0_12, %c0_13], %12 {strides = array<i32>} : memref<96x512xf32, #tpu.memory_space<vmem>>, vector<96x512xf32>,
    } else {
    }
    return
  }
  func.func @transform_0(%arg0: i32, %arg1: i32, %arg2: i32) -> (i32, i32) {
    %c0_i32 = arith.constant 0 : i32
    return %arg0, %arg2 : i32, i32
  }
  func.func @transform_1(%arg0: i32, %arg1: i32, %arg2: i32) -> (i32, i32) {
    %c0_i32 = arith.constant 0 : i32
    return %arg2, %arg1 : i32, i32
  }
  func.func @transform_2(%arg0: i32, %arg1: i32, %arg2: i32) -> (i32, i32) {
    %c0_i32 = arith.constant 0 : i32
    return %arg0, %arg1 : i32, i32
  }
}

module attributes {stable_mosaic.version = 11 : i64} {
  func.func @_bn_relu_kernel(%arg0: memref<512x128xf32, #tpu.memory_space<vmem>>, %arg1: memref<1x128xf32, #tpu.memory_space<vmem>>, %arg2: memref<1x128xf32, #tpu.memory_space<vmem>>, %arg3: memref<512x128xbf16, #tpu.memory_space<vmem>>) attributes {dimension_semantics = [], scalar_prefetch = 0 : i64, scratch_operands = 0 : i64, tpu.core_type = #tpu.core_type<tc>} {
    %c0 = arith.constant 0 : index
    %c0_0 = arith.constant 0 : index
    %0 = vector.load %arg0[%c0, %c0_0] : memref<512x128xf32, #tpu.memory_space<vmem>>, vector<512x128xf32>
    %c0_1 = arith.constant 0 : index
    %c0_2 = arith.constant 0 : index
    %1 = vector.load %arg1[%c0_1, %c0_2] : memref<1x128xf32, #tpu.memory_space<vmem>>, vector<1x128xf32>
    %2 = vector.broadcast %1 : vector<1x128xf32> to vector<512x128xf32>
    %3 = arith.mulf %0, %2 : vector<512x128xf32>
    %c0_3 = arith.constant 0 : index
    %c0_4 = arith.constant 0 : index
    %4 = vector.load %arg2[%c0_3, %c0_4] : memref<1x128xf32, #tpu.memory_space<vmem>>, vector<1x128xf32>
    %5 = vector.broadcast %4 : vector<1x128xf32> to vector<512x128xf32>
    %6 = arith.addf %3, %5 : vector<512x128xf32>
    %cst = arith.constant 0.000000e+00 : f32
    %7 = vector.broadcast %cst : f32 to vector<512x128xf32>
    %8 = arith.maximumf %6, %7 : vector<512x128xf32>
    %9 = arith.truncf %8 : vector<512x128xf32> to vector<512x128xbf16>
    %c0_5 = arith.constant 0 : index
    %c0_6 = arith.constant 0 : index
    %10 = vector.load %arg3[%c0_5, %c0_6] : memref<512x128xbf16, #tpu.memory_space<vmem>>, vector<512x128xbf16>
    tpu.vector_store %arg3[%c0_5, %c0_6], %9 {strides = array<i32>} : memref<512x128xbf16, #tpu.memory_space<vmem>>, vector<512x128xbf16>,
    return
  }
}

module attributes {stable_mosaic.version = 11 : i64} {
  func.func @kernel(%arg0: i32, %arg1: i32, %arg2: i32, %arg3: memref<256x512xbf16, #tpu.memory_space<vmem>>, %arg4: memref<512x256xbf16, #tpu.memory_space<vmem>>, %arg5: memref<256x256xf32, #tpu.memory_space<vmem>>, %arg6: memref<256x256xf32, #tpu.memory_space<vmem>>) attributes {dimension_semantics = [#tpu.dimension_semantics<parallel>, #tpu.dimension_semantics<parallel>, #tpu.dimension_semantics<arbitrary>], iteration_bounds = array<i64: 3, 1, 1>, scalar_prefetch = 0 : i64, scratch_operands = 1 : i64, tpu.core_type = #tpu.core_type<tc>, window_params = [{transform_indices = @transform_0, window_bounds = array<i64: 256, 512>}, {transform_indices = @transform_1, window_bounds = array<i64: 512, 256>}, {transform_indices = @transform_2, window_bounds = array<i64: 256, 256>}]} {
    %c0_i32 = arith.constant 0 : i32
    %0 = arith.cmpi eq, %arg2, %c0_i32 : i32
    %1 = arith.extui %0 : i1 to i32
    %c0_i32_0 = arith.constant 0 : i32
    %2 = arith.cmpi ne, %1, %c0_i32_0 : i32
    scf.if %2 {
      %cst_10 = arith.constant 0.000000e+00 : f32
      %12 = vector.broadcast %cst_10 : f32 to vector<256x256xf32>
      %c0_11 = arith.constant 0 : index
      %c0_12 = arith.constant 0 : index
      %13 = vector.load %arg6[%c0_11, %c0_12] : memref<256x256xf32, #tpu.memory_space<vmem>>, vector<256x256xf32>
      tpu.vector_store %arg6[%c0_11, %c0_12], %12 {strides = array<i32>} : memref<256x256xf32, #tpu.memory_space<vmem>>, vector<256x256xf32>,
    } else {
    }
    %c0 = arith.constant 0 : index
    %c0_1 = arith.constant 0 : index
    %3 = vector.load %arg6[%c0, %c0_1] : memref<256x256xf32, #tpu.memory_space<vmem>>, vector<256x256xf32>
    %c0_2 = arith.constant 0 : index
    %c0_3 = arith.constant 0 : index
    %4 = vector.load %arg3[%c0_2, %c0_3] : memref<256x512xbf16, #tpu.memory_space<vmem>>, vector<256x512xbf16>
    %c0_4 = arith.constant 0 : index
    %c0_5 = arith.constant 0 : index
    %5 = vector.load %arg4[%c0_4, %c0_5] : memref<512x256xbf16, #tpu.memory_space<vmem>>, vector<512x256xbf16>
    %cst = arith.constant dense<0.000000e+00> : vector<256x256xf32>
    %6 = tpu.matmul %4, %5, %cst {dimension_numbers = #tpu.dot_dimension_numbers<[1], [0], [0], [1], [0, 0, 1, 1], [], []>} : vector<256x512xbf16>, vector<512x256xbf16>, vector<256x256xf32> -> vector<256x256xf32>
    %7 = arith.addf %3, %6 : vector<256x256xf32>
    %c0_6 = arith.constant 0 : index
    %c0_7 = arith.constant 0 : index
    %8 = vector.load %arg6[%c0_6, %c0_7] : memref<256x256xf32, #tpu.memory_space<vmem>>, vector<256x256xf32>
    tpu.vector_store %arg6[%c0_6, %c0_7], %7 {strides = array<i32>} : memref<256x256xf32, #tpu.memory_space<vmem>>, vector<256x256xf32>,
    %c0_i32_8 = arith.constant 0 : i32
    %9 = arith.cmpi eq, %arg2, %c0_i32_8 : i32
    %10 = arith.extui %9 : i1 to i32
    %c0_i32_9 = arith.constant 0 : i32
    %11 = arith.cmpi ne, %10, %c0_i32_9 : i32
    scf.if %11 {
      %c0_10 = arith.constant 0 : index
      %c0_11 = arith.constant 0 : index
      %12 = vector.load %arg6[%c0_10, %c0_11] : memref<256x256xf32, #tpu.memory_space<vmem>>, vector<256x256xf32>
      %c0_12 = arith.constant 0 : index
      %c0_13 = arith.constant 0 : index
      %13 = vector.load %arg5[%c0_12, %c0_13] : memref<256x256xf32, #tpu.memory_space<vmem>>, vector<256x256xf32>
      tpu.vector_store %arg5[%c0_12, %c0_13], %12 {strides = array<i32>} : memref<256x256xf32, #tpu.memory_space<vmem>>, vector<256x256xf32>,
    } else {
    }
    return
  }
  func.func @transform_0(%arg0: i32, %arg1: i32, %arg2: i32) -> (i32, i32) {
    %c0_i32 = arith.constant 0 : i32
    return %arg0, %arg2 : i32, i32
  }
  func.func @transform_1(%arg0: i32, %arg1: i32, %arg2: i32) -> (i32, i32) {
    %c0_i32 = arith.constant 0 : i32
    return %arg2, %arg1 : i32, i32
  }
  func.func @transform_2(%arg0: i32, %arg1: i32, %arg2: i32) -> (i32, i32) {
    %c0_i32 = arith.constant 0 : i32
    return %arg0, %arg1 : i32, i32
  }
}

module attributes {stable_mosaic.version = 11 : i64} {
  func.func @_bn_relu_kernel(%arg0: memref<1024x128xf32, #tpu.memory_space<vmem>>, %arg1: memref<1x128xf32, #tpu.memory_space<vmem>>, %arg2: memref<1x128xf32, #tpu.memory_space<vmem>>, %arg3: memref<1024x128xbf16, #tpu.memory_space<vmem>>) attributes {dimension_semantics = [], scalar_prefetch = 0 : i64, scratch_operands = 0 : i64, tpu.core_type = #tpu.core_type<tc>} {
    %c0 = arith.constant 0 : index
    %c0_0 = arith.constant 0 : index
    %0 = vector.load %arg0[%c0, %c0_0] : memref<1024x128xf32, #tpu.memory_space<vmem>>, vector<1024x128xf32>
    %c0_1 = arith.constant 0 : index
    %c0_2 = arith.constant 0 : index
    %1 = vector.load %arg1[%c0_1, %c0_2] : memref<1x128xf32, #tpu.memory_space<vmem>>, vector<1x128xf32>
    %2 = vector.broadcast %1 : vector<1x128xf32> to vector<1024x128xf32>
    %3 = arith.mulf %0, %2 : vector<1024x128xf32>
    %c0_3 = arith.constant 0 : index
    %c0_4 = arith.constant 0 : index
    %4 = vector.load %arg2[%c0_3, %c0_4] : memref<1x128xf32, #tpu.memory_space<vmem>>, vector<1x128xf32>
    %5 = vector.broadcast %4 : vector<1x128xf32> to vector<1024x128xf32>
    %6 = arith.addf %3, %5 : vector<1024x128xf32>
    %cst = arith.constant 0.000000e+00 : f32
    %7 = vector.broadcast %cst : f32 to vector<1024x128xf32>
    %8 = arith.maximumf %6, %7 : vector<1024x128xf32>
    %9 = arith.truncf %8 : vector<1024x128xf32> to vector<1024x128xbf16>
    %c0_5 = arith.constant 0 : index
    %c0_6 = arith.constant 0 : index
    %10 = vector.load %arg3[%c0_5, %c0_6] : memref<1024x128xbf16, #tpu.memory_space<vmem>>, vector<1024x128xbf16>
    tpu.vector_store %arg3[%c0_5, %c0_6], %9 {strides = array<i32>} : memref<1024x128xbf16, #tpu.memory_space<vmem>>, vector<1024x128xbf16>,
    return
  }
}

module attributes {stable_mosaic.version = 11 : i64} {
  func.func @kernel(%arg0: i32, %arg1: i32, %arg2: i32, %arg3: memref<256x256xbf16, #tpu.memory_space<vmem>>, %arg4: memref<256x128xbf16, #tpu.memory_space<vmem>>, %arg5: memref<256x128xf32, #tpu.memory_space<vmem>>, %arg6: memref<256x128xf32, #tpu.memory_space<vmem>>) attributes {dimension_semantics = [#tpu.dimension_semantics<parallel>, #tpu.dimension_semantics<parallel>, #tpu.dimension_semantics<arbitrary>], iteration_bounds = array<i64: 9, 1, 1>, scalar_prefetch = 0 : i64, scratch_operands = 1 : i64, tpu.core_type = #tpu.core_type<tc>, window_params = [{transform_indices = @transform_0, window_bounds = array<i64: 256, 256>}, {transform_indices = @transform_1, window_bounds = array<i64: 256, 128>}, {transform_indices = @transform_2, window_bounds = array<i64: 256, 128>}]} {
    %c0_i32 = arith.constant 0 : i32
    %0 = arith.cmpi eq, %arg2, %c0_i32 : i32
    %1 = arith.extui %0 : i1 to i32
    %c0_i32_0 = arith.constant 0 : i32
    %2 = arith.cmpi ne, %1, %c0_i32_0 : i32
    scf.if %2 {
      %cst_10 = arith.constant 0.000000e+00 : f32
      %12 = vector.broadcast %cst_10 : f32 to vector<256x128xf32>
      %c0_11 = arith.constant 0 : index
      %c0_12 = arith.constant 0 : index
      %13 = vector.load %arg6[%c0_11, %c0_12] : memref<256x128xf32, #tpu.memory_space<vmem>>, vector<256x128xf32>
      tpu.vector_store %arg6[%c0_11, %c0_12], %12 {strides = array<i32>} : memref<256x128xf32, #tpu.memory_space<vmem>>, vector<256x128xf32>,
    } else {
    }
    %c0 = arith.constant 0 : index
    %c0_1 = arith.constant 0 : index
    %3 = vector.load %arg6[%c0, %c0_1] : memref<256x128xf32, #tpu.memory_space<vmem>>, vector<256x128xf32>
    %c0_2 = arith.constant 0 : index
    %c0_3 = arith.constant 0 : index
    %4 = vector.load %arg3[%c0_2, %c0_3] : memref<256x256xbf16, #tpu.memory_space<vmem>>, vector<256x256xbf16>
    %c0_4 = arith.constant 0 : index
    %c0_5 = arith.constant 0 : index
    %5 = vector.load %arg4[%c0_4, %c0_5] : memref<256x128xbf16, #tpu.memory_space<vmem>>, vector<256x128xbf16>
    %cst = arith.constant dense<0.000000e+00> : vector<256x128xf32>
    %6 = tpu.matmul %4, %5, %cst {dimension_numbers = #tpu.dot_dimension_numbers<[1], [0], [0], [1], [0, 0, 1, 1], [], []>} : vector<256x256xbf16>, vector<256x128xbf16>, vector<256x128xf32> -> vector<256x128xf32>
    %7 = arith.addf %3, %6 : vector<256x128xf32>
    %c0_6 = arith.constant 0 : index
    %c0_7 = arith.constant 0 : index
    %8 = vector.load %arg6[%c0_6, %c0_7] : memref<256x128xf32, #tpu.memory_space<vmem>>, vector<256x128xf32>
    tpu.vector_store %arg6[%c0_6, %c0_7], %7 {strides = array<i32>} : memref<256x128xf32, #tpu.memory_space<vmem>>, vector<256x128xf32>,
    %c0_i32_8 = arith.constant 0 : i32
    %9 = arith.cmpi eq, %arg2, %c0_i32_8 : i32
    %10 = arith.extui %9 : i1 to i32
    %c0_i32_9 = arith.constant 0 : i32
    %11 = arith.cmpi ne, %10, %c0_i32_9 : i32
    scf.if %11 {
      %c0_10 = arith.constant 0 : index
      %c0_11 = arith.constant 0 : index
      %12 = vector.load %arg6[%c0_10, %c0_11] : memref<256x128xf32, #tpu.memory_space<vmem>>, vector<256x128xf32>
      %13 = math.tanh %12 : vector<256x128xf32>
      %c0_12 = arith.constant 0 : index
      %c0_13 = arith.constant 0 : index
      %14 = vector.load %arg5[%c0_12, %c0_13] : memref<256x128xf32, #tpu.memory_space<vmem>>, vector<256x128xf32>
      tpu.vector_store %arg5[%c0_12, %c0_13], %13 {strides = array<i32>} : memref<256x128xf32, #tpu.memory_space<vmem>>, vector<256x128xf32>,
    } else {
    }
    return
  }
  func.func @transform_0(%arg0: i32, %arg1: i32, %arg2: i32) -> (i32, i32) {
    %c0_i32 = arith.constant 0 : i32
    return %arg0, %arg2 : i32, i32
  }
  func.func @transform_1(%arg0: i32, %arg1: i32, %arg2: i32) -> (i32, i32) {
    %c0_i32 = arith.constant 0 : i32
    return %arg2, %arg1 : i32, i32
  }
  func.func @transform_2(%arg0: i32, %arg1: i32, %arg2: i32) -> (i32, i32) {
    %c0_i32 = arith.constant 0 : i32
    return %arg0, %arg1 : i32, i32
  }
}

</mosaic_0001>

<bundles_post_ra>
// kernel: _lambda_.10
= control target key start
LH: loop header
LB: loop body
LE: loop exit
PB: predicated region body
PF: predicated region fallthrough
CT: control target
= control target key end

     0   :  { %v32_v0 = vlaneseq  ;;  %s308_s1 = inlined_call_operand.vmem [shape: f32[1,512], index: 1, kind: input, shape index: {}]   ;;  %s309_s2 = inlined_call_operand.vmem [shape: f32[1,512], index: 2, kind: input, shape index: {}]   ;;  %s310_s0 = inlined_call_operand.vmem [shape: f32[32,512], index: 0, kind: input, shape index: {}]   ;;  %s311_s3 = inlined_call_operand.vmem [shape: bf16[32,512], index: 3, kind: output, shape index: {}]  }
   0x1   :  { %v30_v2 = vld [vmem:[%s308_s1] sm:$0xf]  ;;  %v15_v5 = vld [vmem:[%s310_s0 + $0x8] sm:$0xff]  ;;  %v16_v10 = vld [vmem:[%s310_s0 + $0x10] sm:$0xff] }
   0x2   :  { %v33_v1 = vshrl.u32 %v32_v0, 7  ;;  %v68_v3 = vld [vmem:[%s309_s2] sm:$0xf]  ;;  %v19_v12 = vld [vmem:[%s310_s0 + $0x28] sm:$0xff]  ;;  %v17_v17 = vld [vmem:[%s310_s0 + $0x18] sm:$0xff] }
   0x3   :  { %v14_v4 = vld [vmem:[%s310_s0] sm:$0xff]  ;;  %v20_v18 = vld [vmem:[%s310_s0 + $0x30] sm:$0xff]  ;;  %v21_v19 = vld [vmem:[%s310_s0 + $0x38] sm:$0xff] }
   0x4   :  { %v34_v6 = vsub.s32 0, %v33_v1  ;;  %v38_v7 = vsub.s32 1, %v33_v1  ;;  %v42_v8 = vsub.s32 2, %v33_v1  ;;  %v46_v9 = vsub.s32 3, %v33_v1  ;;  %v18_v11 = vld [vmem:[%s310_s0 + $0x20] sm:$0xff]  ;;  %v23_v41 = vld [vmem:[%s310_s0 + $0x48] sm:$0xff] }
   0x5   :  { %v22_v40 = vld [vmem:[%s310_s0 + $0x40] sm:$0xff]  ;;  %v24_v46 = vld [vmem:[%s310_s0 + $0x50] sm:$0xff]  ;;  %v25_v47 = vld [vmem:[%s310_s0 + $0x58] sm:$0xff] }
   0x6   :  { %v35_v13 = vrot.slane %v30_v2, %v34_v6  ;;  %v39_v14 = vrot.slane %v30_v2, %v38_v7  ;;  %v239_v15 = vrot.slane %v68_v3, %v34_v6  ;;  %v241_v16 = vrot.slane %v68_v3, %v38_v7  ;;  %v26_v52 = vld [vmem:[%s310_s0 + $0x60] sm:$0xff]  ;;  %v27_v53 = vld [vmem:[%s310_s0 + $0x68] sm:$0xff]  ;;  %v28_v58 = vld [vmem:[%s310_s0 + $0x70] sm:$0xff] }
   0x7   :  { %v43_v20 = vrot.slane %v30_v2, %v42_v8  ;;  %v47_v21 = vrot.slane %v30_v2, %v46_v9  ;;  %v81_v22 = vrot.slane %v68_v3, %v42_v8  ;;  %v85_v23 = vrot.slane %v68_v3, %v46_v9  ;;  %v29_v59 = vld [vmem:[%s310_s0 + $0x78] sm:$0xff] }
   0x8   :  { %v52_v24 = vmul.f32 %v35_v13, %v14_v4  ;;  %v53_v25 = vmul.f32 %v39_v14, %v15_v5  ;;  %v56_v26 = vmul.f32 %v35_v13, %v18_v11  ;;  %v57_v27 = vmul.f32 %v39_v14, %v19_v12 }
   0x9   :  { %v54_v28 = vmul.f32 %v43_v20, %v16_v10  ;;  %v55_v29 = vmul.f32 %v47_v21, %v17_v17  ;;  %v58_v30 = vmul.f32 %v43_v20, %v20_v18  ;;  %v59_v31 = vmul.f32 %v47_v21, %v21_v19 }
   0xa   :  { %v90_v32 = vadd.f32 %v239_v15, %v52_v24  ;;  %v91_v33 = vadd.f32 %v241_v16, %v53_v25  ;;  %v94_v34 = vadd.f32 %v239_v15, %v56_v26  ;;  %v95_v35 = vadd.f32 %v241_v16, %v57_v27 }
   0xb   :  { %v92_v36 = vadd.f32 %v81_v22, %v54_v28  ;;  %v93_v37 = vadd.f32 %v85_v23, %v55_v29  ;;  %v96_v38 = vadd.f32 %v81_v22, %v58_v30  ;;  %v97_v39 = vadd.f32 %v85_v23, %v59_v31 }
   0xc   :  { %v106_v42 = vmax.f32 %v90_v32, 0.0  ;;  %v107_v43 = vmax.f32 %v91_v33, 0.0  ;;  %v110_v44 = vmax.f32 %v94_v34, 0.0  ;;  %v111_v45 = vmax.f32 %v95_v35, 0.0 }
   0xd   :  { %v108_v48 = vmax.f32 %v92_v36, 0.0  ;;  %v109_v49 = vmax.f32 %v93_v37, 0.0  ;;  %v112_v50 = vmax.f32 %v96_v38, 0.0  ;;  %v113_v51 = vmax.f32 %v97_v39, 0.0 }
   0xe   :  { %v190_v54 = vpack.c.bf16 %v107_v43, %v106_v42  ;;  %v192_v55 = vpack.c.bf16 %v111_v45, %v110_v44  ;;  %v60_v56 = vmul.f32 %v35_v13, %v22_v40  ;;  %v61_v57 = vmul.f32 %v39_v14, %v23_v41 }
   0xf   :  { %v191_v60 = vpack.c.bf16 %v109_v49, %v108_v48  ;;  %v193_v61 = vpack.c.bf16 %v113_v51, %v112_v50  ;;  %v62_v62 = vmul.f32 %v43_v20, %v24_v46  ;;  %v63_v63 = vmul.f32 %v47_v21, %v25_v47 }
  0x10   :  { %170 = vst [vmem:[%s311_s3] sm:$0xff] %v190_v54  ;;  %172 = vst [vmem:[%s311_s3 + $0x10] sm:$0xff] %v192_v55  ;;  %v98_v0 = vadd.f32 %v239_v15, %v60_v56  ;;  %v99_v1 = vadd.f32 %v241_v16, %v61_v57  ;;  %v64_v2 = vmul.f32 %v35_v13, %v26_v52 }
  0x11   :  { %v65_v3 = vmul.f32 %v39_v14, %v27_v53  ;;  %171 = vst [vmem:[%s311_s3 + $0x8] sm:$0xff] %v191_v60  ;;  %173 = vst [vmem:[%s311_s3 + $0x18] sm:$0xff] %v193_v61  ;;  %v100_v4 = vadd.f32 %v81_v22, %v62_v62  ;;  %v101_v5 = vadd.f32 %v85_v23, %v63_v63 }
  0x12   :  { %v66_v6 = vmul.f32 %v43_v20, %v28_v58  ;;  %v67_v7 = vmul.f32 %v47_v21, %v29_v59  ;;  %v114_v8 = vmax.f32 %v98_v0, 0.0  ;;  %v115_v9 = vmax.f32 %v99_v1, 0.0 }
  0x13   :  { %v102_v10 = vadd.f32 %v239_v15, %v64_v2  ;;  %v103_v11 = vadd.f32 %v241_v16, %v65_v3  ;;  %v116_v12 = vmax.f32 %v100_v4, 0.0  ;;  %v117_v13 = vmax.f32 %v101_v5, 0.0 }
  0x14   :  { %v104_v14 = vadd.f32 %v81_v22, %v66_v6  ;;  %v105_v17 = vadd.f32 %v85_v23, %v67_v7  ;;  %v194_v18 = vpack.c.bf16 %v115_v9, %v114_v8 }
  0x15   :  { %v118_v19 = vmax.f32 %v102_v10, 0.0  ;;  %v119_v24 = vmax.f32 %v103_v11, 0.0  ;;  %v195_v25 = vpack.c.bf16 %v117_v13, %v116_v12 }
  0x16   :  { %v120_v26 = vmax.f32 %v104_v14, 0.0  ;;  %v121_v27 = vmax.f32 %v105_v17, 0.0  ;;  %174 = vst [vmem:[%s311_s3 + $0x20] sm:$0xff] %v194_v18 }
  0x17   :  { %v196_v20 = vpack.c.bf16 %v119_v24, %v118_v19  ;;  %175 = vst [vmem:[%s311_s3 + $0x28] sm:$0xff] %v195_v25 }
  0x18   :  { %v197_v15 = vpack.c.bf16 %v121_v27, %v120_v26 }
  0x19   :  { %176 = vst [vmem:[%s311_s3 + $0x30] sm:$0xff] %v196_v20 }
  0x1a   :  { %177 = vst [vmem:[%s311_s3 + $0x38] sm:$0xff] %v197_v15 }

// kernel: _lambda_.9
= control target key start
LH: loop header
LB: loop body
LE: loop exit
PB: predicated region body
PF: predicated region fallthrough
CT: control target
= control target key end

     0   :  { %7 = vsyncpa [#allocation4], 0  ;;  %s1126_s0 = inlined_call_operand.vmem [shape: bf16[16,128], index: 0, kind: input, shape index: {}]   ;;  %s1127_s1 = inlined_call_operand.hbm [shape: bf16[128,8192], index: 1, kind: input, shape index: {}]   ;;  %s1128_s2 = inlined_call_operand.vmem [shape: f32[16,8192], index: 2, kind: output, shape index: {}]  }
   0x1   :  { %9 = vsyncpa [#allocation4 + $0x1], 0  ;;  %s963_s9 = smov 0   ;;  %s965_s10 = smov 0  }
   0x2   :  { %s967_s11 = smov 0   ;;  %s969_s12 = smov 0  }
   0x3   :  { %s971_s13 = smov 0   ;;  %s973_s14 = smov 0  }
   0x4 LB: > { %s704_s15 = sadd.s32 4294967295, %s941_s14   ;;  %s30_s16 = sadd.s32 1, %s937_s13  ;;  %s941_s14 = sphi %s973_s14, %s15_s14   ;;  %s937_s13 = sphi %s971_s13, %s1137_s13   ;;  %s933_s12 = sphi %s969_s12, %s1136_s12   ;;  %s929_s11 = sphi %s967_s11, %s1135_s11   ;;  %s925_s10 = sphi %s965_s10, %s1134_s10   ;;  %s921_s9 = sphi %s963_s9, %s1133_s9  }
   0x5   : > { %p32_p0 = scmp.ge.s32.totalorder %s30_s16, 16  ;;  %s71_s17 = sadd.s32 1, %s929_s11 }
   0x6   : > { %p78_p1 = scmp.ne.s32.totalorder %s929_s11, %s925_s10  ;;  %p79_p2 = scmp.eq.s32.totalorder %s941_s14, 0 }
   0x7   : > { %s1139_s16 = smov (%p32_p0, %s30_s16), 0  ;;  %p84_p4 = scmp.ne.s32.totalorder %s925_s10, %s921_s9 }
   0x8   : > { %p999_p3 = por %p79_p2, %p78_p1  ;;  %s67_s19 = ssub.s32 %s937_s13, %s1139_s16 }
   0x9   : > { %p85_p5 = scmp.eq.s32.totalorder %s704_s15, 0  ;;  %p69_p6 = scmp.eq.s32.totalorder %s67_s19, 0 }
   0xa   : > { %p110_p7 = scmp.eq.s32.totalorder %s704_s15, 15  ;;  %p761_p10 = scmp.lt.s32.totalorder %s941_s14, 16 }
   0xb   : > { %p1006_p8 = por %p85_p5, %p84_p4  ;;  %s148_s23 = sand.u32 1, %s929_s11  }
   0xc   : > { %s1011_s21 = scalar_select %p69_p6, %s929_s11, %s71_s17  }
   0xd   : > { %p1013_p9 = por %p110_p7, %p78_p1  ;;  %s753_s24 = sshll.u32 %s937_s13, 8 }
   0xe   : > { %s709_s25 = sshll.u32 %s148_s23, 8  ;;  %s161_s28 = scalar_lea.hbm %s1127_s1, %s753_s24 }
   0xf   : > { %s152_s29 = scalar_lea.vmem [#allocation3], %s709_s25  ;;  %p1025_p11 = pnand %p761_p10, %p999_p3 }
  0x10   : > { %s162_s30 = sshll.u32 %s152_s29, 4  ;;  %p712_p12 = scmp.ge.s32.totalorder %s941_s14, 1  ;;  %s163_s30 = int_to_ptr.vmem [resolvable:$true] %s162_s30 }
  0x11   : > { %s149_s4 = scalar_lea.sflag [#allocation4], %s148_s23  ;;  %p865_p13 = pneg %p1025_p11 }
  0x12   : > { %s876_s5 = scalar_lea.vmem %s163_s30, 4096  ;;  %s943_s6 = smov [#allocation3]  }
  0x13   : > { %p877_p0 = scmp.ne.s32.totalorder %s163_s30, %s876_s5  ;;  %s881_s7 = sshll.u32 %s943_s6, 4  ;;  %s882_s7 = int_to_ptr.vmem [resolvable:$false] %s881_s7 }
  0x14   : > { %s883_s8 = scalar_lea.vmem %s882_s7, 8192  ;;  %p884_p4 = scmp.lt.s32.totalorder %s163_s30, %s882_s7 }
  0x15   : > { %p879_p1 = pnand %p877_p0, %p865_p13  ;;  %p885_p5 = scmp.lt.s32.totalorder %s883_s8, %s876_s5 }
  0x17   : > { %p880_p2 = pneg %p879_p1  ;;  %p886_p3 = por %p885_p5, %p884_p4 }
  0x19   : > { %p887_p6 = pnand %p886_p3, %p880_p2 }
  0x1b   : > { %890 = shalt.err (!%p887_p6)
}
  0x1c   : > { %s944_s9 = smov 4096   ;;  %s945_s15 = smov 256  }
  0x1d   : > { %s946_s17 = smov 16   ;;  %p170_p7 = scmp.lt.s32.totalorder %s941_s14, 17 }
  0x1e   : > { %760 = dma.hbm_to_vmem [thread:$0]  (!%p1025_p11), %s161_s28, 4096, %s163_s30, %s149_s4, %s944_s9, %s945_s15, %s946_s17  }
  0x1f   : > { %p171_p10 = pnand %p712_p12, %p170_p7 }
  0x20   : > { %s1038_s18 = sand.u32 (!%p171_p10), 1, %s925_s10  }
  0x21   : > { %174 = sbr.rel (%p171_p10) target bundleno = 281 (0x119), region = 28  ;;  %s713_s19 = sshll.u32 (!%p171_p10), %s1038_s18, 8 }
  0x22   : > { %s177_s23 = scalar_lea.sflag (!%p171_p10), [#allocation4], %s1038_s18  ;;  %s1042_s24 = scalar_lea.vmem (!%p171_p10), [#allocation3], %s713_s19 }
  0x26   : > { %916 = dma.done.wait (%p1006_p8), %s177_s23, 4096  }
  0x27   : > { %918 = vsyncadd (%p1006_p8), %s177_s23, 4294963200  ;;  %v947_v0 = vmov 0   ;;  %v814_v1 = vld [vmem:[%s1042_s24 + $0xe4] ss:$16 sps:$4 sm:$0xff]   ;;  %v816_v2 = vld [vmem:[%s1042_s24 + $0xec] ss:$16 sps:$4 sm:$0xff]  }
  0x28   : > { %474 = vmatprep.mubr.bf16.mxu0 %v947_v0  ;;  %517 = vmatprep.mubr.bf16.mxu1 %v947_v0  ;;  %v818_v3 = vld [vmem:[%s1042_s24 + $0xe0] ss:$16 sps:$4 sm:$0xff]   ;;  %v819_v4 = vld [vmem:[%s1042_s24 + $0xe8] ss:$16 sps:$4 sm:$0xff]   ;;  %v820_v5 = vld [vmem:[%s1042_s24 + $0xc4] ss:$16 sps:$4 sm:$0xff]  }
  0x29   : > { %442 = vmatprep.subr.bf16.mxu0 %v814_v1  ;;  %485 = vmatprep.subr.bf16.mxu1 %v816_v2  ;;  %v822_v6 = vld [vmem:[%s1042_s24 + $0xcc] ss:$16 sps:$4 sm:$0xff]   ;;  %v824_v7 = vld [vmem:[%s1042_s24 + $0xc0] ss:$16 sps:$4 sm:$0xff]   ;;  %v825_v8 = vld [vmem:[%s1042_s24 + $0xc8] ss:$16 sps:$4 sm:$0xff]  }
  0x2a   : > { %443 = vmatpush1.bf16.msra.mxu0 %v818_v3  ;;  %486 = vmatpush1.bf16.msra.mxu1 %v819_v4  ;;  %v826_v9 = vld [vmem:[%s1042_s24 + $0xa4] ss:$16 sps:$4 sm:$0xff]   ;;  %v828_v10 = vld [vmem:[%s1042_s24 + $0xac] ss:$16 sps:$4 sm:$0xff]   ;;  %v830_v11 = vld [vmem:[%s1042_s24 + $0xa0] ss:$16 sps:$4 sm:$0xff]  }
  0x2b   : > { %444 = vmatprep.subr.bf16.mxu0 %v820_v5  ;;  %487 = vmatprep.subr.bf16.mxu1 %v822_v6  ;;  %v831_v12 = vld [vmem:[%s1042_s24 + $0xa8] ss:$16 sps:$4 sm:$0xff]   ;;  %v832_v13 = vld [vmem:[%s1042_s24 + $0x84] ss:$16 sps:$4 sm:$0xff]   ;;  %v834_v14 = vld [vmem:[%s1042_s24 + $0x8c] ss:$16 sps:$4 sm:$0xff]  }
  0x2c   : > { %v836_v15 = vld [vmem:[%s1042_s24 + $0x80] ss:$16 sps:$4 sm:$0xff]   ;;  %v837_v16 = vld [vmem:[%s1042_s24 + $0x88] ss:$16 sps:$4 sm:$0xff]   ;;  %v838_v17 = vld [vmem:[%s1042_s24 + $0x64] ss:$16 sps:$4 sm:$0xff]  }
  0x2d   : > { %v840_v18 = vld [vmem:[%s1042_s24 + $0x6c] ss:$16 sps:$4 sm:$0xff]   ;;  %v842_v19 = vld [vmem:[%s1042_s24 + $0x60] ss:$16 sps:$4 sm:$0xff]   ;;  %v843_v20 = vld [vmem:[%s1042_s24 + $0x68] ss:$16 sps:$4 sm:$0xff]  }
  0x2e   : > { %445 = vmatpush1.bf16.msra.mxu0 %v824_v7  ;;  %488 = vmatpush1.bf16.msra.mxu1 %v825_v8  ;;  %v844_v21 = vld [vmem:[%s1042_s24 + $0x44] ss:$16 sps:$4 sm:$0xff]   ;;  %v846_v22 = vld [vmem:[%s1042_s24 + $0x4c] ss:$16 sps:$4 sm:$0xff]   ;;  %v848_v23 = vld [vmem:[%s1042_s24 + $0x40] ss:$16 sps:$4 sm:$0xff]  }
  0x2f   : > { %446 = vmatprep.subr.bf16.mxu0 %v826_v9  ;;  %489 = vmatprep.subr.bf16.mxu1 %v828_v10  ;;  %v849_v24 = vld [vmem:[%s1042_s24 + $0x48] ss:$16 sps:$4 sm:$0xff]   ;;  %v850_v25 = vld [vmem:[%s1042_s24 + $0x24] ss:$16 sps:$4 sm:$0xff]   ;;  %v852_v26 = vld [vmem:[%s1042_s24 + $0x2c] ss:$16 sps:$4 sm:$0xff]  }
  0x30   : > { %v854_v27 = vld [vmem:[%s1042_s24 + $0x20] ss:$16 sps:$4 sm:$0xff]   ;;  %v855_v28 = vld [vmem:[%s1042_s24 + $0x28] ss:$16 sps:$4 sm:$0xff]   ;;  %v856_v29 = vld [vmem:[%s1042_s24 + $0x4] ss:$16 sps:$4 sm:$0xff]  }
  0x31   : > { %v858_v30 = vld [vmem:[%s1042_s24 + $0xc] ss:$16 sps:$4 sm:$0xff]   ;;  %v860_v31 = vld [vmem:[%s1042_s24] ss:$16 sps:$4 sm:$0xff]   ;;  %v861_v32 = vld [vmem:[%s1042_s24 + $0x8] ss:$16 sps:$4 sm:$0xff]  }
  0x32   : > { %447 = vmatpush1.bf16.msra.mxu0 %v830_v11  ;;  %490 = vmatpush1.bf16.msra.mxu1 %v831_v12  ;;  %v862_v33 = vld [vmem:[%s1126_s0] sm:$0xff]   ;;  %s714_s26 = sshll.u32 %s1038_s18, 6  ;;  %s754_s28 = sshll.u32 (%p1013_p9), %s933_s12, 5 }
  0x33   : > { %448 = vmatprep.subr.bf16.mxu0 %v832_v13  ;;  %491 = vmatprep.subr.bf16.mxu1 %v834_v14  ;;  %s1084_s27 = scalar_lea.vmem [#allocation5], %s714_s26  ;;  %s575_s3 = scalar_lea.vmem (%p1013_p9), %s1128_s2, %s754_s28 }
  0x36   : > { %449 = vmatpush1.bf16.msra.mxu0 %v836_v15  ;;  %492 = vmatpush1.bf16.msra.mxu1 %v837_v16 }
  0x37   : > { %450 = vmatprep.subr.bf16.mxu0 %v838_v17  ;;  %493 = vmatprep.subr.bf16.mxu1 %v840_v18 }
  0x3a   : > { %451 = vmatpush1.bf16.msra.mxu0 %v842_v19  ;;  %494 = vmatpush1.bf16.msra.mxu1 %v843_v20 }
  0x3b   : > { %452 = vmatprep.subr.bf16.mxu0 %v844_v21  ;;  %495 = vmatprep.subr.bf16.mxu1 %v846_v22 }
  0x3e   : > { %453 = vmatpush1.bf16.msra.mxu0 %v848_v23  ;;  %496 = vmatpush1.bf16.msra.mxu1 %v849_v24 }
  0x3f   : > { %454 = vmatprep.subr.bf16.mxu0 %v850_v25  ;;  %497 = vmatprep.subr.bf16.mxu1 %v852_v26 }
  0x42   : > { %455 = vmatpush1.bf16.msra.mxu0 %v854_v27  ;;  %498 = vmatpush1.bf16.msra.mxu1 %v855_v28 }
  0x43   : > { %456 = vmatprep.subr.bf16.mxu0 %v856_v29  ;;  %499 = vmatprep.subr.bf16.mxu1 %v858_v30 }
  0x46   : > { %457 = vmatpush1.bf16.msra.mxu0 %v860_v31  ;;  %500 = vmatpush1.bf16.msra.mxu1 %v861_v32 }
  0x49   : > { %475 = vmatmul.mubr.bf16.vlgmr.msra.gmra.mxu0 %v862_v33  ;;  %518 = vmatmul.mubr.bf16.vlgmr.msra.gmra.mxu1 %v862_v33 }
 0x109   : > { %v476_v34 = vpop.f32.mrf.mxu0  ;;  %v519_v35 = vpop.f32.mrf.mxu1 }
 0x10a   : > { %555 = vst [vmem:[%s1084_s27] sm:$0xff] %v476_v34  ;;  %557 = vst [vmem:[%s1084_s27 + $0x10] sm:$0xff] %v519_v35 }
 0x10b   : > { %v478_v36 = vpop.f32.mrf.mxu0  ;;  %v521_v37 = vpop.f32.mrf.mxu1 }
 0x10c   : > { %556 = vst [vmem:[%s1084_s27 + $0x8] sm:$0xff] %v478_v36  ;;  %558 = vst [vmem:[%s1084_s27 + $0x18] sm:$0xff] %v521_v37  ;;  %569 = sbr.rel (!%p1013_p9) target bundleno = 281 (0x119), region = 44 }
 0x10d   : > { %v480_v38 = vpop.f32.mrf.mxu0  ;;  %v523_v39 = vpop.f32.mrf.mxu1 }
 0x10e   : > { %559 = vst [vmem:[%s1084_s27 + $0x20] sm:$0xff] %v480_v38  ;;  %561 = vst [vmem:[%s1084_s27 + $0x30] sm:$0xff] %v523_v39 }
 0x10f   : > { %v482_v40 = vpop.f32.mrf.mxu0  ;;  %v525_v41 = vpop.f32.mrf.mxu1 }
 0x110   : > { %560 = vst [vmem:[%s1084_s27 + $0x28] sm:$0xff] %v482_v40  ;;  %562 = vst [vmem:[%s1084_s27 + $0x38] sm:$0xff] %v525_v41 }
 0x111   : > { %v588_v42 = vld [vmem:[%s1084_s27] sm:$0xff]  ;;  %v592_v44 = vld [vmem:[%s1084_s27 + $0x10] sm:$0xff] }
 0x112   : > { %589 = vst [vmem:[%s575_s3] sm:$0xff] %v588_v42  ;;  %593 = vst [vmem:[%s575_s3 + $0x10] sm:$0xff] %v592_v44 }
 0x113   : > { %v590_v43 = vld [vmem:[%s1084_s27 + $0x8] sm:$0xff]  ;;  %v594_v45 = vld [vmem:[%s1084_s27 + $0x18] sm:$0xff] }
 0x114   : > { %591 = vst [vmem:[%s575_s3 + $0x8] sm:$0xff] %v590_v43  ;;  %595 = vst [vmem:[%s575_s3 + $0x18] sm:$0xff] %v594_v45 }
 0x115   : > { %v596_v46 = vld [vmem:[%s1084_s27 + $0x20] sm:$0xff]  ;;  %v600_v48 = vld [vmem:[%s1084_s27 + $0x30] sm:$0xff] }
 0x116   : > { %597 = vst [vmem:[%s575_s3 + $0x200] sm:$0xff] %v596_v46  ;;  %601 = vst [vmem:[%s575_s3 + $0x210] sm:$0xff] %v600_v48 }
 0x117   : > { %v598_v47 = vld [vmem:[%s1084_s27 + $0x28] sm:$0xff]  ;;  %v602_v49 = vld [vmem:[%s1084_s27 + $0x38] sm:$0xff] }
 0x118   : > { %599 = vst [vmem:[%s575_s3 + $0x208] sm:$0xff] %v598_v47  ;;  %603 = vst [vmem:[%s575_s3 + $0x218] sm:$0xff] %v602_v49 }
 0x119 PF: > { %s15_s14 = sadd.s32 1, %s941_s14   ;;  %s1133_s9 = smov %s925_s10 }
 0x11a   : > { %p12_p8 = scmp.ge.s32.totalorder %s15_s14, 18   ;;  %s1134_s10 = smov %s929_s11 }
 0x11b   : > { %s1135_s11 = smov %s1011_s21  ;;  %s1136_s12 = smov %s937_s13 }
 0x11c   : > { %s1137_s13 = smov %s1139_s16  ;;  %14 = sbr.rel (!%p12_p8) target bundleno = 4 (0x4), region = 102 }
 0x121   :  { %619 = vsyncpa [#allocation4], 1 }
 0x122   :  { %621 = vsyncpa [#allocation4 + $0x1], 1 }

// kernel: _lambda_.11
= control target key start
LH: loop header
LB: loop body
LE: loop exit
PB: predicated region body
PF: predicated region fallthrough
CT: control target
= control target key end

     0   :  { %s7718_s9 = smov 0   ;;  %s7720_s10 = smov 0   ;;  %s10376_s0 = inlined_call_operand.vmem [shape: bf16[64,2048], index: 0, kind: input, shape index: {}]   ;;  %s10377_s1 = inlined_call_operand.vmem [shape: bf16[2048,1024], index: 1, kind: input, shape index: {}]   ;;  %s10378_s2 = inlined_call_operand.vmem [shape: f32[64,1024], index: 2, kind: output, shape index: {}]  }
   0x1   :  { %s7722_s11 = smov 0   ;;  %s7724_s12 = smov 0  }
   0x2   :  { %s7726_s13 = smov 0  }
   0x3 LB: > { %s27_s14 = sadd.s32 1, %s7697_s12  ;;  %s6261_s15 = sadd.s32 4294967295, %s7701_s13   ;;  %s7701_s13 = sphi %s7726_s13, %s12_s13   ;;  %s7697_s12 = sphi %s7724_s12, %s10573_s12   ;;  %s7693_s11 = sphi %s7722_s11, %s10572_s11   ;;  %s7689_s10 = sphi %s7720_s10, %s10571_s10   ;;  %s7685_s9 = sphi %s7718_s9, %s10570_s9  }
   0x4   : > { %p29_p0 = scmp.ge.s32.totalorder %s27_s14, 2  ;;  %p75_p1 = scmp.ne.s32.totalorder %s7689_s10, %s7685_s9 }
   0x5   : > { %p76_p2 = scmp.eq.s32.totalorder %s7701_s13, 0  ;;  %p107_p4 = scmp.eq.s32.totalorder %s6261_s15, 1 }
   0x6   : > { %s10575_s14 = smov (%p29_p0, %s27_s14), 0  ;;  %s68_s17 = sadd.s32 1, %s7689_s10 }
   0x7   : > { %p77_p3 = por %p76_p2, %p75_p1  ;;  %s64_s16 = ssub.s32 %s7697_s12, %s10575_s14 }
   0x8   : > { %p66_p5 = scmp.eq.s32.totalorder %s64_s16, 0  ;;  %p7753_p6 = por %p107_p4, %p75_p1 }
   0x9   : > { %p6265_p7 = scmp.ge.s32.totalorder %s7701_s13, 2 }
   0xa   : > { %s7758_s19 = scalar_select %p66_p5, %s7689_s10, %s68_s17  }
   0xb   : > { %144 = sbr.rel (%p6265_p7) target bundleno = 276 (0x114), region = 20 }
  0x10   : > { %147 = sbr.rel (!%p77_p3) target bundleno = 276 (0x114), region = 24  ;;  %s149_s20 = sand.u32 (%p77_p3), 1, %s7689_s10  }
  0x11   : > { %s6853_s21 = sshll.u32 (%p77_p3), %s7697_s12, 4  ;;  %s6266_s22 = sshll.u32 (%p77_p3), %s149_s20, 12 }
  0x12   : > { %s7766_s25 = scalar_lea.vmem (%p77_p3), %s10377_s1, %s6853_s21  ;;  %s7771_s26 = scalar_lea.vmem (%p77_p3), [#allocation3], %s6266_s22 }
  0x13   : > { %v170_v0 = vld [vmem:[%s7766_s25] sm:$0xff] (%p77_p3)  ;;  %v172_v1 = vld [vmem:[%s7766_s25 + $0x8] sm:$0xff] (%p77_p3) }
  0x14   : > { %v174_v2 = vld [vmem:[%s7766_s25 + $0x20] sm:$0xff] (%p77_p3)  ;;  %171 = vst [vmem:[%s7771_s26] sm:$0xff] (%p77_p3), %v170_v0  ;;  %173 = vst [vmem:[%s7771_s26 + $0x8] sm:$0xff] (%p77_p3), %v172_v1  ;;  %v176_v3 = vld [vmem:[%s7766_s25 + $0x28] sm:$0xff] (%p77_p3) }
  0x15   : > { %175 = vst [vmem:[%s7771_s26 + $0x10] sm:$0xff] %v174_v2  ;;  %v178_v4 = vld [vmem:[%s7766_s25 + $0x40] sm:$0xff]  ;;  %v180_v5 = vld [vmem:[%s7766_s25 + $0x48] sm:$0xff]  ;;  %177 = vst [vmem:[%s7771_s26 + $0x18] sm:$0xff] %v176_v3 }
  0x16   : > { %179 = vst [vmem:[%s7771_s26 + $0x20] sm:$0xff] %v178_v4  ;;  %181 = vst [vmem:[%s7771_s26 + $0x28] sm:$0xff] %v180_v5  ;;  %v182_v6 = vld [vmem:[%s7766_s25 + $0x60] sm:$0xff]  ;;  %v184_v7 = vld [vmem:[%s7766_s25 + $0x68] sm:$0xff] }
  0x17   : > { %v186_v8 = vld [vmem:[%s7766_s25 + $0x80] sm:$0xff]  ;;  %183 = vst [vmem:[%s7771_s26 + $0x30] sm:$0xff] %v182_v6  ;;  %185 = vst [vmem:[%s7771_s26 + $0x38] sm:$0xff] %v184_v7  ;;  %v188_v9 = vld [vmem:[%s7766_s25 + $0x88] sm:$0xff] }
  0x18   : > { %187 = vst [vmem:[%s7771_s26 + $0x40] sm:$0xff] %v186_v8  ;;  %v190_v10 = vld [vmem:[%s7766_s25 + $0xa0] sm:$0xff]  ;;  %v192_v11 = vld [vmem:[%s7766_s25 + $0xa8] sm:$0xff]  ;;  %189 = vst [vmem:[%s7771_s26 + $0x48] sm:$0xff] %v188_v9 }
  0x19   : > { %191 = vst [vmem:[%s7771_s26 + $0x50] sm:$0xff] %v190_v10  ;;  %193 = vst [vmem:[%s7771_s26 + $0x58] sm:$0xff] %v192_v11  ;;  %v194_v12 = vld [vmem:[%s7766_s25 + $0xc0] sm:$0xff]  ;;  %v196_v13 = vld [vmem:[%s7766_s25 + $0xc8] sm:$0xff] }
  0x1a   : > { %v198_v14 = vld [vmem:[%s7766_s25 + $0xe0] sm:$0xff]  ;;  %195 = vst [vmem:[%s7771_s26 + $0x60] sm:$0xff] %v194_v12  ;;  %197 = vst [vmem:[%s7771_s26 + $0x68] sm:$0xff] %v196_v13  ;;  %v200_v15 = vld [vmem:[%s7766_s25 + $0xe8] sm:$0xff] }
  0x1b   : > { %199 = vst [vmem:[%s7771_s26 + $0x70] sm:$0xff] %v198_v14  ;;  %v202_v16 = vld [vmem:[%s7766_s25 + $0x100] sm:$0xff]  ;;  %v204_v17 = vld [vmem:[%s7766_s25 + $0x108] sm:$0xff]  ;;  %201 = vst [vmem:[%s7771_s26 + $0x78] sm:$0xff] %v200_v15 }
  0x1c   : > { %203 = vst [vmem:[%s7771_s26 + $0x80] sm:$0xff] %v202_v16  ;;  %205 = vst [vmem:[%s7771_s26 + $0x88] sm:$0xff] %v204_v17  ;;  %v206_v18 = vld [vmem:[%s7766_s25 + $0x120] sm:$0xff]  ;;  %v208_v19 = vld [vmem:[%s7766_s25 + $0x128] sm:$0xff] }
  0x1d   : > { %v210_v20 = vld [vmem:[%s7766_s25 + $0x140] sm:$0xff]  ;;  %207 = vst [vmem:[%s7771_s26 + $0x90] sm:$0xff] %v206_v18  ;;  %209 = vst [vmem:[%s7771_s26 + $0x98] sm:$0xff] %v208_v19  ;;  %v212_v21 = vld [vmem:[%s7766_s25 + $0x148] sm:$0xff] }
  0x1e   : > { %211 = vst [vmem:[%s7771_s26 + $0xa0] sm:$0xff] %v210_v20  ;;  %v214_v22 = vld [vmem:[%s7766_s25 + $0x160] sm:$0xff]  ;;  %v216_v23 = vld [vmem:[%s7766_s25 + $0x168] sm:$0xff]  ;;  %213 = vst [vmem:[%s7771_s26 + $0xa8] sm:$0xff] %v212_v21 }
  0x1f   : > { %215 = vst [vmem:[%s7771_s26 + $0xb0] sm:$0xff] %v214_v22  ;;  %217 = vst [vmem:[%s7771_s26 + $0xb8] sm:$0xff] %v216_v23  ;;  %v218_v24 = vld [vmem:[%s7766_s25 + $0x180] sm:$0xff]  ;;  %v220_v25 = vld [vmem:[%s7766_s25 + $0x188] sm:$0xff] }
  0x20   : > { %v222_v26 = vld [vmem:[%s7766_s25 + $0x1a0] sm:$0xff]  ;;  %219 = vst [vmem:[%s7771_s26 + $0xc0] sm:$0xff] %v218_v24  ;;  %221 = vst [vmem:[%s7771_s26 + $0xc8] sm:$0xff] %v220_v25  ;;  %v224_v27 = vld [vmem:[%s7766_s25 + $0x1a8] sm:$0xff] }
  0x21   : > { %223 = vst [vmem:[%s7771_s26 + $0xd0] sm:$0xff] %v222_v26  ;;  %v226_v28 = vld [vmem:[%s7766_s25 + $0x1c0] sm:$0xff]  ;;  %v228_v29 = vld [vmem:[%s7766_s25 + $0x1c8] sm:$0xff]  ;;  %225 = vst [vmem:[%s7771_s26 + $0xd8] sm:$0xff] %v224_v27 }
  0x22   : > { %227 = vst [vmem:[%s7771_s26 + $0xe0] sm:$0xff] %v226_v28  ;;  %229 = vst [vmem:[%s7771_s26 + $0xe8] sm:$0xff] %v228_v29  ;;  %v230_v30 = vld [vmem:[%s7766_s25 + $0x1e0] sm:$0xff]  ;;  %v232_v31 = vld [vmem:[%s7766_s25 + $0x1e8] sm:$0xff] }
  0x23   : > { %v234_v32 = vld [vmem:[%s7766_s25 + $0x200] sm:$0xff]  ;;  %231 = vst [vmem:[%s7771_s26 + $0xf0] sm:$0xff] %v230_v30  ;;  %233 = vst [vmem:[%s7771_s26 + $0xf8] sm:$0xff] %v232_v31  ;;  %v236_v33 = vld [vmem:[%s7766_s25 + $0x208] sm:$0xff] }
  0x24   : > { %235 = vst [vmem:[%s7771_s26 + $0x100] sm:$0xff] %v234_v32  ;;  %v238_v34 = vld [vmem:[%s7766_s25 + $0x220] sm:$0xff]  ;;  %v240_v35 = vld [vmem:[%s7766_s25 + $0x228] sm:$0xff]  ;;  %237 = vst [vmem:[%s7771_s26 + $0x108] sm:$0xff] %v236_v33 }
  0x25   : > { %239 = vst [vmem:[%s7771_s26 + $0x110] sm:$0xff] %v238_v34  ;;  %241 = vst [vmem:[%s7771_s26 + $0x118] sm:$0xff] %v240_v35  ;;  %v242_v36 = vld [vmem:[%s7766_s25 + $0x240] sm:$0xff]  ;;  %v244_v37 = vld [vmem:[%s7766_s25 + $0x248] sm:$0xff] }
  0x26   : > { %v246_v38 = vld [vmem:[%s7766_s25 + $0x260] sm:$0xff]  ;;  %243 = vst [vmem:[%s7771_s26 + $0x120] sm:$0xff] %v242_v36  ;;  %245 = vst [vmem:[%s7771_s26 + $0x128] sm:$0xff] %v244_v37  ;;  %v248_v39 = vld [vmem:[%s7766_s25 + $0x268] sm:$0xff] }
  0x27   : > { %247 = vst [vmem:[%s7771_s26 + $0x130] sm:$0xff] %v246_v38  ;;  %v250_v40 = vld [vmem:[%s7766_s25 + $0x280] sm:$0xff]  ;;  %v252_v41 = vld [vmem:[%s7766_s25 + $0x288] sm:$0xff]  ;;  %249 = vst [vmem:[%s7771_s26 + $0x138] sm:$0xff] %v248_v39 }
  0x28   : > { %251 = vst [vmem:[%s7771_s26 + $0x140] sm:$0xff] %v250_v40  ;;  %253 = vst [vmem:[%s7771_s26 + $0x148] sm:$0xff] %v252_v41  ;;  %v254_v42 = vld [vmem:[%s7766_s25 + $0x2a0] sm:$0xff]  ;;  %v256_v43 = vld [vmem:[%s7766_s25 + $0x2a8] sm:$0xff] }
  0x29   : > { %v258_v44 = vld [vmem:[%s7766_s25 + $0x2c0] sm:$0xff]  ;;  %255 = vst [vmem:[%s7771_s26 + $0x150] sm:$0xff] %v254_v42  ;;  %257 = vst [vmem:[%s7771_s26 + $0x158] sm:$0xff] %v256_v43  ;;  %v260_v45 = vld [vmem:[%s7766_s25 + $0x2c8] sm:$0xff] }
  0x2a   : > { %259 = vst [vmem:[%s7771_s26 + $0x160] sm:$0xff] %v258_v44  ;;  %v262_v46 = vld [vmem:[%s7766_s25 + $0x2e0] sm:$0xff]  ;;  %v264_v47 = vld [vmem:[%s7766_s25 + $0x2e8] sm:$0xff]  ;;  %261 = vst [vmem:[%s7771_s26 + $0x168] sm:$0xff] %v260_v45 }
  0x2b   : > { %263 = vst [vmem:[%s7771_s26 + $0x170] sm:$0xff] %v262_v46  ;;  %265 = vst [vmem:[%s7771_s26 + $0x178] sm:$0xff] %v264_v47  ;;  %v266_v48 = vld [vmem:[%s7766_s25 + $0x300] sm:$0xff]  ;;  %v268_v49 = vld [vmem:[%s7766_s25 + $0x308] sm:$0xff] }
  0x2c   : > { %v270_v50 = vld [vmem:[%s7766_s25 + $0x320] sm:$0xff]  ;;  %267 = vst [vmem:[%s7771_s26 + $0x180] sm:$0xff] %v266_v48  ;;  %269 = vst [vmem:[%s7771_s26 + $0x188] sm:$0xff] %v268_v49  ;;  %v272_v51 = vld [vmem:[%s7766_s25 + $0x328] sm:$0xff] }
  0x2d   : > { %271 = vst [vmem:[%s7771_s26 + $0x190] sm:$0xff] %v270_v50  ;;  %v274_v52 = vld [vmem:[%s7766_s25 + $0x340] sm:$0xff]  ;;  %v276_v53 = vld [vmem:[%s7766_s25 + $0x348] sm:$0xff]  ;;  %273 = vst [vmem:[%s7771_s26 + $0x198] sm:$0xff] %v272_v51 }
  0x2e   : > { %275 = vst [vmem:[%s7771_s26 + $0x1a0] sm:$0xff] %v274_v52  ;;  %277 = vst [vmem:[%s7771_s26 + $0x1a8] sm:$0xff] %v276_v53  ;;  %v278_v54 = vld [vmem:[%s7766_s25 + $0x360] sm:$0xff]  ;;  %v280_v55 = vld [vmem:[%s7766_s25 + $0x368] sm:$0xff] }
  0x2f   : > { %v282_v56 = vld [vmem:[%s7766_s25 + $0x380] sm:$0xff]  ;;  %279 = vst [vmem:[%s7771_s26 + $0x1b0] sm:$0xff] %v278_v54  ;;  %281 = vst [vmem:[%s7771_s26 + $0x1b8] sm:$0xff] %v280_v55  ;;  %v284_v57 = vld [vmem:[%s7766_s25 + $0x388] sm:$0xff] }
  0x30   : > { %283 = vst [vmem:[%s7771_s26 + $0x1c0] sm:$0xff] %v282_v56  ;;  %v286_v58 = vld [vmem:[%s7766_s25 + $0x3a0] sm:$0xff]  ;;  %v288_v59 = vld [vmem:[%s7766_s25 + $0x3a8] sm:$0xff]  ;;  %285 = vst [vmem:[%s7771_s26 + $0x1c8] sm:$0xff] %v284_v57 }
  0x31   : > { %287 = vst [vmem:[%s7771_s26 + $0x1d0] sm:$0xff] %v286_v58  ;;  %289 = vst [vmem:[%s7771_s26 + $0x1d8] sm:$0xff] %v288_v59  ;;  %v290_v60 = vld [vmem:[%s7766_s25 + $0x3c0] sm:$0xff]  ;;  %v292_v61 = vld [vmem:[%s7766_s25 + $0x3c8] sm:$0xff] }
  0x32   : > { %v294_v62 = vld [vmem:[%s7766_s25 + $0x3e0] sm:$0xff]  ;;  %291 = vst [vmem:[%s7771_s26 + $0x1e0] sm:$0xff] %v290_v60  ;;  %293 = vst [vmem:[%s7771_s26 + $0x1e8] sm:$0xff] %v292_v61  ;;  %v296_v63 = vld [vmem:[%s7766_s25 + $0x3e8] sm:$0xff] }
  0x33   : > { %295 = vst [vmem:[%s7771_s26 + $0x1f0] sm:$0xff] %v294_v62  ;;  %v298_v0 = vld [vmem:[%s7766_s25 + $0x400] sm:$0xff]  ;;  %v300_v1 = vld [vmem:[%s7766_s25 + $0x408] sm:$0xff]  ;;  %297 = vst [vmem:[%s7771_s26 + $0x1f8] sm:$0xff] %v296_v63 }
  0x34   : > { %299 = vst [vmem:[%s7771_s26 + $0x200] sm:$0xff] %v298_v0  ;;  %301 = vst [vmem:[%s7771_s26 + $0x208] sm:$0xff] %v300_v1  ;;  %v302_v2 = vld [vmem:[%s7766_s25 + $0x420] sm:$0xff]  ;;  %v304_v3 = vld [vmem:[%s7766_s25 + $0x428] sm:$0xff] }
  0x35   : > { %v306_v4 = vld [vmem:[%s7766_s25 + $0x440] sm:$0xff]  ;;  %303 = vst [vmem:[%s7771_s26 + $0x210] sm:$0xff] %v302_v2  ;;  %305 = vst [vmem:[%s7771_s26 + $0x218] sm:$0xff] %v304_v3  ;;  %v308_v5 = vld [vmem:[%s7766_s25 + $0x448] sm:$0xff] }
  0x36   : > { %307 = vst [vmem:[%s7771_s26 + $0x220] sm:$0xff] %v306_v4  ;;  %v310_v6 = vld [vmem:[%s7766_s25 + $0x460] sm:$0xff]  ;;  %v312_v7 = vld [vmem:[%s7766_s25 + $0x468] sm:$0xff]  ;;  %309 = vst [vmem:[%s7771_s26 + $0x228] sm:$0xff] %v308_v5 }
  0x37   : > { %311 = vst [vmem:[%s7771_s26 + $0x230] sm:$0xff] %v310_v6  ;;  %313 = vst [vmem:[%s7771_s26 + $0x238] sm:$0xff] %v312_v7  ;;  %v314_v8 = vld [vmem:[%s7766_s25 + $0x480] sm:$0xff]  ;;  %v316_v9 = vld [vmem:[%s7766_s25 + $0x488] sm:$0xff] }
  0x38   : > { %v318_v10 = vld [vmem:[%s7766_s25 + $0x4a0] sm:$0xff]  ;;  %315 = vst [vmem:[%s7771_s26 + $0x240] sm:$0xff] %v314_v8  ;;  %317 = vst [vmem:[%s7771_s26 + $0x248] sm:$0xff] %v316_v9  ;;  %v320_v11 = vld [vmem:[%s7766_s25 + $0x4a8] sm:$0xff] }
  0x39   : > { %319 = vst [vmem:[%s7771_s26 + $0x250] sm:$0xff] %v318_v10  ;;  %v322_v12 = vld [vmem:[%s7766_s25 + $0x4c0] sm:$0xff]  ;;  %v324_v13 = vld [vmem:[%s7766_s25 + $0x4c8] sm:$0xff]  ;;  %321 = vst [vmem:[%s7771_s26 + $0x258] sm:$0xff] %v320_v11 }
  0x3a   : > { %323 = vst [vmem:[%s7771_s26 + $0x260] sm:$0xff] %v322_v12  ;;  %325 = vst [vmem:[%s7771_s26 + $0x268] sm:$0xff] %v324_v13  ;;  %v326_v14 = vld [vmem:[%s7766_s25 + $0x4e0] sm:$0xff]  ;;  %v328_v15 = vld [vmem:[%s7766_s25 + $0x4e8] sm:$0xff] }
  0x3b   : > { %v330_v16 = vld [vmem:[%s7766_s25 + $0x500] sm:$0xff]  ;;  %327 = vst [vmem:[%s7771_s26 + $0x270] sm:$0xff] %v326_v14  ;;  %329 = vst [vmem:[%s7771_s26 + $0x278] sm:$0xff] %v328_v15  ;;  %v332_v17 = vld [vmem:[%s7766_s25 + $0x508] sm:$0xff] }
  0x3c   : > { %331 = vst [vmem:[%s7771_s26 + $0x280] sm:$0xff] %v330_v16  ;;  %v334_v18 = vld [vmem:[%s7766_s25 + $0x520] sm:$0xff]  ;;  %v336_v19 = vld [vmem:[%s7766_s25 + $0x528] sm:$0xff]  ;;  %333 = vst [vmem:[%s7771_s26 + $0x288] sm:$0xff] %v332_v17 }
  0x3d   : > { %335 = vst [vmem:[%s7771_s26 + $0x290] sm:$0xff] %v334_v18  ;;  %337 = vst [vmem:[%s7771_s26 + $0x298] sm:$0xff] %v336_v19  ;;  %v338_v20 = vld [vmem:[%s7766_s25 + $0x540] sm:$0xff]  ;;  %v340_v21 = vld [vmem:[%s7766_s25 + $0x548] sm:$0xff] }
  0x3e   : > { %v342_v22 = vld [vmem:[%s7766_s25 + $0x560] sm:$0xff]  ;;  %339 = vst [vmem:[%s7771_s26 + $0x2a0] sm:$0xff] %v338_v20  ;;  %341 = vst [vmem:[%s7771_s26 + $0x2a8] sm:$0xff] %v340_v21  ;;  %v344_v23 = vld [vmem:[%s7766_s25 + $0x568] sm:$0xff] }
  0x3f   : > { %343 = vst [vmem:[%s7771_s26 + $0x2b0] sm:$0xff] %v342_v22  ;;  %v346_v24 = vld [vmem:[%s7766_s25 + $0x580] sm:$0xff]  ;;  %v348_v25 = vld [vmem:[%s7766_s25 + $0x588] sm:$0xff]  ;;  %345 = vst [vmem:[%s7771_s26 + $0x2b8] sm:$0xff] %v344_v23 }
  0x40   : > { %347 = vst [vmem:[%s7771_s26 + $0x2c0] sm:$0xff] %v346_v24  ;;  %349 = vst [vmem:[%s7771_s26 + $0x2c8] sm:$0xff] %v348_v25  ;;  %v350_v26 = vld [vmem:[%s7766_s25 + $0x5a0] sm:$0xff]  ;;  %v352_v27 = vld [vmem:[%s7766_s25 + $0x5a8] sm:$0xff] }
  0x41   : > { %v354_v28 = vld [vmem:[%s7766_s25 + $0x5c0] sm:$0xff]  ;;  %351 = vst [vmem:[%s7771_s26 + $0x2d0] sm:$0xff] %v350_v26  ;;  %353 = vst [vmem:[%s7771_s26 + $0x2d8] sm:$0xff] %v352_v27  ;;  %v356_v29 = vld [vmem:[%s7766_s25 + $0x5c8] sm:$0xff] }
  0x42   : > { %355 = vst [vmem:[%s7771_s26 + $0x2e0] sm:$0xff] %v354_v28  ;;  %v358_v30 = vld [vmem:[%s7766_s25 + $0x5e0] sm:$0xff]  ;;  %v360_v31 = vld [vmem:[%s7766_s25 + $0x5e8] sm:$0xff]  ;;  %357 = vst [vmem:[%s7771_s26 + $0x2e8] sm:$0xff] %v356_v29 }
  0x43   : > { %359 = vst [vmem:[%s7771_s26 + $0x2f0] sm:$0xff] %v358_v30  ;;  %361 = vst [vmem:[%s7771_s26 + $0x2f8] sm:$0xff] %v360_v31  ;;  %v362_v32 = vld [vmem:[%s7766_s25 + $0x600] sm:$0xff]  ;;  %v364_v33 = vld [vmem:[%s7766_s25 + $0x608] sm:$0xff] }
  0x44   : > { %v366_v34 = vld [vmem:[%s7766_s25 + $0x620] sm:$0xff]  ;;  %363 = vst [vmem:[%s7771_s26 + $0x300] sm:$0xff] %v362_v32  ;;  %365 = vst [vmem:[%s7771_s26 + $0x308] sm:$0xff] %v364_v33  ;;  %v368_v35 = vld [vmem:[%s7766_s25 + $0x628] sm:$0xff] }
  0x45   : > { %367 = vst [vmem:[%s7771_s26 + $0x310] sm:$0xff] %v366_v34  ;;  %v370_v36 = vld [vmem:[%s7766_s25 + $0x640] sm:$0xff]  ;;  %v372_v37 = vld [vmem:[%s7766_s25 + $0x648] sm:$0xff]  ;;  %369 = vst [vmem:[%s7771_s26 + $0x318] sm:$0xff] %v368_v35 }
  0x46   : > { %371 = vst [vmem:[%s7771_s26 + $0x320] sm:$0xff] %v370_v36  ;;  %373 = vst [vmem:[%s7771_s26 + $0x328] sm:$0xff] %v372_v37  ;;  %v374_v38 = vld [vmem:[%s7766_s25 + $0x660] sm:$0xff]  ;;  %v376_v39 = vld [vmem:[%s7766_s25 + $0x668] sm:$0xff] }
  0x47   : > { %v378_v40 = vld [vmem:[%s7766_s25 + $0x680] sm:$0xff]  ;;  %375 = vst [vmem:[%s7771_s26 + $0x330] sm:$0xff] %v374_v38  ;;  %377 = vst [vmem:[%s7771_s26 + $0x338] sm:$0xff] %v376_v39  ;;  %v380_v41 = vld [vmem:[%s7766_s25 + $0x688] sm:$0xff] }
  0x48   : > { %379 = vst [vmem:[%s7771_s26 + $0x340] sm:$0xff] %v378_v40  ;;  %v382_v42 = vld [vmem:[%s7766_s25 + $0x6a0] sm:$0xff]  ;;  %v384_v43 = vld [vmem:[%s7766_s25 + $0x6a8] sm:$0xff]  ;;  %381 = vst [vmem:[%s7771_s26 + $0x348] sm:$0xff] %v380_v41 }
  0x49   : > { %383 = vst [vmem:[%s7771_s26 + $0x350] sm:$0xff] %v382_v42  ;;  %385 = vst [vmem:[%s7771_s26 + $0x358] sm:$0xff] %v384_v43  ;;  %v386_v44 = vld [vmem:[%s7766_s25 + $0x6c0] sm:$0xff]  ;;  %v388_v45 = vld [vmem:[%s7766_s25 + $0x6c8] sm:$0xff] }
  0x4a   : > { %v390_v46 = vld [vmem:[%s7766_s25 + $0x6e0] sm:$0xff]  ;;  %387 = vst [vmem:[%s7771_s26 + $0x360] sm:$0xff] %v386_v44  ;;  %389 = vst [vmem:[%s7771_s26 + $0x368] sm:$0xff] %v388_v45  ;;  %v392_v47 = vld [vmem:[%s7766_s25 + $0x6e8] sm:$0xff] }
  0x4b   : > { %391 = vst [vmem:[%s7771_s26 + $0x370] sm:$0xff] %v390_v46  ;;  %v394_v48 = vld [vmem:[%s7766_s25 + $0x700] sm:$0xff]  ;;  %v396_v49 = vld [vmem:[%s7766_s25 + $0x708] sm:$0xff]  ;;  %393 = vst [vmem:[%s7771_s26 + $0x378] sm:$0xff] %v392_v47 }
  0x4c   : > { %395 = vst [vmem:[%s7771_s26 + $0x380] sm:$0xff] %v394_v48  ;;  %397 = vst [vmem:[%s7771_s26 + $0x388] sm:$0xff] %v396_v49  ;;  %v398_v50 = vld [vmem:[%s7766_s25 + $0x720] sm:$0xff]  ;;  %v400_v51 = vld [vmem:[%s7766_s25 + $0x728] sm:$0xff] }
  0x4d   : > { %v402_v52 = vld [vmem:[%s7766_s25 + $0x740] sm:$0xff]  ;;  %399 = vst [vmem:[%s7771_s26 + $0x390] sm:$0xff] %v398_v50  ;;  %401 = vst [vmem:[%s7771_s26 + $0x398] sm:$0xff] %v400_v51  ;;  %v404_v53 = vld [vmem:[%s7766_s25 + $0x748] sm:$0xff] }
  0x4e   : > { %403 = vst [vmem:[%s7771_s26 + $0x3a0] sm:$0xff] %v402_v52  ;;  %v406_v54 = vld [vmem:[%s7766_s25 + $0x760] sm:$0xff]  ;;  %v408_v55 = vld [vmem:[%s7766_s25 + $0x768] sm:$0xff]  ;;  %405 = vst [vmem:[%s7771_s26 + $0x3a8] sm:$0xff] %v404_v53 }
  0x4f   : > { %407 = vst [vmem:[%s7771_s26 + $0x3b0] sm:$0xff] %v406_v54  ;;  %409 = vst [vmem:[%s7771_s26 + $0x3b8] sm:$0xff] %v408_v55  ;;  %v410_v56 = vld [vmem:[%s7766_s25 + $0x780] sm:$0xff]  ;;  %v412_v57 = vld [vmem:[%s7766_s25 + $0x788] sm:$0xff] }
  0x50   : > { %v414_v58 = vld [vmem:[%s7766_s25 + $0x7a0] sm:$0xff]  ;;  %411 = vst [vmem:[%s7771_s26 + $0x3c0] sm:$0xff] %v410_v56  ;;  %413 = vst [vmem:[%s7771_s26 + $0x3c8] sm:$0xff] %v412_v57  ;;  %v416_v59 = vld [vmem:[%s7766_s25 + $0x7a8] sm:$0xff] }
  0x51   : > { %415 = vst [vmem:[%s7771_s26 + $0x3d0] sm:$0xff] %v414_v58  ;;  %v418_v60 = vld [vmem:[%s7766_s25 + $0x7c0] sm:$0xff]  ;;  %v420_v61 = vld [vmem:[%s7766_s25 + $0x7c8] sm:$0xff]  ;;  %417 = vst [vmem:[%s7771_s26 + $0x3d8] sm:$0xff] %v416_v59 }
  0x52   : > { %419 = vst [vmem:[%s7771_s26 + $0x3e0] sm:$0xff] %v418_v60  ;;  %421 = vst [vmem:[%s7771_s26 + $0x3e8] sm:$0xff] %v420_v61  ;;  %v422_v62 = vld [vmem:[%s7766_s25 + $0x7e0] sm:$0xff]  ;;  %v424_v63 = vld [vmem:[%s7766_s25 + $0x7e8] sm:$0xff] }
  0x53   : > { %v426_v0 = vld [vmem:[%s7766_s25 + $0x800] sm:$0xff]  ;;  %423 = vst [vmem:[%s7771_s26 + $0x3f0] sm:$0xff] %v422_v62  ;;  %425 = vst [vmem:[%s7771_s26 + $0x3f8] sm:$0xff] %v424_v63  ;;  %v428_v1 = vld [vmem:[%s7766_s25 + $0x808] sm:$0xff] }
  0x54   : > { %427 = vst [vmem:[%s7771_s26 + $0x400] sm:$0xff] %v426_v0  ;;  %v430_v2 = vld [vmem:[%s7766_s25 + $0x820] sm:$0xff]  ;;  %v432_v3 = vld [vmem:[%s7766_s25 + $0x828] sm:$0xff]  ;;  %429 = vst [vmem:[%s7771_s26 + $0x408] sm:$0xff] %v428_v1 }
  0x55   : > { %431 = vst [vmem:[%s7771_s26 + $0x410] sm:$0xff] %v430_v2  ;;  %433 = vst [vmem:[%s7771_s26 + $0x418] sm:$0xff] %v432_v3  ;;  %v434_v4 = vld [vmem:[%s7766_s25 + $0x840] sm:$0xff]  ;;  %v436_v5 = vld [vmem:[%s7766_s25 + $0x848] sm:$0xff] }
  0x56   : > { %v438_v6 = vld [vmem:[%s7766_s25 + $0x860] sm:$0xff]  ;;  %435 = vst [vmem:[%s7771_s26 + $0x420] sm:$0xff] %v434_v4  ;;  %437 = vst [vmem:[%s7771_s26 + $0x428] sm:$0xff] %v436_v5  ;;  %v440_v7 = vld [vmem:[%s7766_s25 + $0x868] sm:$0xff] }
  0x57   : > { %439 = vst [vmem:[%s7771_s26 + $0x430] sm:$0xff] %v438_v6  ;;  %v442_v8 = vld [vmem:[%s7766_s25 + $0x880] sm:$0xff]  ;;  %v444_v9 = vld [vmem:[%s7766_s25 + $0x888] sm:$0xff]  ;;  %441 = vst [vmem:[%s7771_s26 + $0x438] sm:$0xff] %v440_v7 }
  0x58   : > { %443 = vst [vmem:[%s7771_s26 + $0x440] sm:$0xff] %v442_v8  ;;  %445 = vst [vmem:[%s7771_s26 + $0x448] sm:$0xff] %v444_v9  ;;  %v446_v10 = vld [vmem:[%s7766_s25 + $0x8a0] sm:$0xff]  ;;  %v448_v11 = vld [vmem:[%s7766_s25 + $0x8a8] sm:$0xff] }
  0x59   : > { %v450_v12 = vld [vmem:[%s7766_s25 + $0x8c0] sm:$0xff]  ;;  %447 = vst [vmem:[%s7771_s26 + $0x450] sm:$0xff] %v446_v10  ;;  %449 = vst [vmem:[%s7771_s26 + $0x458] sm:$0xff] %v448_v11  ;;  %v452_v13 = vld [vmem:[%s7766_s25 + $0x8c8] sm:$0xff] }
  0x5a   : > { %451 = vst [vmem:[%s7771_s26 + $0x460] sm:$0xff] %v450_v12  ;;  %v454_v14 = vld [vmem:[%s7766_s25 + $0x8e0] sm:$0xff]  ;;  %v456_v15 = vld [vmem:[%s7766_s25 + $0x8e8] sm:$0xff]  ;;  %453 = vst [vmem:[%s7771_s26 + $0x468] sm:$0xff] %v452_v13 }
  0x5b   : > { %455 = vst [vmem:[%s7771_s26 + $0x470] sm:$0xff] %v454_v14  ;;  %457 = vst [vmem:[%s7771_s26 + $0x478] sm:$0xff] %v456_v15  ;;  %v458_v16 = vld [vmem:[%s7766_s25 + $0x900] sm:$0xff]  ;;  %v460_v17 = vld [vmem:[%s7766_s25 + $0x908] sm:$0xff] }
  0x5c   : > { %v462_v18 = vld [vmem:[%s7766_s25 + $0x920] sm:$0xff]  ;;  %459 = vst [vmem:[%s7771_s26 + $0x480] sm:$0xff] %v458_v16  ;;  %461 = vst [vmem:[%s7771_s26 + $0x488] sm:$0xff] %v460_v17  ;;  %v464_v19 = vld [vmem:[%s7766_s25 + $0x928] sm:$0xff] }
  0x5d   : > { %463 = vst [vmem:[%s7771_s26 + $0x490] sm:$0xff] %v462_v18  ;;  %v466_v20 = vld [vmem:[%s7766_s25 + $0x940] sm:$0xff]  ;;  %v468_v21 = vld [vmem:[%s7766_s25 + $0x948] sm:$0xff]  ;;  %465 = vst [vmem:[%s7771_s26 + $0x498] sm:$0xff] %v464_v19 }
  0x5e   : > { %467 = vst [vmem:[%s7771_s26 + $0x4a0] sm:$0xff] %v466_v20  ;;  %469 = vst [vmem:[%s7771_s26 + $0x4a8] sm:$0xff] %v468_v21  ;;  %v470_v22 = vld [vmem:[%s7766_s25 + $0x960] sm:$0xff]  ;;  %v472_v23 = vld [vmem:[%s7766_s25 + $0x968] sm:$0xff] }
  0x5f   : > { %v474_v24 = vld [vmem:[%s7766_s25 + $0x980] sm:$0xff]  ;;  %471 = vst [vmem:[%s7771_s26 + $0x4b0] sm:$0xff] %v470_v22  ;;  %473 = vst [vmem:[%s7771_s26 + $0x4b8] sm:$0xff] %v472_v23  ;;  %v476_v25 = vld [vmem:[%s7766_s25 + $0x988] sm:$0xff] }
  0x60   : > { %475 = vst [vmem:[%s7771_s26 + $0x4c0] sm:$0xff] %v474_v24  ;;  %v478_v26 = vld [vmem:[%s7766_s25 + $0x9a0] sm:$0xff]  ;;  %v480_v27 = vld [vmem:[%s7766_s25 + $0x9a8] sm:$0xff]  ;;  %477 = vst [vmem:[%s7771_s26 + $0x4c8] sm:$0xff] %v476_v25 }
  0x61   : > { %479 = vst [vmem:[%s7771_s26 + $0x4d0] sm:$0xff] %v478_v26  ;;  %481 = vst [vmem:[%s7771_s26 + $0x4d8] sm:$0xff] %v480_v27  ;;  %v482_v28 = vld [vmem:[%s7766_s25 + $0x9c0] sm:$0xff]  ;;  %v484_v29 = vld [vmem:[%s7766_s25 + $0x9c8] sm:$0xff] }
  0x62   : > { %v486_v30 = vld [vmem:[%s7766_s25 + $0x9e0] sm:$0xff]  ;;  %483 = vst [vmem:[%s7771_s26 + $0x4e0] sm:$0xff] %v482_v28  ;;  %485 = vst [vmem:[%s7771_s26 + $0x4e8] sm:$0xff] %v484_v29  ;;  %v488_v31 = vld [vmem:[%s7766_s25 + $0x9e8] sm:$0xff] }
  0x63   : > { %487 = vst [vmem:[%s7771_s26 + $0x4f0] sm:$0xff] %v486_v30  ;;  %v490_v32 = vld [vmem:[%s7766_s25 + $0xa00] sm:$0xff]  ;;  %v492_v33 = vld [vmem:[%s7766_s25 + $0xa08] sm:$0xff]  ;;  %489 = vst [vmem:[%s7771_s26 + $0x4f8] sm:$0xff] %v488_v31 }
  0x64   : > { %491 = vst [vmem:[%s7771_s26 + $0x500] sm:$0xff] %v490_v32  ;;  %493 = vst [vmem:[%s7771_s26 + $0x508] sm:$0xff] %v492_v33  ;;  %v494_v34 = vld [vmem:[%s7766_s25 + $0xa20] sm:$0xff]  ;;  %v496_v35 = vld [vmem:[%s7766_s25 + $0xa28] sm:$0xff] }
  0x65   : > { %v498_v36 = vld [vmem:[%s7766_s25 + $0xa40] sm:$0xff]  ;;  %495 = vst [vmem:[%s7771_s26 + $0x510] sm:$0xff] %v494_v34  ;;  %497 = vst [vmem:[%s7771_s26 + $0x518] sm:$0xff] %v496_v35  ;;  %v500_v37 = vld [vmem:[%s7766_s25 + $0xa48] sm:$0xff] }
  0x66   : > { %499 = vst [vmem:[%s7771_s26 + $0x520] sm:$0xff] %v498_v36  ;;  %v502_v38 = vld [vmem:[%s7766_s25 + $0xa60] sm:$0xff]  ;;  %v504_v39 = vld [vmem:[%s7766_s25 + $0xa68] sm:$0xff]  ;;  %501 = vst [vmem:[%s7771_s26 + $0x528] sm:$0xff] %v500_v37 }
  0x67   : > { %503 = vst [vmem:[%s7771_s26 + $0x530] sm:$0xff] %v502_v38  ;;  %505 = vst [vmem:[%s7771_s26 + $0x538] sm:$0xff] %v504_v39  ;;  %v506_v40 = vld [vmem:[%s7766_s25 + $0xa80] sm:$0xff]  ;;  %v508_v41 = vld [vmem:[%s7766_s25 + $0xa88] sm:$0xff] }
  0x68   : > { %v510_v42 = vld [vmem:[%s7766_s25 + $0xaa0] sm:$0xff]  ;;  %507 = vst [vmem:[%s7771_s26 + $0x540] sm:$0xff] %v506_v40  ;;  %509 = vst [vmem:[%s7771_s26 + $0x548] sm:$0xff] %v508_v41  ;;  %v512_v43 = vld [vmem:[%s7766_s25 + $0xaa8] sm:$0xff] }
  0x69   : > { %511 = vst [vmem:[%s7771_s26 + $0x550] sm:$0xff] %v510_v42  ;;  %v514_v44 = vld [vmem:[%s7766_s25 + $0xac0] sm:$0xff]  ;;  %v516_v45 = vld [vmem:[%s7766_s25 + $0xac8] sm:$0xff]  ;;  %513 = vst [vmem:[%s7771_s26 + $0x558] sm:$0xff] %v512_v43 }
  0x6a   : > { %515 = vst [vmem:[%s7771_s26 + $0x560] sm:$0xff] %v514_v44  ;;  %517 = vst [vmem:[%s7771_s26 + $0x568] sm:$0xff] %v516_v45  ;;  %v518_v46 = vld [vmem:[%s7766_s25 + $0xae0] sm:$0xff]  ;;  %v520_v47 = vld [vmem:[%s7766_s25 + $0xae8] sm:$0xff] }
  0x6b   : > { %v522_v48 = vld [vmem:[%s7766_s25 + $0xb00] sm:$0xff]  ;;  %519 = vst [vmem:[%s7771_s26 + $0x570] sm:$0xff] %v518_v46  ;;  %521 = vst [vmem:[%s7771_s26 + $0x578] sm:$0xff] %v520_v47  ;;  %v524_v49 = vld [vmem:[%s7766_s25 + $0xb08] sm:$0xff] }
  0x6c   : > { %523 = vst [vmem:[%s7771_s26 + $0x580] sm:$0xff] %v522_v48  ;;  %v526_v50 = vld [vmem:[%s7766_s25 + $0xb20] sm:$0xff]  ;;  %v528_v51 = vld [vmem:[%s7766_s25 + $0xb28] sm:$0xff]  ;;  %525 = vst [vmem:[%s7771_s26 + $0x588] sm:$0xff] %v524_v49 }
  0x6d   : > { %527 = vst [vmem:[%s7771_s26 + $0x590] sm:$0xff] %v526_v50  ;;  %529 = vst [vmem:[%s7771_s26 + $0x598] sm:$0xff] %v528_v51  ;;  %v530_v52 = vld [vmem:[%s7766_s25 + $0xb40] sm:$0xff]  ;;  %v532_v53 = vld [vmem:[%s7766_s25 + $0xb48] sm:$0xff] }
  0x6e   : > { %v534_v54 = vld [vmem:[%s7766_s25 + $0xb60] sm:$0xff]  ;;  %531 = vst [vmem:[%s7771_s26 + $0x5a0] sm:$0xff] %v530_v52  ;;  %533 = vst [vmem:[%s7771_s26 + $0x5a8] sm:$0xff] %v532_v53  ;;  %v536_v55 = vld [vmem:[%s7766_s25 + $0xb68] sm:$0xff] }
  0x6f   : > { %535 = vst [vmem:[%s7771_s26 + $0x5b0] sm:$0xff] %v534_v54  ;;  %v538_v56 = vld [vmem:[%s7766_s25 + $0xb80] sm:$0xff]  ;;  %v540_v57 = vld [vmem:[%s7766_s25 + $0xb88] sm:$0xff]  ;;  %537 = vst [vmem:[%s7771_s26 + $0x5b8] sm:$0xff] %v536_v55 }
  0x70   : > { %539 = vst [vmem:[%s7771_s26 + $0x5c0] sm:$0xff] %v538_v56  ;;  %541 = vst [vmem:[%s7771_s26 + $0x5c8] sm:$0xff] %v540_v57  ;;  %v542_v58 = vld [vmem:[%s7766_s25 + $0xba0] sm:$0xff]  ;;  %v544_v59 = vld [vmem:[%s7766_s25 + $0xba8] sm:$0xff] }
  0x71   : > { %v546_v60 = vld [vmem:[%s7766_s25 + $0xbc0] sm:$0xff]  ;;  %543 = vst [vmem:[%s7771_s26 + $0x5d0] sm:$0xff] %v542_v58  ;;  %545 = vst [vmem:[%s7771_s26 + $0x5d8] sm:$0xff] %v544_v59  ;;  %v548_v61 = vld [vmem:[%s7766_s25 + $0xbc8] sm:$0xff] }
  0x72   : > { %547 = vst [vmem:[%s7771_s26 + $0x5e0] sm:$0xff] %v546_v60  ;;  %v550_v62 = vld [vmem:[%s7766_s25 + $0xbe0] sm:$0xff]  ;;  %v552_v63 = vld [vmem:[%s7766_s25 + $0xbe8] sm:$0xff]  ;;  %549 = vst [vmem:[%s7771_s26 + $0x5e8] sm:$0xff] %v548_v61 }
  0x73   : > { %551 = vst [vmem:[%s7771_s26 + $0x5f0] sm:$0xff] %v550_v62  ;;  %553 = vst [vmem:[%s7771_s26 + $0x5f8] sm:$0xff] %v552_v63  ;;  %v554_v0 = vld [vmem:[%s7766_s25 + $0xc00] sm:$0xff]  ;;  %v556_v1 = vld [vmem:[%s7766_s25 + $0xc08] sm:$0xff] }
  0x74   : > { %v558_v2 = vld [vmem:[%s7766_s25 + $0xc20] sm:$0xff]  ;;  %555 = vst [vmem:[%s7771_s26 + $0x600] sm:$0xff] %v554_v0  ;;  %557 = vst [vmem:[%s7771_s26 + $0x608] sm:$0xff] %v556_v1  ;;  %v560_v3 = vld [vmem:[%s7766_s25 + $0xc28] sm:$0xff] }
  0x75   : > { %559 = vst [vmem:[%s7771_s26 + $0x610] sm:$0xff] %v558_v2  ;;  %v562_v4 = vld [vmem:[%s7766_s25 + $0xc40] sm:$0xff]  ;;  %v564_v5 = vld [vmem:[%s7766_s25 + $0xc48] sm:$0xff]  ;;  %561 = vst [vmem:[%s7771_s26 + $0x618] sm:$0xff] %v560_v3 }
  0x76   : > { %563 = vst [vmem:[%s7771_s26 + $0x620] sm:$0xff] %v562_v4  ;;  %565 = vst [vmem:[%s7771_s26 + $0x628] sm:$0xff] %v564_v5  ;;  %v566_v6 = vld [vmem:[%s7766_s25 + $0xc60] sm:$0xff]  ;;  %v568_v7 = vld [vmem:[%s7766_s25 + $0xc68] sm:$0xff] }
  0x77   : > { %v570_v8 = vld [vmem:[%s7766_s25 + $0xc80] sm:$0xff]  ;;  %567 = vst [vmem:[%s7771_s26 + $0x630] sm:$0xff] %v566_v6  ;;  %569 = vst [vmem:[%s7771_s26 + $0x638] sm:$0xff] %v568_v7  ;;  %v572_v9 = vld [vmem:[%s7766_s25 + $0xc88] sm:$0xff] }
  0x78   : > { %571 = vst [vmem:[%s7771_s26 + $0x640] sm:$0xff] %v570_v8  ;;  %v574_v10 = vld [vmem:[%s7766_s25 + $0xca0] sm:$0xff]  ;;  %v576_v11 = vld [vmem:[%s7766_s25 + $0xca8] sm:$0xff]  ;;  %573 = vst [vmem:[%s7771_s26 + $0x648] sm:$0xff] %v572_v9 }
  0x79   : > { %575 = vst [vmem:[%s7771_s26 + $0x650] sm:$0xff] %v574_v10  ;;  %577 = vst [vmem:[%s7771_s26 + $0x658] sm:$0xff] %v576_v11  ;;  %v578_v12 = vld [vmem:[%s7766_s25 + $0xcc0] sm:$0xff]  ;;  %v580_v13 = vld [vmem:[%s7766_s25 + $0xcc8] sm:$0xff] }
  0x7a   : > { %v582_v14 = vld [vmem:[%s7766_s25 + $0xce0] sm:$0xff]  ;;  %579 = vst [vmem:[%s7771_s26 + $0x660] sm:$0xff] %v578_v12  ;;  %581 = vst [vmem:[%s7771_s26 + $0x668] sm:$0xff] %v580_v13  ;;  %v584_v15 = vld [vmem:[%s7766_s25 + $0xce8] sm:$0xff] }
  0x7b   : > { %583 = vst [vmem:[%s7771_s26 + $0x670] sm:$0xff] %v582_v14  ;;  %v586_v16 = vld [vmem:[%s7766_s25 + $0xd00] sm:$0xff]  ;;  %v588_v17 = vld [vmem:[%s7766_s25 + $0xd08] sm:$0xff]  ;;  %585 = vst [vmem:[%s7771_s26 + $0x678] sm:$0xff] %v584_v15 }
  0x7c   : > { %587 = vst [vmem:[%s7771_s26 + $0x680] sm:$0xff] %v586_v16  ;;  %589 = vst [vmem:[%s7771_s26 + $0x688] sm:$0xff] %v588_v17  ;;  %v590_v18 = vld [vmem:[%s7766_s25 + $0xd20] sm:$0xff]  ;;  %v592_v19 = vld [vmem:[%s7766_s25 + $0xd28] sm:$0xff] }
  0x7d   : > { %v594_v20 = vld [vmem:[%s7766_s25 + $0xd40] sm:$0xff]  ;;  %591 = vst [vmem:[%s7771_s26 + $0x690] sm:$0xff] %v590_v18  ;;  %593 = vst [vmem:[%s7771_s26 + $0x698] sm:$0xff] %v592_v19  ;;  %v596_v21 = vld [vmem:[%s7766_s25 + $0xd48] sm:$0xff] }
  0x7e   : > { %595 = vst [vmem:[%s7771_s26 + $0x6a0] sm:$0xff] %v594_v20  ;;  %v598_v22 = vld [vmem:[%s7766_s25 + $0xd60] sm:$0xff]  ;;  %v600_v23 = vld [vmem:[%s7766_s25 + $0xd68] sm:$0xff]  ;;  %597 = vst [vmem:[%s7771_s26 + $0x6a8] sm:$0xff] %v596_v21 }
  0x7f   : > { %599 = vst [vmem:[%s7771_s26 + $0x6b0] sm:$0xff] %v598_v22  ;;  %601 = vst [vmem:[%s7771_s26 + $0x6b8] sm:$0xff] %v600_v23  ;;  %v602_v24 = vld [vmem:[%s7766_s25 + $0xd80] sm:$0xff]  ;;  %v604_v25 = vld [vmem:[%s7766_s25 + $0xd88] sm:$0xff] }
  0x80   : > { %v606_v26 = vld [vmem:[%s7766_s25 + $0xda0] sm:$0xff]  ;;  %603 = vst [vmem:[%s7771_s26 + $0x6c0] sm:$0xff] %v602_v24  ;;  %605 = vst [vmem:[%s7771_s26 + $0x6c8] sm:$0xff] %v604_v25  ;;  %v608_v27 = vld [vmem:[%s7766_s25 + $0xda8] sm:$0xff] }
  0x81   : > { %607 = vst [vmem:[%s7771_s26 + $0x6d0] sm:$0xff] %v606_v26  ;;  %v610_v28 = vld [vmem:[%s7766_s25 + $0xdc0] sm:$0xff]  ;;  %v612_v29 = vld [vmem:[%s7766_s25 + $0xdc8] sm:$0xff]  ;;  %609 = vst [vmem:[%s7771_s26 + $0x6d8] sm:$0xff] %v608_v27 }
  0x82   : > { %611 = vst [vmem:[%s7771_s26 + $0x6e0] sm:$0xff] %v610_v28  ;;  %613 = vst [vmem:[%s7771_s26 + $0x6e8] sm:$0xff] %v612_v29  ;;  %v614_v30 = vld [vmem:[%s7766_s25 + $0xde0] sm:$0xff]  ;;  %v616_v31 = vld [vmem:[%s7766_s25 + $0xde8] sm:$0xff] }
  0x83   : > { %v618_v32 = vld [vmem:[%s7766_s25 + $0xe00] sm:$0xff]  ;;  %615 = vst [vmem:[%s7771_s26 + $0x6f0] sm:$0xff] %v614_v30  ;;  %617 = vst [vmem:[%s7771_s26 + $0x6f8] sm:$0xff] %v616_v31  ;;  %v620_v33 = vld [vmem:[%s7766_s25 + $0xe08] sm:$0xff] }
  0x84   : > { %619 = vst [vmem:[%s7771_s26 + $0x700] sm:$0xff] %v618_v32  ;;  %v622_v34 = vld [vmem:[%s7766_s25 + $0xe20] sm:$0xff]  ;;  %v624_v35 = vld [vmem:[%s7766_s25 + $0xe28] sm:$0xff]  ;;  %621 = vst [vmem:[%s7771_s26 + $0x708] sm:$0xff] %v620_v33 }
  0x85   : > { %623 = vst [vmem:[%s7771_s26 + $0x710] sm:$0xff] %v622_v34  ;;  %625 = vst [vmem:[%s7771_s26 + $0x718] sm:$0xff] %v624_v35  ;;  %v626_v36 = vld [vmem:[%s7766_s25 + $0xe40] sm:$0xff]  ;;  %v628_v37 = vld [vmem:[%s7766_s25 + $0xe48] sm:$0xff] }
  0x86   : > { %v630_v38 = vld [vmem:[%s7766_s25 + $0xe60] sm:$0xff]  ;;  %627 = vst [vmem:[%s7771_s26 + $0x720] sm:$0xff] %v626_v36  ;;  %629 = vst [vmem:[%s7771_s26 + $0x728] sm:$0xff] %v628_v37  ;;  %v632_v39 = vld [vmem:[%s7766_s25 + $0xe68] sm:$0xff] }
  0x87   : > { %631 = vst [vmem:[%s7771_s26 + $0x730] sm:$0xff] %v630_v38  ;;  %v634_v40 = vld [vmem:[%s7766_s25 + $0xe80] sm:$0xff]  ;;  %v636_v41 = vld [vmem:[%s7766_s25 + $0xe88] sm:$0xff]  ;;  %633 = vst [vmem:[%s7771_s26 + $0x738] sm:$0xff] %v632_v39 }
  0x88   : > { %635 = vst [vmem:[%s7771_s26 + $0x740] sm:$0xff] %v634_v40  ;;  %637 = vst [vmem:[%s7771_s26 + $0x748] sm:$0xff] %v636_v41  ;;  %v638_v42 = vld [vmem:[%s7766_s25 + $0xea0] sm:$0xff]  ;;  %v640_v43 = vld [vmem:[%s7766_s25 + $0xea8] sm:$0xff] }
  0x89   : > { %v642_v44 = vld [vmem:[%s7766_s25 + $0xec0] sm:$0xff]  ;;  %639 = vst [vmem:[%s7771_s26 + $0x750] sm:$0xff] %v638_v42  ;;  %641 = vst [vmem:[%s7771_s26 + $0x758] sm:$0xff] %v640_v43  ;;  %v644_v45 = vld [vmem:[%s7766_s25 + $0xec8] sm:$0xff] }
  0x8a   : > { %643 = vst [vmem:[%s7771_s26 + $0x760] sm:$0xff] %v642_v44  ;;  %v646_v46 = vld [vmem:[%s7766_s25 + $0xee0] sm:$0xff]  ;;  %v648_v47 = vld [vmem:[%s7766_s25 + $0xee8] sm:$0xff]  ;;  %645 = vst [vmem:[%s7771_s26 + $0x768] sm:$0xff] %v644_v45 }
  0x8b   : > { %647 = vst [vmem:[%s7771_s26 + $0x770] sm:$0xff] %v646_v46  ;;  %649 = vst [vmem:[%s7771_s26 + $0x778] sm:$0xff] %v648_v47  ;;  %v650_v48 = vld [vmem:[%s7766_s25 + $0xf00] sm:$0xff]  ;;  %v652_v49 = vld [vmem:[%s7766_s25 + $0xf08] sm:$0xff] }
  0x8c   : > { %v654_v50 = vld [vmem:[%s7766_s25 + $0xf20] sm:$0xff]  ;;  %651 = vst [vmem:[%s7771_s26 + $0x780] sm:$0xff] %v650_v48  ;;  %653 = vst [vmem:[%s7771_s26 + $0x788] sm:$0xff] %v652_v49  ;;  %v656_v51 = vld [vmem:[%s7766_s25 + $0xf28] sm:$0xff] }
  0x8d   : > { %655 = vst [vmem:[%s7771_s26 + $0x790] sm:$0xff] %v654_v50  ;;  %v658_v52 = vld [vmem:[%s7766_s25 + $0xf40] sm:$0xff]  ;;  %v660_v53 = vld [vmem:[%s7766_s25 + $0xf48] sm:$0xff]  ;;  %657 = vst [vmem:[%s7771_s26 + $0x798] sm:$0xff] %v656_v51 }
  0x8e   : > { %659 = vst [vmem:[%s7771_s26 + $0x7a0] sm:$0xff] %v658_v52  ;;  %661 = vst [vmem:[%s7771_s26 + $0x7a8] sm:$0xff] %v660_v53  ;;  %v662_v54 = vld [vmem:[%s7766_s25 + $0xf60] sm:$0xff]  ;;  %v664_v55 = vld [vmem:[%s7766_s25 + $0xf68] sm:$0xff] }
  0x8f   : > { %v666_v56 = vld [vmem:[%s7766_s25 + $0xf80] sm:$0xff]  ;;  %663 = vst [vmem:[%s7771_s26 + $0x7b0] sm:$0xff] %v662_v54  ;;  %665 = vst [vmem:[%s7771_s26 + $0x7b8] sm:$0xff] %v664_v55  ;;  %v668_v57 = vld [vmem:[%s7766_s25 + $0xf88] sm:$0xff] }
  0x90   : > { %667 = vst [vmem:[%s7771_s26 + $0x7c0] sm:$0xff] %v666_v56  ;;  %v670_v58 = vld [vmem:[%s7766_s25 + $0xfa0] sm:$0xff]  ;;  %v672_v59 = vld [vmem:[%s7766_s25 + $0xfa8] sm:$0xff]  ;;  %669 = vst [vmem:[%s7771_s26 + $0x7c8] sm:$0xff] %v668_v57 }
  0x91   : > { %671 = vst [vmem:[%s7771_s26 + $0x7d0] sm:$0xff] %v670_v58  ;;  %673 = vst [vmem:[%s7771_s26 + $0x7d8] sm:$0xff] %v672_v59  ;;  %v674_v60 = vld [vmem:[%s7766_s25 + $0xfc0] sm:$0xff]  ;;  %v676_v61 = vld [vmem:[%s7766_s25 + $0xfc8] sm:$0xff] }
  0x92   : > { %v678_v62 = vld [vmem:[%s7766_s25 + $0xfe0] sm:$0xff]  ;;  %675 = vst [vmem:[%s7771_s26 + $0x7e0] sm:$0xff] %v674_v60  ;;  %677 = vst [vmem:[%s7771_s26 + $0x7e8] sm:$0xff] %v676_v61  ;;  %v680_v63 = vld [vmem:[%s7766_s25 + $0xfe8] sm:$0xff] }
  0x93   : > { %679 = vst [vmem:[%s7771_s26 + $0x7f0] sm:$0xff] %v678_v62  ;;  %v682_v0 = vld [vmem:[%s7766_s25 + $0x1000] sm:$0xff]  ;;  %v684_v1 = vld [vmem:[%s7766_s25 + $0x1008] sm:$0xff]  ;;  %681 = vst [vmem:[%s7771_s26 + $0x7f8] sm:$0xff] %v680_v63 }
  0x94   : > { %683 = vst [vmem:[%s7771_s26 + $0x800] sm:$0xff] %v682_v0  ;;  %685 = vst [vmem:[%s7771_s26 + $0x808] sm:$0xff] %v684_v1  ;;  %v686_v2 = vld [vmem:[%s7766_s25 + $0x1020] sm:$0xff]  ;;  %v688_v3 = vld [vmem:[%s7766_s25 + $0x1028] sm:$0xff] }
  0x95   : > { %v690_v4 = vld [vmem:[%s7766_s25 + $0x1040] sm:$0xff]  ;;  %687 = vst [vmem:[%s7771_s26 + $0x810] sm:$0xff] %v686_v2  ;;  %689 = vst [vmem:[%s7771_s26 + $0x818] sm:$0xff] %v688_v3  ;;  %v692_v5 = vld [vmem:[%s7766_s25 + $0x1048] sm:$0xff] }
  0x96   : > { %691 = vst [vmem:[%s7771_s26 + $0x820] sm:$0xff] %v690_v4  ;;  %v694_v6 = vld [vmem:[%s7766_s25 + $0x1060] sm:$0xff]  ;;  %v696_v7 = vld [vmem:[%s7766_s25 + $0x1068] sm:$0xff]  ;;  %693 = vst [vmem:[%s7771_s26 + $0x828] sm:$0xff] %v692_v5 }
  0x97   : > { %695 = vst [vmem:[%s7771_s26 + $0x830] sm:$0xff] %v694_v6  ;;  %697 = vst [vmem:[%s7771_s26 + $0x838] sm:$0xff] %v696_v7  ;;  %v698_v8 = vld [vmem:[%s7766_s25 + $0x1080] sm:$0xff]  ;;  %v700_v9 = vld [vmem:[%s7766_s25 + $0x1088] sm:$0xff] }
  0x98   : > { %v702_v10 = vld [vmem:[%s7766_s25 + $0x10a0] sm:$0xff]  ;;  %699 = vst [vmem:[%s7771_s26 + $0x840] sm:$0xff] %v698_v8  ;;  %701 = vst [vmem:[%s7771_s26 + $0x848] sm:$0xff] %v700_v9  ;;  %v704_v11 = vld [vmem:[%s7766_s25 + $0x10a8] sm:$0xff] }
  0x99   : > { %703 = vst [vmem:[%s7771_s26 + $0x850] sm:$0xff] %v702_v10  ;;  %v706_v12 = vld [vmem:[%s7766_s25 + $0x10c0] sm:$0xff]  ;;  %v708_v13 = vld [vmem:[%s7766_s25 + $0x10c8] sm:$0xff]  ;;  %705 = vst [vmem:[%s7771_s26 + $0x858] sm:$0xff] %v704_v11 }
  0x9a   : > { %707 = vst [vmem:[%s7771_s26 + $0x860] sm:$0xff] %v706_v12  ;;  %709 = vst [vmem:[%s7771_s26 + $0x868] sm:$0xff] %v708_v13  ;;  %v710_v14 = vld [vmem:[%s7766_s25 + $0x10e0] sm:$0xff]  ;;  %v712_v15 = vld [vmem:[%s7766_s25 + $0x10e8] sm:$0xff] }
  0x9b   : > { %v714_v16 = vld [vmem:[%s7766_s25 + $0x1100] sm:$0xff]  ;;  %711 = vst [vmem:[%s7771_s26 + $0x870] sm:$0xff] %v710_v14  ;;  %713 = vst [vmem:[%s7771_s26 + $0x878] sm:$0xff] %v712_v15  ;;  %v716_v17 = vld [vmem:[%s7766_s25 + $0x1108] sm:$0xff] }
  0x9c   : > { %715 = vst [vmem:[%s7771_s26 + $0x880] sm:$0xff] %v714_v16  ;;  %v718_v18 = vld [vmem:[%s7766_s25 + $0x1120] sm:$0xff]  ;;  %v720_v19 = vld [vmem:[%s7766_s25 + $0x1128] sm:$0xff]  ;;  %717 = vst [vmem:[%s7771_s26 + $0x888] sm:$0xff] %v716_v17 }
  0x9d   : > { %719 = vst [vmem:[%s7771_s26 + $0x890] sm:$0xff] %v718_v18  ;;  %721 = vst [vmem:[%s7771_s26 + $0x898] sm:$0xff] %v720_v19  ;;  %v722_v20 = vld [vmem:[%s7766_s25 + $0x1140] sm:$0xff]  ;;  %v724_v21 = vld [vmem:[%s7766_s25 + $0x1148] sm:$0xff] }
  0x9e   : > { %v726_v22 = vld [vmem:[%s7766_s25 + $0x1160] sm:$0xff]  ;;  %723 = vst [vmem:[%s7771_s26 + $0x8a0] sm:$0xff] %v722_v20  ;;  %725 = vst [vmem:[%s7771_s26 + $0x8a8] sm:$0xff] %v724_v21  ;;  %v728_v23 = vld [vmem:[%s7766_s25 + $0x1168] sm:$0xff] }
  0x9f   : > { %727 = vst [vmem:[%s7771_s26 + $0x8b0] sm:$0xff] %v726_v22  ;;  %v730_v24 = vld [vmem:[%s7766_s25 + $0x1180] sm:$0xff]  ;;  %v732_v25 = vld [vmem:[%s7766_s25 + $0x1188] sm:$0xff]  ;;  %729 = vst [vmem:[%s7771_s26 + $0x8b8] sm:$0xff] %v728_v23 }
  0xa0   : > { %731 = vst [vmem:[%s7771_s26 + $0x8c0] sm:$0xff] %v730_v24  ;;  %733 = vst [vmem:[%s7771_s26 + $0x8c8] sm:$0xff] %v732_v25  ;;  %v734_v26 = vld [vmem:[%s7766_s25 + $0x11a0] sm:$0xff]  ;;  %v736_v27 = vld [vmem:[%s7766_s25 + $0x11a8] sm:$0xff] }
  0xa1   : > { %v738_v28 = vld [vmem:[%s7766_s25 + $0x11c0] sm:$0xff]  ;;  %735 = vst [vmem:[%s7771_s26 + $0x8d0] sm:$0xff] %v734_v26  ;;  %737 = vst [vmem:[%s7771_s26 + $0x8d8] sm:$0xff] %v736_v27  ;;  %v740_v29 = vld [vmem:[%s7766_s25 + $0x11c8] sm:$0xff] }
  0xa2   : > { %739 = vst [vmem:[%s7771_s26 + $0x8e0] sm:$0xff] %v738_v28  ;;  %v742_v30 = vld [vmem:[%s7766_s25 + $0x11e0] sm:$0xff]  ;;  %v744_v31 = vld [vmem:[%s7766_s25 + $0x11e8] sm:$0xff]  ;;  %741 = vst [vmem:[%s7771_s26 + $0x8e8] sm:$0xff] %v740_v29 }
  0xa3   : > { %743 = vst [vmem:[%s7771_s26 + $0x8f0] sm:$0xff] %v742_v30  ;;  %745 = vst [vmem:[%s7771_s26 + $0x8f8] sm:$0xff] %v744_v31  ;;  %v746_v32 = vld [vmem:[%s7766_s25 + $0x1200] sm:$0xff]  ;;  %v748_v33 = vld [vmem:[%s7766_s25 + $0x1208] sm:$0xff] }
  0xa4   : > { %v750_v34 = vld [vmem:[%s7766_s25 + $0x1220] sm:$0xff]  ;;  %747 = vst [vmem:[%s7771_s26 + $0x900] sm:$0xff] %v746_v32  ;;  %749 = vst [vmem:[%s7771_s26 + $0x908] sm:$0xff] %v748_v33  ;;  %v752_v35 = vld [vmem:[%s7766_s25 + $0x1228] sm:$0xff] }
  0xa5   : > { %751 = vst [vmem:[%s7771_s26 + $0x910] sm:$0xff] %v750_v34  ;;  %v754_v36 = vld [vmem:[%s7766_s25 + $0x1240] sm:$0xff]  ;;  %v756_v37 = vld [vmem:[%s7766_s25 + $0x1248] sm:$0xff]  ;;  %753 = vst [vmem:[%s7771_s26 + $0x918] sm:$0xff] %v752_v35 }
  0xa6   : > { %755 = vst [vmem:[%s7771_s26 + $0x920] sm:$0xff] %v754_v36  ;;  %757 = vst [vmem:[%s7771_s26 + $0x928] sm:$0xff] %v756_v37  ;;  %v758_v38 = vld [vmem:[%s7766_s25 + $0x1260] sm:$0xff]  ;;  %v760_v39 = vld [vmem:[%s7766_s25 + $0x1268] sm:$0xff] }
  0xa7   : > { %v762_v40 = vld [vmem:[%s7766_s25 + $0x1280] sm:$0xff]  ;;  %759 = vst [vmem:[%s7771_s26 + $0x930] sm:$0xff] %v758_v38  ;;  %761 = vst [vmem:[%s7771_s26 + $0x938] sm:$0xff] %v760_v39  ;;  %v764_v41 = vld [vmem:[%s7766_s25 + $0x1288] sm:$0xff] }
  0xa8   : > { %763 = vst [vmem:[%s7771_s26 + $0x940] sm:$0xff] %v762_v40  ;;  %v766_v42 = vld [vmem:[%s7766_s25 + $0x12a0] sm:$0xff]  ;;  %v768_v43 = vld [vmem:[%s7766_s25 + $0x12a8] sm:$0xff]  ;;  %765 = vst [vmem:[%s7771_s26 + $0x948] sm:$0xff] %v764_v41 }
  0xa9   : > { %767 = vst [vmem:[%s7771_s26 + $0x950] sm:$0xff] %v766_v42  ;;  %769 = vst [vmem:[%s7771_s26 + $0x958] sm:$0xff] %v768_v43  ;;  %v770_v44 = vld [vmem:[%s7766_s25 + $0x12c0] sm:$0xff]  ;;  %v772_v45 = vld [vmem:[%s7766_s25 + $0x12c8] sm:$0xff] }
  0xaa   : > { %v774_v46 = vld [vmem:[%s7766_s25 + $0x12e0] sm:$0xff]  ;;  %771 = vst [vmem:[%s7771_s26 + $0x960] sm:$0xff] %v770_v44  ;;  %773 = vst [vmem:[%s7771_s26 + $0x968] sm:$0xff] %v772_v45  ;;  %v776_v47 = vld [vmem:[%s7766_s25 + $0x12e8] sm:$0xff] }
  0xab   : > { %775 = vst [vmem:[%s7771_s26 + $0x970] sm:$0xff] %v774_v46  ;;  %v778_v48 = vld [vmem:[%s7766_s25 + $0x1300] sm:$0xff]  ;;  %v780_v49 = vld [vmem:[%s7766_s25 + $0x1308] sm:$0xff]  ;;  %777 = vst [vmem:[%s7771_s26 + $0x978] sm:$0xff] %v776_v47 }
  0xac   : > { %779 = vst [vmem:[%s7771_s26 + $0x980] sm:$0xff] %v778_v48  ;;  %781 = vst [vmem:[%s7771_s26 + $0x988] sm:$0xff] %v780_v49  ;;  %v782_v50 = vld [vmem:[%s7766_s25 + $0x1320] sm:$0xff]  ;;  %v784_v51 = vld [vmem:[%s7766_s25 + $0x1328] sm:$0xff] }
  0xad   : > { %v786_v52 = vld [vmem:[%s7766_s25 + $0x1340] sm:$0xff]  ;;  %783 = vst [vmem:[%s7771_s26 + $0x990] sm:$0xff] %v782_v50  ;;  %785 = vst [vmem:[%s7771_s26 + $0x998] sm:$0xff] %v784_v51  ;;  %v788_v53 = vld [vmem:[%s7766_s25 + $0x1348] sm:$0xff] }
  0xae   : > { %787 = vst [vmem:[%s7771_s26 + $0x9a0] sm:$0xff] %v786_v52  ;;  %v790_v54 = vld [vmem:[%s7766_s25 + $0x1360] sm:$0xff]  ;;  %v792_v55 = vld [vmem:[%s7766_s25 + $0x1368] sm:$0xff]  ;;  %789 = vst [vmem:[%s7771_s26 + $0x9a8] sm:$0xff] %v788_v53 }
  0xaf   : > { %791 = vst [vmem:[%s7771_s26 + $0x9b0] sm:$0xff] %v790_v54  ;;  %793 = vst [vmem:[%s7771_s26 + $0x9b8] sm:$0xff] %v792_v55  ;;  %v794_v56 = vld [vmem:[%s7766_s25 + $0x1380] sm:$0xff]  ;;  %v796_v57 = vld [vmem:[%s7766_s25 + $0x1388] sm:$0xff] }
  0xb0   : > { %v798_v58 = vld [vmem:[%s7766_s25 + $0x13a0] sm:$0xff]  ;;  %795 = vst [vmem:[%s7771_s26 + $0x9c0] sm:$0xff] %v794_v56  ;;  %797 = vst [vmem:[%s7771_s26 + $0x9c8] sm:$0xff] %v796_v57  ;;  %v800_v59 = vld [vmem:[%s7766_s25 + $0x13a8] sm:$0xff] }
  0xb1   : > { %799 = vst [vmem:[%s7771_s26 + $0x9d0] sm:$0xff] %v798_v58  ;;  %v802_v60 = vld [vmem:[%s7766_s25 + $0x13c0] sm:$0xff]  ;;  %v804_v61 = vld [vmem:[%s7766_s25 + $0x13c8] sm:$0xff]  ;;  %801 = vst [vmem:[%s7771_s26 + $0x9d8] sm:$0xff] %v800_v59 }
  0xb2   : > { %803 = vst [vmem:[%s7771_s26 + $0x9e0] sm:$0xff] %v802_v60  ;;  %805 = vst [vmem:[%s7771_s26 + $0x9e8] sm:$0xff] %v804_v61  ;;  %v806_v62 = vld [vmem:[%s7766_s25 + $0x13e0] sm:$0xff]  ;;  %v808_v63 = vld [vmem:[%s7766_s25 + $0x13e8] sm:$0xff] }
  0xb3   : > { %v810_v0 = vld [vmem:[%s7766_s25 + $0x1400] sm:$0xff]  ;;  %807 = vst [vmem:[%s7771_s26 + $0x9f0] sm:$0xff] %v806_v62  ;;  %809 = vst [vmem:[%s7771_s26 + $0x9f8] sm:$0xff] %v808_v63  ;;  %v812_v1 = vld [vmem:[%s7766_s25 + $0x1408] sm:$0xff] }
  0xb4   : > { %811 = vst [vmem:[%s7771_s26 + $0xa00] sm:$0xff] %v810_v0  ;;  %v814_v2 = vld [vmem:[%s7766_s25 + $0x1420] sm:$0xff]  ;;  %v816_v3 = vld [vmem:[%s7766_s25 + $0x1428] sm:$0xff]  ;;  %813 = vst [vmem:[%s7771_s26 + $0xa08] sm:$0xff] %v812_v1 }
  0xb5   : > { %815 = vst [vmem:[%s7771_s26 + $0xa10] sm:$0xff] %v814_v2  ;;  %817 = vst [vmem:[%s7771_s26 + $0xa18] sm:$0xff] %v816_v3  ;;  %v818_v4 = vld [vmem:[%s7766_s25 + $0x1440] sm:$0xff]  ;;  %v820_v5 = vld [vmem:[%s7766_s25 + $0x1448] sm:$0xff] }
  0xb6   : > { %v822_v6 = vld [vmem:[%s7766_s25 + $0x1460] sm:$0xff]  ;;  %819 = vst [vmem:[%s7771_s26 + $0xa20] sm:$0xff] %v818_v4  ;;  %821 = vst [vmem:[%s7771_s26 + $0xa28] sm:$0xff] %v820_v5  ;;  %v824_v7 = vld [vmem:[%s7766_s25 + $0x1468] sm:$0xff] }
  0xb7   : > { %823 = vst [vmem:[%s7771_s26 + $0xa30] sm:$0xff] %v822_v6  ;;  %v826_v8 = vld [vmem:[%s7766_s25 + $0x1480] sm:$0xff]  ;;  %v828_v9 = vld [vmem:[%s7766_s25 + $0x1488] sm:$0xff]  ;;  %825 = vst [vmem:[%s7771_s26 + $0xa38] sm:$0xff] %v824_v7 }
  0xb8   : > { %827 = vst [vmem:[%s7771_s26 + $0xa40] sm:$0xff] %v826_v8  ;;  %829 = vst [vmem:[%s7771_s26 + $0xa48] sm:$0xff] %v828_v9  ;;  %v830_v10 = vld [vmem:[%s7766_s25 + $0x14a0] sm:$0xff]  ;;  %v832_v11 = vld [vmem:[%s7766_s25 + $0x14a8] sm:$0xff] }
  0xb9   : > { %v834_v12 = vld [vmem:[%s7766_s25 + $0x14c0] sm:$0xff]  ;;  %831 = vst [vmem:[%s7771_s26 + $0xa50] sm:$0xff] %v830_v10  ;;  %833 = vst [vmem:[%s7771_s26 + $0xa58] sm:$0xff] %v832_v11  ;;  %v836_v13 = vld [vmem:[%s7766_s25 + $0x14c8] sm:$0xff] }
  0xba   : > { %835 = vst [vmem:[%s7771_s26 + $0xa60] sm:$0xff] %v834_v12  ;;  %v838_v14 = vld [vmem:[%s7766_s25 + $0x14e0] sm:$0xff]  ;;  %v840_v15 = vld [vmem:[%s7766_s25 + $0x14e8] sm:$0xff]  ;;  %837 = vst [vmem:[%s7771_s26 + $0xa68] sm:$0xff] %v836_v13 }
  0xbb   : > { %839 = vst [vmem:[%s7771_s26 + $0xa70] sm:$0xff] %v838_v14  ;;  %841 = vst [vmem:[%s7771_s26 + $0xa78] sm:$0xff] %v840_v15  ;;  %v842_v16 = vld [vmem:[%s7766_s25 + $0x1500] sm:$0xff]  ;;  %v844_v17 = vld [vmem:[%s7766_s25 + $0x1508] sm:$0xff] }
  0xbc   : > { %v846_v18 = vld [vmem:[%s7766_s25 + $0x1520] sm:$0xff]  ;;  %843 = vst [vmem:[%s7771_s26 + $0xa80] sm:$0xff] %v842_v16  ;;  %845 = vst [vmem:[%s7771_s26 + $0xa88] sm:$0xff] %v844_v17  ;;  %v848_v19 = vld [vmem:[%s7766_s25 + $0x1528] sm:$0xff] }
  0xbd   : > { %847 = vst [vmem:[%s7771_s26 + $0xa90] sm:$0xff] %v846_v18  ;;  %v850_v20 = vld [vmem:[%s7766_s25 + $0x1540] sm:$0xff]  ;;  %v852_v21 = vld [vmem:[%s7766_s25 + $0x1548] sm:$0xff]  ;;  %849 = vst [vmem:[%s7771_s26 + $0xa98] sm:$0xff] %v848_v19 }
  0xbe   : > { %851 = vst [vmem:[%s7771_s26 + $0xaa0] sm:$0xff] %v850_v20  ;;  %853 = vst [vmem:[%s7771_s26 + $0xaa8] sm:$0xff] %v852_v21  ;;  %v854_v22 = vld [vmem:[%s7766_s25 + $0x1560] sm:$0xff]  ;;  %v856_v23 = vld [vmem:[%s7766_s25 + $0x1568] sm:$0xff] }
  0xbf   : > { %v858_v24 = vld [vmem:[%s7766_s25 + $0x1580] sm:$0xff]  ;;  %855 = vst [vmem:[%s7771_s26 + $0xab0] sm:$0xff] %v854_v22  ;;  %857 = vst [vmem:[%s7771_s26 + $0xab8] sm:$0xff] %v856_v23  ;;  %v860_v25 = vld [vmem:[%s7766_s25 + $0x1588] sm:$0xff] }
  0xc0   : > { %859 = vst [vmem:[%s7771_s26 + $0xac0] sm:$0xff] %v858_v24  ;;  %v862_v26 = vld [vmem:[%s7766_s25 + $0x15a0] sm:$0xff]  ;;  %v864_v27 = vld [vmem:[%s7766_s25 + $0x15a8] sm:$0xff]  ;;  %861 = vst [vmem:[%s7771_s26 + $0xac8] sm:$0xff] %v860_v25 }
  0xc1   : > { %863 = vst [vmem:[%s7771_s26 + $0xad0] sm:$0xff] %v862_v26  ;;  %865 = vst [vmem:[%s7771_s26 + $0xad8] sm:$0xff] %v864_v27  ;;  %v866_v28 = vld [vmem:[%s7766_s25 + $0x15c0] sm:$0xff]  ;;  %v868_v29 = vld [vmem:[%s7766_s25 + $0x15c8] sm:$0xff] }
  0xc2   : > { %v870_v30 = vld [vmem:[%s7766_s25 + $0x15e0] sm:$0xff]  ;;  %867 = vst [vmem:[%s7771_s26 + $0xae0] sm:$0xff] %v866_v28  ;;  %869 = vst [vmem:[%s7771_s26 + $0xae8] sm:$0xff] %v868_v29  ;;  %v872_v31 = vld [vmem:[%s7766_s25 + $0x15e8] sm:$0xff] }
  0xc3   : > { %871 = vst [vmem:[%s7771_s26 + $0xaf0] sm:$0xff] %v870_v30  ;;  %v874_v32 = vld [vmem:[%s7766_s25 + $0x1600] sm:$0xff]  ;;  %v876_v33 = vld [vmem:[%s7766_s25 + $0x1608] sm:$0xff]  ;;  %873 = vst [vmem:[%s7771_s26 + $0xaf8] sm:$0xff] %v872_v31 }
  0xc4   : > { %875 = vst [vmem:[%s7771_s26 + $0xb00] sm:$0xff] %v874_v32  ;;  %877 = vst [vmem:[%s7771_s26 + $0xb08] sm:$0xff] %v876_v33  ;;  %v878_v34 = vld [vmem:[%s7766_s25 + $0x1620] sm:$0xff]  ;;  %v880_v35 = vld [vmem:[%s7766_s25 + $0x1628] sm:$0xff] }
  0xc5   : > { %v882_v36 = vld [vmem:[%s7766_s25 + $0x1640] sm:$0xff]  ;;  %879 = vst [vmem:[%s7771_s26 + $0xb10] sm:$0xff] %v878_v34  ;;  %881 = vst [vmem:[%s7771_s26 + $0xb18] sm:$0xff] %v880_v35  ;;  %v884_v37 = vld [vmem:[%s7766_s25 + $0x1648] sm:$0xff] }
  0xc6   : > { %883 = vst [vmem:[%s7771_s26 + $0xb20] sm:$0xff] %v882_v36  ;;  %v886_v38 = vld [vmem:[%s7766_s25 + $0x1660] sm:$0xff]  ;;  %v888_v39 = vld [vmem:[%s7766_s25 + $0x1668] sm:$0xff]  ;;  %885 = vst [vmem:[%s7771_s26 + $0xb28] sm:$0xff] %v884_v37 }
  0xc7   : > { %887 = vst [vmem:[%s7771_s26 + $0xb30] sm:$0xff] %v886_v38  ;;  %889 = vst [vmem:[%s7771_s26 + $0xb38] sm:$0xff] %v888_v39  ;;  %v890_v40 = vld [vmem:[%s7766_s25 + $0x1680] sm:$0xff]  ;;  %v892_v41 = vld [vmem:[%s7766_s25 + $0x1688] sm:$0xff] }
  0xc8   : > { %v894_v42 = vld [vmem:[%s7766_s25 + $0x16a0] sm:$0xff]  ;;  %891 = vst [vmem:[%s7771_s26 + $0xb40] sm:$0xff] %v890_v40  ;;  %893 = vst [vmem:[%s7771_s26 + $0xb48] sm:$0xff] %v892_v41  ;;  %v896_v43 = vld [vmem:[%s7766_s25 + $0x16a8] sm:$0xff] }
  0xc9   : > { %895 = vst [vmem:[%s7771_s26 + $0xb50] sm:$0xff] %v894_v42  ;;  %v898_v44 = vld [vmem:[%s7766_s25 + $0x16c0] sm:$0xff]  ;;  %v900_v45 = vld [vmem:[%s7766_s25 + $0x16c8] sm:$0xff]  ;;  %897 = vst [vmem:[%s7771_s26 + $0xb58] sm:$0xff] %v896_v43 }
  0xca   : > { %899 = vst [vmem:[%s7771_s26 + $0xb60] sm:$0xff] %v898_v44  ;;  %901 = vst [vmem:[%s7771_s26 + $0xb68] sm:$0xff] %v900_v45  ;;  %v902_v46 = vld [vmem:[%s7766_s25 + $0x16e0] sm:$0xff]  ;;  %v904_v47 = vld [vmem:[%s7766_s25 + $0x16e8] sm:$0xff] }
  0xcb   : > { %v906_v48 = vld [vmem:[%s7766_s25 + $0x1700] sm:$0xff]  ;;  %903 = vst [vmem:[%s7771_s26 + $0xb70] sm:$0xff] %v902_v46  ;;  %905 = vst [vmem:[%s7771_s26 + $0xb78] sm:$0xff] %v904_v47  ;;  %v908_v49 = vld [vmem:[%s7766_s25 + $0x1708] sm:$0xff] }
  0xcc   : > { %907 = vst [vmem:[%s7771_s26 + $0xb80] sm:$0xff] %v906_v48  ;;  %v910_v50 = vld [vmem:[%s7766_s25 + $0x1720] sm:$0xff]  ;;  %v912_v51 = vld [vmem:[%s7766_s25 + $0x1728] sm:$0xff]  ;;  %909 = vst [vmem:[%s7771_s26 + $0xb88] sm:$0xff] %v908_v49 }
  0xcd   : > { %911 = vst [vmem:[%s7771_s26 + $0xb90] sm:$0xff] %v910_v50  ;;  %913 = vst [vmem:[%s7771_s26 + $0xb98] sm:$0xff] %v912_v51  ;;  %v914_v52 = vld [vmem:[%s7766_s25 + $0x1740] sm:$0xff]  ;;  %v916_v53 = vld [vmem:[%s7766_s25 + $0x1748] sm:$0xff] }
  0xce   : > { %v918_v54 = vld [vmem:[%s7766_s25 + $0x1760] sm:$0xff]  ;;  %915 = vst [vmem:[%s7771_s26 + $0xba0] sm:$0xff] %v914_v52  ;;  %917 = vst [vmem:[%s7771_s26 + $0xba8] sm:$0xff] %v916_v53  ;;  %v920_v55 = vld [vmem:[%s7766_s25 + $0x1768] sm:$0xff] }
  0xcf   : > { %919 = vst [vmem:[%s7771_s26 + $0xbb0] sm:$0xff] %v918_v54  ;;  %v922_v56 = vld [vmem:[%s7766_s25 + $0x1780] sm:$0xff]  ;;  %v924_v57 = vld [vmem:[%s7766_s25 + $0x1788] sm:$0xff]  ;;  %921 = vst [vmem:[%s7771_s26 + $0xbb8] sm:$0xff] %v920_v55 }
  0xd0   : > { %923 = vst [vmem:[%s7771_s26 + $0xbc0] sm:$0xff] %v922_v56  ;;  %925 = vst [vmem:[%s7771_s26 + $0xbc8] sm:$0xff] %v924_v57  ;;  %v926_v58 = vld [vmem:[%s7766_s25 + $0x17a0] sm:$0xff]  ;;  %v928_v59 = vld [vmem:[%s7766_s25 + $0x17a8] sm:$0xff] }
  0xd1   : > { %v930_v60 = vld [vmem:[%s7766_s25 + $0x17c0] sm:$0xff]  ;;  %927 = vst [vmem:[%s7771_s26 + $0xbd0] sm:$0xff] %v926_v58  ;;  %929 = vst [vmem:[%s7771_s26 + $0xbd8] sm:$0xff] %v928_v59  ;;  %v932_v61 = vld [vmem:[%s7766_s25 + $0x17c8] sm:$0xff] }
  0xd2   : > { %931 = vst [vmem:[%s7771_s26 + $0xbe0] sm:$0xff] %v930_v60  ;;  %v934_v62 = vld [vmem:[%s7766_s25 + $0x17e0] sm:$0xff]  ;;  %v936_v63 = vld [vmem:[%s7766_s25 + $0x17e8] sm:$0xff]  ;;  %933 = vst [vmem:[%s7771_s26 + $0xbe8] sm:$0xff] %v932_v61 }
  0xd3   : > { %935 = vst [vmem:[%s7771_s26 + $0xbf0] sm:$0xff] %v934_v62  ;;  %937 = vst [vmem:[%s7771_s26 + $0xbf8] sm:$0xff] %v936_v63  ;;  %v938_v0 = vld [vmem:[%s7766_s25 + $0x1800] sm:$0xff]  ;;  %v940_v1 = vld [vmem:[%s7766_s25 + $0x1808] sm:$0xff] }
  0xd4   : > { %v942_v2 = vld [vmem:[%s7766_s25 + $0x1820] sm:$0xff]  ;;  %939 = vst [vmem:[%s7771_s26 + $0xc00] sm:$0xff] %v938_v0  ;;  %941 = vst [vmem:[%s7771_s26 + $0xc08] sm:$0xff] %v940_v1  ;;  %v944_v3 = vld [vmem:[%s7766_s25 + $0x1828] sm:$0xff] }
  0xd5   : > { %943 = vst [vmem:[%s7771_s26 + $0xc10] sm:$0xff] %v942_v2  ;;  %v946_v4 = vld [vmem:[%s7766_s25 + $0x1840] sm:$0xff]  ;;  %v948_v5 = vld [vmem:[%s7766_s25 + $0x1848] sm:$0xff]  ;;  %945 = vst [vmem:[%s7771_s26 + $0xc18] sm:$0xff] %v944_v3 }
  0xd6   : > { %947 = vst [vmem:[%s7771_s26 + $0xc20] sm:$0xff] %v946_v4  ;;  %949 = vst [vmem:[%s7771_s26 + $0xc28] sm:$0xff] %v948_v5  ;;  %v950_v6 = vld [vmem:[%s7766_s25 + $0x1860] sm:$0xff]  ;;  %v952_v7 = vld [vmem:[%s7766_s25 + $0x1868] sm:$0xff] }
  0xd7   : > { %v954_v8 = vld [vmem:[%s7766_s25 + $0x1880] sm:$0xff]  ;;  %951 = vst [vmem:[%s7771_s26 + $0xc30] sm:$0xff] %v950_v6  ;;  %953 = vst [vmem:[%s7771_s26 + $0xc38] sm:$0xff] %v952_v7  ;;  %v956_v9 = vld [vmem:[%s7766_s25 + $0x1888] sm:$0xff] }
  0xd8   : > { %955 = vst [vmem:[%s7771_s26 + $0xc40] sm:$0xff] %v954_v8  ;;  %v958_v10 = vld [vmem:[%s7766_s25 + $0x18a0] sm:$0xff]  ;;  %v960_v11 = vld [vmem:[%s7766_s25 + $0x18a8] sm:$0xff]  ;;  %957 = vst [vmem:[%s7771_s26 + $0xc48] sm:$0xff] %v956_v9 }
  0xd9   : > { %959 = vst [vmem:[%s7771_s26 + $0xc50] sm:$0xff] %v958_v10  ;;  %961 = vst [vmem:[%s7771_s26 + $0xc58] sm:$0xff] %v960_v11  ;;  %v962_v12 = vld [vmem:[%s7766_s25 + $0x18c0] sm:$0xff]  ;;  %v964_v13 = vld [vmem:[%s7766_s25 + $0x18c8] sm:$0xff] }
  0xda   : > { %v966_v14 = vld [vmem:[%s7766_s25 + $0x18e0] sm:$0xff]  ;;  %963 = vst [vmem:[%s7771_s26 + $0xc60] sm:$0xff] %v962_v12  ;;  %965 = vst [vmem:[%s7771_s26 + $0xc68] sm:$0xff] %v964_v13  ;;  %v968_v15 = vld [vmem:[%s7766_s25 + $0x18e8] sm:$0xff] }
  0xdb   : > { %967 = vst [vmem:[%s7771_s26 + $0xc70] sm:$0xff] %v966_v14  ;;  %v970_v16 = vld [vmem:[%s7766_s25 + $0x1900] sm:$0xff]  ;;  %v972_v17 = vld [vmem:[%s7766_s25 + $0x1908] sm:$0xff]  ;;  %969 = vst [vmem:[%s7771_s26 + $0xc78] sm:$0xff] %v968_v15 }
  0xdc   : > { %971 = vst [vmem:[%s7771_s26 + $0xc80] sm:$0xff] %v970_v16  ;;  %973 = vst [vmem:[%s7771_s26 + $0xc88] sm:$0xff] %v972_v17  ;;  %v974_v18 = vld [vmem:[%s7766_s25 + $0x1920] sm:$0xff]  ;;  %v976_v19 = vld [vmem:[%s7766_s25 + $0x1928] sm:$0xff] }
  0xdd   : > { %v978_v20 = vld [vmem:[%s7766_s25 + $0x1940] sm:$0xff]  ;;  %975 = vst [vmem:[%s7771_s26 + $0xc90] sm:$0xff] %v974_v18  ;;  %977 = vst [vmem:[%s7771_s26 + $0xc98] sm:$0xff] %v976_v19  ;;  %v980_v21 = vld [vmem:[%s7766_s25 + $0x1948] sm:$0xff] }
  0xde   : > { %979 = vst [vmem:[%s7771_s26 + $0xca0] sm:$0xff] %v978_v20  ;;  %v982_v22 = vld [vmem:[%s7766_s25 + $0x1960] sm:$0xff]  ;;  %v984_v23 = vld [vmem:[%s7766_s25 + $0x1968] sm:$0xff]  ;;  %981 = vst [vmem:[%s7771_s26 + $0xca8] sm:$0xff] %v980_v21 }
  0xdf   : > { %983 = vst [vmem:[%s7771_s26 + $0xcb0] sm:$0xff] %v982_v22  ;;  %985 = vst [vmem:[%s7771_s26 + $0xcb8] sm:$0xff] %v984_v23  ;;  %v986_v24 = vld [vmem:[%s7766_s25 + $0x1980] sm:$0xff]  ;;  %v988_v25 = vld [vmem:[%s7766_s25 + $0x1988] sm:$0xff] }
  0xe0   : > { %v990_v26 = vld [vmem:[%s7766_s25 + $0x19a0] sm:$0xff]  ;;  %987 = vst [vmem:[%s7771_s26 + $0xcc0] sm:$0xff] %v986_v24  ;;  %989 = vst [vmem:[%s7771_s26 + $0xcc8] sm:$0xff] %v988_v25  ;;  %v992_v27 = vld [vmem:[%s7766_s25 + $0x19a8] sm:$0xff] }
  0xe1   : > { %991 = vst [vmem:[%s7771_s26 + $0xcd0] sm:$0xff] %v990_v26  ;;  %v994_v28 = vld [vmem:[%s7766_s25 + $0x19c0] sm:$0xff]  ;;  %v996_v29 = vld [vmem:[%s7766_s25 + $0x19c8] sm:$0xff]  ;;  %993 = vst [vmem:[%s7771_s26 + $0xcd8] sm:$0xff] %v992_v27 }
  0xe2   : > { %995 = vst [vmem:[%s7771_s26 + $0xce0] sm:$0xff] %v994_v28  ;;  %997 = vst [vmem:[%s7771_s26 + $0xce8] sm:$0xff] %v996_v29  ;;  %v998_v30 = vld [vmem:[%s7766_s25 + $0x19e0] sm:$0xff]  ;;  %v1000_v31 = vld [vmem:[%s7766_s25 + $0x19e8] sm:$0xff] }
  0xe3   : > { %v1002_v32 = vld [vmem:[%s7766_s25 + $0x1a00] sm:$0xff]  ;;  %999 = vst [vmem:[%s7771_s26 + $0xcf0] sm:$0xff] %v998_v30  ;;  %1001 = vst [vmem:[%s7771_s26 + $0xcf8] sm:$0xff] %v1000_v31  ;;  %v1004_v33 = vld [vmem:[%s7766_s25 + $0x1a08] sm:$0xff] }
  0xe4   : > { %1003 = vst [vmem:[%s7771_s26 + $0xd00] sm:$0xff] %v1002_v32  ;;  %v1006_v34 = vld [vmem:[%s7766_s25 + $0x1a20] sm:$0xff]  ;;  %v1008_v35 = vld [vmem:[%s7766_s25 + $0x1a28] sm:$0xff]  ;;  %1005 = vst [vmem:[%s7771_s26 + $0xd08] sm:$0xff] %v1004_v33 }
  0xe5   : > { %1007 = vst [vmem:[%s7771_s26 + $0xd10] sm:$0xff] %v1006_v34  ;;  %1009 = vst [vmem:[%s7771_s26 + $0xd18] sm:$0xff] %v1008_v35  ;;  %v1010_v36 = vld [vmem:[%s7766_s25 + $0x1a40] sm:$0xff]  ;;  %v1012_v37 = vld [vmem:[%s7766_s25 + $0x1a48] sm:$0xff] }
  0xe6   : > { %v1014_v38 = vld [vmem:[%s7766_s25 + $0x1a60] sm:$0xff]  ;;  %1011 = vst [vmem:[%s7771_s26 + $0xd20] sm:$0xff] %v1010_v36  ;;  %1013 = vst [vmem:[%s7771_s26 + $0xd28] sm:$0xff] %v1012_v37  ;;  %v1016_v39 = vld [vmem:[%s7766_s25 + $0x1a68] sm:$0xff] }
  0xe7   : > { %1015 = vst [vmem:[%s7771_s26 + $0xd30] sm:$0xff] %v1014_v38  ;;  %v1018_v40 = vld [vmem:[%s7766_s25 + $0x1a80] sm:$0xff]  ;;  %v1020_v41 = vld [vmem:[%s7766_s25 + $0x1a88] sm:$0xff]  ;;  %1017 = vst [vmem:[%s7771_s26 + $0xd38] sm:$0xff] %v1016_v39 }
  0xe8   : > { %1019 = vst [vmem:[%s7771_s26 + $0xd40] sm:$0xff] %v1018_v40  ;;  %1021 = vst [vmem:[%s7771_s26 + $0xd48] sm:$0xff] %v1020_v41  ;;  %v1022_v42 = vld [vmem:[%s7766_s25 + $0x1aa0] sm:$0xff]  ;;  %v1024_v43 = vld [vmem:[%s7766_s25 + $0x1aa8] sm:$0xff] }
  0xe9   : > { %v1026_v44 = vld [vmem:[%s7766_s25 + $0x1ac0] sm:$0xff]  ;;  %1023 = vst [vmem:[%s7771_s26 + $0xd50] sm:$0xff] %v1022_v42  ;;  %1025 = vst [vmem:[%s7771_s26 + $0xd58] sm:$0xff] %v1024_v43  ;;  %v1028_v45 = vld [vmem:[%s7766_s25 + $0x1ac8] sm:$0xff] }
  0xea   : > { %1027 = vst [vmem:[%s7771_s26 + $0xd60] sm:$0xff] %v1026_v44  ;;  %v1030_v46 = vld [vmem:[%s7766_s25 + $0x1ae0] sm:$0xff]  ;;  %v1032_v47 = vld [vmem:[%s7766_s25 + $0x1ae8] sm:$0xff]  ;;  %1029 = vst [vmem:[%s7771_s26 + $0xd68] sm:$0xff] %v1028_v45 }
  0xeb   : > { %1031 = vst [vmem:[%s7771_s26 + $0xd70] sm:$0xff] %v1030_v46  ;;  %1033 = vst [vmem:[%s7771_s26 + $0xd78] sm:$0xff] %v1032_v47  ;;  %v1034_v48 = vld [vmem:[%s7766_s25 + $0x1b00] sm:$0xff]  ;;  %v1036_v49 = vld [vmem:[%s7766_s25 + $0x1b08] sm:$0xff] }
  0xec   : > { %v1038_v50 = vld [vmem:[%s7766_s25 + $0x1b20] sm:$0xff]  ;;  %1035 = vst [vmem:[%s7771_s26 + $0xd80] sm:$0xff] %v1034_v48  ;;  %1037 = vst [vmem:[%s7771_s26 + $0xd88] sm:$0xff] %v1036_v49  ;;  %v1040_v51 = vld [vmem:[%s7766_s25 + $0x1b28] sm:$0xff] }
  0xed   : > { %1039 = vst [vmem:[%s7771_s26 + $0xd90] sm:$0xff] %v1038_v50  ;;  %v1042_v52 = vld [vmem:[%s7766_s25 + $0x1b40] sm:$0xff]  ;;  %v1044_v53 = vld [vmem:[%s7766_s25 + $0x1b48] sm:$0xff]  ;;  %1041 = vst [vmem:[%s7771_s26 + $0xd98] sm:$0xff] %v1040_v51 }
  0xee   : > { %1043 = vst [vmem:[%s7771_s26 + $0xda0] sm:$0xff] %v1042_v52  ;;  %1045 = vst [vmem:[%s7771_s26 + $0xda8] sm:$0xff] %v1044_v53  ;;  %v1046_v54 = vld [vmem:[%s7766_s25 + $0x1b60] sm:$0xff]  ;;  %v1048_v55 = vld [vmem:[%s7766_s25 + $0x1b68] sm:$0xff] }
  0xef   : > { %v1050_v56 = vld [vmem:[%s7766_s25 + $0x1b80] sm:$0xff]  ;;  %1047 = vst [vmem:[%s7771_s26 + $0xdb0] sm:$0xff] %v1046_v54  ;;  %1049 = vst [vmem:[%s7771_s26 + $0xdb8] sm:$0xff] %v1048_v55  ;;  %v1052_v57 = vld [vmem:[%s7766_s25 + $0x1b88] sm:$0xff] }
  0xf0   : > { %1051 = vst [vmem:[%s7771_s26 + $0xdc0] sm:$0xff] %v1050_v56  ;;  %v1054_v58 = vld [vmem:[%s7766_s25 + $0x1ba0] sm:$0xff]  ;;  %v1056_v59 = vld [vmem:[%s7766_s25 + $0x1ba8] sm:$0xff]  ;;  %1053 = vst [vmem:[%s7771_s26 + $0xdc8] sm:$0xff] %v1052_v57 }
  0xf1   : > { %1055 = vst [vmem:[%s7771_s26 + $0xdd0] sm:$0xff] %v1054_v58  ;;  %1057 = vst [vmem:[%s7771_s26 + $0xdd8] sm:$0xff] %v1056_v59  ;;  %v1058_v60 = vld [vmem:[%s7766_s25 + $0x1bc0] sm:$0xff]  ;;  %v1060_v61 = vld [vmem:[%s7766_s25 + $0x1bc8] sm:$0xff] }
  0xf2   : > { %v1062_v62 = vld [vmem:[%s7766_s25 + $0x1be0] sm:$0xff]  ;;  %1059 = vst [vmem:[%s7771_s26 + $0xde0] sm:$0xff] %v1058_v60  ;;  %1061 = vst [vmem:[%s7771_s26 + $0xde8] sm:$0xff] %v1060_v61  ;;  %v1064_v63 = vld [vmem:[%s7766_s25 + $0x1be8] sm:$0xff] }
  0xf3   : > { %1063 = vst [vmem:[%s7771_s26 + $0xdf0] sm:$0xff] %v1062_v62  ;;  %v1066_v0 = vld [vmem:[%s7766_s25 + $0x1c00] sm:$0xff]  ;;  %v1068_v1 = vld [vmem:[%s7766_s25 + $0x1c08] sm:$0xff]  ;;  %1065 = vst [vmem:[%s7771_s26 + $0xdf8] sm:$0xff] %v1064_v63 }
  0xf4   : > { %1067 = vst [vmem:[%s7771_s26 + $0xe00] sm:$0xff] %v1066_v0  ;;  %1069 = vst [vmem:[%s7771_s26 + $0xe08] sm:$0xff] %v1068_v1  ;;  %v1070_v2 = vld [vmem:[%s7766_s25 + $0x1c20] sm:$0xff]  ;;  %v1072_v3 = vld [vmem:[%s7766_s25 + $0x1c28] sm:$0xff] }
  0xf5   : > { %v1074_v4 = vld [vmem:[%s7766_s25 + $0x1c40] sm:$0xff]  ;;  %1071 = vst [vmem:[%s7771_s26 + $0xe10] sm:$0xff] %v1070_v2  ;;  %1073 = vst [vmem:[%s7771_s26 + $0xe18] sm:$0xff] %v1072_v3  ;;  %v1076_v5 = vld [vmem:[%s7766_s25 + $0x1c48] sm:$0xff] }
  0xf6   : > { %1075 = vst [vmem:[%s7771_s26 + $0xe20] sm:$0xff] %v1074_v4  ;;  %v1078_v6 = vld [vmem:[%s7766_s25 + $0x1c60] sm:$0xff]  ;;  %v1080_v7 = vld [vmem:[%s7766_s25 + $0x1c68] sm:$0xff]  ;;  %1077 = vst [vmem:[%s7771_s26 + $0xe28] sm:$0xff] %v1076_v5 }
  0xf7   : > { %1079 = vst [vmem:[%s7771_s26 + $0xe30] sm:$0xff] %v1078_v6  ;;  %1081 = vst [vmem:[%s7771_s26 + $0xe38] sm:$0xff] %v1080_v7  ;;  %v1082_v8 = vld [vmem:[%s7766_s25 + $0x1c80] sm:$0xff]  ;;  %v1084_v9 = vld [vmem:[%s7766_s25 + $0x1c88] sm:$0xff] }
  0xf8   : > { %v1086_v10 = vld [vmem:[%s7766_s25 + $0x1ca0] sm:$0xff]  ;;  %1083 = vst [vmem:[%s7771_s26 + $0xe40] sm:$0xff] %v1082_v8  ;;  %1085 = vst [vmem:[%s7771_s26 + $0xe48] sm:$0xff] %v1084_v9  ;;  %v1088_v11 = vld [vmem:[%s7766_s25 + $0x1ca8] sm:$0xff] }
  0xf9   : > { %1087 = vst [vmem:[%s7771_s26 + $0xe50] sm:$0xff] %v1086_v10  ;;  %v1090_v12 = vld [vmem:[%s7766_s25 + $0x1cc0] sm:$0xff]  ;;  %v1092_v13 = vld [vmem:[%s7766_s25 + $0x1cc8] sm:$0xff]  ;;  %1089 = vst [vmem:[%s7771_s26 + $0xe58] sm:$0xff] %v1088_v11 }
  0xfa   : > { %1091 = vst [vmem:[%s7771_s26 + $0xe60] sm:$0xff] %v1090_v12  ;;  %1093 = vst [vmem:[%s7771_s26 + $0xe68] sm:$0xff] %v1092_v13  ;;  %v1094_v14 = vld [vmem:[%s7766_s25 + $0x1ce0] sm:$0xff]  ;;  %v1096_v15 = vld [vmem:[%s7766_s25 + $0x1ce8] sm:$0xff] }
  0xfb   : > { %v1098_v16 = vld [vmem:[%s7766_s25 + $0x1d00] sm:$0xff]  ;;  %1095 = vst [vmem:[%s7771_s26 + $0xe70] sm:$0xff] %v1094_v14  ;;  %1097 = vst [vmem:[%s7771_s26 + $0xe78] sm:$0xff] %v1096_v15  ;;  %v1100_v17 = vld [vmem:[%s7766_s25 + $0x1d08] sm:$0xff] }
  0xfc   : > { %1099 = vst [vmem:[%s7771_s26 + $0xe80] sm:$0xff] %v1098_v16  ;;  %v1102_v18 = vld [vmem:[%s7766_s25 + $0x1d20] sm:$0xff]  ;;  %v1104_v19 = vld [vmem:[%s7766_s25 + $0x1d28] sm:$0xff]  ;;  %1101 = vst [vmem:[%s7771_s26 + $0xe88] sm:$0xff] %v1100_v17 }
  0xfd   : > { %1103 = vst [vmem:[%s7771_s26 + $0xe90] sm:$0xff] %v1102_v18  ;;  %1105 = vst [vmem:[%s7771_s26 + $0xe98] sm:$0xff] %v1104_v19  ;;  %v1106_v20 = vld [vmem:[%s7766_s25 + $0x1d40] sm:$0xff]  ;;  %v1108_v21 = vld [vmem:[%s7766_s25 + $0x1d48] sm:$0xff] }
  0xfe   : > { %v1110_v22 = vld [vmem:[%s7766_s25 + $0x1d60] sm:$0xff]  ;;  %1107 = vst [vmem:[%s7771_s26 + $0xea0] sm:$0xff] %v1106_v20  ;;  %1109 = vst [vmem:[%s7771_s26 + $0xea8] sm:$0xff] %v1108_v21  ;;  %v1112_v23 = vld [vmem:[%s7766_s25 + $0x1d68] sm:$0xff] }
  0xff   : > { %1111 = vst [vmem:[%s7771_s26 + $0xeb0] sm:$0xff] %v1110_v22  ;;  %v1114_v24 = vld [vmem:[%s7766_s25 + $0x1d80] sm:$0xff]  ;;  %v1116_v25 = vld [vmem:[%s7766_s25 + $0x1d88] sm:$0xff]  ;;  %1113 = vst [vmem:[%s7771_s26 + $0xeb8] sm:$0xff] %v1112_v23 }
 0x100   : > { %1115 = vst [vmem:[%s7771_s26 + $0xec0] sm:$0xff] %v1114_v24  ;;  %1117 = vst [vmem:[%s7771_s26 + $0xec8] sm:$0xff] %v1116_v25  ;;  %v1118_v26 = vld [vmem:[%s7766_s25 + $0x1da0] sm:$0xff]  ;;  %v1120_v27 = vld [vmem:[%s7766_s25 + $0x1da8] sm:$0xff] }
 0x101   : > { %v1122_v28 = vld [vmem:[%s7766_s25 + $0x1dc0] sm:$0xff]  ;;  %1119 = vst [vmem:[%s7771_s26 + $0xed0] sm:$0xff] %v1118_v26  ;;  %1121 = vst [vmem:[%s7771_s26 + $0xed8] sm:$0xff] %v1120_v27  ;;  %v1124_v29 = vld [vmem:[%s7766_s25 + $0x1dc8] sm:$0xff] }
 0x102   : > { %1123 = vst [vmem:[%s7771_s26 + $0xee0] sm:$0xff] %v1122_v28  ;;  %v1126_v30 = vld [vmem:[%s7766_s25 + $0x1de0] sm:$0xff]  ;;  %v1128_v31 = vld [vmem:[%s7766_s25 + $0x1de8] sm:$0xff]  ;;  %1125 = vst [vmem:[%s7771_s26 + $0xee8] sm:$0xff] %v1124_v29 }
 0x103   : > { %1127 = vst [vmem:[%s7771_s26 + $0xef0] sm:$0xff] %v1126_v30  ;;  %1129 = vst [vmem:[%s7771_s26 + $0xef8] sm:$0xff] %v1128_v31  ;;  %v1130_v32 = vld [vmem:[%s7766_s25 + $0x1e00] sm:$0xff]  ;;  %v1132_v33 = vld [vmem:[%s7766_s25 + $0x1e08] sm:$0xff] }
 0x104   : > { %v1134_v34 = vld [vmem:[%s7766_s25 + $0x1e20] sm:$0xff]  ;;  %1131 = vst [vmem:[%s7771_s26 + $0xf00] sm:$0xff] %v1130_v32  ;;  %1133 = vst [vmem:[%s7771_s26 + $0xf08] sm:$0xff] %v1132_v33  ;;  %v1136_v35 = vld [vmem:[%s7766_s25 + $0x1e28] sm:$0xff] }
 0x105   : > { %1135 = vst [vmem:[%s7771_s26 + $0xf10] sm:$0xff] %v1134_v34  ;;  %v1138_v36 = vld [vmem:[%s7766_s25 + $0x1e40] sm:$0xff]  ;;  %v1140_v37 = vld [vmem:[%s7766_s25 + $0x1e48] sm:$0xff]  ;;  %1137 = vst [vmem:[%s7771_s26 + $0xf18] sm:$0xff] %v1136_v35 }
 0x106   : > { %1139 = vst [vmem:[%s7771_s26 + $0xf20] sm:$0xff] %v1138_v36  ;;  %1141 = vst [vmem:[%s7771_s26 + $0xf28] sm:$0xff] %v1140_v37  ;;  %v1142_v38 = vld [vmem:[%s7766_s25 + $0x1e60] sm:$0xff]  ;;  %v1144_v39 = vld [vmem:[%s7766_s25 + $0x1e68] sm:$0xff] }
 0x107   : > { %v1146_v40 = vld [vmem:[%s7766_s25 + $0x1e80] sm:$0xff]  ;;  %1143 = vst [vmem:[%s7771_s26 + $0xf30] sm:$0xff] %v1142_v38  ;;  %1145 = vst [vmem:[%s7771_s26 + $0xf38] sm:$0xff] %v1144_v39  ;;  %v1148_v41 = vld [vmem:[%s7766_s25 + $0x1e88] sm:$0xff] }
 0x108   : > { %1147 = vst [vmem:[%s7771_s26 + $0xf40] sm:$0xff] %v1146_v40  ;;  %v1150_v42 = vld [vmem:[%s7766_s25 + $0x1ea0] sm:$0xff]  ;;  %v1152_v43 = vld [vmem:[%s7766_s25 + $0x1ea8] sm:$0xff]  ;;  %1149 = vst [vmem:[%s7771_s26 + $0xf48] sm:$0xff] %v1148_v41 }
 0x109   : > { %1151 = vst [vmem:[%s7771_s26 + $0xf50] sm:$0xff] %v1150_v42  ;;  %1153 = vst [vmem:[%s7771_s26 + $0xf58] sm:$0xff] %v1152_v43  ;;  %v1154_v44 = vld [vmem:[%s7766_s25 + $0x1ec0] sm:$0xff]  ;;  %v1156_v45 = vld [vmem:[%s7766_s25 + $0x1ec8] sm:$0xff] }
 0x10a   : > { %v1158_v46 = vld [vmem:[%s7766_s25 + $0x1ee0] sm:$0xff]  ;;  %1155 = vst [vmem:[%s7771_s26 + $0xf60] sm:$0xff] %v1154_v44  ;;  %1157 = vst [vmem:[%s7771_s26 + $0xf68] sm:$0xff] %v1156_v45  ;;  %v1160_v47 = vld [vmem:[%s7766_s25 + $0x1ee8] sm:$0xff] }
 0x10b   : > { %1159 = vst [vmem:[%s7771_s26 + $0xf70] sm:$0xff] %v1158_v46  ;;  %v1162_v48 = vld [vmem:[%s7766_s25 + $0x1f00] sm:$0xff]  ;;  %v1164_v49 = vld [vmem:[%s7766_s25 + $0x1f08] sm:$0xff]  ;;  %1161 = vst [vmem:[%s7771_s26 + $0xf78] sm:$0xff] %v1160_v47 }
 0x10c   : > { %1163 = vst [vmem:[%s7771_s26 + $0xf80] sm:$0xff] %v1162_v48  ;;  %1165 = vst [vmem:[%s7771_s26 + $0xf88] sm:$0xff] %v1164_v49  ;;  %v1166_v50 = vld [vmem:[%s7766_s25 + $0x1f20] sm:$0xff]  ;;  %v1168_v51 = vld [vmem:[%s7766_s25 + $0x1f28] sm:$0xff] }
 0x10d   : > { %v1170_v52 = vld [vmem:[%s7766_s25 + $0x1f40] sm:$0xff]  ;;  %1167 = vst [vmem:[%s7771_s26 + $0xf90] sm:$0xff] %v1166_v50  ;;  %1169 = vst [vmem:[%s7771_s26 + $0xf98] sm:$0xff] %v1168_v51  ;;  %v1172_v53 = vld [vmem:[%s7766_s25 + $0x1f48] sm:$0xff] }
 0x10e   : > { %1171 = vst [vmem:[%s7771_s26 + $0xfa0] sm:$0xff] %v1170_v52  ;;  %v1174_v54 = vld [vmem:[%s7766_s25 + $0x1f60] sm:$0xff]  ;;  %v1176_v55 = vld [vmem:[%s7766_s25 + $0x1f68] sm:$0xff]  ;;  %1173 = vst [vmem:[%s7771_s26 + $0xfa8] sm:$0xff] %v1172_v53 }
 0x10f   : > { %1175 = vst [vmem:[%s7771_s26 + $0xfb0] sm:$0xff] %v1174_v54  ;;  %1177 = vst [vmem:[%s7771_s26 + $0xfb8] sm:$0xff] %v1176_v55  ;;  %v1178_v56 = vld [vmem:[%s7766_s25 + $0x1f80] sm:$0xff]  ;;  %v1180_v57 = vld [vmem:[%s7766_s25 + $0x1f88] sm:$0xff] }
 0x110   : > { %v1182_v58 = vld [vmem:[%s7766_s25 + $0x1fa0] sm:$0xff]  ;;  %1179 = vst [vmem:[%s7771_s26 + $0xfc0] sm:$0xff] %v1178_v56  ;;  %1181 = vst [vmem:[%s7771_s26 + $0xfc8] sm:$0xff] %v1180_v57  ;;  %v1184_v59 = vld [vmem:[%s7766_s25 + $0x1fa8] sm:$0xff] }
 0x111   : > { %1183 = vst [vmem:[%s7771_s26 + $0xfd0] sm:$0xff] %v1182_v58  ;;  %v1186_v60 = vld [vmem:[%s7766_s25 + $0x1fc0] sm:$0xff]  ;;  %v1188_v61 = vld [vmem:[%s7766_s25 + $0x1fc8] sm:$0xff]  ;;  %1185 = vst [vmem:[%s7771_s26 + $0xfd8] sm:$0xff] %v1184_v59 }
 0x112   : > { %1187 = vst [vmem:[%s7771_s26 + $0xfe0] sm:$0xff] %v1186_v60  ;;  %1189 = vst [vmem:[%s7771_s26 + $0xfe8] sm:$0xff] %v1188_v61  ;;  %v1190_v62 = vld [vmem:[%s7766_s25 + $0x1fe0] sm:$0xff]  ;;  %v1192_v63 = vld [vmem:[%s7766_s25 + $0x1fe8] sm:$0xff] }
 0x113   : > { %1191 = vst [vmem:[%s7771_s26 + $0xff0] sm:$0xff] %v1190_v62  ;;  %1193 = vst [vmem:[%s7771_s26 + $0xff8] sm:$0xff] %v1192_v63 }
 0x114 PF: > { %p6269_p8 = scmp.ge.s32.totalorder %s7701_s13, 1  ;;  %p1198_p9 = scmp.lt.s32.totalorder %s7701_s13, 3 }
 0x116   : > { %p1199_p10 = pnand %p6269_p8, %p1198_p9 }
 0x118   : > { %1202 = sbr.rel (%p1199_p10) target bundleno = 1038 (0x40e), region = 47 }
 0x11d   : > { %s1205_s27 = sand.u32 1, %s7685_s9   ;;  %v1319_v0 = vld [vmem:[%s10376_s0] sm:$0xff]  ;;  %v1320_v2 = vld [vmem:[%s10376_s0 + $0x8] sm:$0xff] }
 0x11e   : > { %v1327_v1 = vld [vmem:[%s10376_s0 + $0x40] sm:$0xff]  ;;  %s6270_s6 = sshll.u32 %s1205_s27, 12  ;;  %v1328_v5 = vld [vmem:[%s10376_s0 + $0x48] sm:$0xff]  ;;  %s9912_s3 = sshll.u32 %s1205_s27, 8 }
 0x11f   : > { %v8808_v3 = vcombine.low %v1319_v0, %v1327_v1  ;;  %v8810_v4 = vcombine.high %v1319_v0, %v1327_v1  ;;  %v8815_v6 = vcombine.low %v1320_v2, %v1328_v5  ;;  %v8817_v7 = vcombine.high %v1320_v2, %v1328_v5  ;;  %s8819_s15 = scalar_lea.vmem [#allocation3], %s6270_s6  ;;  %s9939_s9 = scalar_lea.vmem [#allocation4], %s9912_s3 }
 0x120   : > { %v6895_v8 = vld [vmem:[%s8819_s15 + $0xe4] ss:$16 sps:$4 sm:$0xff]   ;;  %v6899_v10 = vld [vmem:[%s8819_s15 + $0xe0] ss:$16 sps:$4 sm:$0xff]   ;;  %s6854_s27 = sshll.u32 (%p7753_p6), %s7693_s11, 5 }
 0x121   : > { %4807 = vmatprep.mubr.bf16.mxu0 %v8810_v4  ;;  %v6897_v9 = vld [vmem:[%s8819_s15 + $0x2e4] ss:$16 sps:$4 sm:$0xff]   ;;  %4880 = vmatprep.mubr.bf16.mxu1 %v8817_v7  ;;  %v6900_v11 = vld [vmem:[%s8819_s15 + $0x2e0] ss:$16 sps:$4 sm:$0xff]   ;;  %s10298_s5 = scalar_lea.vmem (%p7753_p6), %s10378_s2, %s6854_s27 }
 0x122   : > { %4775 = vmatprep.subr.bf16.mxu0 %v6895_v8  ;;  %4848 = vmatprep.subr.bf16.mxu1 %v6897_v9  ;;  %v6901_v12 = vld [vmem:[%s8819_s15 + $0xc4] ss:$16 sps:$4 sm:$0xff]   ;;  %v6905_v14 = vld [vmem:[%s8819_s15 + $0xc0] ss:$16 sps:$4 sm:$0xff]  }
 0x123   : > { %4776 = vmatpush1.bf16.msra.mxu0 %v6899_v10  ;;  %4849 = vmatpush1.bf16.msra.mxu1 %v6900_v11  ;;  %v6903_v13 = vld [vmem:[%s8819_s15 + $0x2c4] ss:$16 sps:$4 sm:$0xff]   ;;  %v6906_v15 = vld [vmem:[%s8819_s15 + $0x2c0] ss:$16 sps:$4 sm:$0xff]  }
 0x124   : > { %4777 = vmatprep.subr.bf16.mxu0 %v6901_v12  ;;  %4850 = vmatprep.subr.bf16.mxu1 %v6903_v13  ;;  %v6907_v16 = vld [vmem:[%s8819_s15 + $0xa4] ss:$16 sps:$4 sm:$0xff]   ;;  %v6911_v18 = vld [vmem:[%s8819_s15 + $0xa0] ss:$16 sps:$4 sm:$0xff]  }
 0x125   : > { %v6909_v17 = vld [vmem:[%s8819_s15 + $0x2a4] ss:$16 sps:$4 sm:$0xff]   ;;  %v6912_v19 = vld [vmem:[%s8819_s15 + $0x2a0] ss:$16 sps:$4 sm:$0xff]  }
 0x126   : > { %v6913_v20 = vld [vmem:[%s8819_s15 + $0x84] ss:$16 sps:$4 sm:$0xff]   ;;  %v6917_v22 = vld [vmem:[%s8819_s15 + $0x80] ss:$16 sps:$4 sm:$0xff]  }
 0x127   : > { %4778 = vmatpush1.bf16.msra.mxu0 %v6905_v14  ;;  %4851 = vmatpush1.bf16.msra.mxu1 %v6906_v15  ;;  %v6915_v21 = vld [vmem:[%s8819_s15 + $0x284] ss:$16 sps:$4 sm:$0xff]   ;;  %v6918_v23 = vld [vmem:[%s8819_s15 + $0x280] ss:$16 sps:$4 sm:$0xff]  }
 0x128   : > { %4779 = vmatprep.subr.bf16.mxu0 %v6907_v16  ;;  %4852 = vmatprep.subr.bf16.mxu1 %v6909_v17  ;;  %v6919_v24 = vld [vmem:[%s8819_s15 + $0x64] ss:$16 sps:$4 sm:$0xff]   ;;  %v6923_v26 = vld [vmem:[%s8819_s15 + $0x60] ss:$16 sps:$4 sm:$0xff]   ;;  %v1336_v16 = vld [vmem:[%s10376_s0 + $0x88] sm:$0xff] }
 0x129   : > { %v6921_v25 = vld [vmem:[%s8819_s15 + $0x264] ss:$16 sps:$4 sm:$0xff]   ;;  %v6924_v27 = vld [vmem:[%s8819_s15 + $0x260] ss:$16 sps:$4 sm:$0xff]   ;;  %v1344_v17 = vld [vmem:[%s10376_s0 + $0xc8] sm:$0xff] }
 0x12a   : > { %v6925_v28 = vld [vmem:[%s8819_s15 + $0x44] ss:$16 sps:$4 sm:$0xff]   ;;  %v6929_v30 = vld [vmem:[%s8819_s15 + $0x40] ss:$16 sps:$4 sm:$0xff]  }
 0x12b   : > { %4780 = vmatpush1.bf16.msra.mxu0 %v6911_v18  ;;  %4853 = vmatpush1.bf16.msra.mxu1 %v6912_v19  ;;  %v6927_v29 = vld [vmem:[%s8819_s15 + $0x244] ss:$16 sps:$4 sm:$0xff]   ;;  %v6930_v31 = vld [vmem:[%s8819_s15 + $0x240] ss:$16 sps:$4 sm:$0xff]  }
 0x12c   : > { %4781 = vmatprep.subr.bf16.mxu0 %v6913_v20  ;;  %4854 = vmatprep.subr.bf16.mxu1 %v6915_v21  ;;  %v6931_v32 = vld [vmem:[%s8819_s15 + $0x24] ss:$16 sps:$4 sm:$0xff]   ;;  %v6935_v34 = vld [vmem:[%s8819_s15 + $0x20] ss:$16 sps:$4 sm:$0xff]  }
 0x12d   : > { %v6933_v33 = vld [vmem:[%s8819_s15 + $0x224] ss:$16 sps:$4 sm:$0xff]   ;;  %v6936_v35 = vld [vmem:[%s8819_s15 + $0x220] ss:$16 sps:$4 sm:$0xff]  }
 0x12e   : > { %v6937_v36 = vld [vmem:[%s8819_s15 + $0x4] ss:$16 sps:$4 sm:$0xff]   ;;  %v6941_v38 = vld [vmem:[%s8819_s15] ss:$16 sps:$4 sm:$0xff]  }
 0x12f   : > { %4782 = vmatpush1.bf16.msra.mxu0 %v6917_v22  ;;  %4855 = vmatpush1.bf16.msra.mxu1 %v6918_v23  ;;  %v6939_v37 = vld [vmem:[%s8819_s15 + $0x204] ss:$16 sps:$4 sm:$0xff]   ;;  %v6942_v39 = vld [vmem:[%s8819_s15 + $0x200] ss:$16 sps:$4 sm:$0xff]   ;;  %v8907_v23 = vcombine.high %v1336_v16, %v1344_v17 }
 0x130   : > { %4783 = vmatprep.subr.bf16.mxu0 %v6919_v24  ;;  %4856 = vmatprep.subr.bf16.mxu1 %v6921_v25  ;;  %v6943_v40 = vld [vmem:[%s8819_s15 + $0x1e4] ss:$16 sps:$4 sm:$0xff]   ;;  %v6947_v42 = vld [vmem:[%s8819_s15 + $0x1e0] ss:$16 sps:$4 sm:$0xff]  }
 0x131   : > { %v6945_v41 = vld [vmem:[%s8819_s15 + $0x3e4] ss:$16 sps:$4 sm:$0xff]   ;;  %v6948_v43 = vld [vmem:[%s8819_s15 + $0x3e0] ss:$16 sps:$4 sm:$0xff]  }
 0x132   : > { %v6949_v44 = vld [vmem:[%s8819_s15 + $0x1c4] ss:$16 sps:$4 sm:$0xff]   ;;  %v6953_v46 = vld [vmem:[%s8819_s15 + $0x1c0] ss:$16 sps:$4 sm:$0xff]  }
 0x133   : > { %4784 = vmatpush1.bf16.msra.mxu0 %v6923_v26  ;;  %4857 = vmatpush1.bf16.msra.mxu1 %v6924_v27  ;;  %v6951_v45 = vld [vmem:[%s8819_s15 + $0x3c4] ss:$16 sps:$4 sm:$0xff]   ;;  %v6954_v47 = vld [vmem:[%s8819_s15 + $0x3c0] ss:$16 sps:$4 sm:$0xff]  }
 0x134   : > { %4785 = vmatprep.subr.bf16.mxu0 %v6925_v28  ;;  %4858 = vmatprep.subr.bf16.mxu1 %v6927_v29  ;;  %v6955_v48 = vld [vmem:[%s8819_s15 + $0x1a4] ss:$16 sps:$4 sm:$0xff]   ;;  %v6959_v50 = vld [vmem:[%s8819_s15 + $0x1a0] ss:$16 sps:$4 sm:$0xff]  }
 0x135   : > { %v6957_v49 = vld [vmem:[%s8819_s15 + $0x3a4] ss:$16 sps:$4 sm:$0xff]   ;;  %v6960_v51 = vld [vmem:[%s8819_s15 + $0x3a0] ss:$16 sps:$4 sm:$0xff]  }
 0x136   : > { %v6961_v52 = vld [vmem:[%s8819_s15 + $0x184] ss:$16 sps:$4 sm:$0xff]   ;;  %v6965_v54 = vld [vmem:[%s8819_s15 + $0x180] ss:$16 sps:$4 sm:$0xff]  }
 0x137   : > { %4786 = vmatpush1.bf16.msra.mxu0 %v6929_v30  ;;  %4859 = vmatpush1.bf16.msra.mxu1 %v6930_v31  ;;  %v6963_v53 = vld [vmem:[%s8819_s15 + $0x384] ss:$16 sps:$4 sm:$0xff]   ;;  %v6966_v55 = vld [vmem:[%s8819_s15 + $0x380] ss:$16 sps:$4 sm:$0xff]  }
 0x138   : > { %4787 = vmatprep.subr.bf16.mxu0 %v6931_v32  ;;  %4860 = vmatprep.subr.bf16.mxu1 %v6933_v33  ;;  %v6967_v56 = vld [vmem:[%s8819_s15 + $0x164] ss:$16 sps:$4 sm:$0xff]   ;;  %v6971_v58 = vld [vmem:[%s8819_s15 + $0x160] ss:$16 sps:$4 sm:$0xff]   ;;  %v8925_v33 = vcombine.low %v1336_v16, %v1344_v17 }
 0x139   : > { %v6969_v57 = vld [vmem:[%s8819_s15 + $0x364] ss:$16 sps:$4 sm:$0xff]   ;;  %v6972_v59 = vld [vmem:[%s8819_s15 + $0x360] ss:$16 sps:$4 sm:$0xff]  }
 0x13a   : > { %v6973_v60 = vld [vmem:[%s8819_s15 + $0x144] ss:$16 sps:$4 sm:$0xff]   ;;  %v6977_v62 = vld [vmem:[%s8819_s15 + $0x140] ss:$16 sps:$4 sm:$0xff]  }
 0x13b   : > { %4788 = vmatpush1.bf16.msra.mxu0 %v6935_v34  ;;  %4861 = vmatpush1.bf16.msra.mxu1 %v6936_v35  ;;  %v6975_v61 = vld [vmem:[%s8819_s15 + $0x344] ss:$16 sps:$4 sm:$0xff]   ;;  %v6978_v63 = vld [vmem:[%s8819_s15 + $0x340] ss:$16 sps:$4 sm:$0xff]   ;;  %v1352_v35 = vld [vmem:[%s10376_s0 + $0x108] sm:$0xff] }
 0x13c   : > { %4789 = vmatprep.subr.bf16.mxu0 %v6937_v36  ;;  %4862 = vmatprep.subr.bf16.mxu1 %v6939_v37  ;;  %v6979_v0 = vld [vmem:[%s8819_s15 + $0x124] ss:$16 sps:$4 sm:$0xff]   ;;  %v6983_v2 = vld [vmem:[%s8819_s15 + $0x120] ss:$16 sps:$4 sm:$0xff]   ;;  %v1360_v36 = vld [vmem:[%s10376_s0 + $0x148] sm:$0xff] }
 0x13d   : > { %v6981_v1 = vld [vmem:[%s8819_s15 + $0x324] ss:$16 sps:$4 sm:$0xff]   ;;  %v6984_v5 = vld [vmem:[%s8819_s15 + $0x320] ss:$16 sps:$4 sm:$0xff]  }
 0x13e   : > { %v6985_v8 = vld [vmem:[%s8819_s15 + $0x104] ss:$16 sps:$4 sm:$0xff]   ;;  %v6989_v10 = vld [vmem:[%s8819_s15 + $0x100] ss:$16 sps:$4 sm:$0xff]  }
 0x13f   : > { %4790 = vmatpush1.bf16.msra.mxu0 %v6941_v38  ;;  %4863 = vmatpush1.bf16.msra.mxu1 %v6942_v39  ;;  %v6987_v9 = vld [vmem:[%s8819_s15 + $0x304] ss:$16 sps:$4 sm:$0xff]   ;;  %v6990_v11 = vld [vmem:[%s8819_s15 + $0x300] ss:$16 sps:$4 sm:$0xff]   ;;  %v8939_v39 = vcombine.high %v1352_v35, %v1360_v36 }
 0x140   : > { %4791 = vmatprep.subr.bf16.mxu0 %v6943_v40  ;;  %4864 = vmatprep.subr.bf16.mxu1 %v6945_v41  ;;  %v6993_v12 = vld [vmem:[%s8819_s15 + $0x4e4] ss:$16 sps:$4 sm:$0xff]   ;;  %v6991_v18 = vld [vmem:[%s8819_s15 + $0x4e0] ss:$16 sps:$4 sm:$0xff]  }
 0x141   : > { %v6996_v13 = vld [vmem:[%s8819_s15 + $0x6e4] ss:$16 sps:$4 sm:$0xff]   ;;  %v6994_v19 = vld [vmem:[%s8819_s15 + $0x6e0] ss:$16 sps:$4 sm:$0xff]  }
 0x142   : > { %v1335_v14 = vld [vmem:[%s10376_s0 + $0x80] sm:$0xff] }
 0x143   : > { %4792 = vmatpush2.bf16.msra.mxu0 %v6947_v42  ;;  %4865 = vmatpush2.bf16.msra.mxu1 %v6948_v43  ;;  %v1343_v15 = vld [vmem:[%s10376_s0 + $0xc0] sm:$0xff] }
 0x144   : > { %4793 = vmatprep.subr.bf16.mxu0 %v6949_v44  ;;  %4866 = vmatprep.subr.bf16.mxu1 %v6951_v45  ;;  %v6999_v20 = vld [vmem:[%s8819_s15 + $0x4c4] ss:$16 sps:$4 sm:$0xff]   ;;  %v8905_v22 = vcombine.high %v1335_v14, %v1343_v15  ;;  %v6997_v24 = vld [vmem:[%s8819_s15 + $0x4c0] ss:$16 sps:$4 sm:$0xff]   ;;  %v8923_v32 = vcombine.low %v1335_v14, %v1343_v15 }
 0x145   : > { %v7002_v21 = vld [vmem:[%s8819_s15 + $0x6c4] ss:$16 sps:$4 sm:$0xff]   ;;  %v7000_v25 = vld [vmem:[%s8819_s15 + $0x6c0] ss:$16 sps:$4 sm:$0xff]  }
 0x146   : > { %v7005_v26 = vld [vmem:[%s8819_s15 + $0x4a4] ss:$16 sps:$4 sm:$0xff]   ;;  %v7003_v28 = vld [vmem:[%s8819_s15 + $0x4a0] ss:$16 sps:$4 sm:$0xff]  }
 0x147   : > { %4794 = vmatpush2.bf16.msra.mxu0 %v6953_v46  ;;  %4867 = vmatpush2.bf16.msra.mxu1 %v6954_v47  ;;  %v7008_v27 = vld [vmem:[%s8819_s15 + $0x6a4] ss:$16 sps:$4 sm:$0xff]   ;;  %v7006_v30 = vld [vmem:[%s8819_s15 + $0x6a0] ss:$16 sps:$4 sm:$0xff]  }
 0x148   : > { %4795 = vmatprep.subr.bf16.mxu0 %v6955_v48  ;;  %4868 = vmatprep.subr.bf16.mxu1 %v6957_v49  ;;  %v1351_v29 = vld [vmem:[%s10376_s0 + $0x100] sm:$0xff]  ;;  %v8958_v48 = vcombine.low %v1352_v35, %v1360_v36  ;;  %v1368_v49 = vld [vmem:[%s10376_s0 + $0x188] sm:$0xff] }
 0x149   : > { %v7011_v31 = vld [vmem:[%s8819_s15 + $0x484] ss:$16 sps:$4 sm:$0xff]   ;;  %v7009_v40 = vld [vmem:[%s8819_s15 + $0x480] ss:$16 sps:$4 sm:$0xff]  }
 0x14a   : > { %v1359_v34 = vld [vmem:[%s10376_s0 + $0x140] sm:$0xff] }
 0x14b   : > { %4796 = vmatpush2.bf16.msra.mxu0 %v6959_v50  ;;  %4869 = vmatpush2.bf16.msra.mxu1 %v6960_v51  ;;  %v7014_v37 = vld [vmem:[%s8819_s15 + $0x684] ss:$16 sps:$4 sm:$0xff]   ;;  %v8937_v38 = vcombine.high %v1351_v29, %v1359_v34  ;;  %v7012_v41 = vld [vmem:[%s8819_s15 + $0x680] ss:$16 sps:$4 sm:$0xff]   ;;  %v8956_v47 = vcombine.low %v1351_v29, %v1359_v34  ;;  %v1376_v50 = vld [vmem:[%s10376_s0 + $0x1c8] sm:$0xff] }
 0x14c   : > { %4797 = vmatprep.subr.bf16.mxu0 %v6961_v52  ;;  %4870 = vmatprep.subr.bf16.mxu1 %v6963_v53  ;;  %v7017_v42 = vld [vmem:[%s8819_s15 + $0x464] ss:$16 sps:$4 sm:$0xff]   ;;  %v7015_v44 = vld [vmem:[%s8819_s15 + $0x460] ss:$16 sps:$4 sm:$0xff]  }
 0x14d   : > { %v7020_v43 = vld [vmem:[%s8819_s15 + $0x664] ss:$16 sps:$4 sm:$0xff]   ;;  %v7018_v51 = vld [vmem:[%s8819_s15 + $0x660] ss:$16 sps:$4 sm:$0xff]  }
 0x14e   : > { %v1367_v45 = vld [vmem:[%s10376_s0 + $0x180] sm:$0xff] }
 0x14f   : > { %4798 = vmatpush2.bf16.msra.mxu0 %v6965_v54  ;;  %4871 = vmatpush2.bf16.msra.mxu1 %v6966_v55  ;;  %v1375_v46 = vld [vmem:[%s10376_s0 + $0x1c0] sm:$0xff]  ;;  %v8971_v55 = vcombine.high %v1368_v49, %v1376_v50 }
 0x150   : > { %4799 = vmatprep.subr.bf16.mxu0 %v6967_v56  ;;  %4872 = vmatprep.subr.bf16.mxu1 %v6969_v57  ;;  %v7023_v52 = vld [vmem:[%s8819_s15 + $0x444] ss:$16 sps:$4 sm:$0xff]   ;;  %v8969_v54 = vcombine.high %v1367_v45, %v1375_v46  ;;  %v7021_v56 = vld [vmem:[%s8819_s15 + $0x440] ss:$16 sps:$4 sm:$0xff]  }
 0x151   : > { %v7026_v53 = vld [vmem:[%s8819_s15 + $0x644] ss:$16 sps:$4 sm:$0xff]   ;;  %v7024_v57 = vld [vmem:[%s8819_s15 + $0x640] ss:$16 sps:$4 sm:$0xff]  }
 0x152   : > { %v7041_v14 = vld [vmem:[%s8819_s15 + $0x5e4] ss:$16 sps:$4 sm:$0xff]   ;;  %v7039_v16 = vld [vmem:[%s8819_s15 + $0x5e0] ss:$16 sps:$4 sm:$0xff]  }
 0x153   : > { %4800 = vmatpush2.bf16.msra.mxu0 %v6971_v58  ;;  %4873 = vmatpush2.bf16.msra.mxu1 %v6972_v59  ;;  %v7029_v58 = vld [vmem:[%s8819_s15 + $0x424] ss:$16 sps:$4 sm:$0xff]   ;;  %v7042_v17 = vld [vmem:[%s8819_s15 + $0x7e0] ss:$16 sps:$4 sm:$0xff]  }
 0x154   : > { %4801 = vmatprep.subr.bf16.mxu0 %v6973_v60  ;;  %4874 = vmatprep.subr.bf16.mxu1 %v6975_v61  ;;  %v7032_v59 = vld [vmem:[%s8819_s15 + $0x624] ss:$16 sps:$4 sm:$0xff]   ;;  %v7027_v60 = vld [vmem:[%s8819_s15 + $0x420] ss:$16 sps:$4 sm:$0xff]  }
 0x155   : > { %v7030_v61 = vld [vmem:[%s8819_s15 + $0x620] ss:$16 sps:$4 sm:$0xff]   ;;  %v7044_v15 = vld [vmem:[%s8819_s15 + $0x7e4] ss:$16 sps:$4 sm:$0xff]  }
 0x156   : > { %v7062_v29 = vld [vmem:[%s8819_s15 + $0x784] ss:$16 sps:$4 sm:$0xff]   ;;  %v7063_v36 = vld [vmem:[%s8819_s15 + $0x560] ss:$16 sps:$4 sm:$0xff]  }
 0x157   : > { %4802 = vmatpush2.bf16.msra.mxu0 %v6977_v62  ;;  %4875 = vmatpush2.bf16.msra.mxu1 %v6978_v63  ;;  %v7035_v62 = vld [vmem:[%s8819_s15 + $0x404] ss:$16 sps:$4 sm:$0xff]   ;;  %v8984_v63 = vcombine.low %v1367_v45, %v1375_v46  ;;  %v7075_v46 = vld [vmem:[%s8819_s15 + $0x520] ss:$16 sps:$4 sm:$0xff]  }
 0x158   : > { %4803 = vmatprep.subr.bf16.mxu0 %v6979_v0  ;;  %4876 = vmatprep.subr.bf16.mxu1 %v6981_v1  ;;  %v8986_v0 = vcombine.low %v1368_v49, %v1376_v50  ;;  %v8991_v1 = vld [vmem:[%s10376_s0 + $0x10] sm:$0xff] }
 0x159   : > { %v7065_v34 = vld [vmem:[%s8819_s15 + $0x564] ss:$16 sps:$4 sm:$0xff]   ;;  %v7078_v49 = vld [vmem:[%s8819_s15 + $0x720] ss:$16 sps:$4 sm:$0xff]  }
 0x15a   : > { %v7068_v35 = vld [vmem:[%s8819_s15 + $0x764] ss:$16 sps:$4 sm:$0xff]  }
 0x15b   : > { %4804 = vmatpush2.bf16.msra.mxu0 %v6983_v2  ;;  %4877 = vmatpush2.bf16.msra.mxu1 %v6984_v5  ;;  %v8996_v2 = vld [vmem:[%s10376_s0 + $0x50] sm:$0xff]  ;;  %v9001_v5 = vld [vmem:[%s10376_s0 + $0x18] sm:$0xff] }
 0x15c   : > { %4805 = vmatprep.subr.bf16.mxu0 %v6985_v8  ;;  %4878 = vmatprep.subr.bf16.mxu1 %v6987_v9  ;;  %v9006_v8 = vld [vmem:[%s10376_s0 + $0x58] sm:$0xff]  ;;  %v7038_v9 = vld [vmem:[%s8819_s15 + $0x604] ss:$16 sps:$4 sm:$0xff]  }
 0x15d   : > { %v7080_v45 = vld [vmem:[%s8819_s15 + $0x724] ss:$16 sps:$4 sm:$0xff]  }
 0x15e   : > { %v7083_v50 = vld [vmem:[%s8819_s15 + $0x504] ss:$16 sps:$4 sm:$0xff]  }
 0x15f   : > { %4806 = vmatpush2.bf16.msra.mxu0 %v6989_v10  ;;  %4879 = vmatpush2.bf16.msra.mxu1 %v6990_v11  ;;  %v9011_v10 = vcombine.high %v8991_v1, %v8996_v2  ;;  %v9015_v11 = vcombine.high %v9001_v5, %v9006_v8 }
 0x160   : > { %4921 = vmatprep.subr.bf16.mxu0 %v6993_v12  ;;  %4994 = vmatprep.subr.bf16.mxu1 %v6996_v13  ;;  %v7033_v12 = vld [vmem:[%s8819_s15 + $0x400] ss:$16 sps:$4 sm:$0xff]  }
 0x161   : > { %v7036_v13 = vld [vmem:[%s8819_s15 + $0x600] ss:$16 sps:$4 sm:$0xff]  }
 0x162   : > { %4808 = vmatmul.mubr.bf16.vlgmr.msra.gmra.mxu0 %v8808_v3  ;;  %4881 = vmatmul.mubr.bf16.vlgmr.msra.gmra.mxu1 %v8815_v6 }
 0x163   : > { %4922 = vmatpush1.bf16.msra.mxu0 %v6991_v18  ;;  %4995 = vmatpush1.bf16.msra.mxu1 %v6994_v19  ;;  %v7047_v18 = vld [vmem:[%s8819_s15 + $0x5c4] ss:$16 sps:$4 sm:$0xff]  }
 0x164   : > { %4923 = vmatprep.subr.bf16.mxu0 %v6999_v20  ;;  %4996 = vmatprep.subr.bf16.mxu1 %v7002_v21  ;;  %v7050_v19 = vld [vmem:[%s8819_s15 + $0x7c4] ss:$16 sps:$4 sm:$0xff]   ;;  %v7045_v20 = vld [vmem:[%s8819_s15 + $0x5c0] ss:$16 sps:$4 sm:$0xff]  }
 0x165   : > { %4817 = vmatprep.mubr.bf16.mxu0 %v8905_v22  ;;  %4890 = vmatprep.mubr.bf16.mxu1 %v8907_v23  ;;  %v7048_v21 = vld [vmem:[%s8819_s15 + $0x7c0] ss:$16 sps:$4 sm:$0xff]  }
 0x167   : > { %4924 = vmatpush1.bf16.msra.mxu0 %v6997_v24  ;;  %4997 = vmatpush1.bf16.msra.mxu1 %v7000_v25  ;;  %v7053_v24 = vld [vmem:[%s8819_s15 + $0x5a4] ss:$16 sps:$4 sm:$0xff]  }
 0x168   : > { %4925 = vmatprep.subr.bf16.mxu0 %v7005_v26  ;;  %4998 = vmatprep.subr.bf16.mxu1 %v7008_v27  ;;  %v7056_v25 = vld [vmem:[%s8819_s15 + $0x7a4] ss:$16 sps:$4 sm:$0xff]   ;;  %v7051_v26 = vld [vmem:[%s8819_s15 + $0x5a0] ss:$16 sps:$4 sm:$0xff]  }
 0x169   : > { %v7054_v27 = vld [vmem:[%s8819_s15 + $0x7a0] ss:$16 sps:$4 sm:$0xff]  }
 0x16a   : > { %4818 = vmatmul.mubr.bf16.gmra.mxu0 %v8923_v32  ;;  %4891 = vmatmul.mubr.bf16.gmra.mxu1 %v8925_v33 }
 0x16b   : > { %4926 = vmatpush1.bf16.msra.mxu0 %v7003_v28  ;;  %4999 = vmatpush1.bf16.msra.mxu1 %v7006_v30  ;;  %v7059_v28 = vld [vmem:[%s8819_s15 + $0x584] ss:$16 sps:$4 sm:$0xff]   ;;  %v7057_v30 = vld [vmem:[%s8819_s15 + $0x580] ss:$16 sps:$4 sm:$0xff]  }
 0x16c   : > { %4927 = vmatprep.subr.bf16.mxu0 %v7011_v31  ;;  %5000 = vmatprep.subr.bf16.mxu1 %v7014_v37  ;;  %v7060_v31 = vld [vmem:[%s8819_s15 + $0x780] ss:$16 sps:$4 sm:$0xff]  }
 0x16d   : > { %4827 = vmatprep.mubr.bf16.mxu0 %v8937_v38  ;;  %4900 = vmatprep.mubr.bf16.mxu1 %v8939_v39  ;;  %v7066_v37 = vld [vmem:[%s8819_s15 + $0x760] ss:$16 sps:$4 sm:$0xff]  }
 0x16f   : > { %4928 = vmatpush1.bf16.msra.mxu0 %v7009_v40  ;;  %5001 = vmatpush1.bf16.msra.mxu1 %v7012_v41  ;;  %v7071_v40 = vld [vmem:[%s8819_s15 + $0x544] ss:$16 sps:$4 sm:$0xff]  }
 0x170   : > { %4929 = vmatprep.subr.bf16.mxu0 %v7017_v42  ;;  %5002 = vmatprep.subr.bf16.mxu1 %v7020_v43  ;;  %v7074_v41 = vld [vmem:[%s8819_s15 + $0x744] ss:$16 sps:$4 sm:$0xff]   ;;  %v7069_v42 = vld [vmem:[%s8819_s15 + $0x540] ss:$16 sps:$4 sm:$0xff]  }
 0x171   : > { %v7072_v43 = vld [vmem:[%s8819_s15 + $0x740] ss:$16 sps:$4 sm:$0xff]  }
 0x172   : > { %4828 = vmatmul.mubr.bf16.gmra.mxu0 %v8956_v47  ;;  %4901 = vmatmul.mubr.bf16.gmra.mxu1 %v8958_v48 }
 0x173   : > { %4930 = vmatpush1.bf16.msra.mxu0 %v7015_v44  ;;  %5003 = vmatpush1.bf16.msra.mxu1 %v7018_v51  ;;  %v7077_v44 = vld [vmem:[%s8819_s15 + $0x524] ss:$16 sps:$4 sm:$0xff]  }
 0x174   : > { %4931 = vmatprep.subr.bf16.mxu0 %v7023_v52  ;;  %5004 = vmatprep.subr.bf16.mxu1 %v7026_v53  ;;  %v7086_v51 = vld [vmem:[%s8819_s15 + $0x704] ss:$16 sps:$4 sm:$0xff]   ;;  %v7081_v52 = vld [vmem:[%s8819_s15 + $0x500] ss:$16 sps:$4 sm:$0xff]  }
 0x175   : > { %4837 = vmatprep.mubr.bf16.mxu0 %v8969_v54  ;;  %4910 = vmatprep.mubr.bf16.mxu1 %v8971_v55  ;;  %v7084_v53 = vld [vmem:[%s8819_s15 + $0x700] ss:$16 sps:$4 sm:$0xff]  }
 0x177   : > { %4932 = vmatpush1.bf16.msra.mxu0 %v7021_v56  ;;  %5005 = vmatpush1.bf16.msra.mxu1 %v7024_v57  ;;  %v7089_v56 = vld [vmem:[%s8819_s15 + $0x8e4] ss:$16 sps:$4 sm:$0xff]  }
 0x178   : > { %4933 = vmatprep.subr.bf16.mxu0 %v7029_v58  ;;  %5006 = vmatprep.subr.bf16.mxu1 %v7032_v59  ;;  %v7092_v57 = vld [vmem:[%s8819_s15 + $0xae4] ss:$16 sps:$4 sm:$0xff]   ;;  %v7087_v59 = vld [vmem:[%s8819_s15 + $0x8e0] ss:$16 sps:$4 sm:$0xff]  }
 0x179   : > { %v1337_v58 = vld [vmem:[%s10376_s0 + $0x90] sm:$0xff] }
 0x17a   : > { %4838 = vmatmul.mubr.bf16.gmra.mxu0 %v8984_v63  ;;  %4911 = vmatmul.mubr.bf16.gmra.mxu1 %v8986_v0 }
 0x17b   : > { %4934 = vmatpush1.bf16.msra.mxu0 %v7027_v60  ;;  %5007 = vmatpush1.bf16.msra.mxu1 %v7030_v61  ;;  %v1345_v60 = vld [vmem:[%s10376_s0 + $0xd0] sm:$0xff]  ;;  %v9066_v61 = vcombine.low %v8991_v1, %v8996_v2 }
 0x17c   : > { %4935 = vmatprep.subr.bf16.mxu0 %v7035_v62  ;;  %5008 = vmatprep.subr.bf16.mxu1 %v7038_v9  ;;  %v9070_v62 = vcombine.low %v9001_v5, %v9006_v8  ;;  %v1338_v9 = vld [vmem:[%s10376_s0 + $0x98] sm:$0xff]  ;;  %v7095_v1 = vld [vmem:[%s8819_s15 + $0x8c4] ss:$16 sps:$4 sm:$0xff]   ;;  %v9081_v5 = vcombine.high %v1337_v58, %v1345_v60 }
 0x17d   : > { %4953 = vmatprep.mubr.bf16.mxu0 %v9011_v10  ;;  %5026 = vmatprep.mubr.bf16.mxu1 %v9015_v11  ;;  %v7098_v2 = vld [vmem:[%s8819_s15 + $0xac4] ss:$16 sps:$4 sm:$0xff]  }
 0x17f   : > { %4936 = vmatpush1.bf16.msra.mxu0 %v7033_v12  ;;  %5009 = vmatpush1.bf16.msra.mxu1 %v7036_v13  ;;  %v1346_v12 = vld [vmem:[%s10376_s0 + $0xd8] sm:$0xff]  ;;  %v7090_v13 = vld [vmem:[%s8819_s15 + $0xae0] ss:$16 sps:$4 sm:$0xff]  }
 0x180   : > { %4937 = vmatprep.subr.bf16.mxu0 %v7041_v14  ;;  %5010 = vmatprep.subr.bf16.mxu1 %v7044_v15  ;;  %v9083_v8 = vcombine.high %v1338_v9, %v1346_v12  ;;  %v7093_v14 = vld [vmem:[%s8819_s15 + $0x8c0] ss:$16 sps:$4 sm:$0xff]  }
 0x181   : > { %v7096_v15 = vld [vmem:[%s8819_s15 + $0xac0] ss:$16 sps:$4 sm:$0xff]  }
 0x183   : > { %4938 = vmatpush2.bf16.msra.mxu0 %v7039_v16  ;;  %5011 = vmatpush2.bf16.msra.mxu1 %v7042_v17  ;;  %v7101_v16 = vld [vmem:[%s8819_s15 + $0x8a4] ss:$16 sps:$4 sm:$0xff]  }
 0x184   : > { %4939 = vmatprep.subr.bf16.mxu0 %v7047_v18  ;;  %5012 = vmatprep.subr.bf16.mxu1 %v7050_v19  ;;  %v7104_v17 = vld [vmem:[%s8819_s15 + $0xaa4] ss:$16 sps:$4 sm:$0xff]   ;;  %v9096_v19 = vcombine.low %v1337_v58, %v1345_v60 }
 0x185   : > { %v1353_v18 = vld [vmem:[%s10376_s0 + $0x110] sm:$0xff]  ;;  %v9158_v60 = vld [vmem:[%s10376_s0 + $0x20] sm:$0xff] }
 0x186   : > { %v7125_v58 = vld [vmem:[%s8819_s15 + $0x824] ss:$16 sps:$4 sm:$0xff]  }
 0x187   : > { %4940 = vmatpush2.bf16.msra.mxu0 %v7045_v20  ;;  %5013 = vmatpush2.bf16.msra.mxu1 %v7048_v21  ;;  %v9098_v20 = vcombine.low %v1338_v9, %v1346_v12  ;;  %v1361_v21 = vld [vmem:[%s10376_s0 + $0x150] sm:$0xff]  ;;  %v9165_v9 = vld [vmem:[%s10376_s0 + $0x60] sm:$0xff]  ;;  %v9170_v12 = vld [vmem:[%s10376_s0 + $0x28] sm:$0xff] }
 0x188   : > { %4941 = vmatprep.subr.bf16.mxu0 %v7053_v24  ;;  %5014 = vmatprep.subr.bf16.mxu1 %v7056_v25  ;;  %v1354_v24 = vld [vmem:[%s10376_s0 + $0x118] sm:$0xff] }
 0x189   : > { %v1362_v25 = vld [vmem:[%s10376_s0 + $0x158] sm:$0xff] }
 0x18b   : > { %4942 = vmatpush2.bf16.msra.mxu0 %v7051_v26  ;;  %5015 = vmatpush2.bf16.msra.mxu1 %v7054_v27  ;;  %v7099_v26 = vld [vmem:[%s8819_s15 + $0x8a0] ss:$16 sps:$4 sm:$0xff]  }
 0x18c   : > { %4943 = vmatprep.subr.bf16.mxu0 %v7059_v28  ;;  %5016 = vmatprep.subr.bf16.mxu1 %v7062_v29  ;;  %v7102_v27 = vld [vmem:[%s8819_s15 + $0xaa0] ss:$16 sps:$4 sm:$0xff]   ;;  %v7107_v28 = vld [vmem:[%s8819_s15 + $0x884] ss:$16 sps:$4 sm:$0xff]  }
 0x18d   : > { %v7110_v29 = vld [vmem:[%s8819_s15 + $0xa84] ss:$16 sps:$4 sm:$0xff]  }
 0x18f   : > { %4944 = vmatpush2.bf16.msra.mxu0 %v7057_v30  ;;  %5017 = vmatpush2.bf16.msra.mxu1 %v7060_v31  ;;  %v9113_v30 = vcombine.high %v1353_v18, %v1361_v21  ;;  %v9115_v31 = vcombine.high %v1354_v24, %v1362_v25 }
 0x190   : > { %4945 = vmatprep.subr.bf16.mxu0 %v7065_v34  ;;  %5018 = vmatprep.subr.bf16.mxu1 %v7068_v35  ;;  %v7105_v34 = vld [vmem:[%s8819_s15 + $0x880] ss:$16 sps:$4 sm:$0xff]  }
 0x191   : > { %v7108_v35 = vld [vmem:[%s8819_s15 + $0xa80] ss:$16 sps:$4 sm:$0xff]  }
 0x193   : > { %4946 = vmatpush2.bf16.msra.mxu0 %v7063_v36  ;;  %5019 = vmatpush2.bf16.msra.mxu1 %v7066_v37  ;;  %v7113_v36 = vld [vmem:[%s8819_s15 + $0x864] ss:$16 sps:$4 sm:$0xff]  }
 0x194   : > { %4947 = vmatprep.subr.bf16.mxu0 %v7071_v40  ;;  %5020 = vmatprep.subr.bf16.mxu1 %v7074_v41  ;;  %v7116_v37 = vld [vmem:[%s8819_s15 + $0xa64] ss:$16 sps:$4 sm:$0xff]   ;;  %v7111_v40 = vld [vmem:[%s8819_s15 + $0x860] ss:$16 sps:$4 sm:$0xff]  }
 0x195   : > { %v1369_v41 = vld [vmem:[%s10376_s0 + $0x190] sm:$0xff] }
 0x197   : > { %4948 = vmatpush2.bf16.msra.mxu0 %v7069_v42  ;;  %5021 = vmatpush2.bf16.msra.mxu1 %v7072_v43  ;;  %v1377_v42 = vld [vmem:[%s10376_s0 + $0x1d0] sm:$0xff]  ;;  %v1370_v43 = vld [vmem:[%s10376_s0 + $0x198] sm:$0xff] }
 0x198   : > { %4949 = vmatprep.subr.bf16.mxu0 %v7077_v44  ;;  %5022 = vmatprep.subr.bf16.mxu1 %v7080_v45  ;;  %v9135_v44 = vcombine.low %v1353_v18, %v1361_v21  ;;  %v9137_v45 = vcombine.low %v1354_v24, %v1362_v25  ;;  %v9187_v18 = vcombine.high %v9158_v60, %v9165_v9  ;;  %v7129_v24 = vld [vmem:[%s8819_s15 + $0x800] ss:$16 sps:$4 sm:$0xff]  }
 0x199   : > { %v7132_v25 = vld [vmem:[%s8819_s15 + $0xa00] ss:$16 sps:$4 sm:$0xff]  }
 0x19b   : > { %4950 = vmatpush2.bf16.msra.mxu0 %v7075_v46  ;;  %5023 = vmatpush2.bf16.msra.mxu1 %v7078_v49  ;;  %v1378_v46 = vld [vmem:[%s10376_s0 + $0x1d8] sm:$0xff]  ;;  %v7114_v49 = vld [vmem:[%s8819_s15 + $0xa60] ss:$16 sps:$4 sm:$0xff]  }
 0x19c   : > { %4951 = vmatprep.subr.bf16.mxu0 %v7083_v50  ;;  %5024 = vmatprep.subr.bf16.mxu1 %v7086_v51  ;;  %v7119_v50 = vld [vmem:[%s8819_s15 + $0x844] ss:$16 sps:$4 sm:$0xff]  }
 0x19d   : > { %v7122_v51 = vld [vmem:[%s8819_s15 + $0xa44] ss:$16 sps:$4 sm:$0xff]  }
 0x19f   : > { %4952 = vmatpush2.bf16.msra.mxu0 %v7081_v52  ;;  %5025 = vmatpush2.bf16.msra.mxu1 %v7084_v53  ;;  %v9145_v52 = vcombine.high %v1369_v41, %v1377_v42  ;;  %v9147_v53 = vcombine.high %v1370_v43, %v1378_v46 }
 0x1a0   : > { %5067 = vmatprep.subr.bf16.mxu0 %v7089_v56  ;;  %5140 = vmatprep.subr.bf16.mxu1 %v7092_v57  ;;  %v7117_v56 = vld [vmem:[%s8819_s15 + $0x840] ss:$16 sps:$4 sm:$0xff]  }
 0x1a1   : > { %v7120_v57 = vld [vmem:[%s8819_s15 + $0xa40] ss:$16 sps:$4 sm:$0xff]  }
 0x1a2   : > { %4954 = vmatmul.mubr.bf16.vlgmr.msra.gmra.mxu0 %v9066_v61  ;;  %5027 = vmatmul.mubr.bf16.vlgmr.msra.gmra.mxu1 %v9070_v62 }
 0x1a3   : > { %5068 = vmatpush1.bf16.msra.mxu0 %v7087_v59  ;;  %5141 = vmatpush1.bf16.msra.mxu1 %v7090_v13  ;;  %v7128_v59 = vld [vmem:[%s8819_s15 + $0xa24] ss:$16 sps:$4 sm:$0xff]   ;;  %v9172_v13 = vcombine.low %v1369_v41, %v1377_v42  ;;  %v7147_v42 = vld [vmem:[%s8819_s15 + $0x9a0] ss:$16 sps:$4 sm:$0xff]  }
 0x1a4   : > { %5069 = vmatprep.subr.bf16.mxu0 %v7095_v1  ;;  %5142 = vmatprep.subr.bf16.mxu1 %v7098_v2  ;;  %v9174_v1 = vcombine.low %v1370_v43, %v1378_v46  ;;  %v9179_v2 = vld [vmem:[%s10376_s0 + $0x68] sm:$0xff]  ;;  %v7152_v41 = vld [vmem:[%s8819_s15 + $0xba4] ss:$16 sps:$4 sm:$0xff]   ;;  %v7150_v43 = vld [vmem:[%s8819_s15 + $0xba0] ss:$16 sps:$4 sm:$0xff]  }
 0x1a5   : > { %4963 = vmatprep.mubr.bf16.mxu0 %v9081_v5  ;;  %5036 = vmatprep.mubr.bf16.mxu1 %v9083_v8  ;;  %v9191_v21 = vcombine.high %v9170_v12, %v9179_v2  ;;  %v7155_v46 = vld [vmem:[%s8819_s15 + $0x984] ss:$16 sps:$4 sm:$0xff]  }
 0x1a7   : > { %5070 = vmatpush1.bf16.msra.mxu0 %v7093_v14  ;;  %5143 = vmatpush1.bf16.msra.mxu1 %v7096_v15  ;;  %v7123_v14 = vld [vmem:[%s8819_s15 + $0x820] ss:$16 sps:$4 sm:$0xff]  }
 0x1a8   : > { %5071 = vmatprep.subr.bf16.mxu0 %v7101_v16  ;;  %5144 = vmatprep.subr.bf16.mxu1 %v7104_v17  ;;  %v7126_v15 = vld [vmem:[%s8819_s15 + $0xa20] ss:$16 sps:$4 sm:$0xff]   ;;  %v7131_v16 = vld [vmem:[%s8819_s15 + $0x804] ss:$16 sps:$4 sm:$0xff]  }
 0x1a9   : > { %v7134_v17 = vld [vmem:[%s8819_s15 + $0xa04] ss:$16 sps:$4 sm:$0xff]  }
 0x1aa   : > { %4964 = vmatmul.mubr.bf16.gmra.mxu0 %v9096_v19  ;;  %5037 = vmatmul.mubr.bf16.gmra.mxu1 %v9098_v20 }
 0x1ab   : > { %5072 = vmatpush1.bf16.msra.mxu0 %v7099_v26  ;;  %5145 = vmatpush1.bf16.msra.mxu1 %v7102_v27  ;;  %v7137_v26 = vld [vmem:[%s8819_s15 + $0x9e4] ss:$16 sps:$4 sm:$0xff]  }
 0x1ac   : > { %5073 = vmatprep.subr.bf16.mxu0 %v7107_v28  ;;  %5146 = vmatprep.subr.bf16.mxu1 %v7110_v29  ;;  %v7140_v27 = vld [vmem:[%s8819_s15 + $0xbe4] ss:$16 sps:$4 sm:$0xff]   ;;  %v7135_v28 = vld [vmem:[%s8819_s15 + $0x9e0] ss:$16 sps:$4 sm:$0xff]  }
 0x1ad   : > { %4973 = vmatprep.mubr.bf16.mxu0 %v9113_v30  ;;  %5046 = vmatprep.mubr.bf16.mxu1 %v9115_v31  ;;  %v7138_v29 = vld [vmem:[%s8819_s15 + $0xbe0] ss:$16 sps:$4 sm:$0xff]  }
 0x1af   : > { %5074 = vmatpush1.bf16.msra.mxu0 %v7105_v34  ;;  %5147 = vmatpush1.bf16.msra.mxu1 %v7108_v35  ;;  %v7143_v34 = vld [vmem:[%s8819_s15 + $0x9c4] ss:$16 sps:$4 sm:$0xff]  }
 0x1b0   : > { %5075 = vmatprep.subr.bf16.mxu0 %v7113_v36  ;;  %5148 = vmatprep.subr.bf16.mxu1 %v7116_v37  ;;  %v7146_v35 = vld [vmem:[%s8819_s15 + $0xbc4] ss:$16 sps:$4 sm:$0xff]   ;;  %v7141_v36 = vld [vmem:[%s8819_s15 + $0x9c0] ss:$16 sps:$4 sm:$0xff]  }
 0x1b1   : > { %v7144_v37 = vld [vmem:[%s8819_s15 + $0xbc0] ss:$16 sps:$4 sm:$0xff]  }
 0x1b2   : > { %4974 = vmatmul.mubr.bf16.gmra.mxu0 %v9135_v44  ;;  %5047 = vmatmul.mubr.bf16.gmra.mxu1 %v9137_v45 }
 0x1b3   : > { %5076 = vmatpush1.bf16.msra.mxu0 %v7111_v40  ;;  %5149 = vmatpush1.bf16.msra.mxu1 %v7114_v49  ;;  %v7149_v40 = vld [vmem:[%s8819_s15 + $0x9a4] ss:$16 sps:$4 sm:$0xff]  }
 0x1b4   : > { %5077 = vmatprep.subr.bf16.mxu0 %v7119_v50  ;;  %5150 = vmatprep.subr.bf16.mxu1 %v7122_v51  ;;  %v7158_v49 = vld [vmem:[%s8819_s15 + $0xb84] ss:$16 sps:$4 sm:$0xff]   ;;  %v7153_v50 = vld [vmem:[%s8819_s15 + $0x980] ss:$16 sps:$4 sm:$0xff]  }
 0x1b5   : > { %4983 = vmatprep.mubr.bf16.mxu0 %v9145_v52  ;;  %5056 = vmatprep.mubr.bf16.mxu1 %v9147_v53  ;;  %v7156_v51 = vld [vmem:[%s8819_s15 + $0xb80] ss:$16 sps:$4 sm:$0xff]  }
 0x1b7   : > { %5078 = vmatpush1.bf16.msra.mxu0 %v7117_v56  ;;  %5151 = vmatpush1.bf16.msra.mxu1 %v7120_v57  ;;  %v7161_v56 = vld [vmem:[%s8819_s15 + $0x964] ss:$16 sps:$4 sm:$0xff]  }
 0x1b8   : > { %5079 = vmatprep.subr.bf16.mxu0 %v7125_v58  ;;  %5152 = vmatprep.subr.bf16.mxu1 %v7128_v59  ;;  %v7164_v57 = vld [vmem:[%s8819_s15 + $0xb64] ss:$16 sps:$4 sm:$0xff]   ;;  %v7159_v58 = vld [vmem:[%s8819_s15 + $0x960] ss:$16 sps:$4 sm:$0xff]  }
 0x1b9   : > { %v7162_v59 = vld [vmem:[%s8819_s15 + $0xb60] ss:$16 sps:$4 sm:$0xff]  }
 0x1ba   : > { %4984 = vmatmul.mubr.bf16.gmra.mxu0 %v9172_v13  ;;  %5057 = vmatmul.mubr.bf16.gmra.mxu1 %v9174_v1 }
 0x1bb   : > { %5080 = vmatpush1.bf16.msra.mxu0 %v7123_v14  ;;  %5153 = vmatpush1.bf16.msra.mxu1 %v7126_v15  ;;  %v7167_v14 = vld [vmem:[%s8819_s15 + $0x944] ss:$16 sps:$4 sm:$0xff]  }
 0x1bc   : > { %5081 = vmatprep.subr.bf16.mxu0 %v7131_v16  ;;  %5154 = vmatprep.subr.bf16.mxu1 %v7134_v17  ;;  %v7170_v15 = vld [vmem:[%s8819_s15 + $0xb44] ss:$16 sps:$4 sm:$0xff]   ;;  %v7165_v16 = vld [vmem:[%s8819_s15 + $0x940] ss:$16 sps:$4 sm:$0xff]  }
 0x1bd   : > { %5099 = vmatprep.mubr.bf16.mxu0 %v9187_v18  ;;  %5172 = vmatprep.mubr.bf16.mxu1 %v9191_v21  ;;  %v7168_v17 = vld [vmem:[%s8819_s15 + $0xb40] ss:$16 sps:$4 sm:$0xff]  }
 0x1bf   : > { %5082 = vmatpush1.bf16.msra.mxu0 %v7129_v24  ;;  %5155 = vmatpush1.bf16.msra.mxu1 %v7132_v25  ;;  %v7173_v24 = vld [vmem:[%s8819_s15 + $0x924] ss:$16 sps:$4 sm:$0xff]  }
 0x1c0   : > { %5083 = vmatprep.subr.bf16.mxu0 %v7137_v26  ;;  %5156 = vmatprep.subr.bf16.mxu1 %v7140_v27  ;;  %v7176_v25 = vld [vmem:[%s8819_s15 + $0xb24] ss:$16 sps:$4 sm:$0xff]   ;;  %v7171_v26 = vld [vmem:[%s8819_s15 + $0x920] ss:$16 sps:$4 sm:$0xff]  }
 0x1c1   : > { %v7174_v27 = vld [vmem:[%s8819_s15 + $0xb20] ss:$16 sps:$4 sm:$0xff]  }
 0x1c3   : > { %5084 = vmatpush2.bf16.msra.mxu0 %v7135_v28  ;;  %5157 = vmatpush2.bf16.msra.mxu1 %v7138_v29  ;;  %v7179_v28 = vld [vmem:[%s8819_s15 + $0x904] ss:$16 sps:$4 sm:$0xff]  }
 0x1c4   : > { %5085 = vmatprep.subr.bf16.mxu0 %v7143_v34  ;;  %5158 = vmatprep.subr.bf16.mxu1 %v7146_v35  ;;  %v7182_v29 = vld [vmem:[%s8819_s15 + $0xb04] ss:$16 sps:$4 sm:$0xff]   ;;  %v7177_v34 = vld [vmem:[%s8819_s15 + $0x900] ss:$16 sps:$4 sm:$0xff]  }
 0x1c5   : > { %v7180_v35 = vld [vmem:[%s8819_s15 + $0xb00] ss:$16 sps:$4 sm:$0xff]  }
 0x1c7   : > { %5086 = vmatpush2.bf16.msra.mxu0 %v7141_v36  ;;  %5159 = vmatpush2.bf16.msra.mxu1 %v7144_v37  ;;  %v7185_v36 = vld [vmem:[%s8819_s15 + $0xce4] ss:$16 sps:$4 sm:$0xff]  }
 0x1c8   : > { %5087 = vmatprep.subr.bf16.mxu0 %v7149_v40  ;;  %5160 = vmatprep.subr.bf16.mxu1 %v7152_v41  ;;  %v7188_v37 = vld [vmem:[%s8819_s15 + $0xee4] ss:$16 sps:$4 sm:$0xff]   ;;  %v7183_v40 = vld [vmem:[%s8819_s15 + $0xce0] ss:$16 sps:$4 sm:$0xff]  }
 0x1c9   : > { %v1339_v41 = vld [vmem:[%s10376_s0 + $0xa0] sm:$0xff] }
 0x1cb   : > { %5088 = vmatpush2.bf16.msra.mxu0 %v7147_v42  ;;  %5161 = vmatpush2.bf16.msra.mxu1 %v7150_v43  ;;  %v1347_v42 = vld [vmem:[%s10376_s0 + $0xe0] sm:$0xff]  ;;  %v1340_v43 = vld [vmem:[%s10376_s0 + $0xa8] sm:$0xff] }
 0x1cc   : > { %5089 = vmatprep.subr.bf16.mxu0 %v7155_v46  ;;  %5162 = vmatprep.subr.bf16.mxu1 %v7158_v49  ;;  %v9245_v46 = vcombine.low %v9158_v60, %v9165_v9  ;;  %v9249_v49 = vcombine.low %v9170_v12, %v9179_v2  ;;  %v9257_v60 = vcombine.high %v1339_v41, %v1347_v42  ;;  %v7189_v12 = vld [vmem:[%s8819_s15 + $0xcc0] ss:$16 sps:$4 sm:$0xff]  }
 0x1cd   : > { %v7192_v2 = vld [vmem:[%s8819_s15 + $0xec0] ss:$16 sps:$4 sm:$0xff]  }
 0x1ce   : > { %10410 = vst [vmem:[#allocation5_spill] sm:$0xff] %v9245_v46  ;;  %10411 = vst [vmem:[#allocation6_spill] sm:$0xff] %v9249_v49 }
 0x1cf   : > { %5090 = vmatpush2.bf16.msra.mxu0 %v7153_v50  ;;  %5163 = vmatpush2.bf16.msra.mxu1 %v7156_v51  ;;  %v1348_v50 = vld [vmem:[%s10376_s0 + $0xe8] sm:$0xff]  ;;  %v7186_v51 = vld [vmem:[%s8819_s15 + $0xee0] ss:$16 sps:$4 sm:$0xff]   ;;  %10412 = vst [vmem:[#allocation7_spill] sm:$0xff] %v9257_v60 }
 0x1d0   : > { %5091 = vmatprep.subr.bf16.mxu0 %v7161_v56  ;;  %5164 = vmatprep.subr.bf16.mxu1 %v7164_v57  ;;  %v7191_v56 = vld [vmem:[%s8819_s15 + $0xcc4] ss:$16 sps:$4 sm:$0xff]   ;;  %v9259_v9 = vcombine.high %v1340_v43, %v1348_v50 }
 0x1d1   : > { %v7194_v57 = vld [vmem:[%s8819_s15 + $0xec4] ss:$16 sps:$4 sm:$0xff]  }
 0x1d2   : > { %10413 = vst [vmem:[#allocation8_spill] sm:$0xff] %v9259_v9 }
 0x1d3   : > { %5092 = vmatpush2.bf16.msra.mxu0 %v7159_v58  ;;  %5165 = vmatpush2.bf16.msra.mxu1 %v7162_v59  ;;  %v7197_v58 = vld [vmem:[%s8819_s15 + $0xca4] ss:$16 sps:$4 sm:$0xff]  }
 0x1d4   : > { %5093 = vmatprep.subr.bf16.mxu0 %v7167_v14  ;;  %5166 = vmatprep.subr.bf16.mxu1 %v7170_v15  ;;  %v7200_v59 = vld [vmem:[%s8819_s15 + $0xea4] ss:$16 sps:$4 sm:$0xff]  }
 0x1d5   : > { %v1355_v14 = vld [vmem:[%s10376_s0 + $0x120] sm:$0xff] }
 0x1d6   : > { %v1363_v15 = vld [vmem:[%s10376_s0 + $0x160] sm:$0xff] }
 0x1d7   : > { %5094 = vmatpush2.bf16.msra.mxu0 %v7165_v16  ;;  %5167 = vmatpush2.bf16.msra.mxu1 %v7168_v17  ;;  %v1356_v16 = vld [vmem:[%s10376_s0 + $0x128] sm:$0xff]  ;;  %v9278_v17 = vcombine.low %v1339_v41, %v1347_v42  ;;  %v7212_v41 = vld [vmem:[%s8819_s15 + $0xe64] ss:$16 sps:$4 sm:$0xff]   ;;  %v7207_v42 = vld [vmem:[%s8819_s15 + $0xc60] ss:$16 sps:$4 sm:$0xff]  }
 0x1d8   : > { %5095 = vmatprep.subr.bf16.mxu0 %v7173_v24  ;;  %5168 = vmatprep.subr.bf16.mxu1 %v7176_v25  ;;  %v9280_v24 = vcombine.low %v1340_v43, %v1348_v50  ;;  %v1364_v25 = vld [vmem:[%s10376_s0 + $0x168] sm:$0xff]  ;;  %v1371_v43 = vld [vmem:[%s10376_s0 + $0x1a0] sm:$0xff] }
 0x1d9   : > { %10414 = vst [vmem:[#allocation9_spill] sm:$0xff] %v9278_v17  ;;  %v1379_v50 = vld [vmem:[%s10376_s0 + $0x1e0] sm:$0xff] }
 0x1da   : > { %10415 = vst [vmem:[#allocation10_spill] sm:$0xff] %v9280_v24 }
 0x1db   : > { %5096 = vmatpush2.bf16.msra.mxu0 %v7171_v26  ;;  %5169 = vmatpush2.bf16.msra.mxu1 %v7174_v27  ;;  %v7195_v26 = vld [vmem:[%s8819_s15 + $0xca0] ss:$16 sps:$4 sm:$0xff]  }
 0x1dc   : > { %5097 = vmatprep.subr.bf16.mxu0 %v7179_v28  ;;  %5170 = vmatprep.subr.bf16.mxu1 %v7182_v29  ;;  %v7198_v27 = vld [vmem:[%s8819_s15 + $0xea0] ss:$16 sps:$4 sm:$0xff]   ;;  %v7203_v28 = vld [vmem:[%s8819_s15 + $0xc84] ss:$16 sps:$4 sm:$0xff]  }
 0x1dd   : > { %v7206_v29 = vld [vmem:[%s8819_s15 + $0xe84] ss:$16 sps:$4 sm:$0xff]  }
 0x1df   : > { %5098 = vmatpush2.bf16.msra.mxu0 %v7177_v34  ;;  %5171 = vmatpush2.bf16.msra.mxu1 %v7180_v35  ;;  %v9289_v34 = vcombine.high %v1355_v14, %v1363_v15  ;;  %v9291_v35 = vcombine.high %v1356_v16, %v1364_v25 }
 0x1e0   : > { %5213 = vmatprep.subr.bf16.mxu0 %v7185_v36  ;;  %5286 = vmatprep.subr.bf16.mxu1 %v7188_v37  ;;  %v7201_v36 = vld [vmem:[%s8819_s15 + $0xc80] ss:$16 sps:$4 sm:$0xff]  }
 0x1e1   : > { %10416 = vst [vmem:[#allocation11_spill] sm:$0xff] %v9289_v34  ;;  %10417 = vst [vmem:[#allocation12_spill] sm:$0xff] %v9291_v35  ;;  %v7204_v37 = vld [vmem:[%s8819_s15 + $0xe80] ss:$16 sps:$4 sm:$0xff]  }
 0x1e2   : > { %5100 = vmatmul.mubr.bf16.vlgmr.msra.gmra.mxu0 %v9245_v46  ;;  %5173 = vmatmul.mubr.bf16.vlgmr.msra.gmra.mxu1 %v9249_v49  ;;  %v7320_v49 = vld [vmem:[%s8819_s15 + $0x22c] ss:$16 sps:$4 sm:$0xff]  }
 0x1e3   : > { %5214 = vmatpush1.bf16.msra.mxu0 %v7183_v40  ;;  %5287 = vmatpush1.bf16.msra.mxu1 %v7186_v51  ;;  %v7209_v40 = vld [vmem:[%s8819_s15 + $0xc64] ss:$16 sps:$4 sm:$0xff]   ;;  %v9308_v51 = vcombine.low %v1355_v14, %v1363_v15  ;;  %v9321_v14 = vcombine.high %v1371_v43, %v1379_v50 }
 0x1e4   : > { %5215 = vmatprep.subr.bf16.mxu0 %v7191_v56  ;;  %5288 = vmatprep.subr.bf16.mxu1 %v7194_v57  ;;  %v9310_v56 = vcombine.low %v1356_v16, %v1364_v25  ;;  %v1372_v57 = vld [vmem:[%s10376_s0 + $0x1a8] sm:$0xff]  ;;  %v7213_v16 = vld [vmem:[%s8819_s15 + $0xc40] ss:$16 sps:$4 sm:$0xff]  }
 0x1e5   : > { %5109 = vmatprep.mubr.bf16.mxu0 %v9257_v60  ;;  %5182 = vmatprep.mubr.bf16.mxu1 %v9259_v9  ;;  %10418 = vst [vmem:[#allocation13_spill] sm:$0xff] %v9308_v51  ;;  %10420 = vst [vmem:[#allocation15_spill] sm:$0xff] %v9321_v14  ;;  %v7216_v25 = vld [vmem:[%s8819_s15 + $0xe40] ss:$16 sps:$4 sm:$0xff]   ;;  %v7306_v9 = vld [vmem:[%s8819_s15 + $0x268] ss:$16 sps:$4 sm:$0xff]  }
 0x1e6   : > { %10419 = vst [vmem:[#allocation14_spill] sm:$0xff] %v9310_v56 }
 0x1e7   : > { %5216 = vmatpush1.bf16.msra.mxu0 %v7189_v12  ;;  %5289 = vmatpush1.bf16.msra.mxu1 %v7192_v2  ;;  %v1380_v12 = vld [vmem:[%s10376_s0 + $0x1e8] sm:$0xff]  ;;  %v7210_v2 = vld [vmem:[%s8819_s15 + $0xe60] ss:$16 sps:$4 sm:$0xff]  }
 0x1e8   : > { %5217 = vmatprep.subr.bf16.mxu0 %v7197_v58  ;;  %5290 = vmatprep.subr.bf16.mxu1 %v7200_v59  ;;  %v7215_v58 = vld [vmem:[%s8819_s15 + $0xc44] ss:$16 sps:$4 sm:$0xff]   ;;  %v9323_v15 = vcombine.high %v1372_v57, %v1380_v12 }
 0x1e9   : > { %v7218_v59 = vld [vmem:[%s8819_s15 + $0xe44] ss:$16 sps:$4 sm:$0xff]  }
 0x1ea   : > { %5110 = vmatmul.mubr.bf16.gmra.mxu0 %v9278_v17  ;;  %5183 = vmatmul.mubr.bf16.gmra.mxu1 %v9280_v24  ;;  %10421 = vst [vmem:[#allocation16_spill] sm:$0xff] %v9323_v15  ;;  %v7308_v24 = vld [vmem:[%s8819_s15 + $0x26c] ss:$16 sps:$4 sm:$0xff]   ;;  %v7303_v17 = vld [vmem:[%s8819_s15 + $0x68] ss:$16 sps:$4 sm:$0xff]  }
 0x1eb   : > { %5218 = vmatpush1.bf16.msra.mxu0 %v7195_v26  ;;  %5291 = vmatpush1.bf16.msra.mxu1 %v7198_v27  ;;  %v7221_v26 = vld [vmem:[%s8819_s15 + $0xc24] ss:$16 sps:$4 sm:$0xff]  }
 0x1ec   : > { %5219 = vmatprep.subr.bf16.mxu0 %v7203_v28  ;;  %5292 = vmatprep.subr.bf16.mxu1 %v7206_v29  ;;  %v7224_v27 = vld [vmem:[%s8819_s15 + $0xe24] ss:$16 sps:$4 sm:$0xff]   ;;  %v7219_v29 = vld [vmem:[%s8819_s15 + $0xc20] ss:$16 sps:$4 sm:$0xff]  }
 0x1ed   : > { %5119 = vmatprep.mubr.bf16.mxu0 %v9289_v34  ;;  %5192 = vmatprep.mubr.bf16.mxu1 %v9291_v35  ;;  %v9334_v28 = vld [vmem:[%s10376_s0 + $0x30] sm:$0xff]  ;;  %v7305_v34 = vld [vmem:[%s8819_s15 + $0x6c] ss:$16 sps:$4 sm:$0xff]  }
 0x1ef   : > { %5220 = vmatpush1.bf16.msra.mxu0 %v7201_v36  ;;  %5293 = vmatpush1.bf16.msra.mxu1 %v7204_v37  ;;  %v9342_v36 = vld [vmem:[%s10376_s0 + $0x70] sm:$0xff]  ;;  %v9344_v37 = vcombine.low %v1371_v43, %v1379_v50 }
 0x1f0   : > { %5221 = vmatprep.subr.bf16.mxu0 %v7209_v40  ;;  %5294 = vmatprep.subr.bf16.mxu1 %v7212_v41  ;;  %v9346_v40 = vcombine.low %v1372_v57, %v1380_v12  ;;  %v9351_v41 = vld [vmem:[%s10376_s0 + $0x38] sm:$0xff]  ;;  %v7227_v43 = vld [vmem:[%s8819_s15 + $0xc04] ss:$16 sps:$4 sm:$0xff]   ;;  %v9363_v57 = vcombine.high %v9334_v28, %v9342_v36 }
 0x1f1   : > { %10422 = vst [vmem:[#allocation17_spill] sm:$0xff] %v9344_v37  ;;  %v7230_v50 = vld [vmem:[%s8819_s15 + $0xe04] ss:$16 sps:$4 sm:$0xff]  }
 0x1f2   : > { %5120 = vmatmul.mubr.bf16.gmra.mxu0 %v9308_v51  ;;  %5193 = vmatmul.mubr.bf16.gmra.mxu1 %v9310_v56  ;;  %10423 = vst [vmem:[#allocation18_spill] sm:$0xff] %v9346_v40  ;;  %10424 = vst [vmem:[#allocation19_spill] sm:$0xff] %v9363_v57 }
 0x1f3   : > { %5222 = vmatpush1.bf16.msra.mxu0 %v7207_v42  ;;  %5295 = vmatpush1.bf16.msra.mxu1 %v7210_v2  ;;  %v9356_v42 = vld [vmem:[%s10376_s0 + $0x78] sm:$0xff]  ;;  %v7222_v2 = vld [vmem:[%s8819_s15 + $0xe20] ss:$16 sps:$4 sm:$0xff]  }
 0x1f4   : > { %5223 = vmatprep.subr.bf16.mxu0 %v7215_v58  ;;  %5296 = vmatprep.subr.bf16.mxu1 %v7218_v59  ;;  %v9367_v12 = vcombine.high %v9351_v41, %v9356_v42  ;;  %v7225_v58 = vld [vmem:[%s8819_s15 + $0xc00] ss:$16 sps:$4 sm:$0xff]  }
 0x1f5   : > { %5129 = vmatprep.mubr.bf16.mxu0 %v9321_v14  ;;  %5202 = vmatprep.mubr.bf16.mxu1 %v9323_v15  ;;  %v7228_v59 = vld [vmem:[%s8819_s15 + $0xe00] ss:$16 sps:$4 sm:$0xff]  }
 0x1f6   : > { %10425 = vst [vmem:[#allocation20_spill] sm:$0xff] %v9367_v12 }
 0x1f7   : > { %5224 = vmatpush1.bf16.msra.mxu0 %v7213_v16  ;;  %5297 = vmatpush1.bf16.msra.mxu1 %v7216_v25  ;;  %v7233_v16 = vld [vmem:[%s8819_s15 + $0xde4] ss:$16 sps:$4 sm:$0xff]  }
 0x1f8   : > { %5225 = vmatprep.subr.bf16.mxu0 %v7221_v26  ;;  %5298 = vmatprep.subr.bf16.mxu1 %v7224_v27  ;;  %v7236_v25 = vld [vmem:[%s8819_s15 + $0xfe4] ss:$16 sps:$4 sm:$0xff]   ;;  %v7231_v26 = vld [vmem:[%s8819_s15 + $0xde0] ss:$16 sps:$4 sm:$0xff]  }
 0x1f9   : > { %v7234_v27 = vld [vmem:[%s8819_s15 + $0xfe0] ss:$16 sps:$4 sm:$0xff]  }
 0x1fa   : > { %5130 = vmatmul.mubr.bf16.gmra.mxu0 %v9344_v37  ;;  %5203 = vmatmul.mubr.bf16.gmra.mxu1 %v9346_v40  ;;  %v7273_v40 = vld [vmem:[%s8819_s15 + $0xd00] ss:$16 sps:$4 sm:$0xff]  }
 0x1fb   : > { %5226 = vmatpush1.bf16.msra.mxu0 %v7219_v29  ;;  %5299 = vmatpush1.bf16.msra.mxu1 %v7222_v2  ;;  %v7239_v29 = vld [vmem:[%s8819_s15 + $0xdc4] ss:$16 sps:$4 sm:$0xff]  }
 0x1fc   : > { %5227 = vmatprep.subr.bf16.mxu0 %v7227_v43  ;;  %5300 = vmatprep.subr.bf16.mxu1 %v7230_v50  ;;  %v7242_v2 = vld [vmem:[%s8819_s15 + $0xfc4] ss:$16 sps:$4 sm:$0xff]   ;;  %v7237_v43 = vld [vmem:[%s8819_s15 + $0xdc0] ss:$16 sps:$4 sm:$0xff]  }
 0x1fd   : > { %5245 = vmatprep.mubr.bf16.mxu0 %v9363_v57  ;;  %5318 = vmatprep.mubr.bf16.mxu1 %v9367_v12  ;;  %v7240_v50 = vld [vmem:[%s8819_s15 + $0xfc0] ss:$16 sps:$4 sm:$0xff]   ;;  %v7245_v12 = vld [vmem:[%s8819_s15 + $0xda4] ss:$16 sps:$4 sm:$0xff]  }
 0x1fe   : > { %v7278_v57 = vld [vmem:[%s8819_s15 + $0xf04] ss:$16 sps:$4 sm:$0xff]  }
 0x1ff   : > { %5228 = vmatpush1.bf16.msra.mxu0 %v7225_v58  ;;  %5301 = vmatpush1.bf16.msra.mxu1 %v7228_v59  ;;  %v7248_v58 = vld [vmem:[%s8819_s15 + $0xfa4] ss:$16 sps:$4 sm:$0xff]   ;;  %v7243_v59 = vld [vmem:[%s8819_s15 + $0xda0] ss:$16 sps:$4 sm:$0xff]  }
 0x200   : > { %5229 = vmatprep.subr.bf16.mxu0 %v7233_v16  ;;  %5302 = vmatprep.subr.bf16.mxu1 %v7236_v25  ;;  %v7246_v16 = vld [vmem:[%s8819_s15 + $0xfa0] ss:$16 sps:$4 sm:$0xff]   ;;  %v7251_v25 = vld [vmem:[%s8819_s15 + $0xd84] ss:$16 sps:$4 sm:$0xff]  }
 0x203   : > { %5230 = vmatpush2.bf16.msra.mxu0 %v7231_v26  ;;  %5303 = vmatpush2.bf16.msra.mxu1 %v7234_v27  ;;  %v7254_v26 = vld [vmem:[%s8819_s15 + $0xf84] ss:$16 sps:$4 sm:$0xff]   ;;  %v7249_v27 = vld [vmem:[%s8819_s15 + $0xd80] ss:$16 sps:$4 sm:$0xff]  }
 0x204   : > { %5231 = vmatprep.subr.bf16.mxu0 %v7239_v29  ;;  %5304 = vmatprep.subr.bf16.mxu1 %v7242_v2  ;;  %v7252_v29 = vld [vmem:[%s8819_s15 + $0xf80] ss:$16 sps:$4 sm:$0xff]   ;;  %v7257_v2 = vld [vmem:[%s8819_s15 + $0xd64] ss:$16 sps:$4 sm:$0xff]  }
 0x207   : > { %5232 = vmatpush2.bf16.msra.mxu0 %v7237_v43  ;;  %5305 = vmatpush2.bf16.msra.mxu1 %v7240_v50  ;;  %v7260_v43 = vld [vmem:[%s8819_s15 + $0xf64] ss:$16 sps:$4 sm:$0xff]   ;;  %v7255_v50 = vld [vmem:[%s8819_s15 + $0xd60] ss:$16 sps:$4 sm:$0xff]  }
 0x208   : > { %5233 = vmatprep.subr.bf16.mxu0 %v7245_v12  ;;  %5306 = vmatprep.subr.bf16.mxu1 %v7248_v58  ;;  %v7258_v12 = vld [vmem:[%s8819_s15 + $0xf60] ss:$16 sps:$4 sm:$0xff]   ;;  %v7263_v58 = vld [vmem:[%s8819_s15 + $0xd44] ss:$16 sps:$4 sm:$0xff]  }
 0x20b   : > { %5234 = vmatpush2.bf16.msra.mxu0 %v7243_v59  ;;  %5307 = vmatpush2.bf16.msra.mxu1 %v7246_v16  ;;  %v7266_v59 = vld [vmem:[%s8819_s15 + $0xf44] ss:$16 sps:$4 sm:$0xff]   ;;  %v7261_v16 = vld [vmem:[%s8819_s15 + $0xd40] ss:$16 sps:$4 sm:$0xff]  }
 0x20c   : > { %5235 = vmatprep.subr.bf16.mxu0 %v7251_v25  ;;  %5308 = vmatprep.subr.bf16.mxu1 %v7254_v26  ;;  %v7264_v25 = vld [vmem:[%s8819_s15 + $0xf40] ss:$16 sps:$4 sm:$0xff]   ;;  %v7269_v26 = vld [vmem:[%s8819_s15 + $0xd24] ss:$16 sps:$4 sm:$0xff]  }
 0x20f   : > { %5236 = vmatpush2.bf16.msra.mxu0 %v7249_v27  ;;  %5309 = vmatpush2.bf16.msra.mxu1 %v7252_v29  ;;  %v7272_v27 = vld [vmem:[%s8819_s15 + $0xf24] ss:$16 sps:$4 sm:$0xff]   ;;  %v7267_v29 = vld [vmem:[%s8819_s15 + $0xd20] ss:$16 sps:$4 sm:$0xff]  }
 0x210   : > { %5237 = vmatprep.subr.bf16.mxu0 %v7257_v2  ;;  %5310 = vmatprep.subr.bf16.mxu1 %v7260_v43  ;;  %v7270_v2 = vld [vmem:[%s8819_s15 + $0xf20] ss:$16 sps:$4 sm:$0xff]   ;;  %v7275_v43 = vld [vmem:[%s8819_s15 + $0xd04] ss:$16 sps:$4 sm:$0xff]  }
 0x213   : > { %5238 = vmatpush2.bf16.msra.mxu0 %v7255_v50  ;;  %5311 = vmatpush2.bf16.msra.mxu1 %v7258_v12  ;;  %v7276_v50 = vld [vmem:[%s8819_s15 + $0xf00] ss:$16 sps:$4 sm:$0xff]   ;;  %v7281_v12 = vld [vmem:[%s8819_s15 + $0xec] ss:$16 sps:$4 sm:$0xff]  }
 0x214   : > { %5239 = vmatprep.subr.bf16.mxu0 %v7263_v58  ;;  %5312 = vmatprep.subr.bf16.mxu1 %v7266_v59  ;;  %v7284_v58 = vld [vmem:[%s8819_s15 + $0x2ec] ss:$16 sps:$4 sm:$0xff]   ;;  %v1341_v59 = vld [vmem:[%s10376_s0 + $0xb0] sm:$0xff] }
 0x217   : > { %5240 = vmatpush2.bf16.msra.mxu0 %v7261_v16  ;;  %5313 = vmatpush2.bf16.msra.mxu1 %v7264_v25  ;;  %v7279_v16 = vld [vmem:[%s8819_s15 + $0xe8] ss:$16 sps:$4 sm:$0xff]   ;;  %v1349_v25 = vld [vmem:[%s10376_s0 + $0xf0] sm:$0xff] }
 0x218   : > { %5241 = vmatprep.subr.bf16.mxu0 %v7269_v26  ;;  %5314 = vmatprep.subr.bf16.mxu1 %v7272_v27  ;;  %v9418_v26 = vcombine.low %v9334_v28, %v9342_v36  ;;  %v9422_v27 = vcombine.low %v9351_v41, %v9356_v42  ;;  %v7287_v28 = vld [vmem:[%s8819_s15 + $0xcc] ss:$16 sps:$4 sm:$0xff]   ;;  %v9433_v41 = vcombine.high %v1341_v59, %v1349_v25 }
 0x219   : > { %v7290_v36 = vld [vmem:[%s8819_s15 + $0x2cc] ss:$16 sps:$4 sm:$0xff]  }
 0x21a   : > { %10426 = vst [vmem:[#allocation21_spill] sm:$0xff] %v9418_v26  ;;  %10427 = vst [vmem:[#allocation22_spill] sm:$0xff] %v9422_v27 }
 0x21b   : > { %5242 = vmatpush2.bf16.msra.mxu0 %v7267_v29  ;;  %5315 = vmatpush2.bf16.msra.mxu1 %v7270_v2  ;;  %v1350_v29 = vld [vmem:[%s10376_s0 + $0xf8] sm:$0xff]  ;;  %10428 = vst [vmem:[#allocation23_spill] sm:$0xff] %v9433_v41 }
 0x21c   : > { %5243 = vmatprep.subr.bf16.mxu0 %v7275_v43  ;;  %5316 = vmatprep.subr.bf16.mxu1 %v7278_v57  ;;  %v1342_v57 = vld [vmem:[%s10376_s0 + $0xb8] sm:$0xff] }
 0x21d   : > { %v7282_v2 = vld [vmem:[%s8819_s15 + $0x2e8] ss:$16 sps:$4 sm:$0xff]   ;;  %v9435_v42 = vcombine.high %v1342_v57, %v1350_v29 }
 0x21f   : > { %5244 = vmatpush2.bf16.msra.mxu0 %v7273_v40  ;;  %5317 = vmatpush2.bf16.msra.mxu1 %v7276_v50  ;;  %10429 = vst [vmem:[#allocation24_spill] sm:$0xff] %v9435_v42  ;;  %v7285_v40 = vld [vmem:[%s8819_s15 + $0xc8] ss:$16 sps:$4 sm:$0xff]  }
 0x220   : > { %5359 = vmatprep.subr.bf16.mxu0 %v7281_v12  ;;  %5432 = vmatprep.subr.bf16.mxu1 %v7284_v58  ;;  %v7288_v50 = vld [vmem:[%s8819_s15 + $0x2c8] ss:$16 sps:$4 sm:$0xff]   ;;  %v7293_v12 = vld [vmem:[%s8819_s15 + $0xac] ss:$16 sps:$4 sm:$0xff]  }
 0x221   : > { %v7296_v58 = vld [vmem:[%s8819_s15 + $0x2ac] ss:$16 sps:$4 sm:$0xff]  }
 0x222   : > { %v4809_v43 = vpop.f32.mrf.mxu0  ;;  %v4882_v37 = vpop.f32.mrf.mxu1  ;;  %5246 = vmatmul.mubr.bf16.vlgmr.msra.gmra.mxu0 %v9418_v26  ;;  %5319 = vmatmul.mubr.bf16.vlgmr.msra.gmra.mxu1 %v9422_v27  ;;  %v1357_v26 = vld [vmem:[%s10376_s0 + $0x130] sm:$0xff]  ;;  %v7299_v27 = vld [vmem:[%s8819_s15 + $0x8c] ss:$16 sps:$4 sm:$0xff]  }
 0x223   : > { %v9441_v15 = vadd.f32 %v4882_v37, %v4809_v43  ;;  %5360 = vmatpush1.bf16.msra.mxu0 %v7279_v16  ;;  %5433 = vmatpush1.bf16.msra.mxu1 %v7282_v2  ;;  %v7291_v37 = vld [vmem:[%s8819_s15 + $0xa8] ss:$16 sps:$4 sm:$0xff]   ;;  %v1365_v16 = vld [vmem:[%s10376_s0 + $0x170] sm:$0xff]  ;;  %v9458_v43 = vcombine.low %v1342_v57, %v1350_v29  ;;  %v7302_v57 = vld [vmem:[%s8819_s15 + $0x28c] ss:$16 sps:$4 sm:$0xff]  }
 0x224   : > { %v4811_v14 = vpop.f32.mrf.mxu0  ;;  %v4884_v56 = vpop.f32.mrf.mxu1  ;;  %5361 = vmatprep.subr.bf16.mxu0 %v7287_v28  ;;  %5434 = vmatprep.subr.bf16.mxu1 %v7290_v36  ;;  %v9456_v36 = vcombine.low %v1341_v59, %v1349_v25  ;;  %v9475_v29 = vcombine.high %v1357_v26, %v1365_v16 }
 0x225   : > { %v9448_v51 = vadd.f32 %v4884_v56, %v4811_v14  ;;  %5255 = vmatprep.mubr.bf16.mxu0 %v9433_v41  ;;  %5328 = vmatprep.mubr.bf16.mxu1 %v9435_v42  ;;  %10431 = vst [vmem:[#allocation26_spill] sm:$0xff] %v9458_v43  ;;  %v1358_v56 = vld [vmem:[%s10376_s0 + $0x138] sm:$0xff] }
 0x226   : > { %v4813_v2 = vpop.f32.mrf.mxu0  ;;  %v4886_v28 = vpop.f32.mrf.mxu1  ;;  %10430 = vst [vmem:[#allocation25_spill] sm:$0xff] %v9456_v36  ;;  %v1366_v14 = vld [vmem:[%s10376_s0 + $0x178] sm:$0xff]  ;;  %10432 = vst [vmem:[#allocation27_spill] sm:$0xff] %v9475_v29 }
 0x227   : > { %v9466_v42 = vadd.f32 %v4886_v28, %v4813_v2  ;;  %5362 = vmatpush1.bf16.msra.mxu0 %v7285_v40  ;;  %5435 = vmatpush1.bf16.msra.mxu1 %v7288_v50  ;;  %v7294_v41 = vld [vmem:[%s8819_s15 + $0x2a8] ss:$16 sps:$4 sm:$0xff]   ;;  %v9477_v35 = vcombine.high %v1358_v56, %v1366_v14 }
 0x228   : > { %v9470_v59 = vpop.f32.mrf.mxu0  ;;  %v9472_v25 = vpop.f32.mrf.mxu1  ;;  %5363 = vmatprep.subr.bf16.mxu0 %v7293_v12  ;;  %5436 = vmatprep.subr.bf16.mxu1 %v7296_v58  ;;  %v7297_v40 = vld [vmem:[%s8819_s15 + $0x88] ss:$16 sps:$4 sm:$0xff]   ;;  %v1373_v58 = vld [vmem:[%s10376_s0 + $0x1b0] sm:$0xff] }
 0x229   : > { %10433 = vst [vmem:[#allocation28_spill] sm:$0xff] %v9477_v35  ;;  %v7300_v50 = vld [vmem:[%s8819_s15 + $0x288] ss:$16 sps:$4 sm:$0xff]  }
 0x22a   : > { %5256 = vmatmul.mubr.bf16.gmra.mxu0 %v9456_v36  ;;  %5329 = vmatmul.mubr.bf16.gmra.mxu1 %v9458_v43  ;;  %v4819_v2 = vpop.f32.mrf.mxu0  ;;  %v4892_v28 = vpop.f32.mrf.mxu1 }
 0x22b   : > { %5364 = vmatpush1.bf16.msra.mxu0 %v7291_v37  ;;  %5437 = vmatpush1.bf16.msra.mxu1 %v7294_v41  ;;  %v9485_v12 = vadd.f32 %v4892_v28, %v4819_v2  ;;  %v1381_v41 = vld [vmem:[%s10376_s0 + $0x1f0] sm:$0xff]  ;;  %v9498_v37 = vcombine.low %v1357_v26, %v1365_v16  ;;  %v1374_v2 = vld [vmem:[%s10376_s0 + $0x1b8] sm:$0xff] }
 0x22c   : > { %5365 = vmatprep.subr.bf16.mxu0 %v7299_v27  ;;  %5438 = vmatprep.subr.bf16.mxu1 %v7302_v57  ;;  %v4821_v36 = vpop.f32.mrf.mxu0  ;;  %v4894_v43 = vpop.f32.mrf.mxu1  ;;  %v9500_v57 = vcombine.low %v1358_v56, %v1366_v14  ;;  %v1382_v28 = vld [vmem:[%s10376_s0 + $0x1f8] sm:$0xff]  ;;  %v9517_v14 = vcombine.high %v1373_v58, %v1381_v41 }
 0x22d   : > { %5265 = vmatprep.mubr.bf16.mxu0 %v9475_v29  ;;  %5338 = vmatprep.mubr.bf16.mxu1 %v9477_v35  ;;  %v9496_v27 = vadd.f32 %v4894_v43, %v4821_v36  ;;  %10434 = vst [vmem:[#allocation29_spill] sm:$0xff] %v9498_v37  ;;  %v7311_v36 = vld [vmem:[%s8819_s15 + $0x4c] ss:$16 sps:$4 sm:$0xff]   ;;  %v9519_v60 = vcombine.high %v1374_v2, %v1382_v28 }
 0x22e   : > { %10435 = vst [vmem:[#allocation30_spill] sm:$0xff] %v9500_v57  ;;  %v4823_v35 = vpop.f32.mrf.mxu0  ;;  %v4896_v29 = vpop.f32.mrf.mxu1  ;;  %v7314_v16 = vld [vmem:[%s8819_s15 + $0x24c] ss:$16 sps:$4 sm:$0xff]   ;;  %10437 = vst [vmem:[#allocation32_spill] sm:$0xff] %v9517_v14 }
 0x22f   : > { %5366 = vmatpush1.bf16.msra.mxu0 %v7297_v40  ;;  %5439 = vmatpush1.bf16.msra.mxu1 %v7300_v50  ;;  %v9510_v26 = vadd.f32 %v4896_v29, %v4823_v35  ;;  %10438 = vst [vmem:[#allocation33_spill] sm:$0xff] %v9519_v60  ;;  %v7309_v40 = vld [vmem:[%s8819_s15 + $0x48] ss:$16 sps:$4 sm:$0xff]  }
 0x230   : > { %5367 = vmatprep.subr.bf16.mxu0 %v7305_v34  ;;  %5440 = vmatprep.subr.bf16.mxu1 %v7308_v24  ;;  %v9513_v43 = vpop.f32.mrf.mxu0  ;;  %v9515_v56 = vpop.f32.mrf.mxu1  ;;  %v7312_v24 = vld [vmem:[%s8819_s15 + $0x248] ss:$16 sps:$4 sm:$0xff]   ;;  %v7317_v34 = vld [vmem:[%s8819_s15 + $0x2c] ss:$16 sps:$4 sm:$0xff]  }
 0x231   : > { %10436 = vst [vmem:[#allocation31_spill] sm:$0xff] %v9510_v26 }
 0x232   : > { %5266 = vmatmul.mubr.bf16.gmra.mxu0 %v9498_v37  ;;  %5339 = vmatmul.mubr.bf16.gmra.mxu1 %v9500_v57  ;;  %v4829_v35 = vpop.f32.mrf.mxu0  ;;  %v4902_v29 = vpop.f32.mrf.mxu1  ;;  %v7323_v37 = vld [vmem:[%s8819_s15 + $0xc] ss:$16 sps:$4 sm:$0xff]  }
 0x233   : > { %5368 = vmatpush1.bf16.msra.mxu0 %v7303_v17  ;;  %5441 = vmatpush1.bf16.msra.mxu1 %v7306_v9  ;;  %v9526_v50 = vadd.f32 %v4902_v29, %v4829_v35  ;;  %v9533_v17 = vcombine.low %v1373_v58, %v1381_v41  ;;  %v7315_v9 = vld [vmem:[%s8819_s15 + $0x28] ss:$16 sps:$4 sm:$0xff]   ;;  %v9536_v35 = vcombine.low %v1374_v2, %v1382_v28 }
 0x234   : > { %5369 = vmatprep.subr.bf16.mxu0 %v7311_v36  ;;  %5442 = vmatprep.subr.bf16.mxu1 %v7314_v16  ;;  %v4831_v46 = vpop.f32.mrf.mxu0  ;;  %v4904_v26 = vpop.f32.mrf.mxu1  ;;  %v7318_v16 = vld [vmem:[%s8819_s15 + $0x228] ss:$16 sps:$4 sm:$0xff]  }
 0x235   : > { %10439 = vst [vmem:[#allocation34_spill] sm:$0xff] %v9526_v50  ;;  %5275 = vmatprep.mubr.bf16.mxu0 %v9517_v14  ;;  %5348 = vmatprep.mubr.bf16.mxu1 %v9519_v60  ;;  %v9531_v57 = vadd.f32 %v4904_v26, %v4831_v46  ;;  %10440 = vst [vmem:[#allocation35_spill] sm:$0xff] %v9533_v17  ;;  %v7326_v46 = vld [vmem:[%s8819_s15 + $0x20c] ss:$16 sps:$4 sm:$0xff]   ;;  %v7321_v2 = vld [vmem:[%s8819_s15 + $0x8] ss:$16 sps:$4 sm:$0xff]  }
 0x236   : > { %10441 = vst [vmem:[#allocation36_spill] sm:$0xff] %v9536_v35  ;;  %v4833_v29 = vpop.f32.mrf.mxu0  ;;  %v4906_v36 = vpop.f32.mrf.mxu1  ;;  %v7449_v60 = vld [vmem:[%s8819_s15 + $0x56c] ss:$16 sps:$4 sm:$0xff]   ;;  %v7447_v14 = vld [vmem:[%s8819_s15 + $0x568] ss:$16 sps:$4 sm:$0xff]  }
 0x237   : > { %5370 = vmatpush1.bf16.msra.mxu0 %v7309_v40  ;;  %5443 = vmatpush1.bf16.msra.mxu1 %v7312_v24  ;;  %v9540_v50 = vadd.f32 %v4906_v36, %v4833_v29  ;;  %v7324_v40 = vld [vmem:[%s8819_s15 + $0x208] ss:$16 sps:$4 sm:$0xff]   ;;  %v7329_v24 = vld [vmem:[%s8819_s15 + $0x1ec] ss:$16 sps:$4 sm:$0xff]  }
 0x238   : > { %5371 = vmatprep.subr.bf16.mxu0 %v7317_v34  ;;  %5444 = vmatprep.subr.bf16.mxu1 %v7320_v49  ;;  %v9543_v58 = vpop.f32.mrf.mxu0  ;;  %v9545_v41 = vpop.f32.mrf.mxu1  ;;  %v7332_v34 = vld [vmem:[%s8819_s15 + $0x3ec] ss:$16 sps:$4 sm:$0xff]  }
 0x23a   : > { %5276 = vmatmul.mubr.bf16.gmra.mxu0 %v9533_v17  ;;  %5349 = vmatmul.mubr.bf16.gmra.mxu1 %v9536_v35  ;;  %v4839_v28 = vpop.f32.mrf.mxu0  ;;  %v4912_v26 = vpop.f32.mrf.mxu1 }
 0x23b   : > { %5372 = vmatpush1.bf16.msra.mxu0 %v7315_v9  ;;  %5445 = vmatpush1.bf16.msra.mxu1 %v7318_v16  ;;  %v9552_v49 = vadd.f32 %v4912_v26, %v4839_v28  ;;  %v7327_v9 = vld [vmem:[%s8819_s15 + $0x1e8] ss:$16 sps:$4 sm:$0xff]  }
 0x23c   : > { %5373 = vmatprep.subr.bf16.mxu0 %v7323_v37  ;;  %5446 = vmatprep.subr.bf16.mxu1 %v7326_v46  ;;  %v4841_v29 = vpop.f32.mrf.mxu0  ;;  %v4914_v36 = vpop.f32.mrf.mxu1  ;;  %v7330_v37 = vld [vmem:[%s8819_s15 + $0x3e8] ss:$16 sps:$4 sm:$0xff]   ;;  %v7335_v46 = vld [vmem:[%s8819_s15 + $0x1cc] ss:$16 sps:$4 sm:$0xff]  }
 0x23d   : > { %10442 = vst [vmem:[#allocation37_spill] sm:$0xff] %v9552_v49  ;;  %v9555_v35 = vadd.f32 %v4914_v36, %v4841_v29  ;;  %5391 = vmatprep.mubr.bf16.mxu0 %v8810_v4  ;;  %5464 = vmatprep.mubr.bf16.mxu1 %v8817_v7  ;;  %v7338_v4 = vld [vmem:[%s8819_s15 + $0x3cc] ss:$16 sps:$4 sm:$0xff]   ;;  %v7333_v26 = vld [vmem:[%s8819_s15 + $0x1c8] ss:$16 sps:$4 sm:$0xff]  }
 0x23e   : > { %v4843_v16 = vpop.f32.mrf.mxu0  ;;  %v4916_v17 = vpop.f32.mrf.mxu1  ;;  %v7336_v7 = vld [vmem:[%s8819_s15 + $0x3c8] ss:$16 sps:$4 sm:$0xff]   ;;  %v7341_v29 = vld [vmem:[%s8819_s15 + $0x1ac] ss:$16 sps:$4 sm:$0xff]  }
 0x23f   : > { %10443 = vst [vmem:[#allocation38_spill] sm:$0xff] %v9555_v35  ;;  %5374 = vmatpush1.bf16.msra.mxu0 %v7321_v2  ;;  %5447 = vmatpush1.bf16.msra.mxu1 %v7324_v40  ;;  %v9562_v28 = vadd.f32 %v4916_v17, %v4843_v16  ;;  %v7344_v2 = vld [vmem:[%s8819_s15 + $0x3ac] ss:$16 sps:$4 sm:$0xff]   ;;  %v7339_v40 = vld [vmem:[%s8819_s15 + $0x1a8] ss:$16 sps:$4 sm:$0xff]  }
 0x240   : > { %5375 = vmatprep.subr.bf16.mxu0 %v7329_v24  ;;  %5448 = vmatprep.subr.bf16.mxu1 %v7332_v34  ;;  %v7342_v17 = vld [vmem:[%s8819_s15 + $0x3a8] ss:$16 sps:$4 sm:$0xff]   ;;  %v7347_v24 = vld [vmem:[%s8819_s15 + $0x18c] ss:$16 sps:$4 sm:$0xff]  }
 0x241   : > { %10444 = vst [vmem:[#allocation39_spill] sm:$0xff] %v9562_v28  ;;  %v7350_v34 = vld [vmem:[%s8819_s15 + $0x38c] ss:$16 sps:$4 sm:$0xff]   ;;  %v7345_v36 = vld [vmem:[%s8819_s15 + $0x188] ss:$16 sps:$4 sm:$0xff]  }
 0x242   : > { %v7353_v16 = vld [vmem:[%s8819_s15 + $0x16c] ss:$16 sps:$4 sm:$0xff]   ;;  %v7453_v35 = vld [vmem:[%s8819_s15 + $0x548] ss:$16 sps:$4 sm:$0xff]  }
 0x243   : > { %5376 = vmatpush2.bf16.msra.mxu0 %v7327_v9  ;;  %5449 = vmatpush2.bf16.msra.mxu1 %v7330_v37  ;;  %v7348_v9 = vld [vmem:[%s8819_s15 + $0x388] ss:$16 sps:$4 sm:$0xff]   ;;  %v7356_v37 = vld [vmem:[%s8819_s15 + $0x36c] ss:$16 sps:$4 sm:$0xff]  }
 0x244   : > { %5377 = vmatprep.subr.bf16.mxu0 %v7335_v46  ;;  %5450 = vmatprep.subr.bf16.mxu1 %v7338_v4  ;;  %v7351_v46 = vld [vmem:[%s8819_s15 + $0x168] ss:$16 sps:$4 sm:$0xff]   ;;  %v7455_v28 = vld [vmem:[%s8819_s15 + $0x54c] ss:$16 sps:$4 sm:$0xff]  }
 0x245   : > { %v7354_v4 = vld [vmem:[%s8819_s15 + $0x368] ss:$16 sps:$4 sm:$0xff]   ;;  %v7473_v49 = vld [vmem:[%s8819_s15 + $0x8ec] ss:$16 sps:$4 sm:$0xff]  }
 0x247   : > { %5378 = vmatpush2.bf16.msra.mxu0 %v7333_v26  ;;  %5451 = vmatpush2.bf16.msra.mxu1 %v7336_v7  ;;  %v7359_v26 = vld [vmem:[%s8819_s15 + $0x14c] ss:$16 sps:$4 sm:$0xff]  }
 0x248   : > { %5379 = vmatprep.subr.bf16.mxu0 %v7341_v29  ;;  %5452 = vmatprep.subr.bf16.mxu1 %v7344_v2  ;;  %v7362_v7 = vld [vmem:[%s8819_s15 + $0x34c] ss:$16 sps:$4 sm:$0xff]   ;;  %v7357_v29 = vld [vmem:[%s8819_s15 + $0x148] ss:$16 sps:$4 sm:$0xff]  }
 0x249   : > { %v7360_v2 = vld [vmem:[%s8819_s15 + $0x348] ss:$16 sps:$4 sm:$0xff]  }
 0x24b   : > { %5380 = vmatpush2.bf16.msra.mxu0 %v7339_v40  ;;  %5453 = vmatpush2.bf16.msra.mxu1 %v7342_v17  ;;  %v7365_v40 = vld [vmem:[%s8819_s15 + $0x12c] ss:$16 sps:$4 sm:$0xff]  }
 0x24c   : > { %5381 = vmatprep.subr.bf16.mxu0 %v7347_v24  ;;  %5454 = vmatprep.subr.bf16.mxu1 %v7350_v34  ;;  %v7368_v17 = vld [vmem:[%s8819_s15 + $0x32c] ss:$16 sps:$4 sm:$0xff]   ;;  %v7363_v24 = vld [vmem:[%s8819_s15 + $0x128] ss:$16 sps:$4 sm:$0xff]  }
 0x24d   : > { %v7366_v34 = vld [vmem:[%s8819_s15 + $0x328] ss:$16 sps:$4 sm:$0xff]  }
 0x24f   : > { %5382 = vmatpush2.bf16.msra.mxu0 %v7345_v36  ;;  %5455 = vmatpush2.bf16.msra.mxu1 %v7348_v9  ;;  %v7371_v36 = vld [vmem:[%s8819_s15 + $0x10c] ss:$16 sps:$4 sm:$0xff]  }
 0x250   : > { %5383 = vmatprep.subr.bf16.mxu0 %v7353_v16  ;;  %5456 = vmatprep.subr.bf16.mxu1 %v7356_v37  ;;  %v7374_v9 = vld [vmem:[%s8819_s15 + $0x30c] ss:$16 sps:$4 sm:$0xff]   ;;  %v7369_v16 = vld [vmem:[%s8819_s15 + $0x108] ss:$16 sps:$4 sm:$0xff]  }
 0x251   : > { %v7372_v37 = vld [vmem:[%s8819_s15 + $0x308] ss:$16 sps:$4 sm:$0xff]  }
 0x253   : > { %5384 = vmatpush2.bf16.msra.mxu0 %v7351_v46  ;;  %5457 = vmatpush2.bf16.msra.mxu1 %v7354_v4  ;;  %v7377_v46 = vld [vmem:[%s8819_s15 + $0x4ec] ss:$16 sps:$4 sm:$0xff]  }
 0x254   : > { %5385 = vmatprep.subr.bf16.mxu0 %v7359_v26  ;;  %5458 = vmatprep.subr.bf16.mxu1 %v7362_v7  ;;  %v7380_v4 = vld [vmem:[%s8819_s15 + $0x6ec] ss:$16 sps:$4 sm:$0xff]   ;;  %v7375_v26 = vld [vmem:[%s8819_s15 + $0x4e8] ss:$16 sps:$4 sm:$0xff]  }
 0x255   : > { %v7378_v7 = vld [vmem:[%s8819_s15 + $0x6e8] ss:$16 sps:$4 sm:$0xff]  }
 0x257   : > { %5386 = vmatpush2.bf16.msra.mxu0 %v7357_v29  ;;  %5459 = vmatpush2.bf16.msra.mxu1 %v7360_v2  ;;  %v7383_v29 = vld [vmem:[%s8819_s15 + $0x4cc] ss:$16 sps:$4 sm:$0xff]  }
 0x258   : > { %5387 = vmatprep.subr.bf16.mxu0 %v7365_v40  ;;  %5460 = vmatprep.subr.bf16.mxu1 %v7368_v17  ;;  %v7386_v2 = vld [vmem:[%s8819_s15 + $0x6cc] ss:$16 sps:$4 sm:$0xff]   ;;  %v7381_v40 = vld [vmem:[%s8819_s15 + $0x4c8] ss:$16 sps:$4 sm:$0xff]  }
 0x259   : > { %v7384_v17 = vld [vmem:[%s8819_s15 + $0x6c8] ss:$16 sps:$4 sm:$0xff]  }
 0x25b   : > { %5388 = vmatpush2.bf16.msra.mxu0 %v7363_v24  ;;  %5461 = vmatpush2.bf16.msra.mxu1 %v7366_v34  ;;  %v9601_v24 = vpop.f32.mrf.mxu0  ;;  %v7389_v34 = vld [vmem:[%s8819_s15 + $0x4ac] ss:$16 sps:$4 sm:$0xff]  }
 0x25c   : > { %5389 = vmatprep.subr.bf16.mxu0 %v7371_v36  ;;  %5462 = vmatprep.subr.bf16.mxu1 %v7374_v9  ;;  %10445 = vst [vmem:[#allocation40_spill] sm:$0xff] %v9601_v24  ;;  %v7392_v36 = vld [vmem:[%s8819_s15 + $0x6ac] ss:$16 sps:$4 sm:$0xff]   ;;  %v7387_v9 = vld [vmem:[%s8819_s15 + $0x4a8] ss:$16 sps:$4 sm:$0xff]  }
 0x25d   : > { %v7459_v24 = vld [vmem:[%s8819_s15 + $0x528] ss:$16 sps:$4 sm:$0xff]  }
 0x25f   : > { %5390 = vmatpush2.bf16.msra.mxu0 %v7369_v16  ;;  %5463 = vmatpush2.bf16.msra.mxu1 %v7372_v37  ;;  %v7390_v16 = vld [vmem:[%s8819_s15 + $0x6a8] ss:$16 sps:$4 sm:$0xff]   ;;  %v7395_v37 = vld [vmem:[%s8819_s15 + $0x48c] ss:$16 sps:$4 sm:$0xff]  }
 0x260   : > { %5505 = vmatprep.subr.bf16.mxu0 %v7377_v46  ;;  %5578 = vmatprep.subr.bf16.mxu1 %v7380_v4  ;;  %v7398_v46 = vld [vmem:[%s8819_s15 + $0x68c] ss:$16 sps:$4 sm:$0xff]   ;;  %v7393_v4 = vld [vmem:[%s8819_s15 + $0x488] ss:$16 sps:$4 sm:$0xff]  }
 0x262   : > { %5392 = vmatmul.mubr.bf16.vlgmr.msra.gmra.mxu0 %v8808_v3  ;;  %5465 = vmatmul.mubr.bf16.vlgmr.msra.gmra.mxu1 %v8815_v6  ;;  %v9609_v3 = vpop.f32.mrf.mxu0  ;;  %v9611_v6 = vpop.f32.mrf.mxu1 }
 0x263   : > { %5506 = vmatpush1.bf16.msra.mxu0 %v7375_v26  ;;  %5579 = vmatpush1.bf16.msra.mxu1 %v7378_v7  ;;  %10446 = vst [vmem:[#allocation41_spill] sm:$0xff] %v9611_v6  ;;  %v7396_v26 = vld [vmem:[%s8819_s15 + $0x688] ss:$16 sps:$4 sm:$0xff]   ;;  %v7461_v6 = vld [vmem:[%s8819_s15 + $0x52c] ss:$16 sps:$4 sm:$0xff]  }
 0x264   : > { %5507 = vmatprep.subr.bf16.mxu0 %v7383_v29  ;;  %5580 = vmatprep.subr.bf16.mxu1 %v7386_v2  ;;  %v9617_v7 = vpop.f32.mrf.mxu1  ;;  %v7404_v29 = vld [vmem:[%s8819_s15 + $0x66c] ss:$16 sps:$4 sm:$0xff]   ;;  %v7399_v2 = vld [vmem:[%s8819_s15 + $0x468] ss:$16 sps:$4 sm:$0xff]  }
 0x265   : > { %5401 = vmatprep.mubr.bf16.mxu0 %v8905_v22  ;;  %5474 = vmatprep.mubr.bf16.mxu1 %v8907_v23  ;;  %v9619_v22 = vpop.f32.mrf.mxu0  ;;  %v7401_v23 = vld [vmem:[%s8819_s15 + $0x46c] ss:$16 sps:$4 sm:$0xff]  }
 0x267   : > { %5508 = vmatpush1.bf16.msra.mxu0 %v7381_v40  ;;  %5581 = vmatpush1.bf16.msra.mxu1 %v7384_v17  ;;  %v7402_v40 = vld [vmem:[%s8819_s15 + $0x668] ss:$16 sps:$4 sm:$0xff]   ;;  %v9629_v17 = vpop.f32.mrf.mxu1 }
 0x268   : > { %5509 = vmatprep.subr.bf16.mxu0 %v7389_v34  ;;  %5582 = vmatprep.subr.bf16.mxu1 %v7392_v36  ;;  %v7410_v34 = vld [vmem:[%s8819_s15 + $0x64c] ss:$16 sps:$4 sm:$0xff]   ;;  %v7405_v36 = vld [vmem:[%s8819_s15 + $0x448] ss:$16 sps:$4 sm:$0xff]  }
 0x26a   : > { %5402 = vmatmul.mubr.bf16.gmra.mxu0 %v8923_v32  ;;  %5475 = vmatmul.mubr.bf16.gmra.mxu1 %v8925_v33  ;;  %v9631_v32 = vpop.f32.mrf.mxu0  ;;  %v7407_v33 = vld [vmem:[%s8819_s15 + $0x44c] ss:$16 sps:$4 sm:$0xff]  }
 0x26b   : > { %5510 = vmatpush1.bf16.msra.mxu0 %v7387_v9  ;;  %5583 = vmatpush1.bf16.msra.mxu1 %v7390_v16  ;;  %v7408_v9 = vld [vmem:[%s8819_s15 + $0x648] ss:$16 sps:$4 sm:$0xff]   ;;  %v9637_v16 = vpop.f32.mrf.mxu1 }
 0x26c   : > { %5511 = vmatprep.subr.bf16.mxu0 %v7395_v37  ;;  %5584 = vmatprep.subr.bf16.mxu1 %v7398_v46  ;;  %v7416_v37 = vld [vmem:[%s8819_s15 + $0x62c] ss:$16 sps:$4 sm:$0xff]   ;;  %v7411_v46 = vld [vmem:[%s8819_s15 + $0x428] ss:$16 sps:$4 sm:$0xff]  }
 0x26d   : > { %5411 = vmatprep.mubr.bf16.mxu0 %v8937_v38  ;;  %5484 = vmatprep.mubr.bf16.mxu1 %v8939_v39  ;;  %v9639_v38 = vpop.f32.mrf.mxu0  ;;  %v7413_v39 = vld [vmem:[%s8819_s15 + $0x42c] ss:$16 sps:$4 sm:$0xff]  }
 0x26f   : > { %5512 = vmatpush1.bf16.msra.mxu0 %v7393_v4  ;;  %5585 = vmatpush1.bf16.msra.mxu1 %v7396_v26  ;;  %v7414_v4 = vld [vmem:[%s8819_s15 + $0x628] ss:$16 sps:$4 sm:$0xff]   ;;  %v9649_v26 = vpop.f32.mrf.mxu1 }
 0x270   : > { %5513 = vmatprep.subr.bf16.mxu0 %v7401_v23  ;;  %5586 = vmatprep.subr.bf16.mxu1 %v7404_v29  ;;  %v7419_v23 = vld [vmem:[%s8819_s15 + $0x40c] ss:$16 sps:$4 sm:$0xff]  }
 0x271   : > { %v7422_v29 = vld [vmem:[%s8819_s15 + $0x60c] ss:$16 sps:$4 sm:$0xff]  }
 0x272   : > { %5412 = vmatmul.mubr.bf16.gmra.mxu0 %v8956_v47  ;;  %5485 = vmatmul.mubr.bf16.gmra.mxu1 %v8958_v48  ;;  %v9651_v47 = vpop.f32.mrf.mxu0  ;;  %v9653_v48 = vpop.f32.mrf.mxu1 }
 0x273   : > { %5514 = vmatpush1.bf16.msra.mxu0 %v7399_v2  ;;  %5587 = vmatpush1.bf16.msra.mxu1 %v7402_v40 }
 0x274   : > { %5515 = vmatprep.subr.bf16.mxu0 %v7407_v33  ;;  %5588 = vmatprep.subr.bf16.mxu1 %v7410_v34  ;;  %v9657_v2 = vpop.f32.mrf.mxu0  ;;  %v9663_v40 = vpop.f32.mrf.mxu1  ;;  %v7425_v33 = vld [vmem:[%s8819_s15 + $0x5ec] ss:$16 sps:$4 sm:$0xff]  }
 0x275   : > { %5421 = vmatprep.mubr.bf16.mxu0 %v8969_v54  ;;  %5494 = vmatprep.mubr.bf16.mxu1 %v8971_v55  ;;  %v7417_v54 = vld [vmem:[%s8819_s15 + $0x408] ss:$16 sps:$4 sm:$0xff]   ;;  %v7428_v34 = vld [vmem:[%s8819_s15 + $0x7ec] ss:$16 sps:$4 sm:$0xff]  }
 0x276   : > { %v7420_v55 = vld [vmem:[%s8819_s15 + $0x608] ss:$16 sps:$4 sm:$0xff]  }
 0x277   : > { %5516 = vmatpush1.bf16.msra.mxu0 %v7405_v36  ;;  %5589 = vmatpush1.bf16.msra.mxu1 %v7408_v9  ;;  %v7426_v36 = vld [vmem:[%s8819_s15 + $0x7e8] ss:$16 sps:$4 sm:$0xff]   ;;  %v9673_v9 = vpop.f32.mrf.mxu1 }
 0x278   : > { %5517 = vmatprep.subr.bf16.mxu0 %v7413_v39  ;;  %5590 = vmatprep.subr.bf16.mxu1 %v7416_v37  ;;  %v7431_v39 = vld [vmem:[%s8819_s15 + $0x5cc] ss:$16 sps:$4 sm:$0xff]  }
 0x279   : > { %v7434_v37 = vld [vmem:[%s8819_s15 + $0x7cc] ss:$16 sps:$4 sm:$0xff]  }
 0x27a   : > { %5422 = vmatmul.mubr.bf16.gmra.mxu0 %v8984_v63  ;;  %5495 = vmatmul.mubr.bf16.gmra.mxu1 %v8986_v0  ;;  %v9669_v63 = vpop.f32.mrf.mxu0  ;;  %v7423_v0 = vld [vmem:[%s8819_s15 + $0x5e8] ss:$16 sps:$4 sm:$0xff]  }
 0x27b   : > { %5518 = vmatpush1.bf16.msra.mxu0 %v7411_v46  ;;  %5591 = vmatpush1.bf16.msra.mxu1 %v7414_v4  ;;  %v7432_v46 = vld [vmem:[%s8819_s15 + $0x7c8] ss:$16 sps:$4 sm:$0xff]   ;;  %v9681_v4 = vpop.f32.mrf.mxu1 }
 0x27c   : > { %5519 = vmatprep.subr.bf16.mxu0 %v7419_v23  ;;  %5592 = vmatprep.subr.bf16.mxu1 %v7422_v29  ;;  %v7437_v23 = vld [vmem:[%s8819_s15 + $0x5ac] ss:$16 sps:$4 sm:$0xff]  }
 0x27d   : > { %5537 = vmatprep.mubr.bf16.mxu0 %v9011_v10  ;;  %5610 = vmatprep.mubr.bf16.mxu1 %v9015_v11  ;;  %v9677_v10 = vpop.f32.mrf.mxu0  ;;  %v7429_v11 = vld [vmem:[%s8819_s15 + $0x5c8] ss:$16 sps:$4 sm:$0xff]   ;;  %v7440_v29 = vld [vmem:[%s8819_s15 + $0x7ac] ss:$16 sps:$4 sm:$0xff]  }
 0x27f   : > { %5520 = vmatpush1.bf16.msra.mxu0 %v7417_v54  ;;  %5593 = vmatpush1.bf16.msra.mxu1 %v7420_v55  ;;  %v9685_v54 = vpop.f32.mrf.mxu0  ;;  %v7435_v55 = vld [vmem:[%s8819_s15 + $0x5a8] ss:$16 sps:$4 sm:$0xff]  }
 0x280   : > { %5521 = vmatprep.subr.bf16.mxu0 %v7425_v33  ;;  %5594 = vmatprep.subr.bf16.mxu1 %v7428_v34  ;;  %v7438_v33 = vld [vmem:[%s8819_s15 + $0x7a8] ss:$16 sps:$4 sm:$0xff]   ;;  %v9689_v34 = vpop.f32.mrf.mxu1 }
 0x283   : > { %5522 = vmatpush2.bf16.msra.mxu0 %v7423_v0  ;;  %5595 = vmatpush2.bf16.msra.mxu1 %v7426_v36  ;;  %v7443_v0 = vld [vmem:[%s8819_s15 + $0x58c] ss:$16 sps:$4 sm:$0xff]  }
 0x284   : > { %5523 = vmatprep.subr.bf16.mxu0 %v7431_v39  ;;  %5596 = vmatprep.subr.bf16.mxu1 %v7434_v37  ;;  %v7446_v36 = vld [vmem:[%s8819_s15 + $0x78c] ss:$16 sps:$4 sm:$0xff]   ;;  %v9693_v39 = vpop.f32.mrf.mxu0  ;;  %v7441_v37 = vld [vmem:[%s8819_s15 + $0x588] ss:$16 sps:$4 sm:$0xff]  }
 0x287   : > { %5524 = vmatpush2.bf16.msra.mxu0 %v7429_v11  ;;  %5597 = vmatpush2.bf16.msra.mxu1 %v7432_v46  ;;  %v7444_v11 = vld [vmem:[%s8819_s15 + $0x788] ss:$16 sps:$4 sm:$0xff]   ;;  %v9697_v46 = vpop.f32.mrf.mxu1 }
 0x288   : > { %5525 = vmatprep.subr.bf16.mxu0 %v7437_v23  ;;  %5598 = vmatprep.subr.bf16.mxu1 %v7440_v29  ;;  %v7452_v23 = vld [vmem:[%s8819_s15 + $0x76c] ss:$16 sps:$4 sm:$0xff]   ;;  %v9701_v29 = vpop.f32.mrf.mxu0 }
 0x28b   : > { %5526 = vmatpush2.bf16.msra.mxu0 %v7435_v55  ;;  %5599 = vmatpush2.bf16.msra.mxu1 %v7438_v33  ;;  %v7450_v55 = vld [vmem:[%s8819_s15 + $0x768] ss:$16 sps:$4 sm:$0xff]   ;;  %v9705_v33 = vpop.f32.mrf.mxu1 }
 0x28c   : > { %5527 = vmatprep.subr.bf16.mxu0 %v7443_v0  ;;  %5600 = vmatprep.subr.bf16.mxu1 %v7446_v36  ;;  %10447 = vst [vmem:[#allocation42_spill] sm:$0xff] %v9705_v33  ;;  %v7458_v0 = vld [vmem:[%s8819_s15 + $0x74c] ss:$16 sps:$4 sm:$0xff]   ;;  %v9709_v36 = vpop.f32.mrf.mxu0 }
 0x28f   : > { %5528 = vmatpush2.bf16.msra.mxu0 %v7441_v37  ;;  %5601 = vmatpush2.bf16.msra.mxu1 %v7444_v11  ;;  %v7456_v37 = vld [vmem:[%s8819_s15 + $0x748] ss:$16 sps:$4 sm:$0xff]   ;;  %v9713_v11 = vpop.f32.mrf.mxu1 }
 0x290   : > { %5529 = vmatprep.subr.bf16.mxu0 %v7449_v60  ;;  %5602 = vmatprep.subr.bf16.mxu1 %v7452_v23  ;;  %10448 = vst [vmem:[#allocation43_spill] sm:$0xff] %v9713_v11  ;;  %v7464_v60 = vld [vmem:[%s8819_s15 + $0x72c] ss:$16 sps:$4 sm:$0xff]   ;;  %v9717_v23 = vpop.f32.mrf.mxu0 }
 0x291   : > { %10449 = vst [vmem:[#allocation44_spill] sm:$0xff] %v9717_v23  ;;  %v7467_v11 = vld [vmem:[%s8819_s15 + $0x50c] ss:$16 sps:$4 sm:$0xff]   ;;  %v7465_v23 = vld [vmem:[%s8819_s15 + $0x508] ss:$16 sps:$4 sm:$0xff]  }
 0x293   : > { %5530 = vmatpush2.bf16.msra.mxu0 %v7447_v14  ;;  %5603 = vmatpush2.bf16.msra.mxu1 %v7450_v55  ;;  %v7462_v14 = vld [vmem:[%s8819_s15 + $0x728] ss:$16 sps:$4 sm:$0xff]   ;;  %v9721_v55 = vpop.f32.mrf.mxu1 }
 0x294   : > { %5531 = vmatprep.subr.bf16.mxu0 %v7455_v28  ;;  %5604 = vmatprep.subr.bf16.mxu1 %v7458_v0  ;;  %10450 = vst [vmem:[#allocation45_spill] sm:$0xff] %v9721_v55  ;;  %v7470_v28 = vld [vmem:[%s8819_s15 + $0x70c] ss:$16 sps:$4 sm:$0xff]   ;;  %v9725_v0 = vpop.f32.mrf.mxu0 }
 0x295   : > { %10451 = vst [vmem:[#allocation46_spill] sm:$0xff] %v9725_v0  ;;  %v7476_v55 = vld [vmem:[%s8819_s15 + $0xaec] ss:$16 sps:$4 sm:$0xff]   ;;  %v7474_v0 = vld [vmem:[%s8819_s15 + $0xae8] ss:$16 sps:$4 sm:$0xff]  }
 0x297   : > { %5532 = vmatpush2.bf16.msra.mxu0 %v7453_v35  ;;  %5605 = vmatpush2.bf16.msra.mxu1 %v7456_v37  ;;  %v7468_v35 = vld [vmem:[%s8819_s15 + $0x708] ss:$16 sps:$4 sm:$0xff]   ;;  %v9729_v37 = vpop.f32.mrf.mxu1 }
 0x298   : > { %5533 = vmatprep.subr.bf16.mxu0 %v7461_v6  ;;  %5606 = vmatprep.subr.bf16.mxu1 %v7464_v60  ;;  %10452 = vst [vmem:[#allocation47_spill] sm:$0xff] %v9729_v37  ;;  %v9733_v6 = vpop.f32.mrf.mxu0  ;;  %v7471_v60 = vld [vmem:[%s8819_s15 + $0x8e8] ss:$16 sps:$4 sm:$0xff]   ;;  %v7482_v37 = vld [vmem:[%s8819_s15 + $0xacc] ss:$16 sps:$4 sm:$0xff]  }
 0x299   : > { %10453 = vst [vmem:[#allocation48_spill] sm:$0xff] %v9733_v6 }
 0x29b   : > { %5534 = vmatpush2.bf16.msra.mxu0 %v7459_v24  ;;  %5607 = vmatpush2.bf16.msra.mxu1 %v7462_v14  ;;  %v9737_v24 = vpop.f32.mrf.mxu1  ;;  %v7479_v14 = vld [vmem:[%s8819_s15 + $0x8cc] ss:$16 sps:$4 sm:$0xff]  }
 0x29c   : > { %5535 = vmatprep.subr.bf16.mxu0 %v7467_v11  ;;  %5608 = vmatprep.subr.bf16.mxu1 %v7470_v28  ;;  %10454 = vst [vmem:[#allocation49_spill] sm:$0xff] %v9737_v24  ;;  %v9741_v11 = vpop.f32.mrf.mxu0  ;;  %v7480_v28 = vld [vmem:[%s8819_s15 + $0xac8] ss:$16 sps:$4 sm:$0xff]   ;;  %v7488_v24 = vld [vmem:[%s8819_s15 + $0xaac] ss:$16 sps:$4 sm:$0xff]  }
 0x29d   : > { %10455 = vst [vmem:[#allocation50_spill] sm:$0xff] %v9741_v11  ;;  %v7536_v11 = vld [vmem:[%s8819_s15 + $0xbac] ss:$16 sps:$4 sm:$0xff]  }
 0x29f   : > { %5536 = vmatpush2.bf16.msra.mxu0 %v7465_v23  ;;  %5609 = vmatpush2.bf16.msra.mxu1 %v7468_v35  ;;  %v7477_v23 = vld [vmem:[%s8819_s15 + $0x8c8] ss:$16 sps:$4 sm:$0xff]   ;;  %v9747_v35 = vpop.f32.mrf.mxu1 }
 0x2a0   : > { %5651 = vmatprep.subr.bf16.mxu0 %v7473_v49  ;;  %5724 = vmatprep.subr.bf16.mxu1 %v7476_v55  ;;  %10456 = vst [vmem:[#allocation51_spill] sm:$0xff] %v9747_v35  ;;  %v7485_v55 = vld [vmem:[%s8819_s15 + $0x8ac] ss:$16 sps:$4 sm:$0xff]  }
 0x2a2   : > { %5538 = vmatmul.mubr.bf16.vlgmr.msra.gmra.mxu0 %v9066_v61  ;;  %5611 = vmatmul.mubr.bf16.vlgmr.msra.gmra.mxu1 %v9070_v62  ;;  %v9749_v49 = vpop.f32.mrf.mxu0  ;;  %v9755_v61 = vpop.f32.mrf.mxu1  ;;  %v7483_v62 = vld [vmem:[%s8819_s15 + $0x8a8] ss:$16 sps:$4 sm:$0xff]  }
 0x2a3   : > { %5652 = vmatpush1.bf16.msra.mxu0 %v7471_v60  ;;  %5725 = vmatpush1.bf16.msra.mxu1 %v7474_v0  ;;  %v7486_v0 = vld [vmem:[%s8819_s15 + $0xaa8] ss:$16 sps:$4 sm:$0xff]  }
 0x2a4   : > { %5653 = vmatprep.subr.bf16.mxu0 %v7479_v14  ;;  %5726 = vmatprep.subr.bf16.mxu1 %v7482_v37  ;;  %v9759_v60 = vpop.f32.mrf.mxu0  ;;  %v7491_v37 = vld [vmem:[%s8819_s15 + $0x88c] ss:$16 sps:$4 sm:$0xff]   ;;  %v9763_v35 = vpop.f32.mrf.mxu1 }
 0x2a5   : > { %5547 = vmatprep.mubr.bf16.mxu0 %v9081_v5  ;;  %5620 = vmatprep.mubr.bf16.mxu1 %v9083_v8  ;;  %v7494_v14 = vld [vmem:[%s8819_s15 + $0xa8c] ss:$16 sps:$4 sm:$0xff]   ;;  %v7489_v5 = vld [vmem:[%s8819_s15 + $0x888] ss:$16 sps:$4 sm:$0xff]  }
 0x2a6   : > { %v7492_v8 = vld [vmem:[%s8819_s15 + $0xa88] ss:$16 sps:$4 sm:$0xff]  }
 0x2a7   : > { %5654 = vmatpush1.bf16.msra.mxu0 %v7477_v23  ;;  %5727 = vmatpush1.bf16.msra.mxu1 %v7480_v28  ;;  %v9769_v23 = vpop.f32.mrf.mxu0  ;;  %v7500_v28 = vld [vmem:[%s8819_s15 + $0xa6c] ss:$16 sps:$4 sm:$0xff]  }
 0x2a8   : > { %5655 = vmatprep.subr.bf16.mxu0 %v7485_v55  ;;  %5728 = vmatprep.subr.bf16.mxu1 %v7488_v24  ;;  %v7497_v24 = vld [vmem:[%s8819_s15 + $0x86c] ss:$16 sps:$4 sm:$0xff]   ;;  %v7498_v55 = vld [vmem:[%s8819_s15 + $0xa68] ss:$16 sps:$4 sm:$0xff]  }
 0x2aa   : > { %5548 = vmatmul.mubr.bf16.gmra.mxu0 %v9096_v19  ;;  %5621 = vmatmul.mubr.bf16.gmra.mxu1 %v9098_v20  ;;  %v9775_v19 = vpop.f32.mrf.mxu1  ;;  %v7495_v20 = vld [vmem:[%s8819_s15 + $0x868] ss:$16 sps:$4 sm:$0xff]  }
 0x2ab   : > { %5656 = vmatpush1.bf16.msra.mxu0 %v7483_v62  ;;  %5729 = vmatpush1.bf16.msra.mxu1 %v7486_v0  ;;  %v9779_v62 = vpop.f32.mrf.mxu0  ;;  %v7503_v0 = vld [vmem:[%s8819_s15 + $0x84c] ss:$16 sps:$4 sm:$0xff]  }
 0x2ac   : > { %5657 = vmatprep.subr.bf16.mxu0 %v7491_v37  ;;  %5730 = vmatprep.subr.bf16.mxu1 %v7494_v14  ;;  %v7506_v37 = vld [vmem:[%s8819_s15 + $0xa4c] ss:$16 sps:$4 sm:$0xff]   ;;  %v9783_v14 = vpop.f32.mrf.mxu1 }
 0x2ad   : > { %5557 = vmatprep.mubr.bf16.mxu0 %v9113_v30  ;;  %5630 = vmatprep.mubr.bf16.mxu1 %v9115_v31  ;;  %v7501_v30 = vld [vmem:[%s8819_s15 + $0x848] ss:$16 sps:$4 sm:$0xff]  }
 0x2ae   : > { %v7504_v31 = vld [vmem:[%s8819_s15 + $0xa48] ss:$16 sps:$4 sm:$0xff]  }
 0x2af   : > { %5658 = vmatpush1.bf16.msra.mxu0 %v7489_v5  ;;  %5731 = vmatpush1.bf16.msra.mxu1 %v7492_v8  ;;  %v9789_v5 = vpop.f32.mrf.mxu0  ;;  %v9791_v8 = vpop.f32.mrf.mxu1 }
 0x2b0   : > { %5659 = vmatprep.subr.bf16.mxu0 %v7497_v24  ;;  %5732 = vmatprep.subr.bf16.mxu1 %v7500_v28  ;;  %v7509_v24 = vld [vmem:[%s8819_s15 + $0x82c] ss:$16 sps:$4 sm:$0xff]  }
 0x2b1   : > { %v7512_v28 = vld [vmem:[%s8819_s15 + $0xa2c] ss:$16 sps:$4 sm:$0xff]  }
 0x2b2   : > { %5558 = vmatmul.mubr.bf16.gmra.mxu0 %v9135_v44  ;;  %5631 = vmatmul.mubr.bf16.gmra.mxu1 %v9137_v45  ;;  %v7507_v44 = vld [vmem:[%s8819_s15 + $0x828] ss:$16 sps:$4 sm:$0xff]  }
 0x2b3   : > { %5660 = vmatpush1.bf16.msra.mxu0 %v7495_v20  ;;  %5733 = vmatpush1.bf16.msra.mxu1 %v7498_v55  ;;  %v7510_v45 = vld [vmem:[%s8819_s15 + $0xa28] ss:$16 sps:$4 sm:$0xff]   ;;  %v9799_v20 = vpop.f32.mrf.mxu0  ;;  %v9801_v55 = vpop.f32.mrf.mxu1 }
 0x2b4   : > { %5661 = vmatprep.subr.bf16.mxu0 %v7503_v0  ;;  %5734 = vmatprep.subr.bf16.mxu1 %v7506_v37  ;;  %v7515_v0 = vld [vmem:[%s8819_s15 + $0x80c] ss:$16 sps:$4 sm:$0xff]  }
 0x2b5   : > { %5567 = vmatprep.mubr.bf16.mxu0 %v9145_v52  ;;  %5640 = vmatprep.mubr.bf16.mxu1 %v9147_v53  ;;  %v7518_v37 = vld [vmem:[%s8819_s15 + $0xa0c] ss:$16 sps:$4 sm:$0xff]   ;;  %v7513_v52 = vld [vmem:[%s8819_s15 + $0x808] ss:$16 sps:$4 sm:$0xff]  }
 0x2b6   : > { %v7516_v53 = vld [vmem:[%s8819_s15 + $0xa08] ss:$16 sps:$4 sm:$0xff]  }
 0x2b7   : > { %5662 = vmatpush1.bf16.msra.mxu0 %v7501_v30  ;;  %5735 = vmatpush1.bf16.msra.mxu1 %v7504_v31  ;;  %v9809_v30 = vpop.f32.mrf.mxu0  ;;  %v9811_v31 = vpop.f32.mrf.mxu1 }
 0x2b8   : > { %5663 = vmatprep.subr.bf16.mxu0 %v7509_v24  ;;  %5736 = vmatprep.subr.bf16.mxu1 %v7512_v28  ;;  %v7521_v24 = vld [vmem:[%s8819_s15 + $0x9ec] ss:$16 sps:$4 sm:$0xff]  }
 0x2b9   : > { %v7524_v28 = vld [vmem:[%s8819_s15 + $0xbec] ss:$16 sps:$4 sm:$0xff]  }
 0x2ba   : > { %5568 = vmatmul.mubr.bf16.gmra.mxu0 %v9172_v13  ;;  %5641 = vmatmul.mubr.bf16.gmra.mxu1 %v9174_v1  ;;  %v7519_v13 = vld [vmem:[%s8819_s15 + $0x9e8] ss:$16 sps:$4 sm:$0xff]  }
 0x2bb   : > { %5664 = vmatpush1.bf16.msra.mxu0 %v7507_v44  ;;  %5737 = vmatpush1.bf16.msra.mxu1 %v7510_v45  ;;  %v7522_v1 = vld [vmem:[%s8819_s15 + $0xbe8] ss:$16 sps:$4 sm:$0xff]   ;;  %v9819_v44 = vpop.f32.mrf.mxu0  ;;  %v9821_v45 = vpop.f32.mrf.mxu1 }
 0x2bc   : > { %5665 = vmatprep.subr.bf16.mxu0 %v7515_v0  ;;  %5738 = vmatprep.subr.bf16.mxu1 %v7518_v37  ;;  %10457 = vst [vmem:[#allocation52_spill] sm:$0xff] %v9821_v45  ;;  %v7527_v0 = vld [vmem:[%s8819_s15 + $0x9cc] ss:$16 sps:$4 sm:$0xff]  }
 0x2bd   : > { %5683 = vmatprep.mubr.bf16.mxu0 %v9187_v18  ;;  %5756 = vmatprep.mubr.bf16.mxu1 %v9191_v21  ;;  %v7530_v37 = vld [vmem:[%s8819_s15 + $0xbcc] ss:$16 sps:$4 sm:$0xff]   ;;  %v7525_v18 = vld [vmem:[%s8819_s15 + $0x9c8] ss:$16 sps:$4 sm:$0xff]  }
 0x2be   : > { %v7528_v21 = vld [vmem:[%s8819_s15 + $0xbc8] ss:$16 sps:$4 sm:$0xff]  }
 0x2bf   : > { %5666 = vmatpush1.bf16.msra.mxu0 %v7513_v52  ;;  %5739 = vmatpush1.bf16.msra.mxu1 %v7516_v53  ;;  %v9827_v52 = vpop.f32.mrf.mxu0  ;;  %v9829_v53 = vpop.f32.mrf.mxu1 }
 0x2c0   : > { %5667 = vmatprep.subr.bf16.mxu0 %v7521_v24  ;;  %5740 = vmatprep.subr.bf16.mxu1 %v7524_v28  ;;  %10458 = vst [vmem:[#allocation53_spill] sm:$0xff] %v9829_v53  ;;  %v7533_v24 = vld [vmem:[%s8819_s15 + $0x9ac] ss:$16 sps:$4 sm:$0xff]   ;;  %v7531_v28 = vld [vmem:[%s8819_s15 + $0x9a8] ss:$16 sps:$4 sm:$0xff]  }
 0x2c1   : > { %v9837_v6 = vpop.f32.mrf.mxu1  ;;  %v7542_v53 = vld [vmem:[%s8819_s15 + $0xb8c] ss:$16 sps:$4 sm:$0xff]  }
 0x2c2   : > { %10460 = vst [vmem:[#allocation55_spill] sm:$0xff] %v9837_v6  ;;  %v7548_v6 = vld [vmem:[%s8819_s15 + $0xb6c] ss:$16 sps:$4 sm:$0xff]  }
 0x2c3   : > { %5668 = vmatpush2.bf16.msra.mxu0 %v7519_v13  ;;  %5741 = vmatpush2.bf16.msra.mxu1 %v7522_v1  ;;  %v7534_v13 = vld [vmem:[%s8819_s15 + $0xba8] ss:$16 sps:$4 sm:$0xff]   ;;  %v9835_v1 = vpop.f32.mrf.mxu0  ;;  %v9845_v45 = vpop.f32.mrf.mxu1 }
 0x2c4   : > { %5669 = vmatprep.subr.bf16.mxu0 %v7527_v0  ;;  %5742 = vmatprep.subr.bf16.mxu1 %v7530_v37  ;;  %10459 = vst [vmem:[#allocation54_spill] sm:$0xff] %v9835_v1  ;;  %v7539_v0 = vld [vmem:[%s8819_s15 + $0x98c] ss:$16 sps:$4 sm:$0xff]   ;;  %v7537_v37 = vld [vmem:[%s8819_s15 + $0x988] ss:$16 sps:$4 sm:$0xff]   ;;  %10462 = vst [vmem:[#allocation57_spill] sm:$0xff] %v9845_v45 }
 0x2c5   : > { %v9853_v1 = vpop.f32.mrf.mxu1  ;;  %v7551_v45 = vld [vmem:[%s8819_s15 + $0x94c] ss:$16 sps:$4 sm:$0xff]  }
 0x2c6   : > { %10464 = vst [vmem:[#allocation59_spill] sm:$0xff] %v9853_v1  ;;  %v7560_v1 = vld [vmem:[%s8819_s15 + $0xb2c] ss:$16 sps:$4 sm:$0xff]  }
 0x2c7   : > { %5670 = vmatpush2.bf16.msra.mxu0 %v7525_v18  ;;  %5743 = vmatpush2.bf16.msra.mxu1 %v7528_v21  ;;  %v7540_v18 = vld [vmem:[%s8819_s15 + $0xb88] ss:$16 sps:$4 sm:$0xff]   ;;  %v9843_v21 = vpop.f32.mrf.mxu0 }
 0x2c8   : > { %5671 = vmatprep.subr.bf16.mxu0 %v7533_v24  ;;  %5744 = vmatprep.subr.bf16.mxu1 %v7536_v11  ;;  %10461 = vst [vmem:[#allocation56_spill] sm:$0xff] %v9843_v21  ;;  %v7545_v24 = vld [vmem:[%s8819_s15 + $0x96c] ss:$16 sps:$4 sm:$0xff]   ;;  %v7543_v11 = vld [vmem:[%s8819_s15 + $0x968] ss:$16 sps:$4 sm:$0xff]  }
 0x2c9   : > { %v7552_v21 = vld [vmem:[%s8819_s15 + $0xb48] ss:$16 sps:$4 sm:$0xff]  }
 0x2cb   : > { %5672 = vmatpush2.bf16.msra.mxu0 %v7531_v28  ;;  %5745 = vmatpush2.bf16.msra.mxu1 %v7534_v13  ;;  %v7546_v28 = vld [vmem:[%s8819_s15 + $0xb68] ss:$16 sps:$4 sm:$0xff]   ;;  %v9851_v13 = vpop.f32.mrf.mxu0 }
 0x2cc   : > { %5673 = vmatprep.subr.bf16.mxu0 %v7539_v0  ;;  %5746 = vmatprep.subr.bf16.mxu1 %v7542_v53  ;;  %10463 = vst [vmem:[#allocation58_spill] sm:$0xff] %v9851_v13  ;;  %v7554_v0 = vld [vmem:[%s8819_s15 + $0xb4c] ss:$16 sps:$4 sm:$0xff]   ;;  %v7549_v53 = vld [vmem:[%s8819_s15 + $0x948] ss:$16 sps:$4 sm:$0xff]  }
 0x2cd   : > { %v7557_v13 = vld [vmem:[%s8819_s15 + $0x92c] ss:$16 sps:$4 sm:$0xff]  }
 0x2cf   : > { %5674 = vmatpush2.bf16.msra.mxu0 %v7537_v37  ;;  %5747 = vmatpush2.bf16.msra.mxu1 %v7540_v18  ;;  %v9859_v37 = vpop.f32.mrf.mxu0  ;;  %v9861_v18 = vpop.f32.mrf.mxu1 }
 0x2d0   : > { %5675 = vmatprep.subr.bf16.mxu0 %v7545_v24  ;;  %5748 = vmatprep.subr.bf16.mxu1 %v7548_v6  ;;  %10465 = vst [vmem:[#allocation60_spill] sm:$0xff] %v9861_v18  ;;  %v4956_v6 = vadd.f32 %v9609_v3, %v9441_v15  ;;  %v7555_v24 = vld [vmem:[%s8819_s15 + $0x928] ss:$16 sps:$4 sm:$0xff]   ;;  %v4958_v18 = vadd.f32 %v9619_v22, %v9448_v51  ;;  %v7569_v51 = vld [vmem:[%s8819_s15 + $0xcec] ss:$16 sps:$4 sm:$0xff]  }
 0x2d1   : > { %v9871_v33 = vpop.f32.mrf.mxu1  ;;  %v4960_v15 = vadd.f32 %v9631_v32, %v9466_v42  ;;  %v4889_v3 = vadd.f32 %v9472_v25, %v9470_v59  ;;  %v7572_v22 = vld [vmem:[%s8819_s15 + $0xeec] ss:$16 sps:$4 sm:$0xff]   ;;  %v4966_v32 = vadd.f32 %v9651_v47, %v9485_v12 }
 0x2d2   : > { %10466 = vst [vmem:[#allocation61_spill] sm:$0xff] %v9871_v33  ;;  %v5031_v42 = vadd.f32 %v9629_v17, %v4958_v18  ;;  %v4968_v17 = vadd.f32 %v9657_v2, %v9496_v27  ;;  %v7578_v12 = vld [vmem:[%s8819_s15 + $0xecc] ss:$16 sps:$4 sm:$0xff]   ;;  %v4899_v27 = vadd.f32 %v9515_v56, %v9513_v43  ;;  %v7573_v43 = vld [vmem:[%s8819_s15 + $0xcc8] ss:$16 sps:$4 sm:$0xff]  }
 0x2d3   : > { %5676 = vmatpush2.bf16.msra.mxu0 %v7543_v11  ;;  %5749 = vmatpush2.bf16.msra.mxu1 %v7546_v28  ;;  %v7558_v11 = vld [vmem:[%s8819_s15 + $0xb28] ss:$16 sps:$4 sm:$0xff]   ;;  %v9869_v28 = vpop.f32.mrf.mxu0  ;;  %v9886_v33 = vpop.f32.mrf.mxu1  ;;  %v4962_v59 = vadd.f32 %v9639_v38, %v4889_v3  ;;  %v5039_v2 = vadd.f32 %v9653_v48, %v4966_v32  ;;  %v10468_v3 = vld [vmem:[#allocation5_spill] sm:$0xff] }
 0x2d4   : > { %5677 = vmatprep.subr.bf16.mxu0 %v7551_v45  ;;  %5750 = vmatprep.subr.bf16.mxu1 %v7554_v0  ;;  %v7563_v45 = vld [vmem:[%s8819_s15 + $0x90c] ss:$16 sps:$4 sm:$0xff]   ;;  %v7576_v56 = vld [vmem:[%s8819_s15 + $0xec8] ss:$16 sps:$4 sm:$0xff]   ;;  %v5041_v48 = vadd.f32 %v9663_v40, %v4968_v17 }
 0x2d5   : > { %v7566_v0 = vld [vmem:[%s8819_s15 + $0xb0c] ss:$16 sps:$4 sm:$0xff]   ;;  %v5035_v47 = vadd.f32 %v9649_v26, %v4962_v59 }
 0x2d6   : > { %v10471_v40 = vld [vmem:[#allocation8_spill] sm:$0xff] }
 0x2d7   : > { %5678 = vmatpush2.bf16.msra.mxu0 %v7549_v53  ;;  %5751 = vmatpush2.bf16.msra.mxu1 %v7552_v21  ;;  %v5029_v21 = vadd.f32 %v9617_v7, %v4956_v6  ;;  %v7561_v53 = vld [vmem:[%s8819_s15 + $0x908] ss:$16 sps:$4 sm:$0xff]   ;;  %v5033_v7 = vadd.f32 %v9637_v16, %v4960_v15  ;;  %v5104_v6 = vadd.f32 %v9759_v60, %v5031_v42  ;;  %v7575_v16 = vld [vmem:[%s8819_s15 + $0xccc] ss:$16 sps:$4 sm:$0xff]  }
 0x2d8   : > { %5679 = vmatprep.subr.bf16.mxu0 %v7557_v13  ;;  %5752 = vmatprep.subr.bf16.mxu1 %v7560_v1  ;;  %v7564_v13 = vld [vmem:[%s8819_s15 + $0xb08] ss:$16 sps:$4 sm:$0xff]   ;;  %v9884_v1 = vpop.f32.mrf.mxu0  ;;  %v7581_v42 = vld [vmem:[%s8819_s15 + $0xcac] ss:$16 sps:$4 sm:$0xff]  }
 0x2d9   : > { %v5102_v25 = vadd.f32 %v9749_v49, %v5029_v21  ;;  %v5106_v38 = vadd.f32 %v9769_v23, %v5033_v7  ;;  %v9904_v49 = vpop.f32.mrf.mxu1  ;;  %v10467_v23 = vld [vmem:[#allocation31_spill] sm:$0xff]  ;;  %v10469_v21 = vld [vmem:[#allocation6_spill] sm:$0xff]  ;;  %v5177_v26 = vadd.f32 %v9763_v35, %v5104_v6  ;;  %v5114_v6 = vadd.f32 %v9799_v20, %v5041_v48 }
 0x2da   : > { %v9902_v18 = vpop.f32.mrf.mxu0  ;;  %v7584_v35 = vld [vmem:[%s8819_s15 + $0xeac] ss:$16 sps:$4 sm:$0xff]   ;;  %v10470_v7 = vld [vmem:[#allocation7_spill] sm:$0xff]  ;;  %v4978_v20 = vadd.f32 %v9693_v39, %v9531_v57 }
 0x2db   : > { %5680 = vmatpush2.bf16.msra.mxu0 %v7555_v24  ;;  %5753 = vmatpush2.bf16.msra.mxu1 %v7558_v11  ;;  %v7567_v24 = vld [vmem:[%s8819_s15 + $0xce8] ss:$16 sps:$4 sm:$0xff]   ;;  %v5175_v60 = vadd.f32 %v9755_v61, %v5102_v25  ;;  %v5108_v61 = vadd.f32 %v9779_v62, %v5035_v47  ;;  %v5112_v62 = vadd.f32 %v9789_v5, %v5039_v2 }
 0x2dc   : > { %5681 = vmatprep.subr.bf16.mxu0 %v7563_v45  ;;  %5754 = vmatprep.subr.bf16.mxu1 %v7566_v0  ;;  %v7570_v11 = vld [vmem:[%s8819_s15 + $0xee8] ss:$16 sps:$4 sm:$0xff]   ;;  %v4970_v45 = vadd.f32 %v9669_v63, %v10467_v23  ;;  %v4972_v63 = vadd.f32 %v9677_v10, %v4899_v27  ;;  %v7590_v27 = vld [vmem:[%s8819_s15 + $0xe8c] ss:$16 sps:$4 sm:$0xff]   ;;  %v5187_v39 = vadd.f32 %v9801_v55, %v5114_v6 }
 0x2dd   : > { %v5181_v17 = vadd.f32 %v9783_v14, %v5108_v61  ;;  %v5185_v23 = vadd.f32 %v9791_v8, %v5112_v62  ;;  %v10482_v6 = vld [vmem:[#allocation40_spill] sm:$0xff] }
 0x2de   : > { %v5043_v10 = vadd.f32 %v9673_v9, %v4970_v45  ;;  %v7579_v9 = vld [vmem:[%s8819_s15 + $0xca8] ss:$16 sps:$4 sm:$0xff]   ;;  %v5045_v2 = vadd.f32 %v9681_v4, %v4972_v63 }
 0x2df   : > { %5682 = vmatpush2.bf16.msra.mxu0 %v7561_v53  ;;  %5755 = vmatpush2.bf16.msra.mxu1 %v7564_v13  ;;  %v5179_v13 = vadd.f32 %v9775_v19, %v5106_v38  ;;  %v10472_v19 = vld [vmem:[#allocation34_spill] sm:$0xff] }
 0x2e0   : > { %5797 = vmatprep.subr.bf16.mxu0 %v7569_v51  ;;  %5870 = vmatprep.subr.bf16.mxu1 %v7572_v22  ;;  %v4976_v32 = vadd.f32 %v9685_v54, %v10472_v19  ;;  %v4909_v54 = vadd.f32 %v9545_v41, %v9543_v58  ;;  %v5116_v14 = vadd.f32 %v9809_v30, %v5043_v10  ;;  %v7591_v19 = vld [vmem:[%s8819_s15 + $0xc68] ss:$16 sps:$4 sm:$0xff]  }
 0x2e1   : > { %v4980_v41 = vadd.f32 %v9701_v29, %v9540_v50  ;;  %v5118_v4 = vadd.f32 %v9819_v44, %v5045_v2  ;;  %v7588_v50 = vld [vmem:[%s8819_s15 + $0xe88] ss:$16 sps:$4 sm:$0xff]   ;;  %v5051_v29 = vadd.f32 %v9697_v46, %v4978_v20  ;;  %v7593_v44 = vld [vmem:[%s8819_s15 + $0xc6c] ss:$16 sps:$4 sm:$0xff]  }
 0x2e2   : > { %v5247_v0 = vpop.f32.mrf.mxu0  ;;  %v5320_v15 = vpop.f32.mrf.mxu1  ;;  %5684 = vmatmul.mubr.bf16.vlgmr.msra.gmra.mxu0 %v10468_v3  ;;  %5757 = vmatmul.mubr.bf16.vlgmr.msra.gmra.mxu1 %v10469_v21  ;;  %v5049_v57 = vadd.f32 %v9689_v34, %v4976_v32  ;;  %v10474_v3 = vld [vmem:[#allocation10_spill] sm:$0xff]  ;;  %v4982_v55 = vadd.f32 %v9709_v36, %v4909_v54  ;;  %v10476_v46 = vld [vmem:[#allocation12_spill] sm:$0xff] }
 0x2e3   : > { %v5248_v53 = vadd.f32 %v5247_v0, %v5175_v60  ;;  %5798 = vmatpush1.bf16.msra.mxu0 %v7567_v24  ;;  %5871 = vmatpush1.bf16.msra.mxu1 %v7570_v11  ;;  %v7587_v60 = vld [vmem:[%s8819_s15 + $0xc8c] ss:$16 sps:$4 sm:$0xff]   ;;  %v10473_v0 = vld [vmem:[#allocation9_spill] sm:$0xff]  ;;  %v7585_v34 = vld [vmem:[%s8819_s15 + $0xc88] ss:$16 sps:$4 sm:$0xff]  }
 0x2e4   : > { %v5249_v51 = vpop.f32.mrf.mxu0  ;;  %v5322_v22 = vpop.f32.mrf.mxu1  ;;  %5799 = vmatprep.subr.bf16.mxu0 %v7575_v16  ;;  %5872 = vmatprep.subr.bf16.mxu1 %v7578_v12  ;;  %v7582_v16 = vld [vmem:[%s8819_s15 + $0xea8] ss:$16 sps:$4 sm:$0xff]  }
 0x2e5   : > { %v5321_v59 = vadd.f32 %v5320_v15, %v5248_v53  ;;  %v5250_v25 = vadd.f32 %v5249_v51, %v5177_v26  ;;  %5693 = vmatprep.mubr.bf16.mxu0 %v10470_v7  ;;  %5766 = vmatprep.mubr.bf16.mxu1 %v10471_v40  ;;  %v5189_v26 = vadd.f32 %v9811_v31, %v5116_v14  ;;  %v10477_v36 = vld [vmem:[#allocation42_spill] sm:$0xff]  ;;  %v10478_v51 = vld [vmem:[#allocation37_spill] sm:$0xff]  ;;  %v10481_v7 = vld [vmem:[#allocation52_spill] sm:$0xff] }
 0x2e6   : > { %v5251_v24 = vpop.f32.mrf.mxu0  ;;  %v5324_v11 = vpop.f32.mrf.mxu1  ;;  %v5053_v31 = vadd.f32 %v10477_v36, %v4980_v41  ;;  %v7594_v32 = vld [vmem:[%s8819_s15 + $0xe68] ss:$16 sps:$4 sm:$0xff]   ;;  %v7599_v14 = vld [vmem:[%s8819_s15 + $0xc4c] ss:$16 sps:$4 sm:$0xff]   ;;  %v10490_v41 = vld [vmem:[#allocation39_spill] sm:$0xff] }
 0x2e7   : > { %6042 = vst [vmem:[%s9939_s9] sm:$0xff] %v5321_v59  ;;  %v5323_v5 = vadd.f32 %v5322_v22, %v5250_v25  ;;  %v5252_v38 = vadd.f32 %v5251_v24, %v5179_v13  ;;  %5800 = vmatpush1.bf16.msra.mxu0 %v7573_v43  ;;  %5873 = vmatpush1.bf16.msra.mxu1 %v7576_v56  ;;  %v7596_v43 = vld [vmem:[%s8819_s15 + $0xe6c] ss:$16 sps:$4 sm:$0xff]   ;;  %v10475_v13 = vld [vmem:[#allocation11_spill] sm:$0xff]  ;;  %v10483_v24 = vld [vmem:[#allocation41_spill] sm:$0xff] }
 0x2e8   : > { %v5253_v12 = vpop.f32.mrf.mxu0  ;;  %v5326_v47 = vpop.f32.mrf.mxu1  ;;  %5801 = vmatprep.subr.bf16.mxu0 %v7581_v42  ;;  %5874 = vmatprep.subr.bf16.mxu1 %v7584_v35  ;;  %v5122_v56 = vadd.f32 %v9827_v52, %v5049_v57  ;;  %v10479_v22 = vld [vmem:[#allocation44_spill] sm:$0xff]  ;;  %v10480_v35 = vld [vmem:[#allocation54_spill] sm:$0xff]  ;;  %v5191_v52 = vadd.f32 %v10481_v7, %v5118_v4  ;;  %v10493_v4 = vld [vmem:[#allocation13_spill] sm:$0xff] }
 0x2e9   : > { %6043 = vst [vmem:[%s9939_s9 + $0x8] sm:$0xff] %v5323_v5  ;;  %v5325_v45 = vadd.f32 %v5324_v11, %v5252_v38  ;;  %v5254_v58 = vadd.f32 %v5253_v12, %v5181_v17  ;;  %v4986_v42 = vadd.f32 %v10479_v22, %v10478_v51  ;;  %v5124_v62 = vadd.f32 %v10480_v35, %v5051_v29  ;;  %v10484_v17 = vld [vmem:[#allocation38_spill] sm:$0xff]  ;;  %v10499_v35 = vld [vmem:[#allocation15_spill] sm:$0xff] }
 0x2ea   : > { %v5257_v30 = vpop.f32.mrf.mxu0  ;;  %5694 = vmatmul.mubr.bf16.gmra.mxu0 %v10473_v0  ;;  %v5330_v15 = vpop.f32.mrf.mxu1  ;;  %5767 = vmatmul.mubr.bf16.gmra.mxu1 %v10474_v3  ;;  %v4919_v11 = vadd.f32 %v10483_v24, %v10482_v6  ;;  %v10485_v5 = vld [vmem:[#allocation46_spill] sm:$0xff]  ;;  %v10492_v0 = vld [vmem:[#allocation55_spill] sm:$0xff] }
 0x2eb   : > { %6046 = vst [vmem:[%s9939_s9 + $0x20] sm:$0xff] %v5325_v45  ;;  %v5327_v8 = vadd.f32 %v5326_v47, %v5254_v58  ;;  %v5258_v21 = vadd.f32 %v5257_v30, %v5185_v23  ;;  %5802 = vmatpush1.bf16.msra.mxu0 %v7579_v9  ;;  %5875 = vmatpush1.bf16.msra.mxu1 %v7582_v16  ;;  %v10486_v9 = vld [vmem:[#allocation56_spill] sm:$0xff]  ;;  %v10487_v47 = vld [vmem:[#allocation43_spill] sm:$0xff]  ;;  %v10489_v58 = vld [vmem:[#allocation45_spill] sm:$0xff] }
 0x2ec   : > { %v5259_v61 = vpop.f32.mrf.mxu0  ;;  %v5332_v53 = vpop.f32.mrf.mxu1  ;;  %5803 = vmatprep.subr.bf16.mxu0 %v7587_v60  ;;  %5876 = vmatprep.subr.bf16.mxu1 %v7590_v27  ;;  %v4988_v38 = vadd.f32 %v10485_v5, %v10484_v17  ;;  %v5126_v16 = vadd.f32 %v10486_v9, %v5053_v31  ;;  %v7602_v12 = vld [vmem:[%s8819_s15 + $0xe4c] ss:$16 sps:$4 sm:$0xff]   ;;  %v5055_v60 = vadd.f32 %v10487_v47, %v4982_v55  ;;  %v10488_v27 = vld [vmem:[#allocation53_spill] sm:$0xff]  ;;  %v7603_v6 = vld [vmem:[%s8819_s15 + $0xc28] ss:$16 sps:$4 sm:$0xff]  }
 0x2ed   : > { %6047 = vst [vmem:[%s9939_s9 + $0x28] sm:$0xff] %v5327_v8  ;;  %v5260_v48 = vadd.f32 %v5259_v61, %v5187_v39  ;;  %v5331_v63 = vadd.f32 %v5330_v15, %v5258_v21  ;;  %5703 = vmatprep.mubr.bf16.mxu0 %v10475_v13  ;;  %5776 = vmatprep.mubr.bf16.mxu1 %v10476_v46  ;;  %v10491_v39 = vld [vmem:[#allocation48_spill] sm:$0xff]  ;;  %v10494_v21 = vld [vmem:[#allocation14_spill] sm:$0xff]  ;;  %v10505_v47 = vld [vmem:[#allocation61_spill] sm:$0xff] }
 0x2ee   : > { %v5261_v59 = vpop.f32.mrf.mxu0  ;;  %v5334_v25 = vpop.f32.mrf.mxu1  ;;  %v5195_v2 = vadd.f32 %v10488_v27, %v5122_v56  ;;  %v5059_v57 = vadd.f32 %v10489_v58, %v4986_v42  ;;  %v4990_v30 = vadd.f32 %v10491_v39, %v10490_v41  ;;  %v5197_v15 = vadd.f32 %v10492_v0, %v5124_v62  ;;  %v7600_v61 = vld [vmem:[%s8819_s15 + $0xe48] ss:$16 sps:$4 sm:$0xff]   ;;  %v7605_v36 = vld [vmem:[%s8819_s15 + $0xc2c] ss:$16 sps:$4 sm:$0xff]  }
 0x2ef   : > { %6050 = vst [vmem:[%s9939_s9 + $0x40] sm:$0xff] %v5331_v63  ;;  %v5262_v40 = vadd.f32 %v5261_v59, %v5189_v26  ;;  %v5333_v10 = vadd.f32 %v5332_v53, %v5260_v48  ;;  %5804 = vmatpush1.bf16.msra.mxu0 %v7585_v34  ;;  %5877 = vmatpush1.bf16.msra.mxu1 %v7588_v50  ;;  %v10495_v34 = vld [vmem:[#allocation58_spill] sm:$0xff]  ;;  %v10496_v53 = vld [vmem:[#allocation47_spill] sm:$0xff]  ;;  %v10498_v48 = vld [vmem:[#allocation57_spill] sm:$0xff] }
 0x2f0   : > { %v5263_v54 = vpop.f32.mrf.mxu0  ;;  %v5336_v20 = vpop.f32.mrf.mxu1  ;;  %5805 = vmatprep.subr.bf16.mxu0 %v7593_v44  ;;  %5878 = vmatprep.subr.bf16.mxu1 %v7596_v43  ;;  %v5128_v50 = vadd.f32 %v10495_v34, %v5055_v60  ;;  %v7597_v26 = vld [vmem:[%s8819_s15 + $0xc48] ss:$16 sps:$4 sm:$0xff]   ;;  %v5061_v44 = vadd.f32 %v10496_v53, %v4988_v38  ;;  %v5199_v63 = vadd.f32 %v10498_v48, %v5126_v16  ;;  %v7608_v31 = vld [vmem:[%s8819_s15 + $0xe2c] ss:$16 sps:$4 sm:$0xff]   ;;  %v10501_v59 = vld [vmem:[#allocation49_spill] sm:$0xff] }
 0x2f1   : > { %6051 = vst [vmem:[%s9939_s9 + $0x48] sm:$0xff] %v5333_v10  ;;  %v5264_v23 = vadd.f32 %v5263_v54, %v5191_v52  ;;  %v5335_v45 = vadd.f32 %v5334_v25, %v5262_v40  ;;  %v10497_v43 = vld [vmem:[#allocation50_spill] sm:$0xff]  ;;  %v5132_v51 = vadd.f32 %v9859_v37, %v5059_v57  ;;  %v10500_v62 = vld [vmem:[#allocation16_spill] sm:$0xff]  ;;  %v5063_v25 = vadd.f32 %v10501_v59, %v4990_v30  ;;  %v10502_v10 = vld [vmem:[#allocation59_spill] sm:$0xff] }
 0x2f2   : > { %v5267_v3 = vpop.f32.mrf.mxu0  ;;  %5704 = vmatmul.mubr.bf16.gmra.mxu0 %v10493_v4  ;;  %v5340_v8 = vpop.f32.mrf.mxu1  ;;  %5777 = vmatmul.mubr.bf16.gmra.mxu1 %v10494_v21  ;;  %v4992_v56 = vadd.f32 %v10497_v43, %v4919_v11  ;;  %v5134_v7 = vadd.f32 %v9869_v28, %v5061_v44  ;;  %v7606_v24 = vld [vmem:[%s8819_s15 + $0xe28] ss:$16 sps:$4 sm:$0xff]   ;;  %v10503_v11 = vld [vmem:[#allocation51_spill] sm:$0xff]  ;;  %v7611_v28 = vld [vmem:[%s8819_s15 + $0xc0c] ss:$16 sps:$4 sm:$0xff]  }
 0x2f3   : > { %6054 = vst [vmem:[%s9939_s9 + $0x60] sm:$0xff] %v5335_v45  ;;  %v5268_v29 = vadd.f32 %v5267_v3, %v5195_v2  ;;  %v5337_v55 = vadd.f32 %v5336_v20, %v5264_v23  ;;  %5806 = vmatpush1.bf16.msra.mxu0 %v7591_v19  ;;  %5879 = vmatpush1.bf16.msra.mxu1 %v7594_v32  ;;  %v7614_v9 = vld [vmem:[%s8819_s15 + $0xe0c] ss:$16 sps:$4 sm:$0xff]   ;;  %v10506_v2 = vld [vmem:[#allocation17_spill] sm:$0xff]  ;;  %v7609_v41 = vld [vmem:[%s8819_s15 + $0xc08] ss:$16 sps:$4 sm:$0xff]  }
 0x2f4   : > { %v5269_v13 = vpop.f32.mrf.mxu0  ;;  %v5342_v46 = vpop.f32.mrf.mxu1  ;;  %5807 = vmatprep.subr.bf16.mxu0 %v7599_v14  ;;  %5880 = vmatprep.subr.bf16.mxu1 %v7602_v12  ;;  %v5201_v19 = vadd.f32 %v10502_v10, %v5128_v50  ;;  %v5065_v17 = vadd.f32 %v10503_v11, %v4992_v56  ;;  %v10504_v16 = vld [vmem:[#allocation60_spill] sm:$0xff]  ;;  %v5136_v20 = vadd.f32 %v9884_v1, %v5063_v25  ;;  %v10507_v45 = vld [vmem:[#allocation18_spill] sm:$0xff]  ;;  %v10508_v21 = vld [vmem:[#allocation19_spill] sm:$0xff] }
 0x2f5   : > { %6055 = vst [vmem:[%s9939_s9 + $0x68] sm:$0xff] %v5337_v55  ;;  %v5270_v22 = vadd.f32 %v5269_v13, %v5197_v15  ;;  %v5341_v42 = vadd.f32 %v5340_v8, %v5268_v29  ;;  %5713 = vmatprep.mubr.bf16.mxu0 %v10499_v35  ;;  %5786 = vmatprep.mubr.bf16.mxu1 %v10500_v62  ;;  %v7612_v39 = vld [vmem:[%s8819_s15 + $0xe08] ss:$16 sps:$4 sm:$0xff]   ;;  %v7617_v15 = vld [vmem:[%s8819_s15 + $0xdec] ss:$16 sps:$4 sm:$0xff]  }
 0x2f6   : > { %v5271_v52 = vpop.f32.mrf.mxu0  ;;  %v5344_v40 = vpop.f32.mrf.mxu1  ;;  %v5205_v54 = vadd.f32 %v10504_v16, %v5132_v51  ;;  %v5207_v60 = vadd.f32 %v10505_v47, %v5134_v7  ;;  %v5138_v58 = vadd.f32 %v9902_v18, %v5065_v17  ;;  %v7620_v3 = vld [vmem:[%s8819_s15 + $0xfec] ss:$16 sps:$4 sm:$0xff]   ;;  %v5209_v4 = vadd.f32 %v9886_v33, %v5136_v20  ;;  %v7615_v33 = vld [vmem:[%s8819_s15 + $0xde8] ss:$16 sps:$4 sm:$0xff]  }
 0x2f7   : > { %6058 = vst [vmem:[%s9939_s9 + $0x80] sm:$0xff] %v5341_v42  ;;  %v5272_v37 = vadd.f32 %v5271_v52, %v5199_v63  ;;  %v5343_v32 = vadd.f32 %v5342_v46, %v5270_v22  ;;  %5808 = vmatpush1.bf16.msra.mxu0 %v7597_v26  ;;  %5881 = vmatpush1.bf16.msra.mxu1 %v7600_v61  ;;  %v10509_v34 = vld [vmem:[#allocation20_spill] sm:$0xff] }
 0x2f8   : > { %v5273_v5 = vpop.f32.mrf.mxu0  ;;  %v5346_v38 = vpop.f32.mrf.mxu1  ;;  %5809 = vmatprep.subr.bf16.mxu0 %v7605_v36  ;;  %5882 = vmatprep.subr.bf16.mxu1 %v7608_v31  ;;  %v5211_v55 = vadd.f32 %v9904_v49, %v5138_v58  ;;  %v7618_v53 = vld [vmem:[%s8819_s15 + $0xfe8] ss:$16 sps:$4 sm:$0xff]   ;;  %v7623_v56 = vld [vmem:[%s8819_s15 + $0xdcc] ss:$16 sps:$4 sm:$0xff]  }
 0x2f9   : > { %6059 = vst [vmem:[%s9939_s9 + $0x88] sm:$0xff] %v5343_v32  ;;  %v5274_v14 = vadd.f32 %v5273_v5, %v5201_v19  ;;  %v5345_v12 = vadd.f32 %v5344_v40, %v5272_v37  ;;  %v7626_v48 = vld [vmem:[%s8819_s15 + $0xfcc] ss:$16 sps:$4 sm:$0xff]   ;;  %v7621_v46 = vld [vmem:[%s8819_s15 + $0xdc8] ss:$16 sps:$4 sm:$0xff]  }
 0x2fa   : > { %v5277_v27 = vpop.f32.mrf.mxu0  ;;  %5714 = vmatmul.mubr.bf16.gmra.mxu0 %v10506_v2  ;;  %v5350_v23 = vpop.f32.mrf.mxu1  ;;  %5787 = vmatmul.mubr.bf16.gmra.mxu1 %v10507_v45  ;;  %v7624_v36 = vld [vmem:[%s8819_s15 + $0xfc8] ss:$16 sps:$4 sm:$0xff]   ;;  %v7629_v31 = vld [vmem:[%s8819_s15 + $0xdac] ss:$16 sps:$4 sm:$0xff]  }
 0x2fb   : > { %6062 = vst [vmem:[%s9939_s9 + $0xa0] sm:$0xff] %v5345_v12  ;;  %v5278_v57 = vadd.f32 %v5277_v27, %v5205_v54  ;;  %v5347_v1 = vadd.f32 %v5346_v38, %v5274_v14  ;;  %5810 = vmatpush1.bf16.msra.mxu0 %v7603_v6  ;;  %5883 = vmatpush1.bf16.msra.mxu1 %v7606_v24  ;;  %v7632_v51 = vld [vmem:[%s8819_s15 + $0xfac] ss:$16 sps:$4 sm:$0xff]   ;;  %v7627_v22 = vld [vmem:[%s8819_s15 + $0xda8] ss:$16 sps:$4 sm:$0xff]   ;;  %v10510_v14 = vld [vmem:[#allocation21_spill] sm:$0xff] }
 0x2fc   : > { %v5279_v30 = vpop.f32.mrf.mxu0  ;;  %v5352_v0 = vpop.f32.mrf.mxu1  ;;  %5811 = vmatprep.subr.bf16.mxu0 %v7611_v28  ;;  %5884 = vmatprep.subr.bf16.mxu1 %v7614_v9  ;;  %v7630_v42 = vld [vmem:[%s8819_s15 + $0xfa8] ss:$16 sps:$4 sm:$0xff]   ;;  %v7635_v35 = vld [vmem:[%s8819_s15 + $0xd8c] ss:$16 sps:$4 sm:$0xff]  }
 0x2fd   : > { %6063 = vst [vmem:[%s9939_s9 + $0xa8] sm:$0xff] %v5347_v1  ;;  %v5280_v18 = vadd.f32 %v5279_v30, %v5207_v60  ;;  %v5351_v8 = vadd.f32 %v5350_v23, %v5278_v57  ;;  %5829 = vmatprep.mubr.bf16.mxu0 %v10508_v21  ;;  %5902 = vmatprep.mubr.bf16.mxu1 %v10509_v34  ;;  %v7638_v62 = vld [vmem:[%s8819_s15 + $0xf8c] ss:$16 sps:$4 sm:$0xff]   ;;  %v7633_v59 = vld [vmem:[%s8819_s15 + $0xd88] ss:$16 sps:$4 sm:$0xff]   ;;  %v10512_v60 = vld [vmem:[#allocation23_spill] sm:$0xff] }
 0x2fe   : > { %v5281_v50 = vpop.f32.mrf.mxu0  ;;  %v5354_v29 = vpop.f32.mrf.mxu1  ;;  %v7636_v25 = vld [vmem:[%s8819_s15 + $0xf88] ss:$16 sps:$4 sm:$0xff]   ;;  %v7641_v7 = vld [vmem:[%s8819_s15 + $0xd6c] ss:$16 sps:$4 sm:$0xff]  }
 0x2ff   : > { %6066 = vst [vmem:[%s9939_s9 + $0xc0] sm:$0xff] %v5351_v8  ;;  %v5282_v26 = vadd.f32 %v5281_v50, %v5209_v4  ;;  %v5353_v61 = vadd.f32 %v5352_v0, %v5280_v18  ;;  %5812 = vmatpush1.bf16.msra.mxu0 %v7609_v41  ;;  %5885 = vmatpush1.bf16.msra.mxu1 %v7612_v39  ;;  %v7644_v52 = vld [vmem:[%s8819_s15 + $0xf6c] ss:$16 sps:$4 sm:$0xff]   ;;  %v7639_v40 = vld [vmem:[%s8819_s15 + $0xd68] ss:$16 sps:$4 sm:$0xff]   ;;  %v10514_v0 = vld [vmem:[#allocation25_spill] sm:$0xff] }
 0x300   : > { %v5283_v44 = vpop.f32.mrf.mxu0  ;;  %v5356_v43 = vpop.f32.mrf.mxu1  ;;  %5813 = vmatprep.subr.bf16.mxu0 %v7617_v15  ;;  %5886 = vmatprep.subr.bf16.mxu1 %v7620_v3  ;;  %v7642_v10 = vld [vmem:[%s8819_s15 + $0xf68] ss:$16 sps:$4 sm:$0xff]   ;;  %v7647_v19 = vld [vmem:[%s8819_s15 + $0xd4c] ss:$16 sps:$4 sm:$0xff]   ;;  %v10516_v18 = vld [vmem:[#allocation27_spill] sm:$0xff] }
 0x301   : > { %6067 = vst [vmem:[%s9939_s9 + $0xc8] sm:$0xff] %v5353_v61  ;;  %v5284_v49 = vadd.f32 %v5283_v44, %v5211_v55  ;;  %v5355_v63 = vadd.f32 %v5354_v29, %v5282_v26  ;;  %v7650_v37 = vld [vmem:[%s8819_s15 + $0xf4c] ss:$16 sps:$4 sm:$0xff]   ;;  %v7645_v32 = vld [vmem:[%s8819_s15 + $0xd48] ss:$16 sps:$4 sm:$0xff]  }
 0x302   : > { %v7648_v6 = vld [vmem:[%s8819_s15 + $0xf48] ss:$16 sps:$4 sm:$0xff]   ;;  %v7653_v24 = vld [vmem:[%s8819_s15 + $0xd2c] ss:$16 sps:$4 sm:$0xff]  }
 0x303   : > { %6070 = vst [vmem:[%s9939_s9 + $0xe0] sm:$0xff] %v5355_v63  ;;  %v5357_v13 = vadd.f32 %v5356_v43, %v5284_v49  ;;  %5814 = vmatpush2.bf16.msra.mxu0 %v7615_v33  ;;  %5887 = vmatpush2.bf16.msra.mxu1 %v7618_v53  ;;  %v7656_v11 = vld [vmem:[%s8819_s15 + $0xf2c] ss:$16 sps:$4 sm:$0xff]   ;;  %v7651_v17 = vld [vmem:[%s8819_s15 + $0xd28] ss:$16 sps:$4 sm:$0xff]   ;;  %v10518_v43 = vld [vmem:[#allocation29_spill] sm:$0xff] }
 0x304   : > { %5815 = vmatprep.subr.bf16.mxu0 %v7623_v56  ;;  %5888 = vmatprep.subr.bf16.mxu1 %v7626_v48  ;;  %v7654_v5 = vld [vmem:[%s8819_s15 + $0xf28] ss:$16 sps:$4 sm:$0xff]   ;;  %v7659_v38 = vld [vmem:[%s8819_s15 + $0xd0c] ss:$16 sps:$4 sm:$0xff]  }
 0x305   : > { %6071 = vst [vmem:[%s9939_s9 + $0xe8] sm:$0xff] %v5357_v13  ;;  %v7662_v28 = vld [vmem:[%s8819_s15 + $0xf0c] ss:$16 sps:$4 sm:$0xff]   ;;  %v7657_v9 = vld [vmem:[%s8819_s15 + $0xd08] ss:$16 sps:$4 sm:$0xff]   ;;  %v10521_v13 = vld [vmem:[#allocation33_spill] sm:$0xff] }
 0x306   : > { %v7660_v16 = vld [vmem:[%s8819_s15 + $0xf08] ss:$16 sps:$4 sm:$0xff]  }
 0x307   : > { %5816 = vmatpush2.bf16.msra.mxu0 %v7621_v46  ;;  %5889 = vmatpush2.bf16.msra.mxu1 %v7624_v36  ;;  %v10511_v12 = vld [vmem:[#allocation22_spill] sm:$0xff]  ;;  %v10513_v27 = vld [vmem:[#allocation24_spill] sm:$0xff] }
 0x308   : > { %5817 = vmatprep.subr.bf16.mxu0 %v7629_v31  ;;  %5890 = vmatprep.subr.bf16.mxu1 %v7632_v51  ;;  %v10515_v15 = vld [vmem:[#allocation26_spill] sm:$0xff]  ;;  %v10517_v8 = vld [vmem:[#allocation28_spill] sm:$0xff] }
 0x309   : > { %v10519_v56 = vld [vmem:[#allocation30_spill] sm:$0xff]  ;;  %v10520_v63 = vld [vmem:[#allocation32_spill] sm:$0xff] }
 0x30b   : > { %5818 = vmatpush2.bf16.msra.mxu0 %v7627_v22  ;;  %5891 = vmatpush2.bf16.msra.mxu1 %v7630_v42 }
 0x30c   : > { %5819 = vmatprep.subr.bf16.mxu0 %v7635_v35  ;;  %5892 = vmatprep.subr.bf16.mxu1 %v7638_v62 }
 0x30f   : > { %5820 = vmatpush2.bf16.msra.mxu0 %v7633_v59  ;;  %5893 = vmatpush2.bf16.msra.mxu1 %v7636_v25 }
 0x310   : > { %5821 = vmatprep.subr.bf16.mxu0 %v7641_v7  ;;  %5894 = vmatprep.subr.bf16.mxu1 %v7644_v52  ;;  %v10522_v7 = vld [vmem:[#allocation35_spill] sm:$0xff]  ;;  %v10523_v52 = vld [vmem:[#allocation36_spill] sm:$0xff] }
 0x313   : > { %5822 = vmatpush2.bf16.msra.mxu0 %v7639_v40  ;;  %5895 = vmatpush2.bf16.msra.mxu1 %v7642_v10 }
 0x314   : > { %5823 = vmatprep.subr.bf16.mxu0 %v7647_v19  ;;  %5896 = vmatprep.subr.bf16.mxu1 %v7650_v37 }
 0x317   : > { %5824 = vmatpush2.bf16.msra.mxu0 %v7645_v32  ;;  %5897 = vmatpush2.bf16.msra.mxu1 %v7648_v6 }
 0x318   : > { %5825 = vmatprep.subr.bf16.mxu0 %v7653_v24  ;;  %5898 = vmatprep.subr.bf16.mxu1 %v7656_v11 }
 0x31b   : > { %5826 = vmatpush2.bf16.msra.mxu0 %v7651_v17  ;;  %5899 = vmatpush2.bf16.msra.mxu1 %v7654_v5 }
 0x31c   : > { %5827 = vmatprep.subr.bf16.mxu0 %v7659_v38  ;;  %5900 = vmatprep.subr.bf16.mxu1 %v7662_v28 }
 0x31f   : > { %5828 = vmatpush2.bf16.msra.mxu0 %v7657_v9  ;;  %5901 = vmatpush2.bf16.msra.mxu1 %v7660_v16 }
 0x322   : > { %v5393_v54 = vpop.f32.mrf.mxu0  ;;  %v5466_v20 = vpop.f32.mrf.mxu1  ;;  %5830 = vmatmul.mubr.bf16.vlgmr.msra.gmra.mxu0 %v10510_v14  ;;  %5903 = vmatmul.mubr.bf16.vlgmr.msra.gmra.mxu1 %v10511_v12 }
 0x323   : > { %v10072_v47 = vadd.f32 %v5466_v20, %v5393_v54  ;;  %5839 = vmatprep.mubr.bf16.mxu0 %v10512_v60  ;;  %5912 = vmatprep.mubr.bf16.mxu1 %v10513_v27 }
 0x324   : > { %v5395_v2 = vpop.f32.mrf.mxu0  ;;  %v5468_v23 = vpop.f32.mrf.mxu1 }
 0x325   : > { %v10076_v45 = vadd.f32 %v5468_v23, %v5395_v2 }
 0x326   : > { %v5397_v58 = vpop.f32.mrf.mxu0  ;;  %v5470_v57 = vpop.f32.mrf.mxu1 }
 0x327   : > { %v10078_v1 = vadd.f32 %v5470_v57, %v5397_v58 }
 0x328   : > { %v5399_v41 = vpop.f32.mrf.mxu0  ;;  %v5472_v39 = vpop.f32.mrf.mxu1 }
 0x329   : > { %v10080_v30 = vadd.f32 %v5472_v39, %v5399_v41 }
 0x32a   : > { %5840 = vmatmul.mubr.bf16.gmra.mxu0 %v10514_v0  ;;  %5913 = vmatmul.mubr.bf16.gmra.mxu1 %v10515_v15  ;;  %v5403_v3 = vpop.f32.mrf.mxu0  ;;  %v5476_v4 = vpop.f32.mrf.mxu1 }
 0x32b   : > { %5849 = vmatprep.mubr.bf16.mxu0 %v10516_v18  ;;  %5922 = vmatprep.mubr.bf16.mxu1 %v10517_v8  ;;  %v10086_v21 = vadd.f32 %v5476_v4, %v5403_v3 }
 0x32c   : > { %v5405_v34 = vpop.f32.mrf.mxu0  ;;  %v5478_v50 = vpop.f32.mrf.mxu1 }
 0x32d   : > { %v10088_v29 = vadd.f32 %v5478_v50, %v5405_v34 }
 0x32e   : > { %v5407_v55 = vpop.f32.mrf.mxu0  ;;  %v5480_v26 = vpop.f32.mrf.mxu1 }
 0x32f   : > { %v10090_v61 = vadd.f32 %v5480_v26, %v5407_v55 }
 0x330   : > { %v5409_v33 = vpop.f32.mrf.mxu0  ;;  %v5482_v53 = vpop.f32.mrf.mxu1 }
 0x331   : > { %v10092_v44 = vadd.f32 %v5482_v53, %v5409_v33 }
 0x332   : > { %5850 = vmatmul.mubr.bf16.gmra.mxu0 %v10518_v43  ;;  %5923 = vmatmul.mubr.bf16.gmra.mxu1 %v10519_v56  ;;  %v5413_v48 = vpop.f32.mrf.mxu0  ;;  %v5486_v49 = vpop.f32.mrf.mxu1 }
 0x333   : > { %5859 = vmatprep.mubr.bf16.mxu0 %v10520_v63  ;;  %5932 = vmatprep.mubr.bf16.mxu1 %v10521_v13  ;;  %v10098_v46 = vadd.f32 %v5486_v49, %v5413_v48 }
 0x334   : > { %v5415_v36 = vpop.f32.mrf.mxu0  ;;  %v5488_v31 = vpop.f32.mrf.mxu1 }
 0x335   : > { %v10100_v51 = vadd.f32 %v5488_v31, %v5415_v36 }
 0x336   : > { %v5417_v22 = vpop.f32.mrf.mxu0  ;;  %v5490_v42 = vpop.f32.mrf.mxu1 }
 0x337   : > { %v10102_v35 = vadd.f32 %v5490_v42, %v5417_v22 }
 0x338   : > { %v5419_v62 = vpop.f32.mrf.mxu0  ;;  %v5492_v59 = vpop.f32.mrf.mxu1 }
 0x339   : > { %v10104_v25 = vadd.f32 %v5492_v59, %v5419_v62 }
 0x33a   : > { %5860 = vmatmul.mubr.bf16.gmra.mxu0 %v10522_v7  ;;  %5933 = vmatmul.mubr.bf16.gmra.mxu1 %v10523_v52  ;;  %v5423_v40 = vpop.f32.mrf.mxu0  ;;  %v5496_v10 = vpop.f32.mrf.mxu1 }
 0x33b   : > { %v10108_v19 = vadd.f32 %v5496_v10, %v5423_v40 }
 0x33c   : > { %v5425_v37 = vpop.f32.mrf.mxu0  ;;  %v5498_v32 = vpop.f32.mrf.mxu1 }
 0x33d   : > { %v10110_v6 = vadd.f32 %v5498_v32, %v5425_v37 }
 0x33e   : > { %v5427_v24 = vpop.f32.mrf.mxu0  ;;  %v5500_v11 = vpop.f32.mrf.mxu1 }
 0x33f   : > { %10524 = vst [vmem:[#allocation31_spill] sm:$0xff] %v10110_v6  ;;  %v10112_v17 = vadd.f32 %v5500_v11, %v5427_v24 }
 0x340   : > { %v5429_v5 = vpop.f32.mrf.mxu0  ;;  %v5502_v38 = vpop.f32.mrf.mxu1 }
 0x341   : > { %10525 = vst [vmem:[#allocation5_spill] sm:$0xff] %v10112_v17  ;;  %v10114_v28 = vadd.f32 %v5502_v38, %v5429_v5 }
 0x343   : > { %10526 = vst [vmem:[#allocation6_spill] sm:$0xff] %v10114_v28 }
 0x362   : > { %v5539_v9 = vpop.f32.mrf.mxu0  ;;  %v5612_v16 = vpop.f32.mrf.mxu1 }
 0x364   : > { %v5541_v54 = vpop.f32.mrf.mxu0  ;;  %v10116_v20 = vpop.f32.mrf.mxu1 }
 0x366   : > { %v5543_v14 = vpop.f32.mrf.mxu0  ;;  %v10118_v12 = vpop.f32.mrf.mxu1 }
 0x368   : > { %v5545_v60 = vpop.f32.mrf.mxu0  ;;  %v10120_v27 = vpop.f32.mrf.mxu1 }
 0x36a   : > { %v5549_v2 = vpop.f32.mrf.mxu0  ;;  %v10122_v23 = vpop.f32.mrf.mxu1 }
 0x36c   : > { %v5551_v58 = vpop.f32.mrf.mxu0  ;;  %v10124_v57 = vpop.f32.mrf.mxu1 }
 0x36e   : > { %v10126_v41 = vpop.f32.mrf.mxu0  ;;  %v10128_v39 = vpop.f32.mrf.mxu1 }
 0x370   : > { %v10130_v0 = vpop.f32.mrf.mxu0  ;;  %v10132_v15 = vpop.f32.mrf.mxu1 }
 0x372   : > { %v10134_v3 = vpop.f32.mrf.mxu0  ;;  %v10136_v4 = vpop.f32.mrf.mxu1 }
 0x374   : > { %v10138_v18 = vpop.f32.mrf.mxu0  ;;  %v10140_v8 = vpop.f32.mrf.mxu1 }
 0x376   : > { %v10142_v34 = vpop.f32.mrf.mxu0  ;;  %v10144_v50 = vpop.f32.mrf.mxu1 }
 0x378   : > { %v10146_v55 = vpop.f32.mrf.mxu0  ;;  %v10148_v26 = vpop.f32.mrf.mxu1 }
 0x379   : > { %10527 = vst [vmem:[#allocation7_spill] sm:$0xff] %v10148_v26  ;;  %v5540_v26 = vadd.f32 %v5539_v9, %v10072_v47  ;;  %v5550_v9 = vadd.f32 %v5549_v2, %v10086_v21 }
 0x37a   : > { %v10150_v33 = vpop.f32.mrf.mxu0  ;;  %v10152_v53 = vpop.f32.mrf.mxu1 }
 0x37b   : > { %10528 = vst [vmem:[#allocation8_spill] sm:$0xff] %v10152_v53 }
 0x37c   : > { %v10154_v43 = vpop.f32.mrf.mxu0  ;;  %v10156_v56 = vpop.f32.mrf.mxu1 }
 0x37d   : > { %10529 = vst [vmem:[#allocation34_spill] sm:$0xff] %v10154_v43  ;;  %10530 = vst [vmem:[#allocation9_spill] sm:$0xff] %v10156_v56 }
 0x37e   : > { %v10158_v48 = vpop.f32.mrf.mxu0  ;;  %v10160_v49 = vpop.f32.mrf.mxu1 }
 0x37f   : > { %10531 = vst [vmem:[#allocation10_spill] sm:$0xff] %v10158_v48  ;;  %10532 = vst [vmem:[#allocation11_spill] sm:$0xff] %v10160_v49 }
 0x380   : > { %v10162_v63 = vpop.f32.mrf.mxu0  ;;  %v10164_v13 = vpop.f32.mrf.mxu1 }
 0x381   : > { %10533 = vst [vmem:[#allocation12_spill] sm:$0xff] %v10162_v63  ;;  %10534 = vst [vmem:[#allocation42_spill] sm:$0xff] %v10164_v13 }
 0x3a2   : > { %v5685_v36 = vpop.f32.mrf.mxu0  ;;  %v5758_v31 = vpop.f32.mrf.mxu1 }
 0x3a4   : > { %v5687_v22 = vpop.f32.mrf.mxu0  ;;  %v5760_v42 = vpop.f32.mrf.mxu1 }
 0x3a6   : > { %v5689_v62 = vpop.f32.mrf.mxu0  ;;  %v5762_v59 = vpop.f32.mrf.mxu1 }
 0x3a8   : > { %v5691_v7 = vpop.f32.mrf.mxu0  ;;  %v5764_v52 = vpop.f32.mrf.mxu1 }
 0x3aa   : > { %v5695_v40 = vpop.f32.mrf.mxu0  ;;  %v10166_v10 = vpop.f32.mrf.mxu1 }
 0x3ac   : > { %v5697_v37 = vpop.f32.mrf.mxu0  ;;  %v10168_v32 = vpop.f32.mrf.mxu1 }
 0x3ae   : > { %v10170_v24 = vpop.f32.mrf.mxu0  ;;  %v10172_v11 = vpop.f32.mrf.mxu1 }
 0x3b0   : > { %v10174_v5 = vpop.f32.mrf.mxu0  ;;  %v10176_v38 = vpop.f32.mrf.mxu1 }
 0x3b1   : > { %10535 = vst [vmem:[#allocation37_spill] sm:$0xff] %v10176_v38 }
 0x3b2   : > { %v10178_v13 = vpop.f32.mrf.mxu0  ;;  %v10180_v49 = vpop.f32.mrf.mxu1 }
 0x3b3   : > { %10536 = vst [vmem:[#allocation44_spill] sm:$0xff] %v10180_v49 }
 0x3b4   : > { %v10182_v63 = vpop.f32.mrf.mxu0  ;;  %v10184_v28 = vpop.f32.mrf.mxu1 }
 0x3b5   : > { %10537 = vst [vmem:[#allocation54_spill] sm:$0xff] %v10182_v63  ;;  %10538 = vst [vmem:[#allocation52_spill] sm:$0xff] %v10184_v28  ;;  %v5542_v28 = vadd.f32 %v5541_v54, %v10076_v45  ;;  %v5613_v63 = vadd.f32 %v5612_v16, %v5540_v26 }
 0x3b6   : > { %v10186_v56 = vpop.f32.mrf.mxu0  ;;  %v10188_v48 = vpop.f32.mrf.mxu1 }
 0x3b7   : > { %10539 = vst [vmem:[#allocation40_spill] sm:$0xff] %v10186_v56  ;;  %10540 = vst [vmem:[#allocation41_spill] sm:$0xff] %v10188_v48  ;;  %v5544_v56 = vadd.f32 %v5543_v14, %v10078_v1 }
 0x3b8   : > { %v10190_v17 = vpop.f32.mrf.mxu0  ;;  %v10192_v53 = vpop.f32.mrf.mxu1 }
 0x3b9   : > { %10541 = vst [vmem:[#allocation38_spill] sm:$0xff] %v10190_v17  ;;  %10542 = vst [vmem:[#allocation46_spill] sm:$0xff] %v10192_v53  ;;  %v5615_v53 = vadd.f32 %v10116_v20, %v5542_v28  ;;  %v5617_v47 = vadd.f32 %v10118_v12, %v5544_v56  ;;  %v5554_v28 = vadd.f32 %v10126_v41, %v10090_v61 }
 0x3ba   : > { %v10194_v43 = vpop.f32.mrf.mxu0  ;;  %v10196_v6 = vpop.f32.mrf.mxu1  ;;  %v5623_v12 = vadd.f32 %v10122_v23, %v5550_v9  ;;  %v5560_v23 = vadd.f32 %v10134_v3, %v10098_v46  ;;  %v5570_v9 = vadd.f32 %v10150_v33, %v10108_v19 }
 0x3bb   : > { %10543 = vst [vmem:[#allocation56_spill] sm:$0xff] %v10194_v43  ;;  %10544 = vst [vmem:[#allocation43_spill] sm:$0xff] %v10196_v6  ;;  %v5546_v43 = vadd.f32 %v5545_v60, %v10080_v30  ;;  %v5686_v6 = vadd.f32 %v5685_v36, %v5613_v63  ;;  %v5690_v14 = vadd.f32 %v5689_v62, %v5617_v47 }
 0x3bc   : > { %v10199_v38 = vpop.f32.mrf.mxu0  ;;  %v10201_v49 = vpop.f32.mrf.mxu1  ;;  %v5627_v61 = vadd.f32 %v10128_v39, %v5554_v28 }
 0x3bd   : > { %10545 = vst [vmem:[#allocation53_spill] sm:$0xff] %v10199_v38  ;;  %10546 = vst [vmem:[#allocation45_spill] sm:$0xff] %v10201_v49  ;;  %v5688_v38 = vadd.f32 %v5687_v22, %v5615_v53  ;;  %v5552_v49 = vadd.f32 %v5551_v58, %v10088_v29  ;;  %v5619_v1 = vadd.f32 %v10120_v27, %v5546_v43 }
 0x3be   : > { %v10205_v48 = vpop.f32.mrf.mxu0  ;;  %v10207_v17 = vpop.f32.mrf.mxu1  ;;  %v5759_v54 = vadd.f32 %v5758_v31, %v5686_v6  ;;  %v5556_v58 = vadd.f32 %v10130_v0, %v10092_v44  ;;  %v5763_v6 = vadd.f32 %v5762_v59, %v5690_v14  ;;  %v5696_v53 = vadd.f32 %v5695_v40, %v5623_v12  ;;  %v10551_v12 = vld [vmem:[#allocation34_spill] sm:$0xff]  ;;  %v10553_v19 = vld [vmem:[#allocation40_spill] sm:$0xff] }
 0x3bf   : > { %v5761_v60 = vadd.f32 %v5760_v42, %v5688_v38  ;;  %v5692_v21 = vadd.f32 %v5691_v7, %v5619_v1  ;;  %v5625_v29 = vadd.f32 %v10124_v57, %v5552_v49  ;;  %v5562_v0 = vadd.f32 %v10138_v18, %v10100_v51 }
 0x3c0   : > { %v10214_v45 = vpop.f32.mrf.mxu0  ;;  %v10216_v16 = vpop.f32.mrf.mxu1  ;;  %v5629_v44 = vadd.f32 %v10132_v15, %v5556_v58  ;;  %v5769_v39 = vadd.f32 %v10166_v10, %v5696_v53  ;;  %v5700_v62 = vadd.f32 %v10170_v24, %v5627_v61  ;;  %v5633_v59 = vadd.f32 %v10136_v4, %v5560_v23  ;;  %v10555_v53 = vld [vmem:[#allocation5_spill] sm:$0xff] }
 0x3c1   : > { %v5765_v36 = vadd.f32 %v5764_v52, %v5692_v21  ;;  %v5698_v31 = vadd.f32 %v5697_v37, %v5625_v29  ;;  %v5564_v7 = vadd.f32 %v10142_v34, %v10102_v35  ;;  %v5635_v37 = vadd.f32 %v10140_v8, %v5562_v0 }
 0x3c2   : > { %v5702_v51 = vadd.f32 %v10174_v5, %v5629_v44  ;;  %v5566_v24 = vadd.f32 %v10146_v55, %v10104_v25  ;;  %v5773_v47 = vadd.f32 %v10172_v11, %v5700_v62  ;;  %v5706_v35 = vadd.f32 %v10178_v13, %v5633_v59  ;;  %v10548_v25 = vld [vmem:[#allocation54_spill] sm:$0xff]  ;;  %v10559_v44 = vld [vmem:[#allocation9_spill] sm:$0xff] }
 0x3c3   : > { %v5771_v40 = vadd.f32 %v10168_v32, %v5698_v31  ;;  %v5637_v5 = vadd.f32 %v10144_v50, %v5564_v7  ;;  %v5708_v55 = vadd.f32 %v10548_v25, %v5635_v37  ;;  %v10563_v7 = vld [vmem:[#allocation56_spill] sm:$0xff] }
 0x3c5   : > { %v5710_v33 = vadd.f32 %v10553_v19, %v5637_v5 }
 0x3e2   : > { %v5831_v30 = vpop.f32.mrf.mxu0  ;;  %v5904_v20 = vpop.f32.mrf.mxu1 }
 0x3e3   : > { %v5832_v2 = vadd.f32 %v5831_v30, %v5759_v54  ;;  %v10547_v54 = vld [vmem:[#allocation37_spill] sm:$0xff]  ;;  %v10549_v30 = vld [vmem:[#allocation7_spill] sm:$0xff] }
 0x3e4   : > { %v5833_v26 = vpop.f32.mrf.mxu0  ;;  %v5906_v27 = vpop.f32.mrf.mxu1  ;;  %v5775_v14 = vadd.f32 %v10547_v54, %v5702_v51  ;;  %v5639_v13 = vadd.f32 %v10549_v30, %v5566_v24  ;;  %v10564_v51 = vld [vmem:[#allocation11_spill] sm:$0xff]  ;;  %v10565_v24 = vld [vmem:[#allocation46_spill] sm:$0xff]  ;;  %v10569_v30 = vld [vmem:[#allocation45_spill] sm:$0xff] }
 0x3e5   : > { %v5905_v43 = vadd.f32 %v5904_v20, %v5832_v2  ;;  %v5834_v56 = vadd.f32 %v5833_v26, %v5761_v60  ;;  %v10550_v20 = vld [vmem:[#allocation31_spill] sm:$0xff]  ;;  %v10552_v2 = vld [vmem:[#allocation44_spill] sm:$0xff] }
 0x3e6   : > { %v5835_v41 = vpop.f32.mrf.mxu0  ;;  %v5908_v63 = vpop.f32.mrf.mxu1  ;;  %v5572_v60 = vadd.f32 %v10551_v12, %v10550_v20  ;;  %v5779_v29 = vadd.f32 %v10552_v2, %v5706_v35 }
 0x3e7   : > { %6044 = vst [vmem:[%s9939_s9 + $0x10] sm:$0xff] %v5905_v43  ;;  %v5907_v57 = vadd.f32 %v5906_v27, %v5834_v56  ;;  %v5836_v49 = vadd.f32 %v5835_v41, %v5763_v6  ;;  %v10554_v27 = vld [vmem:[#allocation8_spill] sm:$0xff]  ;;  %v10556_v43 = vld [vmem:[#allocation10_spill] sm:$0xff] }
 0x3e8   : > { %v5837_v22 = vpop.f32.mrf.mxu0  ;;  %v5910_v42 = vpop.f32.mrf.mxu1  ;;  %v5643_v6 = vadd.f32 %v10554_v27, %v5570_v9  ;;  %v5574_v56 = vadd.f32 %v10556_v43, %v10555_v53  ;;  %v10557_v41 = vld [vmem:[#allocation52_spill] sm:$0xff]  ;;  %v5645_v0 = vadd.f32 %v10559_v44, %v5572_v60 }
 0x3e9   : > { %6045 = vst [vmem:[%s9939_s9 + $0x18] sm:$0xff] %v5907_v57  ;;  %v5909_v46 = vadd.f32 %v5908_v63, %v5836_v49  ;;  %v5838_v3 = vadd.f32 %v5837_v22, %v5765_v36  ;;  %v5781_v63 = vadd.f32 %v10557_v41, %v5708_v55  ;;  %v10558_v36 = vld [vmem:[#allocation38_spill] sm:$0xff]  ;;  %v6107_v41 = vld [vmem:[%s9939_s9 + $0x20] sm:$0xff] (%p7753_p6) }
 0x3ea   : > { %v5841_v52 = vpop.f32.mrf.mxu0  ;;  %v5914_v15 = vpop.f32.mrf.mxu1  ;;  %v5712_v31 = vadd.f32 %v10558_v36, %v5639_v13  ;;  %v10560_v22 = vld [vmem:[#allocation6_spill] sm:$0xff]  ;;  %6108 = vst [vmem:[%s10298_s5 + $0x40] sm:$0xff] (%p7753_p6), %v6107_v41 }
 0x3eb   : > { %6048 = vst [vmem:[%s9939_s9 + $0x30] sm:$0xff] %v5909_v46  ;;  %v5911_v18 = vadd.f32 %v5910_v42, %v5838_v3  ;;  %v5842_v10 = vadd.f32 %v5841_v52, %v5769_v39  ;;  %v10561_v42 = vld [vmem:[#allocation12_spill] sm:$0xff]  ;;  %v10562_v3 = vld [vmem:[#allocation41_spill] sm:$0xff]  ;;  %v5716_v52 = vadd.f32 %v10563_v7, %v5643_v6 }
 0x3ec   : > { %v5843_v38 = vpop.f32.mrf.mxu0  ;;  %v5916_v4 = vpop.f32.mrf.mxu1  ;;  %v5576_v39 = vadd.f32 %v10561_v42, %v10560_v22  ;;  %v5783_v59 = vadd.f32 %v10562_v3, %v5710_v33  ;;  %v6123_v22 = vld [vmem:[%s9939_s9 + $0x60] sm:$0xff] (%p7753_p6)  ;;  %v6125_v42 = vld [vmem:[%s9939_s9 + $0x68] sm:$0xff] (%p7753_p6) }
 0x3ed   : > { %6049 = vst [vmem:[%s9939_s9 + $0x38] sm:$0xff] %v5911_v18  ;;  %v5915_v34 = vadd.f32 %v5914_v15, %v5842_v10  ;;  %v5844_v32 = vadd.f32 %v5843_v38, %v5771_v40  ;;  %v5647_v18 = vadd.f32 %v10564_v51, %v5574_v56  ;;  %v5785_v38 = vadd.f32 %v10565_v24, %v5712_v31  ;;  %v6133_v3 = vld [vmem:[%s9939_s9 + $0x88] sm:$0xff] (%p7753_p6) }
 0x3ee   : > { %v5845_v1 = vpop.f32.mrf.mxu0  ;;  %v5918_v8 = vpop.f32.mrf.mxu1  ;;  %6124 = vst [vmem:[%s10298_s5 + $0xc0] sm:$0xff] (%p7753_p6), %v6123_v22  ;;  %6126 = vst [vmem:[%s10298_s5 + $0xc8] sm:$0xff] (%p7753_p6), %v6125_v42 }
 0x3ef   : > { %6052 = vst [vmem:[%s9939_s9 + $0x50] sm:$0xff] %v5915_v34  ;;  %v5917_v28 = vadd.f32 %v5916_v4, %v5844_v32  ;;  %v5846_v11 = vadd.f32 %v5845_v1, %v5773_v47  ;;  %v10566_v4 = vld [vmem:[#allocation53_spill] sm:$0xff]  ;;  %v10567_v32 = vld [vmem:[#allocation42_spill] sm:$0xff]  ;;  %6134 = vst [vmem:[%s10298_s5 + $0x108] sm:$0xff] (%p7753_p6), %v6133_v3 }
 0x3f0   : > { %v5847_v21 = vpop.f32.mrf.mxu0  ;;  %v5920_v50 = vpop.f32.mrf.mxu1  ;;  %v5718_v47 = vadd.f32 %v10566_v4, %v5645_v0  ;;  %v5649_v5 = vadd.f32 %v10567_v32, %v5576_v39  ;;  %v6157_v4 = vld [vmem:[%s9939_s9 + $0xe8] sm:$0xff] (%p7753_p6) }
 0x3f1   : > { %6053 = vst [vmem:[%s9939_s9 + $0x58] sm:$0xff] %v5917_v28  ;;  %v5919_v58 = vadd.f32 %v5918_v8, %v5846_v11  ;;  %v5848_v26 = vadd.f32 %v5847_v21, %v5775_v14  ;;  %v10568_v8 = vld [vmem:[#allocation43_spill] sm:$0xff]  ;;  %v5720_v14 = vadd.f32 %v10205_v48, %v5647_v18  ;;  %v6147_v18 = vld [vmem:[%s9939_s9 + $0xc0] sm:$0xff] (%p7753_p6)  ;;  %6158 = vst [vmem:[%s10298_s5 + $0x1c8] sm:$0xff] (%p7753_p6), %v6157_v4 }
 0x3f2   : > { %v5851_v61 = vpop.f32.mrf.mxu0  ;;  %v5924_v23 = vpop.f32.mrf.mxu1  ;;  %v5789_v54 = vadd.f32 %v10568_v8, %v5716_v52  ;;  %v5791_v13 = vadd.f32 %v10569_v30, %v5718_v47  ;;  %v5722_v20 = vadd.f32 %v10214_v45, %v5649_v5  ;;  %v6111_v36 = vld [vmem:[%s9939_s9 + $0x30] sm:$0xff] (%p7753_p6)  ;;  %v6139_v52 = vld [vmem:[%s9939_s9 + $0xa0] sm:$0xff] (%p7753_p6)  ;;  %6148 = vst [vmem:[%s10298_s5 + $0x180] sm:$0xff] (%p7753_p6), %v6147_v18 }
 0x3f3   : > { %6056 = vst [vmem:[%s9939_s9 + $0x70] sm:$0xff] %v5919_v58  ;;  %v5921_v57 = vadd.f32 %v5920_v50, %v5848_v26  ;;  %v5852_v49 = vadd.f32 %v5851_v61, %v5779_v29  ;;  %v5793_v2 = vadd.f32 %v10207_v17, %v5720_v14  ;;  %v6099_v17 = vld [vmem:[%s9939_s9] sm:$0xff] (%p7753_p6)  ;;  %v6103_v61 = vld [vmem:[%s9939_s9 + $0x10] sm:$0xff] (%p7753_p6)  ;;  %6112 = vst [vmem:[%s10298_s5 + $0x50] sm:$0xff] (%p7753_p6), %v6111_v36 }
 0x3f4   : > { %v5853_v62 = vpop.f32.mrf.mxu0  ;;  %v5926_v46 = vpop.f32.mrf.mxu1  ;;  %v5795_v58 = vadd.f32 %v10216_v16, %v5722_v20  ;;  %v6101_v16 = vld [vmem:[%s9939_s9 + $0x8] sm:$0xff] (%p7753_p6)  ;;  %6100 = vst [vmem:[%s10298_s5] sm:$0xff] (%p7753_p6), %v6099_v17  ;;  %6104 = vst [vmem:[%s10298_s5 + $0x10] sm:$0xff] (%p7753_p6), %v6103_v61  ;;  %v6113_v31 = vld [vmem:[%s9939_s9 + $0x38] sm:$0xff] (%p7753_p6) }
 0x3f5   : > { %6057 = vst [vmem:[%s9939_s9 + $0x78] sm:$0xff] %v5921_v57  ;;  %v5925_v15 = vadd.f32 %v5924_v23, %v5852_v49  ;;  %v5854_v40 = vadd.f32 %v5853_v62, %v5781_v63  ;;  %v6105_v23 = vld [vmem:[%s9939_s9 + $0x18] sm:$0xff] (%p7753_p6)  ;;  %v6109_v63 = vld [vmem:[%s9939_s9 + $0x28] sm:$0xff] (%p7753_p6)  ;;  %6102 = vst [vmem:[%s10298_s5 + $0x8] sm:$0xff] (%p7753_p6), %v6101_v16 }
 0x3f6   : > { %v5855_v10 = vpop.f32.mrf.mxu0  ;;  %v5928_v37 = vpop.f32.mrf.mxu1  ;;  %6106 = vst [vmem:[%s10298_s5 + $0x18] sm:$0xff] (%p7753_p6), %v6105_v23  ;;  %6110 = vst [vmem:[%s10298_s5 + $0x48] sm:$0xff] (%p7753_p6), %v6109_v63  ;;  %v6115_v57 = vld [vmem:[%s9939_s9 + $0x40] sm:$0xff] (%p7753_p6)  ;;  %v6117_v49 = vld [vmem:[%s9939_s9 + $0x48] sm:$0xff] (%p7753_p6) }
 0x3f7   : > { %6060 = vst [vmem:[%s9939_s9 + $0x90] sm:$0xff] %v5925_v15  ;;  %v5927_v35 = vadd.f32 %v5926_v46, %v5854_v40  ;;  %v5856_v34 = vadd.f32 %v5855_v10, %v5783_v59  ;;  %6114 = vst [vmem:[%s10298_s5 + $0x58] sm:$0xff] (%p7753_p6), %v6113_v31  ;;  %v6119_v44 = vld [vmem:[%s9939_s9 + $0x50] sm:$0xff] (%p7753_p6)  ;;  %v6131_v46 = vld [vmem:[%s9939_s9 + $0x80] sm:$0xff] (%p7753_p6) }
 0x3f8   : > { %v5857_v9 = vpop.f32.mrf.mxu0  ;;  %v5930_v1 = vpop.f32.mrf.mxu1  ;;  %6116 = vst [vmem:[%s10298_s5 + $0x80] sm:$0xff] (%p7753_p6), %v6115_v57  ;;  %v6121_v0 = vld [vmem:[%s9939_s9 + $0x58] sm:$0xff] (%p7753_p6)  ;;  %6118 = vst [vmem:[%s10298_s5 + $0x88] sm:$0xff] (%p7753_p6), %v6117_v49  ;;  %v6141_v15 = vld [vmem:[%s9939_s9 + $0xa8] sm:$0xff] (%p7753_p6) }
 0x3f9   : > { %6061 = vst [vmem:[%s9939_s9 + $0x98] sm:$0xff] %v5927_v35  ;;  %v5929_v25 = vadd.f32 %v5928_v37, %v5856_v34  ;;  %v5858_v55 = vadd.f32 %v5857_v9, %v5785_v38  ;;  %6120 = vst [vmem:[%s10298_s5 + $0x90] sm:$0xff] (%p7753_p6), %v6119_v44  ;;  %v6149_v10 = vld [vmem:[%s9939_s9 + $0xc8] sm:$0xff] (%p7753_p6)  ;;  %v6155_v38 = vld [vmem:[%s9939_s9 + $0xe0] sm:$0xff] (%p7753_p6) }
 0x3fa   : > { %v5861_v28 = vpop.f32.mrf.mxu0  ;;  %v5934_v11 = vpop.f32.mrf.mxu1  ;;  %6122 = vst [vmem:[%s10298_s5 + $0x98] sm:$0xff] (%p7753_p6), %v6121_v0  ;;  %v6127_v39 = vld [vmem:[%s9939_s9 + $0x70] sm:$0xff] (%p7753_p6)  ;;  %6132 = vst [vmem:[%s10298_s5 + $0x100] sm:$0xff] (%p7753_p6), %v6131_v46 }
 0x3fb   : > { %6064 = vst [vmem:[%s9939_s9 + $0xb0] sm:$0xff] %v5929_v25  ;;  %v5931_v12 = vadd.f32 %v5930_v1, %v5858_v55  ;;  %v5862_v60 = vadd.f32 %v5861_v28, %v5789_v54  ;;  %6128 = vst [vmem:[%s10298_s5 + $0xd0] sm:$0xff] (%p7753_p6), %v6127_v39 }
 0x3fc   : > { %v5863_v21 = vpop.f32.mrf.mxu0  ;;  %v5936_v50 = vpop.f32.mrf.mxu1  ;;  %v6129_v62 = vld [vmem:[%s9939_s9 + $0x78] sm:$0xff] (%p7753_p6)  ;;  %6140 = vst [vmem:[%s10298_s5 + $0x140] sm:$0xff] (%p7753_p6), %v6139_v52  ;;  %6142 = vst [vmem:[%s10298_s5 + $0x148] sm:$0xff] (%p7753_p6), %v6141_v15 }
 0x3fd   : > { %6065 = vst [vmem:[%s9939_s9 + $0xb8] sm:$0xff] %v5931_v12  ;;  %v5935_v48 = vadd.f32 %v5934_v11, %v5862_v60  ;;  %v5864_v29 = vadd.f32 %v5863_v21, %v5791_v13  ;;  %6130 = vst [vmem:[%s10298_s5 + $0xd8] sm:$0xff] (%p7753_p6), %v6129_v62 }
 0x3fe   : > { %v5865_v19 = vpop.f32.mrf.mxu0  ;;  %v5938_v33 = vpop.f32.mrf.mxu1  ;;  %v6135_v59 = vld [vmem:[%s9939_s9 + $0x90] sm:$0xff] (%p7753_p6)  ;;  %6150 = vst [vmem:[%s10298_s5 + $0x188] sm:$0xff] (%p7753_p6), %v6149_v10  ;;  %6156 = vst [vmem:[%s10298_s5 + $0x1c0] sm:$0xff] (%p7753_p6), %v6155_v38 }
 0x3ff   : > { %6068 = vst [vmem:[%s9939_s9 + $0xd0] sm:$0xff] %v5935_v48  ;;  %v5937_v26 = vadd.f32 %v5936_v50, %v5864_v29  ;;  %v5866_v45 = vadd.f32 %v5865_v19, %v5793_v2  ;;  %6136 = vst [vmem:[%s10298_s5 + $0x110] sm:$0xff] (%p7753_p6), %v6135_v59 }
 0x400   : > { %v5867_v27 = vpop.f32.mrf.mxu0  ;;  %v5940_v43 = vpop.f32.mrf.mxu1  ;;  %v6137_v7 = vld [vmem:[%s9939_s9 + $0x98] sm:$0xff] (%p7753_p6) }
 0x401   : > { %6069 = vst [vmem:[%s9939_s9 + $0xd8] sm:$0xff] %v5937_v26  ;;  %v5939_v6 = vadd.f32 %v5938_v33, %v5866_v45  ;;  %v5868_v53 = vadd.f32 %v5867_v27, %v5795_v58  ;;  %6080 = sbr.rel (!%p7753_p6) target bundleno = 1038 (0x40e), region = 63  ;;  %6138 = vst [vmem:[%s10298_s5 + $0x118] sm:$0xff] (%p7753_p6), %v6137_v7 }
 0x402   : > { %v6143_v40 = vld [vmem:[%s9939_s9 + $0xb0] sm:$0xff] (%p7753_p6) }
 0x403   : > { %6072 = vst [vmem:[%s9939_s9 + $0xf0] sm:$0xff] %v5939_v6  ;;  %v5941_v56 = vadd.f32 %v5940_v43, %v5868_v53  ;;  %6144 = vst [vmem:[%s10298_s5 + $0x150] sm:$0xff] (%p7753_p6), %v6143_v40 }
 0x404   : > { %v6145_v51 = vld [vmem:[%s9939_s9 + $0xb8] sm:$0xff] (%p7753_p6) }
 0x405   : > { %6073 = vst [vmem:[%s9939_s9 + $0xf8] sm:$0xff] %v5941_v56  ;;  %6146 = vst [vmem:[%s10298_s5 + $0x158] sm:$0xff] (%p7753_p6), %v6145_v51 }
 0x406   : > { %v6151_v37 = vld [vmem:[%s9939_s9 + $0xd0] sm:$0xff] }
 0x407   : > { %6152 = vst [vmem:[%s10298_s5 + $0x190] sm:$0xff] %v6151_v37 }
 0x408   : > { %v6153_v24 = vld [vmem:[%s9939_s9 + $0xd8] sm:$0xff] }
 0x409   : > { %6154 = vst [vmem:[%s10298_s5 + $0x198] sm:$0xff] %v6153_v24 }
 0x40a   : > { %v6159_v47 = vld [vmem:[%s9939_s9 + $0xf0] sm:$0xff] }
 0x40b   : > { %6160 = vst [vmem:[%s10298_s5 + $0x1d0] sm:$0xff] %v6159_v47 }
 0x40c   : > { %v6161_v35 = vld [vmem:[%s9939_s9 + $0xf8] sm:$0xff] }
 0x40d   : > { %6162 = vst [vmem:[%s10298_s5 + $0x1d8] sm:$0xff] %v6161_v35 }
 0x40e PF: > { %s12_s13 = sadd.s32 1, %s7701_s13   ;;  %s10570_s9 = smov %s7689_s10 }
 0x40f   : > { %p9_p11 = scmp.ge.s32.totalorder %s12_s13, 4   ;;  %s10571_s10 = smov %s7758_s19 }
 0x410   : > { %s10572_s11 = smov %s7697_s12  ;;  %s10573_s12 = smov %s10575_s14 }
 0x411   :  { %11 = sbr.rel (!%p9_p11) target bundleno = 3 (0x3), region = 120 }

// kernel: _lambda_.12
= control target key start
LH: loop header
LB: loop body
LE: loop exit
PB: predicated region body
PF: predicated region fallthrough
CT: control target
= control target key end

     0   :  { %v48_v0 = vlaneseq  ;;  %s556_s1 = inlined_call_operand.vmem [shape: f32[1,256], index: 1, kind: input, shape index: {}]   ;;  %s557_s2 = inlined_call_operand.vmem [shape: f32[1,256], index: 2, kind: input, shape index: {}]   ;;  %s558_s0 = inlined_call_operand.vmem [shape: f32[128,256], index: 0, kind: input, shape index: {}]   ;;  %s559_s3 = inlined_call_operand.vmem [shape: bf16[128,256], index: 3, kind: output, shape index: {}]  }
   0x1   :  { %v46_v2 = vld [vmem:[%s556_s1] sm:$0x3]  ;;  %v15_v5 = vld [vmem:[%s558_s0 + $0x8] sm:$0xff]  ;;  %v16_v8 = vld [vmem:[%s558_s0 + $0x10] sm:$0xff] }
   0x2   :  { %v49_v1 = vshrl.u32 %v48_v0, 7  ;;  %v90_v3 = vld [vmem:[%s557_s2] sm:$0x3]  ;;  %v17_v9 = vld [vmem:[%s558_s0 + $0x18] sm:$0xff]  ;;  %v19_v15 = vld [vmem:[%s558_s0 + $0x28] sm:$0xff] }
   0x3   :  { %v14_v4 = vld [vmem:[%s558_s0] sm:$0xff]  ;;  %v20_v16 = vld [vmem:[%s558_s0 + $0x30] sm:$0xff]  ;;  %v21_v17 = vld [vmem:[%s558_s0 + $0x38] sm:$0xff] }
   0x4   :  { %v50_v6 = vsub.s32 0, %v49_v1  ;;  %v54_v7 = vsub.s32 1, %v49_v1  ;;  %v18_v10 = vld [vmem:[%s558_s0 + $0x20] sm:$0xff]  ;;  %v23_v35 = vld [vmem:[%s558_s0 + $0x48] sm:$0xff]  ;;  %v24_v40 = vld [vmem:[%s558_s0 + $0x50] sm:$0xff] }
   0x5   :  { %v22_v34 = vld [vmem:[%s558_s0 + $0x40] sm:$0xff]  ;;  %v25_v41 = vld [vmem:[%s558_s0 + $0x58] sm:$0xff]  ;;  %v27_v47 = vld [vmem:[%s558_s0 + $0x68] sm:$0xff] }
   0x6   :  { %v355_v11 = vrot.slane %v46_v2, %v50_v6  ;;  %v357_v12 = vrot.slane %v46_v2, %v54_v7  ;;  %v359_v13 = vrot.slane %v90_v3, %v50_v6  ;;  %v361_v14 = vrot.slane %v90_v3, %v54_v7  ;;  %v26_v46 = vld [vmem:[%s558_s0 + $0x60] sm:$0xff]  ;;  %v28_v52 = vld [vmem:[%s558_s0 + $0x70] sm:$0xff]  ;;  %v29_v53 = vld [vmem:[%s558_s0 + $0x78] sm:$0xff] }
   0x7   :  { %v30_v2 = vld [vmem:[%s558_s0 + $0x80] sm:$0xff]  ;;  %v31_v7 = vld [vmem:[%s558_s0 + $0x88] sm:$0xff] }
   0x8   :  { %v58_v18 = vmul.f32 %v355_v11, %v14_v4  ;;  %v59_v19 = vmul.f32 %v357_v12, %v15_v5  ;;  %v60_v20 = vmul.f32 %v355_v11, %v16_v8  ;;  %v61_v21 = vmul.f32 %v357_v12, %v17_v9 }
   0x9   :  { %v62_v22 = vmul.f32 %v355_v11, %v18_v10  ;;  %v63_v23 = vmul.f32 %v357_v12, %v19_v15  ;;  %v64_v24 = vmul.f32 %v355_v11, %v20_v16  ;;  %v65_v25 = vmul.f32 %v357_v12, %v21_v17  ;;  %v32_v16 = vld [vmem:[%s558_s0 + $0x90] sm:$0xff]  ;;  %v33_v17 = vld [vmem:[%s558_s0 + $0x98] sm:$0xff] }
   0xa   :  { %v102_v26 = vadd.f32 %v359_v13, %v58_v18  ;;  %v103_v27 = vadd.f32 %v361_v14, %v59_v19  ;;  %v104_v28 = vadd.f32 %v359_v13, %v60_v20  ;;  %v105_v29 = vadd.f32 %v361_v14, %v61_v21 }
   0xb   :  { %v106_v30 = vadd.f32 %v359_v13, %v62_v22  ;;  %v107_v31 = vadd.f32 %v361_v14, %v63_v23  ;;  %v108_v32 = vadd.f32 %v359_v13, %v64_v24  ;;  %v109_v33 = vadd.f32 %v361_v14, %v65_v25  ;;  %v34_v22 = vld [vmem:[%s558_s0 + $0xa0] sm:$0xff]  ;;  %v35_v23 = vld [vmem:[%s558_s0 + $0xa8] sm:$0xff] }
   0xc   :  { %v134_v36 = vmax.f32 %v102_v26, 0.0  ;;  %v135_v37 = vmax.f32 %v103_v27, 0.0  ;;  %v136_v38 = vmax.f32 %v104_v28, 0.0  ;;  %v137_v39 = vmax.f32 %v105_v29, 0.0  ;;  %v36_v28 = vld [vmem:[%s558_s0 + $0xb0] sm:$0xff] }
   0xd   :  { %v138_v42 = vmax.f32 %v106_v30, 0.0  ;;  %v139_v43 = vmax.f32 %v107_v31, 0.0  ;;  %v140_v44 = vmax.f32 %v108_v32, 0.0  ;;  %v141_v45 = vmax.f32 %v109_v33, 0.0  ;;  %v37_v33 = vld [vmem:[%s558_s0 + $0xb8] sm:$0xff] }
   0xe   :  { %v298_v48 = vpack.c.bf16 %v135_v37, %v134_v36  ;;  %v299_v49 = vpack.c.bf16 %v137_v39, %v136_v38  ;;  %v66_v50 = vmul.f32 %v355_v11, %v22_v34  ;;  %v67_v51 = vmul.f32 %v357_v12, %v23_v35  ;;  %v38_v38 = vld [vmem:[%s558_s0 + $0xc0] sm:$0xff] }
   0xf   :  { %v300_v54 = vpack.c.bf16 %v139_v43, %v138_v42  ;;  %v301_v55 = vpack.c.bf16 %v141_v45, %v140_v44  ;;  %v68_v56 = vmul.f32 %v355_v11, %v24_v40  ;;  %v69_v57 = vmul.f32 %v357_v12, %v25_v41 }
  0x10   :  { %262 = vst [vmem:[%s559_s3] sm:$0xff] %v298_v48  ;;  %263 = vst [vmem:[%s559_s3 + $0x8] sm:$0xff] %v299_v49  ;;  %v110_v58 = vadd.f32 %v359_v13, %v66_v50  ;;  %v111_v59 = vadd.f32 %v361_v14, %v67_v51  ;;  %v70_v60 = vmul.f32 %v355_v11, %v26_v46 }
  0x11   :  { %v71_v61 = vmul.f32 %v357_v12, %v27_v47  ;;  %264 = vst [vmem:[%s559_s3 + $0x10] sm:$0xff] %v300_v54  ;;  %265 = vst [vmem:[%s559_s3 + $0x18] sm:$0xff] %v301_v55  ;;  %v112_v62 = vadd.f32 %v359_v13, %v68_v56  ;;  %v113_v63 = vadd.f32 %v361_v14, %v69_v57  ;;  %v39_v47 = vld [vmem:[%s558_s0 + $0xc8] sm:$0xff] }
  0x12   :  { %v72_v0 = vmul.f32 %v355_v11, %v28_v52  ;;  %v73_v1 = vmul.f32 %v357_v12, %v29_v53  ;;  %v142_v3 = vmax.f32 %v110_v58, 0.0  ;;  %v143_v4 = vmax.f32 %v111_v59, 0.0  ;;  %v40_v52 = vld [vmem:[%s558_s0 + $0xd0] sm:$0xff]  ;;  %v41_v53 = vld [vmem:[%s558_s0 + $0xd8] sm:$0xff]  ;;  %v42_v58 = vld [vmem:[%s558_s0 + $0xe0] sm:$0xff] }
  0x13   :  { %v114_v5 = vadd.f32 %v359_v13, %v70_v60  ;;  %v115_v6 = vadd.f32 %v361_v14, %v71_v61  ;;  %v144_v8 = vmax.f32 %v112_v62, 0.0  ;;  %v145_v9 = vmax.f32 %v113_v63, 0.0  ;;  %v43_v59 = vld [vmem:[%s558_s0 + $0xe8] sm:$0xff] }
  0x14   :  { %v116_v10 = vadd.f32 %v359_v13, %v72_v0  ;;  %v117_v15 = vadd.f32 %v361_v14, %v73_v1  ;;  %v302_v18 = vpack.c.bf16 %v143_v4, %v142_v3  ;;  %v74_v21 = vmul.f32 %v355_v11, %v30_v2  ;;  %v44_v0 = vld [vmem:[%s558_s0 + $0xf0] sm:$0xff] }
  0x15   :  { %v146_v19 = vmax.f32 %v114_v5, 0.0  ;;  %v147_v20 = vmax.f32 %v115_v6, 0.0  ;;  %v303_v24 = vpack.c.bf16 %v145_v9, %v144_v8  ;;  %v75_v27 = vmul.f32 %v357_v12, %v31_v7  ;;  %v45_v5 = vld [vmem:[%s558_s0 + $0xf8] sm:$0xff] }
  0x16   :  { %v148_v25 = vmax.f32 %v116_v10, 0.0  ;;  %v149_v26 = vmax.f32 %v117_v15, 0.0  ;;  %266 = vst [vmem:[%s559_s3 + $0x20] sm:$0xff] %v302_v18  ;;  %v118_v30 = vadd.f32 %v359_v13, %v74_v21  ;;  %v76_v31 = vmul.f32 %v355_v11, %v32_v16 }
  0x17   :  { %v304_v29 = vpack.c.bf16 %v147_v20, %v146_v19  ;;  %v77_v32 = vmul.f32 %v357_v12, %v33_v17  ;;  %267 = vst [vmem:[%s559_s3 + $0x28] sm:$0xff] %v303_v24  ;;  %v119_v35 = vadd.f32 %v361_v14, %v75_v27  ;;  %v78_v36 = vmul.f32 %v355_v11, %v34_v22 }
  0x18   :  { %v305_v34 = vpack.c.bf16 %v149_v26, %v148_v25  ;;  %v79_v37 = vmul.f32 %v357_v12, %v35_v23  ;;  %v150_v39 = vmax.f32 %v118_v30, 0.0  ;;  %v120_v40 = vadd.f32 %v359_v13, %v76_v31 }
  0x19   :  { %268 = vst [vmem:[%s559_s3 + $0x30] sm:$0xff] %v304_v29  ;;  %v121_v41 = vadd.f32 %v361_v14, %v77_v32  ;;  %v80_v42 = vmul.f32 %v355_v11, %v36_v28  ;;  %v151_v43 = vmax.f32 %v119_v35, 0.0  ;;  %v122_v44 = vadd.f32 %v359_v13, %v78_v36 }
  0x1a   :  { %269 = vst [vmem:[%s559_s3 + $0x38] sm:$0xff] %v305_v34  ;;  %v123_v45 = vadd.f32 %v361_v14, %v79_v37  ;;  %v81_v46 = vmul.f32 %v357_v12, %v37_v33  ;;  %v152_v48 = vmax.f32 %v120_v40, 0.0  ;;  %v82_v51 = vmul.f32 %v355_v11, %v38_v38 }
  0x1b   :  { %v153_v49 = vmax.f32 %v121_v41, 0.0  ;;  %v124_v50 = vadd.f32 %v359_v13, %v80_v42  ;;  %v306_v54 = vpack.c.bf16 %v151_v43, %v150_v39  ;;  %v154_v55 = vmax.f32 %v122_v44, 0.0 }
  0x1c   :  { %v155_v56 = vmax.f32 %v123_v45, 0.0  ;;  %v125_v57 = vadd.f32 %v361_v14, %v81_v46  ;;  %v83_v62 = vmul.f32 %v357_v12, %v39_v47  ;;  %v126_v63 = vadd.f32 %v359_v13, %v82_v51 }
  0x1d   :  { %v307_v60 = vpack.c.bf16 %v153_v49, %v152_v48  ;;  %v156_v61 = vmax.f32 %v124_v50, 0.0  ;;  %270 = vst [vmem:[%s559_s3 + $0x40] sm:$0xff] %v306_v54  ;;  %v84_v3 = vmul.f32 %v355_v11, %v40_v52  ;;  %v85_v4 = vmul.f32 %v357_v12, %v41_v53 }
  0x1e   :  { %v308_v1 = vpack.c.bf16 %v155_v56, %v154_v55  ;;  %v157_v2 = vmax.f32 %v125_v57, 0.0  ;;  %v127_v6 = vadd.f32 %v361_v14, %v83_v62  ;;  %v158_v7 = vmax.f32 %v126_v63, 0.0 }
  0x1f   :  { %271 = vst [vmem:[%s559_s3 + $0x48] sm:$0xff] %v307_v60  ;;  %v86_v8 = vmul.f32 %v355_v11, %v42_v58  ;;  %v87_v9 = vmul.f32 %v357_v12, %v43_v59  ;;  %v128_v15 = vadd.f32 %v359_v13, %v84_v3  ;;  %v129_v16 = vadd.f32 %v361_v14, %v85_v4 }
  0x20   :  { %272 = vst [vmem:[%s559_s3 + $0x50] sm:$0xff] %v308_v1  ;;  %v309_v10 = vpack.c.bf16 %v157_v2, %v156_v61  ;;  %v88_v17 = vmul.f32 %v355_v11, %v44_v0  ;;  %v159_v18 = vmax.f32 %v127_v6, 0.0  ;;  %v89_v21 = vmul.f32 %v357_v12, %v45_v5 }
  0x21   :  { %v130_v19 = vadd.f32 %v359_v13, %v86_v8  ;;  %v131_v20 = vadd.f32 %v361_v14, %v87_v9  ;;  %v160_v22 = vmax.f32 %v128_v15, 0.0  ;;  %v161_v23 = vmax.f32 %v129_v16, 0.0 }
  0x22   :  { %273 = vst [vmem:[%s559_s3 + $0x58] sm:$0xff] %v309_v10  ;;  %v132_v24 = vadd.f32 %v359_v13, %v88_v17  ;;  %v310_v25 = vpack.c.bf16 %v159_v18, %v158_v7  ;;  %v133_v11 = vadd.f32 %v361_v14, %v89_v21 }
  0x23   :  { %v162_v26 = vmax.f32 %v130_v19, 0.0  ;;  %v163_v27 = vmax.f32 %v131_v20, 0.0  ;;  %v311_v28 = vpack.c.bf16 %v161_v23, %v160_v22 }
  0x24   :  { %v164_v29 = vmax.f32 %v132_v24, 0.0  ;;  %274 = vst [vmem:[%s559_s3 + $0x60] sm:$0xff] %v310_v25  ;;  %v165_v30 = vmax.f32 %v133_v11, 0.0 }
  0x25   :  { %v312_v12 = vpack.c.bf16 %v163_v27, %v162_v26  ;;  %275 = vst [vmem:[%s559_s3 + $0x68] sm:$0xff] %v311_v28 }
  0x26   :  { %v313_v13 = vpack.c.bf16 %v165_v30, %v164_v29 }
  0x27   :  { %276 = vst [vmem:[%s559_s3 + $0x70] sm:$0xff] %v312_v12 }
  0x28   :  { %277 = vst [vmem:[%s559_s3 + $0x78] sm:$0xff] %v313_v13 }

// kernel: _lambda_.13
= control target key start
LH: loop header
LB: loop body
LE: loop exit
PB: predicated region body
PF: predicated region fallthrough
CT: control target
= control target key end

     0   :  { %s3981_s9 = smov 0   ;;  %s3983_s10 = smov 0   ;;  %s5336_s0 = inlined_call_operand.vmem [shape: bf16[192,1024], index: 0, kind: input, shape index: {}]   ;;  %s5337_s1 = inlined_call_operand.vmem [shape: bf16[1024,512], index: 1, kind: input, shape index: {}]   ;;  %s5338_s2 = inlined_call_operand.vmem [shape: f32[192,512], index: 2, kind: output, shape index: {}]  }
   0x1   :  { %s3985_s11 = smov 0  }
   0x2 LB: > { %s31_s12 = sadd.s32 1, %s3960_s10  ;;  %p3221_p0 = scmp.ge.s32.totalorder %s3964_s11, 1  ;;  %s3964_s11 = sphi %s3985_s11, %s12_s11   ;;  %s3960_s10 = sphi %s3983_s10, %s5340_s10   ;;  %s3956_s9 = sphi %s3981_s9, %s5339_s9  }
   0x3   : > { %p33_p1 = scmp.ge.s32.totalorder %s31_s12, 2  ;;  %p161_p2 = scmp.lt.s32.totalorder %s3964_s11, 3 }
   0x5   : > { %s5342_s12 = smov (%p33_p1, %s31_s12), 0  ;;  %p162_p3 = pnand %p3221_p0, %p161_p2 }
   0x6   : > { %s203_s23 = smul.u32 (!%p162_p3), 12, %s3956_s9 }
   0x7   : > { %165 = sbr.rel (%p162_p3) target bundleno = 513 (0x201), region = 28 }
   0x8   : > { %p205_p4 = scmp.lt.s32.totalorder (!%p162_p3), %s203_s23, 23 }
   0xc   : > { %v3558_v0 = vld [vmem:[%s5337_s1 + $0xe4] ss:$16 sps:$4 sm:$0xff]   ;;  %v3562_v2 = vld [vmem:[%s5337_s1 + $0xe0] ss:$16 sps:$4 sm:$0xff]   ;;  %s5344_s23 = smov (!%p205_p4, %s203_s23), 23 }
   0xd   : > { %v3560_v1 = vld [vmem:[%s5337_s1 + $0x2e4] ss:$16 sps:$4 sm:$0xff]   ;;  %2163 = vmatprep.subr.bf16.mxu0 %v3558_v0  ;;  %v3563_v3 = vld [vmem:[%s5337_s1 + $0x2e0] ss:$16 sps:$4 sm:$0xff]   ;;  %s3532_s24 = sshll.u32 %s5344_s23, 5 }
   0xe   : > { %2256 = vmatprep.subr.bf16.mxu1 %v3560_v1  ;;  %v3564_v4 = vld [vmem:[%s5337_s1 + $0xc4] ss:$16 sps:$4 sm:$0xff]   ;;  %2164 = vmatpush1.bf16.msra.mxu0 %v3562_v2  ;;  %v3568_v6 = vld [vmem:[%s5337_s1 + $0xc0] ss:$16 sps:$4 sm:$0xff]   ;;  %s4142_s4 = scalar_lea.vmem %s5336_s0, %s3532_s24  ;;  %s5125_s5 = scalar_lea.vmem %s5338_s2, %s3532_s24 }
   0xf   : > { %2257 = vmatpush1.bf16.msra.mxu1 %v3563_v3  ;;  %v3566_v5 = vld [vmem:[%s5337_s1 + $0x2c4] ss:$16 sps:$4 sm:$0xff]   ;;  %2165 = vmatprep.subr.bf16.mxu0 %v3564_v4  ;;  %v3569_v7 = vld [vmem:[%s5337_s1 + $0x2c0] ss:$16 sps:$4 sm:$0xff]   ;;  %v340_v50 = vld [vmem:[%s4142_s4 + $0x8] sm:$0xff] }
  0x10   : > { %2258 = vmatprep.subr.bf16.mxu1 %v3566_v5  ;;  %v3570_v8 = vld [vmem:[%s5337_s1 + $0xa4] ss:$16 sps:$4 sm:$0xff]   ;;  %v3574_v10 = vld [vmem:[%s5337_s1 + $0xa0] ss:$16 sps:$4 sm:$0xff]   ;;  %v344_v51 = vld [vmem:[%s4142_s4 + $0x28] sm:$0xff] }
  0x11   : > { %v3572_v9 = vld [vmem:[%s5337_s1 + $0x2a4] ss:$16 sps:$4 sm:$0xff]   ;;  %v3575_v11 = vld [vmem:[%s5337_s1 + $0x2a0] ss:$16 sps:$4 sm:$0xff]   ;;  %v4168_v55 = vcombine.high %v340_v50, %v344_v51 }
  0x12   : > { %2166 = vmatpush1.bf16.msra.mxu0 %v3568_v6  ;;  %v3576_v12 = vld [vmem:[%s5337_s1 + $0x84] ss:$16 sps:$4 sm:$0xff]   ;;  %v3580_v14 = vld [vmem:[%s5337_s1 + $0x80] ss:$16 sps:$4 sm:$0xff]  }
  0x13   : > { %2259 = vmatpush1.bf16.msra.mxu1 %v3569_v7  ;;  %2167 = vmatprep.subr.bf16.mxu0 %v3570_v8  ;;  %v3578_v13 = vld [vmem:[%s5337_s1 + $0x284] ss:$16 sps:$4 sm:$0xff]   ;;  %v3581_v15 = vld [vmem:[%s5337_s1 + $0x280] ss:$16 sps:$4 sm:$0xff]  }
  0x14   : > { %2260 = vmatprep.subr.bf16.mxu1 %v3572_v9  ;;  %v3582_v16 = vld [vmem:[%s5337_s1 + $0x64] ss:$16 sps:$4 sm:$0xff]   ;;  %v3586_v18 = vld [vmem:[%s5337_s1 + $0x60] ss:$16 sps:$4 sm:$0xff]   ;;  %2288 = vmatprep.mubr.bf16.mxu1 %v4168_v55 }
  0x15   : > { %v3584_v17 = vld [vmem:[%s5337_s1 + $0x264] ss:$16 sps:$4 sm:$0xff]   ;;  %v3587_v19 = vld [vmem:[%s5337_s1 + $0x260] ss:$16 sps:$4 sm:$0xff]  }
  0x16   : > { %2168 = vmatpush1.bf16.msra.mxu0 %v3574_v10  ;;  %v3588_v20 = vld [vmem:[%s5337_s1 + $0x44] ss:$16 sps:$4 sm:$0xff]   ;;  %v3592_v22 = vld [vmem:[%s5337_s1 + $0x40] ss:$16 sps:$4 sm:$0xff]  }
  0x17   : > { %2261 = vmatpush1.bf16.msra.mxu1 %v3575_v11  ;;  %2169 = vmatprep.subr.bf16.mxu0 %v3576_v12  ;;  %v3590_v21 = vld [vmem:[%s5337_s1 + $0x244] ss:$16 sps:$4 sm:$0xff]   ;;  %v3593_v23 = vld [vmem:[%s5337_s1 + $0x240] ss:$16 sps:$4 sm:$0xff]   ;;  %v4224_v11 = vcombine.low %v340_v50, %v344_v51  ;;  %v348_v12 = vld [vmem:[%s4142_s4 + $0x48] sm:$0xff] }
  0x18   : > { %2262 = vmatprep.subr.bf16.mxu1 %v3578_v13  ;;  %v3594_v24 = vld [vmem:[%s5337_s1 + $0x24] ss:$16 sps:$4 sm:$0xff]   ;;  %v3598_v26 = vld [vmem:[%s5337_s1 + $0x20] ss:$16 sps:$4 sm:$0xff]   ;;  %v352_v13 = vld [vmem:[%s4142_s4 + $0x68] sm:$0xff] }
  0x19   : > { %v3596_v25 = vld [vmem:[%s5337_s1 + $0x224] ss:$16 sps:$4 sm:$0xff]   ;;  %v3599_v27 = vld [vmem:[%s5337_s1 + $0x220] ss:$16 sps:$4 sm:$0xff]  }
  0x1a   : > { %2170 = vmatpush1.bf16.msra.mxu0 %v3580_v14  ;;  %v3600_v28 = vld [vmem:[%s5337_s1 + $0x4] ss:$16 sps:$4 sm:$0xff]   ;;  %v3604_v30 = vld [vmem:[%s5337_s1] ss:$16 sps:$4 sm:$0xff]  }
  0x1b   : > { %2263 = vmatpush1.bf16.msra.mxu1 %v3581_v15  ;;  %2171 = vmatprep.subr.bf16.mxu0 %v3582_v16  ;;  %v3602_v29 = vld [vmem:[%s5337_s1 + $0x204] ss:$16 sps:$4 sm:$0xff]   ;;  %v3605_v31 = vld [vmem:[%s5337_s1 + $0x200] ss:$16 sps:$4 sm:$0xff]  }
  0x1c   : > { %2264 = vmatprep.subr.bf16.mxu1 %v3584_v17  ;;  %v3606_v32 = vld [vmem:[%s5337_s1 + $0x1e4] ss:$16 sps:$4 sm:$0xff]   ;;  %v3610_v34 = vld [vmem:[%s5337_s1 + $0x1e0] ss:$16 sps:$4 sm:$0xff]  }
  0x1d   : > { %v3608_v33 = vld [vmem:[%s5337_s1 + $0x3e4] ss:$16 sps:$4 sm:$0xff]   ;;  %v3611_v35 = vld [vmem:[%s5337_s1 + $0x3e0] ss:$16 sps:$4 sm:$0xff]  }
  0x1e   : > { %2172 = vmatpush1.bf16.msra.mxu0 %v3586_v18  ;;  %v3612_v36 = vld [vmem:[%s5337_s1 + $0x1c4] ss:$16 sps:$4 sm:$0xff]   ;;  %v3616_v38 = vld [vmem:[%s5337_s1 + $0x1c0] ss:$16 sps:$4 sm:$0xff]  }
  0x1f   : > { %2265 = vmatpush1.bf16.msra.mxu1 %v3587_v19  ;;  %2173 = vmatprep.subr.bf16.mxu0 %v3588_v20  ;;  %v3614_v37 = vld [vmem:[%s5337_s1 + $0x3c4] ss:$16 sps:$4 sm:$0xff]   ;;  %v3617_v39 = vld [vmem:[%s5337_s1 + $0x3c0] ss:$16 sps:$4 sm:$0xff]   ;;  %v4242_v19 = vcombine.high %v348_v12, %v352_v13 }
  0x20   : > { %2266 = vmatprep.subr.bf16.mxu1 %v3590_v21  ;;  %v3618_v40 = vld [vmem:[%s5337_s1 + $0x1a4] ss:$16 sps:$4 sm:$0xff]   ;;  %v3622_v42 = vld [vmem:[%s5337_s1 + $0x1a0] ss:$16 sps:$4 sm:$0xff]  }
  0x21   : > { %v3620_v41 = vld [vmem:[%s5337_s1 + $0x3a4] ss:$16 sps:$4 sm:$0xff]   ;;  %v3623_v43 = vld [vmem:[%s5337_s1 + $0x3a0] ss:$16 sps:$4 sm:$0xff]  }
  0x22   : > { %2174 = vmatpush1.bf16.msra.mxu0 %v3592_v22  ;;  %v3624_v44 = vld [vmem:[%s5337_s1 + $0x184] ss:$16 sps:$4 sm:$0xff]   ;;  %v3628_v46 = vld [vmem:[%s5337_s1 + $0x180] ss:$16 sps:$4 sm:$0xff]  }
  0x23   : > { %2267 = vmatpush1.bf16.msra.mxu1 %v3593_v23  ;;  %2175 = vmatprep.subr.bf16.mxu0 %v3594_v24  ;;  %v3626_v45 = vld [vmem:[%s5337_s1 + $0x384] ss:$16 sps:$4 sm:$0xff]   ;;  %v3629_v47 = vld [vmem:[%s5337_s1 + $0x380] ss:$16 sps:$4 sm:$0xff]  }
  0x24   : > { %2268 = vmatprep.subr.bf16.mxu1 %v3596_v25  ;;  %v339_v48 = vld [vmem:[%s4142_s4] sm:$0xff] }
  0x25   : > { %v343_v49 = vld [vmem:[%s4142_s4 + $0x20] sm:$0xff] }
  0x26   : > { %2176 = vmatpush1.bf16.msra.mxu0 %v3598_v26  ;;  %v3630_v52 = vld [vmem:[%s5337_s1 + $0x164] ss:$16 sps:$4 sm:$0xff]   ;;  %v4163_v53 = vcombine.high %v339_v48, %v343_v49  ;;  %v3634_v56 = vld [vmem:[%s5337_s1 + $0x160] ss:$16 sps:$4 sm:$0xff]   ;;  %v4222_v10 = vcombine.low %v339_v48, %v343_v49 }
  0x27   : > { %2269 = vmatpush1.bf16.msra.mxu1 %v3599_v27  ;;  %2177 = vmatprep.subr.bf16.mxu0 %v3600_v28  ;;  %v3632_v54 = vld [vmem:[%s5337_s1 + $0x364] ss:$16 sps:$4 sm:$0xff]   ;;  %v3635_v57 = vld [vmem:[%s5337_s1 + $0x360] ss:$16 sps:$4 sm:$0xff]   ;;  %v4269_v28 = vcombine.low %v348_v12, %v352_v13 }
  0x28   : > { %2270 = vmatprep.subr.bf16.mxu1 %v3602_v29  ;;  %2195 = vmatprep.mubr.bf16.mxu0 %v4163_v53  ;;  %v3636_v58 = vld [vmem:[%s5337_s1 + $0x144] ss:$16 sps:$4 sm:$0xff]   ;;  %v3640_v60 = vld [vmem:[%s5337_s1 + $0x140] ss:$16 sps:$4 sm:$0xff]  }
  0x29   : > { %v3638_v59 = vld [vmem:[%s5337_s1 + $0x344] ss:$16 sps:$4 sm:$0xff]   ;;  %v3641_v61 = vld [vmem:[%s5337_s1 + $0x340] ss:$16 sps:$4 sm:$0xff]  }
  0x2a   : > { %2178 = vmatpush1.bf16.msra.mxu0 %v3604_v30  ;;  %v3642_v62 = vld [vmem:[%s5337_s1 + $0x124] ss:$16 sps:$4 sm:$0xff]   ;;  %v3646_v0 = vld [vmem:[%s5337_s1 + $0x120] ss:$16 sps:$4 sm:$0xff]   ;;  %v356_v30 = vld [vmem:[%s4142_s4 + $0x88] sm:$0xff] }
  0x2b   : > { %2271 = vmatpush1.bf16.msra.mxu1 %v3605_v31  ;;  %2179 = vmatprep.subr.bf16.mxu0 %v3606_v32  ;;  %v3644_v63 = vld [vmem:[%s5337_s1 + $0x324] ss:$16 sps:$4 sm:$0xff]   ;;  %v3647_v1 = vld [vmem:[%s5337_s1 + $0x320] ss:$16 sps:$4 sm:$0xff]   ;;  %v360_v31 = vld [vmem:[%s4142_s4 + $0xa8] sm:$0xff] }
  0x2c   : > { %2272 = vmatprep.subr.bf16.mxu1 %v3608_v33  ;;  %v3648_v2 = vld [vmem:[%s5337_s1 + $0x104] ss:$16 sps:$4 sm:$0xff]   ;;  %v3652_v4 = vld [vmem:[%s5337_s1 + $0x100] ss:$16 sps:$4 sm:$0xff]  }
  0x2d   : > { %v3650_v3 = vld [vmem:[%s5337_s1 + $0x304] ss:$16 sps:$4 sm:$0xff]   ;;  %v3653_v5 = vld [vmem:[%s5337_s1 + $0x300] ss:$16 sps:$4 sm:$0xff]  }
  0x2e   : > { %2180 = vmatpush2.bf16.msra.mxu0 %v3610_v34  ;;  %v3656_v6 = vld [vmem:[%s5337_s1 + $0x4e4] ss:$16 sps:$4 sm:$0xff]   ;;  %v3654_v14 = vld [vmem:[%s5337_s1 + $0x4e0] ss:$16 sps:$4 sm:$0xff]  }
  0x2f   : > { %2273 = vmatpush2.bf16.msra.mxu1 %v3611_v35  ;;  %2181 = vmatprep.subr.bf16.mxu0 %v3612_v36  ;;  %v3659_v7 = vld [vmem:[%s5337_s1 + $0x6e4] ss:$16 sps:$4 sm:$0xff]   ;;  %v3657_v15 = vld [vmem:[%s5337_s1 + $0x6e0] ss:$16 sps:$4 sm:$0xff]   ;;  %v4282_v35 = vcombine.high %v356_v30, %v360_v31 }
  0x30   : > { %2274 = vmatprep.subr.bf16.mxu1 %v3614_v37  ;;  %v347_v8 = vld [vmem:[%s4142_s4 + $0x40] sm:$0xff] }
  0x31   : > { %v351_v9 = vld [vmem:[%s4142_s4 + $0x60] sm:$0xff] }
  0x32   : > { %2182 = vmatpush2.bf16.msra.mxu0 %v3616_v38  ;;  %v3662_v16 = vld [vmem:[%s5337_s1 + $0x4c4] ss:$16 sps:$4 sm:$0xff]   ;;  %v4240_v18 = vcombine.high %v347_v8, %v351_v9  ;;  %v3660_v20 = vld [vmem:[%s5337_s1 + $0x4c0] ss:$16 sps:$4 sm:$0xff]   ;;  %v4267_v27 = vcombine.low %v347_v8, %v351_v9 }
  0x33   : > { %2275 = vmatpush2.bf16.msra.mxu1 %v3617_v39  ;;  %2183 = vmatprep.subr.bf16.mxu0 %v3618_v40  ;;  %v3665_v17 = vld [vmem:[%s5337_s1 + $0x6c4] ss:$16 sps:$4 sm:$0xff]   ;;  %v3663_v21 = vld [vmem:[%s5337_s1 + $0x6c0] ss:$16 sps:$4 sm:$0xff]  }
  0x34   : > { %2276 = vmatprep.subr.bf16.mxu1 %v3620_v41  ;;  %v3668_v22 = vld [vmem:[%s5337_s1 + $0x4a4] ss:$16 sps:$4 sm:$0xff]   ;;  %v3666_v24 = vld [vmem:[%s5337_s1 + $0x4a0] ss:$16 sps:$4 sm:$0xff]  }
  0x35   : > { %v3671_v23 = vld [vmem:[%s5337_s1 + $0x6a4] ss:$16 sps:$4 sm:$0xff]   ;;  %v3669_v25 = vld [vmem:[%s5337_s1 + $0x6a0] ss:$16 sps:$4 sm:$0xff]  }
  0x36   : > { %2184 = vmatpush2.bf16.msra.mxu0 %v3622_v42  ;;  %v355_v26 = vld [vmem:[%s4142_s4 + $0x80] sm:$0xff] }
  0x37   : > { %2277 = vmatpush2.bf16.msra.mxu1 %v3623_v43  ;;  %2185 = vmatprep.subr.bf16.mxu0 %v3624_v44  ;;  %v359_v29 = vld [vmem:[%s4142_s4 + $0xa0] sm:$0xff] }
  0x38   : > { %2278 = vmatprep.subr.bf16.mxu1 %v3626_v45  ;;  %v3674_v32 = vld [vmem:[%s5337_s1 + $0x484] ss:$16 sps:$4 sm:$0xff]   ;;  %v4280_v34 = vcombine.high %v355_v26, %v359_v29  ;;  %v3672_v36 = vld [vmem:[%s5337_s1 + $0x480] ss:$16 sps:$4 sm:$0xff]   ;;  %v4308_v44 = vcombine.low %v355_v26, %v359_v29  ;;  %v4310_v45 = vcombine.low %v356_v30, %v360_v31 }
  0x39   : > { %v3677_v33 = vld [vmem:[%s5337_s1 + $0x684] ss:$16 sps:$4 sm:$0xff]   ;;  %v3675_v37 = vld [vmem:[%s5337_s1 + $0x680] ss:$16 sps:$4 sm:$0xff]  }
  0x3a   : > { %2186 = vmatpush2.bf16.msra.mxu0 %v3628_v46  ;;  %v3680_v38 = vld [vmem:[%s5337_s1 + $0x464] ss:$16 sps:$4 sm:$0xff]   ;;  %v3678_v40 = vld [vmem:[%s5337_s1 + $0x460] ss:$16 sps:$4 sm:$0xff]   ;;  %v364_v46 = vld [vmem:[%s4142_s4 + $0xc8] sm:$0xff] }
  0x3b   : > { %2279 = vmatpush2.bf16.msra.mxu1 %v3629_v47  ;;  %2187 = vmatprep.subr.bf16.mxu0 %v3630_v52  ;;  %v3683_v39 = vld [vmem:[%s5337_s1 + $0x664] ss:$16 sps:$4 sm:$0xff]   ;;  %v3681_v41 = vld [vmem:[%s5337_s1 + $0x660] ss:$16 sps:$4 sm:$0xff]   ;;  %v368_v47 = vld [vmem:[%s4142_s4 + $0xe8] sm:$0xff] }
  0x3c   : > { %2280 = vmatprep.subr.bf16.mxu1 %v3632_v54  ;;  %v363_v42 = vld [vmem:[%s4142_s4 + $0xc0] sm:$0xff]  ;;  %v4322_v51 = vcombine.high %v364_v46, %v368_v47 }
  0x3d   : > { %v367_v43 = vld [vmem:[%s4142_s4 + $0xe0] sm:$0xff] }
  0x3e   : > { %2188 = vmatpush2.bf16.msra.mxu0 %v3634_v56  ;;  %v3686_v48 = vld [vmem:[%s5337_s1 + $0x444] ss:$16 sps:$4 sm:$0xff]   ;;  %v4320_v50 = vcombine.high %v363_v42, %v367_v43  ;;  %v3684_v52 = vld [vmem:[%s5337_s1 + $0x440] ss:$16 sps:$4 sm:$0xff]  }
  0x3f   : > { %2281 = vmatpush2.bf16.msra.mxu1 %v3635_v57  ;;  %2189 = vmatprep.subr.bf16.mxu0 %v3636_v58  ;;  %v3689_v49 = vld [vmem:[%s5337_s1 + $0x644] ss:$16 sps:$4 sm:$0xff]   ;;  %v3687_v54 = vld [vmem:[%s5337_s1 + $0x640] ss:$16 sps:$4 sm:$0xff]  }
  0x40   : > { %2282 = vmatprep.subr.bf16.mxu1 %v3638_v59  ;;  %v3692_v56 = vld [vmem:[%s5337_s1 + $0x424] ss:$16 sps:$4 sm:$0xff]   ;;  %v3690_v58 = vld [vmem:[%s5337_s1 + $0x420] ss:$16 sps:$4 sm:$0xff]  }
  0x41   : > { %v3695_v57 = vld [vmem:[%s5337_s1 + $0x624] ss:$16 sps:$4 sm:$0xff]   ;;  %v3693_v59 = vld [vmem:[%s5337_s1 + $0x620] ss:$16 sps:$4 sm:$0xff]  }
  0x42   : > { %2190 = vmatpush2.bf16.msra.mxu0 %v3640_v60  ;;  %v371_v60 = vld [vmem:[%s4142_s4 + $0x100] sm:$0xff] }
  0x43   : > { %2283 = vmatpush2.bf16.msra.mxu1 %v3641_v61  ;;  %2191 = vmatprep.subr.bf16.mxu0 %v3642_v62  ;;  %v375_v61 = vld [vmem:[%s4142_s4 + $0x120] sm:$0xff]  ;;  %v4348_v62 = vcombine.low %v363_v42, %v367_v43 }
  0x44   : > { %2284 = vmatprep.subr.bf16.mxu1 %v3644_v63  ;;  %v4350_v63 = vcombine.low %v364_v46, %v368_v47  ;;  %v3704_v8 = vld [vmem:[%s5337_s1 + $0x5e4] ss:$16 sps:$4 sm:$0xff]   ;;  %v3702_v12 = vld [vmem:[%s5337_s1 + $0x5e0] ss:$16 sps:$4 sm:$0xff]  }
  0x45   : > { %v3707_v9 = vld [vmem:[%s5337_s1 + $0x7e4] ss:$16 sps:$4 sm:$0xff]   ;;  %v3705_v13 = vld [vmem:[%s5337_s1 + $0x7e0] ss:$16 sps:$4 sm:$0xff]  }
  0x46   : > { %2192 = vmatpush2.bf16.msra.mxu0 %v3646_v0  ;;  %v372_v0 = vld [vmem:[%s4142_s4 + $0x108] sm:$0xff]  ;;  %v3708_v26 = vld [vmem:[%s5337_s1 + $0x5c0] ss:$16 sps:$4 sm:$0xff]   ;;  %v3716_v30 = vld [vmem:[%s5337_s1 + $0x5a4] ss:$16 sps:$4 sm:$0xff]  }
  0x47   : > { %2285 = vmatpush2.bf16.msra.mxu1 %v3647_v1  ;;  %2193 = vmatprep.subr.bf16.mxu0 %v3648_v2  ;;  %v376_v1 = vld [vmem:[%s4142_s4 + $0x128] sm:$0xff]  ;;  %v3698_v2 = vld [vmem:[%s5337_s1 + $0x404] ss:$16 sps:$4 sm:$0xff]   ;;  %v3711_v29 = vld [vmem:[%s5337_s1 + $0x7c0] ss:$16 sps:$4 sm:$0xff]  }
  0x48   : > { %2286 = vmatprep.subr.bf16.mxu1 %v3650_v3  ;;  %v3701_v3 = vld [vmem:[%s5337_s1 + $0x604] ss:$16 sps:$4 sm:$0xff]  }
  0x49   : > { %v3719_v31 = vld [vmem:[%s5337_s1 + $0x7a4] ss:$16 sps:$4 sm:$0xff]  }
  0x4a   : > { %2194 = vmatpush2.bf16.msra.mxu0 %v3652_v4  ;;  %v4360_v4 = vcombine.high %v371_v60, %v375_v61  ;;  %v3722_v42 = vld [vmem:[%s5337_s1 + $0x584] ss:$16 sps:$4 sm:$0xff]  }
  0x4b   : > { %2287 = vmatpush2.bf16.msra.mxu1 %v3653_v5  ;;  %2349 = vmatprep.subr.bf16.mxu0 %v3656_v6  ;;  %v4362_v5 = vcombine.high %v372_v0, %v376_v1  ;;  %v3696_v6 = vld [vmem:[%s5337_s1 + $0x400] ss:$16 sps:$4 sm:$0xff]   ;;  %v3725_v43 = vld [vmem:[%s5337_s1 + $0x784] ss:$16 sps:$4 sm:$0xff]  }
  0x4c   : > { %2442 = vmatprep.subr.bf16.mxu1 %v3659_v7  ;;  %v3699_v7 = vld [vmem:[%s5337_s1 + $0x600] ss:$16 sps:$4 sm:$0xff]  }
  0x4d   : > { %2196 = vmatmul.mubr.bf16.vlgmr.msra.gmra.mxu0 %v4222_v10 }
  0x4e   : > { %2289 = vmatmul.mubr.bf16.vlgmr.msra.gmra.mxu1 %v4224_v11  ;;  %2350 = vmatpush1.bf16.msra.mxu0 %v3654_v14  ;;  %v379_v14 = vld [vmem:[%s4142_s4 + $0x140] sm:$0xff] }
  0x4f   : > { %2443 = vmatpush1.bf16.msra.mxu1 %v3657_v15  ;;  %2351 = vmatprep.subr.bf16.mxu0 %v3662_v16  ;;  %v383_v15 = vld [vmem:[%s4142_s4 + $0x160] sm:$0xff]  ;;  %v4388_v16 = vcombine.low %v371_v60, %v375_v61 }
  0x50   : > { %2444 = vmatprep.subr.bf16.mxu1 %v3665_v17  ;;  %2205 = vmatprep.mubr.bf16.mxu0 %v4240_v18  ;;  %v4390_v17 = vcombine.low %v372_v0, %v376_v1  ;;  %v3732_v60 = vld [vmem:[%s5337_s1 + $0x540] ss:$16 sps:$4 sm:$0xff]   ;;  %v3740_v0 = vld [vmem:[%s5337_s1 + $0x524] ss:$16 sps:$4 sm:$0xff]  }
  0x51   : > { %2298 = vmatprep.mubr.bf16.mxu1 %v4242_v19  ;;  %v3735_v61 = vld [vmem:[%s5337_s1 + $0x740] ss:$16 sps:$4 sm:$0xff]   ;;  %v3743_v1 = vld [vmem:[%s5337_s1 + $0x724] ss:$16 sps:$4 sm:$0xff]  }
  0x52   : > { %2352 = vmatpush1.bf16.msra.mxu0 %v3660_v20  ;;  %v380_v20 = vld [vmem:[%s4142_s4 + $0x148] sm:$0xff] }
  0x53   : > { %2445 = vmatpush1.bf16.msra.mxu1 %v3663_v21  ;;  %2353 = vmatprep.subr.bf16.mxu0 %v3668_v22  ;;  %v384_v21 = vld [vmem:[%s4142_s4 + $0x168] sm:$0xff]  ;;  %v3710_v22 = vld [vmem:[%s5337_s1 + $0x5c4] ss:$16 sps:$4 sm:$0xff]  }
  0x54   : > { %2446 = vmatprep.subr.bf16.mxu1 %v3671_v23  ;;  %v3713_v23 = vld [vmem:[%s5337_s1 + $0x7c4] ss:$16 sps:$4 sm:$0xff]  }
  0x55   : > { %2206 = vmatmul.mubr.bf16.gmra.mxu0 %v4267_v27 }
  0x56   : > { %2299 = vmatmul.mubr.bf16.gmra.mxu1 %v4269_v28  ;;  %2354 = vmatpush1.bf16.msra.mxu0 %v3666_v24  ;;  %v4400_v24 = vcombine.high %v379_v14, %v383_v15 }
  0x57   : > { %2447 = vmatpush1.bf16.msra.mxu1 %v3669_v25  ;;  %2355 = vmatprep.subr.bf16.mxu0 %v3674_v32  ;;  %v4402_v25 = vcombine.high %v380_v20, %v384_v21  ;;  %v3714_v32 = vld [vmem:[%s5337_s1 + $0x5a0] ss:$16 sps:$4 sm:$0xff]  }
  0x58   : > { %2448 = vmatprep.subr.bf16.mxu1 %v3677_v33  ;;  %2215 = vmatprep.mubr.bf16.mxu0 %v4280_v34  ;;  %v3717_v33 = vld [vmem:[%s5337_s1 + $0x7a0] ss:$16 sps:$4 sm:$0xff]  }
  0x59   : > { %2308 = vmatprep.mubr.bf16.mxu1 %v4282_v35 }
  0x5a   : > { %2356 = vmatpush1.bf16.msra.mxu0 %v3672_v36  ;;  %v341_v36 = vld [vmem:[%s4142_s4 + $0x10] sm:$0xff] }
  0x5b   : > { %2449 = vmatpush1.bf16.msra.mxu1 %v3675_v37  ;;  %2357 = vmatprep.subr.bf16.mxu0 %v3680_v38  ;;  %v4427_v37 = vcombine.low %v379_v14, %v383_v15  ;;  %v4429_v38 = vcombine.low %v380_v20, %v384_v21  ;;  %v349_v14 = vld [vmem:[%s4142_s4 + $0x50] sm:$0xff]  ;;  %v350_v20 = vld [vmem:[%s4142_s4 + $0x58] sm:$0xff] }
  0x5c   : > { %2450 = vmatprep.subr.bf16.mxu1 %v3683_v39  ;;  %v345_v39 = vld [vmem:[%s4142_s4 + $0x30] sm:$0xff] }
  0x5d   : > { %2216 = vmatmul.mubr.bf16.gmra.mxu0 %v4308_v44  ;;  %v4440_v46 = vcombine.high %v341_v36, %v345_v39  ;;  %v353_v15 = vld [vmem:[%s4142_s4 + $0x70] sm:$0xff]  ;;  %v4511_v21 = vcombine.low %v341_v36, %v345_v39  ;;  %v3756_v36 = vld [vmem:[%s5337_s1 + $0xc8] ss:$16 sps:$4 sm:$0xff]  }
  0x5e   : > { %2309 = vmatmul.mubr.bf16.gmra.mxu1 %v4310_v45  ;;  %2358 = vmatpush1.bf16.msra.mxu0 %v3678_v40  ;;  %v342_v40 = vld [vmem:[%s4142_s4 + $0x18] sm:$0xff] }
  0x5f   : > { %2451 = vmatpush1.bf16.msra.mxu1 %v3681_v41  ;;  %2359 = vmatprep.subr.bf16.mxu0 %v3686_v48  ;;  %v346_v41 = vld [vmem:[%s4142_s4 + $0x38] sm:$0xff]  ;;  %v3720_v48 = vld [vmem:[%s5337_s1 + $0x580] ss:$16 sps:$4 sm:$0xff]  }
  0x60   : > { %2452 = vmatprep.subr.bf16.mxu1 %v3689_v49  ;;  %2225 = vmatprep.mubr.bf16.mxu0 %v4320_v50  ;;  %v4442_v47 = vcombine.high %v342_v40, %v346_v41  ;;  %v3723_v49 = vld [vmem:[%s5337_s1 + $0x780] ss:$16 sps:$4 sm:$0xff]   ;;  %v3759_v39 = vld [vmem:[%s5337_s1 + $0x2c8] ss:$16 sps:$4 sm:$0xff]  }
  0x61   : > { %2318 = vmatprep.mubr.bf16.mxu1 %v4322_v51 }
  0x62   : > { %2360 = vmatpush1.bf16.msra.mxu0 %v3684_v52  ;;  %v3728_v52 = vld [vmem:[%s5337_s1 + $0x564] ss:$16 sps:$4 sm:$0xff]  }
  0x63   : > { %2453 = vmatpush1.bf16.msra.mxu1 %v3687_v54  ;;  %2361 = vmatprep.subr.bf16.mxu0 %v3692_v56  ;;  %v3731_v54 = vld [vmem:[%s5337_s1 + $0x764] ss:$16 sps:$4 sm:$0xff]   ;;  %v3726_v56 = vld [vmem:[%s5337_s1 + $0x560] ss:$16 sps:$4 sm:$0xff]  }
  0x64   : > { %2454 = vmatprep.subr.bf16.mxu1 %v3695_v57  ;;  %v3729_v57 = vld [vmem:[%s5337_s1 + $0x760] ss:$16 sps:$4 sm:$0xff]  }
  0x65   : > { %2226 = vmatmul.mubr.bf16.gmra.mxu0 %v4348_v62 }
  0x66   : > { %2319 = vmatmul.mubr.bf16.gmra.mxu1 %v4350_v63  ;;  %2362 = vmatpush1.bf16.msra.mxu0 %v3690_v58  ;;  %v3734_v58 = vld [vmem:[%s5337_s1 + $0x544] ss:$16 sps:$4 sm:$0xff]  }
  0x67   : > { %2455 = vmatpush1.bf16.msra.mxu1 %v3693_v59  ;;  %2363 = vmatprep.subr.bf16.mxu0 %v3698_v2  ;;  %v3737_v59 = vld [vmem:[%s5337_s1 + $0x744] ss:$16 sps:$4 sm:$0xff]   ;;  %v3738_v2 = vld [vmem:[%s5337_s1 + $0x520] ss:$16 sps:$4 sm:$0xff]  }
  0x68   : > { %2456 = vmatprep.subr.bf16.mxu1 %v3701_v3  ;;  %2235 = vmatprep.mubr.bf16.mxu0 %v4360_v4  ;;  %v3741_v3 = vld [vmem:[%s5337_s1 + $0x720] ss:$16 sps:$4 sm:$0xff]  }
  0x69   : > { %2328 = vmatprep.mubr.bf16.mxu1 %v4362_v5 }
  0x6a   : > { %2364 = vmatpush1.bf16.msra.mxu0 %v3696_v6  ;;  %v3746_v6 = vld [vmem:[%s5337_s1 + $0x504] ss:$16 sps:$4 sm:$0xff]  }
  0x6b   : > { %2457 = vmatpush1.bf16.msra.mxu1 %v3699_v7  ;;  %2365 = vmatprep.subr.bf16.mxu0 %v3704_v8  ;;  %v3749_v7 = vld [vmem:[%s5337_s1 + $0x704] ss:$16 sps:$4 sm:$0xff]   ;;  %v3744_v8 = vld [vmem:[%s5337_s1 + $0x500] ss:$16 sps:$4 sm:$0xff]  }
  0x6c   : > { %2458 = vmatprep.subr.bf16.mxu1 %v3707_v9  ;;  %v3747_v9 = vld [vmem:[%s5337_s1 + $0x700] ss:$16 sps:$4 sm:$0xff]  }
  0x6d   : > { %2236 = vmatmul.mubr.bf16.gmra.mxu0 %v4388_v16 }
  0x6e   : > { %2329 = vmatmul.mubr.bf16.gmra.mxu1 %v4390_v17  ;;  %2366 = vmatpush2.bf16.msra.mxu0 %v3702_v12  ;;  %v3752_v12 = vld [vmem:[%s5337_s1 + $0xec] ss:$16 sps:$4 sm:$0xff]  }
  0x6f   : > { %2459 = vmatpush2.bf16.msra.mxu1 %v3705_v13  ;;  %2367 = vmatprep.subr.bf16.mxu0 %v3710_v22  ;;  %v3755_v13 = vld [vmem:[%s5337_s1 + $0x2ec] ss:$16 sps:$4 sm:$0xff]   ;;  %v4513_v22 = vcombine.low %v342_v40, %v346_v41 }
  0x70   : > { %2460 = vmatprep.subr.bf16.mxu1 %v3713_v23  ;;  %2245 = vmatprep.mubr.bf16.mxu0 %v4400_v24  ;;  %v354_v23 = vld [vmem:[%s4142_s4 + $0x78] sm:$0xff] }
  0x71   : > { %2338 = vmatprep.mubr.bf16.mxu1 %v4402_v25  ;;  %v3764_v40 = vld [vmem:[%s5337_s1 + $0xac] ss:$16 sps:$4 sm:$0xff]  }
  0x72   : > { %2368 = vmatpush2.bf16.msra.mxu0 %v3708_v26  ;;  %v3750_v26 = vld [vmem:[%s5337_s1 + $0xe8] ss:$16 sps:$4 sm:$0xff]   ;;  %v3767_v41 = vld [vmem:[%s5337_s1 + $0x2ac] ss:$16 sps:$4 sm:$0xff]  }
  0x73   : > { %2461 = vmatpush2.bf16.msra.mxu1 %v3711_v29  ;;  %2369 = vmatprep.subr.bf16.mxu0 %v3716_v30  ;;  %v3753_v29 = vld [vmem:[%s5337_s1 + $0x2e8] ss:$16 sps:$4 sm:$0xff]   ;;  %v3758_v30 = vld [vmem:[%s5337_s1 + $0xcc] ss:$16 sps:$4 sm:$0xff]  }
  0x74   : > { %2462 = vmatprep.subr.bf16.mxu1 %v3719_v31  ;;  %v3761_v31 = vld [vmem:[%s5337_s1 + $0x2cc] ss:$16 sps:$4 sm:$0xff]  }
  0x75   : > { %2246 = vmatmul.mubr.bf16.gmra.mxu0 %v4427_v37 }
  0x76   : > { %2339 = vmatmul.mubr.bf16.gmra.mxu1 %v4429_v38  ;;  %2370 = vmatpush2.bf16.msra.mxu0 %v3714_v32  ;;  %v4528_v32 = vcombine.high %v349_v14, %v353_v15 }
  0x77   : > { %2463 = vmatpush2.bf16.msra.mxu1 %v3717_v33  ;;  %2371 = vmatprep.subr.bf16.mxu0 %v3722_v42  ;;  %v4530_v33 = vcombine.high %v350_v20, %v354_v23  ;;  %v3762_v42 = vld [vmem:[%s5337_s1 + $0xa8] ss:$16 sps:$4 sm:$0xff]  }
  0x78   : > { %2464 = vmatprep.subr.bf16.mxu1 %v3725_v43  ;;  %2381 = vmatprep.mubr.bf16.mxu0 %v4440_v46  ;;  %v3765_v43 = vld [vmem:[%s5337_s1 + $0x2a8] ss:$16 sps:$4 sm:$0xff]  }
  0x79   : > { %2474 = vmatprep.mubr.bf16.mxu1 %v4442_v47 }
  0x7a   : > { %2372 = vmatpush2.bf16.msra.mxu0 %v3720_v48  ;;  %v357_v48 = vld [vmem:[%s4142_s4 + $0x90] sm:$0xff] }
  0x7b   : > { %2465 = vmatpush2.bf16.msra.mxu1 %v3723_v49  ;;  %2373 = vmatprep.subr.bf16.mxu0 %v3728_v52  ;;  %v361_v49 = vld [vmem:[%s4142_s4 + $0xb0] sm:$0xff]  ;;  %v4556_v52 = vcombine.low %v349_v14, %v353_v15  ;;  %v366_v14 = vld [vmem:[%s4142_s4 + $0xd8] sm:$0xff] }
  0x7c   : > { %2466 = vmatprep.subr.bf16.mxu1 %v3731_v54  ;;  %v4558_v54 = vcombine.low %v350_v20, %v354_v23  ;;  %v370_v15 = vld [vmem:[%s4142_s4 + $0xf8] sm:$0xff] }
  0x7d   : > { %v3782_v20 = vld [vmem:[%s5337_s1 + $0x4c] ss:$16 sps:$4 sm:$0xff]  }
  0x7e   : > { %2374 = vmatpush2.bf16.msra.mxu0 %v3726_v56  ;;  %v358_v56 = vld [vmem:[%s4142_s4 + $0x98] sm:$0xff] }
  0x7f   : > { %2467 = vmatpush2.bf16.msra.mxu1 %v3729_v57  ;;  %2375 = vmatprep.subr.bf16.mxu0 %v3734_v58  ;;  %v362_v57 = vld [vmem:[%s4142_s4 + $0xb8] sm:$0xff] }
  0x80   : > { %2468 = vmatprep.subr.bf16.mxu1 %v3737_v59  ;;  %v3770_v58 = vld [vmem:[%s5337_s1 + $0x8c] ss:$16 sps:$4 sm:$0xff]  }
  0x81   : > { %v3773_v59 = vld [vmem:[%s5337_s1 + $0x28c] ss:$16 sps:$4 sm:$0xff]  }
  0x82   : > { %2376 = vmatpush2.bf16.msra.mxu0 %v3732_v60  ;;  %v4568_v60 = vcombine.high %v357_v48, %v361_v49  ;;  %v3785_v23 = vld [vmem:[%s5337_s1 + $0x24c] ss:$16 sps:$4 sm:$0xff]  }
  0x83   : > { %2469 = vmatpush2.bf16.msra.mxu1 %v3735_v61  ;;  %2377 = vmatprep.subr.bf16.mxu0 %v3740_v0  ;;  %v4570_v61 = vcombine.high %v358_v56, %v362_v57  ;;  %v3768_v0 = vld [vmem:[%s5337_s1 + $0x88] ss:$16 sps:$4 sm:$0xff]  }
  0x84   : > { %2470 = vmatprep.subr.bf16.mxu1 %v3743_v1  ;;  %v3771_v1 = vld [vmem:[%s5337_s1 + $0x288] ss:$16 sps:$4 sm:$0xff]  }
  0x86   : > { %2378 = vmatpush2.bf16.msra.mxu0 %v3738_v2  ;;  %v3776_v2 = vld [vmem:[%s5337_s1 + $0x6c] ss:$16 sps:$4 sm:$0xff]  }
  0x87   : > { %2471 = vmatpush2.bf16.msra.mxu1 %v3741_v3  ;;  %2379 = vmatprep.subr.bf16.mxu0 %v3746_v6  ;;  %v3779_v3 = vld [vmem:[%s5337_s1 + $0x26c] ss:$16 sps:$4 sm:$0xff]   ;;  %v3774_v6 = vld [vmem:[%s5337_s1 + $0x68] ss:$16 sps:$4 sm:$0xff]  }
  0x88   : > { %2472 = vmatprep.subr.bf16.mxu1 %v3749_v7  ;;  %v3777_v7 = vld [vmem:[%s5337_s1 + $0x268] ss:$16 sps:$4 sm:$0xff]  }
  0x8a   : > { %2380 = vmatpush2.bf16.msra.mxu0 %v3744_v8  ;;  %v365_v8 = vld [vmem:[%s4142_s4 + $0xd0] sm:$0xff] }
  0x8b   : > { %2473 = vmatpush2.bf16.msra.mxu1 %v3747_v9  ;;  %2535 = vmatprep.subr.bf16.mxu0 %v3752_v12  ;;  %v369_v9 = vld [vmem:[%s4142_s4 + $0xf0] sm:$0xff]  ;;  %v4596_v12 = vcombine.low %v357_v48, %v361_v49  ;;  %v4638_v49 = vcombine.low %v366_v14, %v370_v15 }
  0x8c   : > { %2628 = vmatprep.subr.bf16.mxu1 %v3755_v13  ;;  %v4598_v13 = vcombine.low %v358_v56, %v362_v57  ;;  %v4636_v48 = vcombine.low %v365_v8, %v369_v9  ;;  %v374_v56 = vld [vmem:[%s4142_s4 + $0x118] sm:$0xff] }
  0x8d   : > { %2382 = vmatmul.mubr.bf16.vlgmr.msra.gmra.mxu0 %v4511_v21  ;;  %v378_v57 = vld [vmem:[%s4142_s4 + $0x138] sm:$0xff] }
  0x8e   : > { %2475 = vmatmul.mubr.bf16.vlgmr.msra.gmra.mxu1 %v4513_v22  ;;  %2536 = vmatpush1.bf16.msra.mxu0 %v3750_v26  ;;  %v4608_v26 = vcombine.high %v365_v8, %v369_v9  ;;  %v3798_v8 = vld [vmem:[%s5337_s1 + $0x1e8] ss:$16 sps:$4 sm:$0xff]  }
  0x8f   : > { %2629 = vmatpush1.bf16.msra.mxu1 %v3753_v29  ;;  %2537 = vmatprep.subr.bf16.mxu0 %v3758_v30  ;;  %v4610_v29 = vcombine.high %v366_v14, %v370_v15  ;;  %v3780_v30 = vld [vmem:[%s5337_s1 + $0x48] ss:$16 sps:$4 sm:$0xff]   ;;  %v381_v14 = vld [vmem:[%s4142_s4 + $0x150] sm:$0xff] }
  0x90   : > { %2630 = vmatprep.subr.bf16.mxu1 %v3761_v31  ;;  %2391 = vmatprep.mubr.bf16.mxu0 %v4528_v32  ;;  %v3783_v31 = vld [vmem:[%s5337_s1 + $0x248] ss:$16 sps:$4 sm:$0xff]   ;;  %v385_v15 = vld [vmem:[%s4142_s4 + $0x170] sm:$0xff] }
  0x91   : > { %2484 = vmatprep.mubr.bf16.mxu1 %v4530_v33  ;;  %v3801_v9 = vld [vmem:[%s5337_s1 + $0x3e8] ss:$16 sps:$4 sm:$0xff]  }
  0x92   : > { %2538 = vmatpush1.bf16.msra.mxu0 %v3756_v36  ;;  %v3788_v36 = vld [vmem:[%s5337_s1 + $0x2c] ss:$16 sps:$4 sm:$0xff]  }
  0x93   : > { %2631 = vmatpush1.bf16.msra.mxu1 %v3759_v39  ;;  %2539 = vmatprep.subr.bf16.mxu0 %v3764_v40  ;;  %v3791_v39 = vld [vmem:[%s5337_s1 + $0x22c] ss:$16 sps:$4 sm:$0xff]   ;;  %v3786_v40 = vld [vmem:[%s5337_s1 + $0x28] ss:$16 sps:$4 sm:$0xff]  }
  0x94   : > { %2632 = vmatprep.subr.bf16.mxu1 %v3767_v41  ;;  %v3789_v41 = vld [vmem:[%s5337_s1 + $0x228] ss:$16 sps:$4 sm:$0xff]  }
  0x95   : > { %2392 = vmatmul.mubr.bf16.gmra.mxu0 %v4556_v52 }
  0x96   : > { %2485 = vmatmul.mubr.bf16.gmra.mxu1 %v4558_v54  ;;  %2540 = vmatpush1.bf16.msra.mxu0 %v3762_v42  ;;  %v373_v42 = vld [vmem:[%s4142_s4 + $0x110] sm:$0xff] }
  0x97   : > { %2633 = vmatpush1.bf16.msra.mxu1 %v3765_v43  ;;  %2541 = vmatprep.subr.bf16.mxu0 %v3770_v58  ;;  %v377_v43 = vld [vmem:[%s4142_s4 + $0x130] sm:$0xff]  ;;  %v3794_v58 = vld [vmem:[%s5337_s1 + $0xc] ss:$16 sps:$4 sm:$0xff]  }
  0x98   : > { %2634 = vmatprep.subr.bf16.mxu1 %v3773_v59  ;;  %2401 = vmatprep.mubr.bf16.mxu0 %v4568_v60  ;;  %v3797_v59 = vld [vmem:[%s5337_s1 + $0x20c] ss:$16 sps:$4 sm:$0xff]  }
  0x99   : > { %2494 = vmatprep.mubr.bf16.mxu1 %v4570_v61 }
  0x9a   : > { %2542 = vmatpush1.bf16.msra.mxu0 %v3768_v0  ;;  %v4648_v0 = vcombine.high %v373_v42, %v377_v43 }
  0x9b   : > { %2635 = vmatpush1.bf16.msra.mxu1 %v3771_v1  ;;  %2543 = vmatprep.subr.bf16.mxu0 %v3776_v2  ;;  %v4650_v1 = vcombine.high %v374_v56, %v378_v57  ;;  %v3792_v2 = vld [vmem:[%s5337_s1 + $0x8] ss:$16 sps:$4 sm:$0xff]  }
  0x9c   : > { %2636 = vmatprep.subr.bf16.mxu1 %v3779_v3  ;;  %v3795_v3 = vld [vmem:[%s5337_s1 + $0x208] ss:$16 sps:$4 sm:$0xff]  }
  0x9d   : > { %2402 = vmatmul.mubr.bf16.gmra.mxu0 %v4596_v12 }
  0x9e   : > { %2495 = vmatmul.mubr.bf16.gmra.mxu1 %v4598_v13  ;;  %2544 = vmatpush1.bf16.msra.mxu0 %v3774_v6  ;;  %v3800_v6 = vld [vmem:[%s5337_s1 + $0x1ec] ss:$16 sps:$4 sm:$0xff]  }
  0x9f   : > { %2637 = vmatpush1.bf16.msra.mxu1 %v3777_v7  ;;  %2545 = vmatprep.subr.bf16.mxu0 %v3782_v20  ;;  %v3803_v7 = vld [vmem:[%s5337_s1 + $0x3ec] ss:$16 sps:$4 sm:$0xff]   ;;  %v4676_v20 = vcombine.low %v373_v42, %v377_v43  ;;  %v3804_v42 = vld [vmem:[%s5337_s1 + $0x1c8] ss:$16 sps:$4 sm:$0xff]  }
  0xa0   : > { %2638 = vmatprep.subr.bf16.mxu1 %v3785_v23  ;;  %2411 = vmatprep.mubr.bf16.mxu0 %v4608_v26  ;;  %v4678_v23 = vcombine.low %v374_v56, %v378_v57  ;;  %v3807_v43 = vld [vmem:[%s5337_s1 + $0x3c8] ss:$16 sps:$4 sm:$0xff]   ;;  %v3812_v56 = vld [vmem:[%s5337_s1 + $0x1ac] ss:$16 sps:$4 sm:$0xff]  }
  0xa1   : > { %2504 = vmatprep.mubr.bf16.mxu1 %v4610_v29  ;;  %v3815_v57 = vld [vmem:[%s5337_s1 + $0x3ac] ss:$16 sps:$4 sm:$0xff]  }
  0xa2   : > { %2546 = vmatpush1.bf16.msra.mxu0 %v3780_v30  ;;  %v382_v30 = vld [vmem:[%s4142_s4 + $0x158] sm:$0xff] }
  0xa3   : > { %2639 = vmatpush1.bf16.msra.mxu1 %v3783_v31  ;;  %2547 = vmatprep.subr.bf16.mxu0 %v3788_v36  ;;  %v386_v31 = vld [vmem:[%s4142_s4 + $0x178] sm:$0xff] }
  0xa4   : > { %2640 = vmatprep.subr.bf16.mxu1 %v3791_v39  ;;  %v3806_v36 = vld [vmem:[%s5337_s1 + $0x1cc] ss:$16 sps:$4 sm:$0xff]  }
  0xa5   : > { %2412 = vmatmul.mubr.bf16.gmra.mxu0 %v4636_v48  ;;  %v3809_v39 = vld [vmem:[%s5337_s1 + $0x3cc] ss:$16 sps:$4 sm:$0xff]  }
  0xa6   : > { %2505 = vmatmul.mubr.bf16.gmra.mxu1 %v4638_v49  ;;  %2548 = vmatpush1.bf16.msra.mxu0 %v3786_v40  ;;  %v4688_v40 = vcombine.high %v381_v14, %v385_v15 }
  0xa7   : > { %2641 = vmatpush1.bf16.msra.mxu1 %v3789_v41  ;;  %2549 = vmatprep.subr.bf16.mxu0 %v3794_v58  ;;  %v4690_v41 = vcombine.high %v382_v30, %v386_v31  ;;  %v4708_v58 = vcombine.low %v381_v14, %v385_v15  ;;  %v3824_v14 = vld [vmem:[%s5337_s1 + $0x16c] ss:$16 sps:$4 sm:$0xff]  }
  0xa8   : > { %2642 = vmatprep.subr.bf16.mxu1 %v3797_v59  ;;  %2421 = vmatprep.mubr.bf16.mxu0 %v4648_v0  ;;  %v3810_v59 = vld [vmem:[%s5337_s1 + $0x1a8] ss:$16 sps:$4 sm:$0xff]   ;;  %v3827_v15 = vld [vmem:[%s5337_s1 + $0x36c] ss:$16 sps:$4 sm:$0xff]  }
  0xa9   : > { %2514 = vmatprep.mubr.bf16.mxu1 %v4650_v1 }
  0xaa   : > { %2550 = vmatpush1.bf16.msra.mxu0 %v3792_v2  ;;  %v3813_v2 = vld [vmem:[%s5337_s1 + $0x3a8] ss:$16 sps:$4 sm:$0xff]  }
  0xab   : > { %2643 = vmatpush1.bf16.msra.mxu1 %v3795_v3  ;;  %2551 = vmatprep.subr.bf16.mxu0 %v3800_v6  ;;  %v4716_v3 = vcombine.low %v382_v30, %v386_v31  ;;  %v3818_v6 = vld [vmem:[%s5337_s1 + $0x18c] ss:$16 sps:$4 sm:$0xff]   ;;  %v3822_v30 = vld [vmem:[%s5337_s1 + $0x168] ss:$16 sps:$4 sm:$0xff]  }
  0xac   : > { %2644 = vmatprep.subr.bf16.mxu1 %v3803_v7  ;;  %v3821_v7 = vld [vmem:[%s5337_s1 + $0x38c] ss:$16 sps:$4 sm:$0xff]   ;;  %v3825_v31 = vld [vmem:[%s5337_s1 + $0x368] ss:$16 sps:$4 sm:$0xff]  }
  0xad   : > { %2422 = vmatmul.mubr.bf16.gmra.mxu0 %v4676_v20 }
  0xae   : > { %2515 = vmatmul.mubr.bf16.gmra.mxu1 %v4678_v23  ;;  %2552 = vmatpush2.bf16.msra.mxu0 %v3798_v8  ;;  %v3816_v8 = vld [vmem:[%s5337_s1 + $0x188] ss:$16 sps:$4 sm:$0xff]  }
  0xaf   : > { %2645 = vmatpush2.bf16.msra.mxu1 %v3801_v9  ;;  %2553 = vmatprep.subr.bf16.mxu0 %v3806_v36  ;;  %v3819_v9 = vld [vmem:[%s5337_s1 + $0x388] ss:$16 sps:$4 sm:$0xff]   ;;  %v3830_v36 = vld [vmem:[%s5337_s1 + $0x14c] ss:$16 sps:$4 sm:$0xff]  }
  0xb0   : > { %2646 = vmatprep.subr.bf16.mxu1 %v3809_v39  ;;  %2431 = vmatprep.mubr.bf16.mxu0 %v4688_v40  ;;  %v3831_v39 = vld [vmem:[%s5337_s1 + $0x348] ss:$16 sps:$4 sm:$0xff]  }
  0xb1   : > { %2524 = vmatprep.mubr.bf16.mxu1 %v4690_v41 }
  0xb2   : > { %2554 = vmatpush2.bf16.msra.mxu0 %v3804_v42  ;;  %v3836_v42 = vld [vmem:[%s5337_s1 + $0x12c] ss:$16 sps:$4 sm:$0xff]  }
  0xb3   : > { %2647 = vmatpush2.bf16.msra.mxu1 %v3807_v43  ;;  %2555 = vmatprep.subr.bf16.mxu0 %v3812_v56  ;;  %v3839_v43 = vld [vmem:[%s5337_s1 + $0x32c] ss:$16 sps:$4 sm:$0xff]   ;;  %v3834_v56 = vld [vmem:[%s5337_s1 + $0x128] ss:$16 sps:$4 sm:$0xff]  }
  0xb4   : > { %2648 = vmatprep.subr.bf16.mxu1 %v3815_v57  ;;  %v3837_v57 = vld [vmem:[%s5337_s1 + $0x328] ss:$16 sps:$4 sm:$0xff]  }
  0xb5   : > { %2432 = vmatmul.mubr.bf16.gmra.mxu0 %v4708_v58 }
  0xb6   : > { %2525 = vmatmul.mubr.bf16.gmra.mxu1 %v4716_v3  ;;  %2556 = vmatpush2.bf16.msra.mxu0 %v3810_v59  ;;  %v3842_v59 = vld [vmem:[%s5337_s1 + $0x10c] ss:$16 sps:$4 sm:$0xff]  }
  0xb7   : > { %2649 = vmatpush2.bf16.msra.mxu1 %v3813_v2  ;;  %2557 = vmatprep.subr.bf16.mxu0 %v3818_v6  ;;  %v3845_v2 = vld [vmem:[%s5337_s1 + $0x30c] ss:$16 sps:$4 sm:$0xff]   ;;  %v3840_v6 = vld [vmem:[%s5337_s1 + $0x108] ss:$16 sps:$4 sm:$0xff]  }
  0xb8   : > { %2650 = vmatprep.subr.bf16.mxu1 %v3821_v7  ;;  %2567 = vmatprep.mubr.bf16.mxu0 %v4163_v53  ;;  %v3833_v53 = vld [vmem:[%s5337_s1 + $0x34c] ss:$16 sps:$4 sm:$0xff]   ;;  %v3843_v7 = vld [vmem:[%s5337_s1 + $0x308] ss:$16 sps:$4 sm:$0xff]  }
  0xb9   : > { %2660 = vmatprep.mubr.bf16.mxu1 %v4168_v55  ;;  %v3828_v55 = vld [vmem:[%s5337_s1 + $0x148] ss:$16 sps:$4 sm:$0xff]  }
  0xba   : > { %2558 = vmatpush2.bf16.msra.mxu0 %v3816_v8  ;;  %v3848_v8 = vld [vmem:[%s5337_s1 + $0x4ec] ss:$16 sps:$4 sm:$0xff]  }
  0xbb   : > { %2651 = vmatpush2.bf16.msra.mxu1 %v3819_v9  ;;  %2559 = vmatprep.subr.bf16.mxu0 %v3824_v14  ;;  %v3851_v9 = vld [vmem:[%s5337_s1 + $0x6ec] ss:$16 sps:$4 sm:$0xff]   ;;  %v3846_v14 = vld [vmem:[%s5337_s1 + $0x4e8] ss:$16 sps:$4 sm:$0xff]  }
  0xbc   : > { %2652 = vmatprep.subr.bf16.mxu1 %v3827_v15  ;;  %v3849_v15 = vld [vmem:[%s5337_s1 + $0x6e8] ss:$16 sps:$4 sm:$0xff]  }
  0xbe   : > { %2560 = vmatpush2.bf16.msra.mxu0 %v3822_v30  ;;  %v3854_v30 = vld [vmem:[%s5337_s1 + $0x4cc] ss:$16 sps:$4 sm:$0xff]  }
  0xbf   : > { %2653 = vmatpush2.bf16.msra.mxu1 %v3825_v31  ;;  %2561 = vmatprep.subr.bf16.mxu0 %v3830_v36  ;;  %v3857_v31 = vld [vmem:[%s5337_s1 + $0x6cc] ss:$16 sps:$4 sm:$0xff]   ;;  %v3852_v36 = vld [vmem:[%s5337_s1 + $0x4c8] ss:$16 sps:$4 sm:$0xff]  }
  0xc0   : > { %2654 = vmatprep.subr.bf16.mxu1 %v3833_v53  ;;  %v3855_v53 = vld [vmem:[%s5337_s1 + $0x6c8] ss:$16 sps:$4 sm:$0xff]  }
  0xc2   : > { %2562 = vmatpush2.bf16.msra.mxu0 %v3828_v55  ;;  %v3860_v55 = vld [vmem:[%s5337_s1 + $0x4ac] ss:$16 sps:$4 sm:$0xff]  }
  0xc3   : > { %2655 = vmatpush2.bf16.msra.mxu1 %v3831_v39  ;;  %2563 = vmatprep.subr.bf16.mxu0 %v3836_v42  ;;  %v3861_v39 = vld [vmem:[%s5337_s1 + $0x6a8] ss:$16 sps:$4 sm:$0xff]   ;;  %v3866_v42 = vld [vmem:[%s5337_s1 + $0x48c] ss:$16 sps:$4 sm:$0xff]  }
  0xc4   : > { %2656 = vmatprep.subr.bf16.mxu1 %v3839_v43  ;;  %v3867_v43 = vld [vmem:[%s5337_s1 + $0x688] ss:$16 sps:$4 sm:$0xff]  }
  0xc6   : > { %2564 = vmatpush2.bf16.msra.mxu0 %v3834_v56  ;;  %v3872_v56 = vld [vmem:[%s5337_s1 + $0x46c] ss:$16 sps:$4 sm:$0xff]  }
  0xc7   : > { %2657 = vmatpush2.bf16.msra.mxu1 %v3837_v57  ;;  %2565 = vmatprep.subr.bf16.mxu0 %v3842_v59  ;;  %v3873_v57 = vld [vmem:[%s5337_s1 + $0x668] ss:$16 sps:$4 sm:$0xff]   ;;  %v3878_v59 = vld [vmem:[%s5337_s1 + $0x44c] ss:$16 sps:$4 sm:$0xff]  }
  0xc8   : > { %2658 = vmatprep.subr.bf16.mxu1 %v3845_v2  ;;  %v3879_v2 = vld [vmem:[%s5337_s1 + $0x648] ss:$16 sps:$4 sm:$0xff]  }
  0xca   : > { %2566 = vmatpush2.bf16.msra.mxu0 %v3840_v6  ;;  %v3884_v6 = vld [vmem:[%s5337_s1 + $0x42c] ss:$16 sps:$4 sm:$0xff]  }
  0xcb   : > { %2659 = vmatpush2.bf16.msra.mxu1 %v3843_v7  ;;  %2721 = vmatprep.subr.bf16.mxu0 %v3848_v8  ;;  %v3885_v7 = vld [vmem:[%s5337_s1 + $0x628] ss:$16 sps:$4 sm:$0xff]   ;;  %v3890_v8 = vld [vmem:[%s5337_s1 + $0x40c] ss:$16 sps:$4 sm:$0xff]  }
  0xcc   : > { %2814 = vmatprep.subr.bf16.mxu1 %v3851_v9  ;;  %v3891_v9 = vld [vmem:[%s5337_s1 + $0x608] ss:$16 sps:$4 sm:$0xff]  }
  0xcd   : > { %2568 = vmatmul.mubr.bf16.vlgmr.msra.gmra.mxu0 %v4222_v10  ;;  %v3863_v10 = vld [vmem:[%s5337_s1 + $0x6ac] ss:$16 sps:$4 sm:$0xff]  }
  0xce   : > { %2661 = vmatmul.mubr.bf16.vlgmr.msra.gmra.mxu1 %v4224_v11  ;;  %2722 = vmatpush1.bf16.msra.mxu0 %v3846_v14  ;;  %v3858_v11 = vld [vmem:[%s5337_s1 + $0x4a8] ss:$16 sps:$4 sm:$0xff]   ;;  %v3896_v14 = vld [vmem:[%s5337_s1 + $0x5ec] ss:$16 sps:$4 sm:$0xff]  }
  0xcf   : > { %2815 = vmatpush1.bf16.msra.mxu1 %v3849_v15  ;;  %2723 = vmatprep.subr.bf16.mxu0 %v3854_v30  ;;  %v3897_v15 = vld [vmem:[%s5337_s1 + $0x7e8] ss:$16 sps:$4 sm:$0xff]   ;;  %v3902_v30 = vld [vmem:[%s5337_s1 + $0x5cc] ss:$16 sps:$4 sm:$0xff]  }
  0xd0   : > { %2816 = vmatprep.subr.bf16.mxu1 %v3857_v31  ;;  %2577 = vmatprep.mubr.bf16.mxu0 %v4240_v18  ;;  %v3869_v18 = vld [vmem:[%s5337_s1 + $0x68c] ss:$16 sps:$4 sm:$0xff]   ;;  %v3903_v31 = vld [vmem:[%s5337_s1 + $0x7c8] ss:$16 sps:$4 sm:$0xff]  }
  0xd1   : > { %2670 = vmatprep.mubr.bf16.mxu1 %v4242_v19  ;;  %v3864_v19 = vld [vmem:[%s5337_s1 + $0x488] ss:$16 sps:$4 sm:$0xff]  }
  0xd2   : > { %2724 = vmatpush1.bf16.msra.mxu0 %v3852_v36  ;;  %v3908_v36 = vld [vmem:[%s5337_s1 + $0x5ac] ss:$16 sps:$4 sm:$0xff]  }
  0xd3   : > { %2817 = vmatpush1.bf16.msra.mxu1 %v3855_v53  ;;  %2725 = vmatprep.subr.bf16.mxu0 %v3860_v55  ;;  %v3909_v53 = vld [vmem:[%s5337_s1 + $0x7a8] ss:$16 sps:$4 sm:$0xff]   ;;  %v3914_v55 = vld [vmem:[%s5337_s1 + $0x58c] ss:$16 sps:$4 sm:$0xff]  }
  0xd4   : > { %2818 = vmatprep.subr.bf16.mxu1 %v3863_v10  ;;  %v3915_v10 = vld [vmem:[%s5337_s1 + $0x788] ss:$16 sps:$4 sm:$0xff]  }
  0xd5   : > { %2578 = vmatmul.mubr.bf16.gmra.mxu0 %v4267_v27  ;;  %v3875_v27 = vld [vmem:[%s5337_s1 + $0x66c] ss:$16 sps:$4 sm:$0xff]  }
  0xd6   : > { %2671 = vmatmul.mubr.bf16.gmra.mxu1 %v4269_v28  ;;  %2726 = vmatpush1.bf16.msra.mxu0 %v3858_v11  ;;  %v3870_v28 = vld [vmem:[%s5337_s1 + $0x468] ss:$16 sps:$4 sm:$0xff]   ;;  %v3920_v11 = vld [vmem:[%s5337_s1 + $0x56c] ss:$16 sps:$4 sm:$0xff]  }
  0xd7   : > { %2819 = vmatpush1.bf16.msra.mxu1 %v3861_v39  ;;  %2727 = vmatprep.subr.bf16.mxu0 %v3866_v42  ;;  %v3921_v39 = vld [vmem:[%s5337_s1 + $0x768] ss:$16 sps:$4 sm:$0xff]   ;;  %v3926_v42 = vld [vmem:[%s5337_s1 + $0x54c] ss:$16 sps:$4 sm:$0xff]  }
  0xd8   : > { %2820 = vmatprep.subr.bf16.mxu1 %v3869_v18  ;;  %2587 = vmatprep.mubr.bf16.mxu0 %v4280_v34  ;;  %v3881_v34 = vld [vmem:[%s5337_s1 + $0x64c] ss:$16 sps:$4 sm:$0xff]   ;;  %v3927_v18 = vld [vmem:[%s5337_s1 + $0x748] ss:$16 sps:$4 sm:$0xff]  }
  0xd9   : > { %2680 = vmatprep.mubr.bf16.mxu1 %v4282_v35  ;;  %v3876_v35 = vld [vmem:[%s5337_s1 + $0x448] ss:$16 sps:$4 sm:$0xff]  }
  0xda   : > { %2728 = vmatpush1.bf16.msra.mxu0 %v3864_v19  ;;  %v3932_v19 = vld [vmem:[%s5337_s1 + $0x52c] ss:$16 sps:$4 sm:$0xff]  }
  0xdb   : > { %2821 = vmatpush1.bf16.msra.mxu1 %v3867_v43  ;;  %2729 = vmatprep.subr.bf16.mxu0 %v3872_v56  ;;  %v3935_v43 = vld [vmem:[%s5337_s1 + $0x72c] ss:$16 sps:$4 sm:$0xff]   ;;  %v3930_v56 = vld [vmem:[%s5337_s1 + $0x528] ss:$16 sps:$4 sm:$0xff]  }
  0xdc   : > { %2822 = vmatprep.subr.bf16.mxu1 %v3875_v27  ;;  %v3933_v27 = vld [vmem:[%s5337_s1 + $0x728] ss:$16 sps:$4 sm:$0xff]  }
  0xdd   : > { %2588 = vmatmul.mubr.bf16.gmra.mxu0 %v4308_v44  ;;  %v3887_v44 = vld [vmem:[%s5337_s1 + $0x62c] ss:$16 sps:$4 sm:$0xff]  }
  0xde   : > { %2681 = vmatmul.mubr.bf16.gmra.mxu1 %v4310_v45  ;;  %2730 = vmatpush1.bf16.msra.mxu0 %v3870_v28  ;;  %v3882_v45 = vld [vmem:[%s5337_s1 + $0x428] ss:$16 sps:$4 sm:$0xff]   ;;  %v3938_v28 = vld [vmem:[%s5337_s1 + $0x50c] ss:$16 sps:$4 sm:$0xff]  }
  0xdf   : > { %2823 = vmatpush1.bf16.msra.mxu1 %v3873_v57  ;;  %2731 = vmatprep.subr.bf16.mxu0 %v3878_v59  ;;  %v3941_v57 = vld [vmem:[%s5337_s1 + $0x70c] ss:$16 sps:$4 sm:$0xff]   ;;  %v3936_v59 = vld [vmem:[%s5337_s1 + $0x508] ss:$16 sps:$4 sm:$0xff]  }
  0xe0   : > { %2824 = vmatprep.subr.bf16.mxu1 %v3881_v34  ;;  %2597 = vmatprep.mubr.bf16.mxu0 %v4320_v50  ;;  %v3893_v50 = vld [vmem:[%s5337_s1 + $0x60c] ss:$16 sps:$4 sm:$0xff]   ;;  %v3939_v34 = vld [vmem:[%s5337_s1 + $0x708] ss:$16 sps:$4 sm:$0xff]  }
  0xe1   : > { %2690 = vmatprep.mubr.bf16.mxu1 %v4322_v51  ;;  %v3888_v51 = vld [vmem:[%s5337_s1 + $0x408] ss:$16 sps:$4 sm:$0xff]  }
  0xe2   : > { %2732 = vmatpush1.bf16.msra.mxu0 %v3876_v35 }
  0xe3   : > { %2825 = vmatpush1.bf16.msra.mxu1 %v3879_v2  ;;  %2733 = vmatprep.subr.bf16.mxu0 %v3884_v6 }
  0xe4   : > { %2826 = vmatprep.subr.bf16.mxu1 %v3887_v44 }
  0xe5   : > { %2598 = vmatmul.mubr.bf16.gmra.mxu0 %v4348_v62  ;;  %v3899_v62 = vld [vmem:[%s5337_s1 + $0x7ec] ss:$16 sps:$4 sm:$0xff]  }
  0xe6   : > { %2691 = vmatmul.mubr.bf16.gmra.mxu1 %v4350_v63  ;;  %2734 = vmatpush1.bf16.msra.mxu0 %v3882_v45  ;;  %v3894_v63 = vld [vmem:[%s5337_s1 + $0x5e8] ss:$16 sps:$4 sm:$0xff]  }
  0xe7   : > { %2827 = vmatpush1.bf16.msra.mxu1 %v3885_v7  ;;  %2735 = vmatprep.subr.bf16.mxu0 %v3890_v8 }
  0xe8   : > { %2828 = vmatprep.subr.bf16.mxu1 %v3893_v50  ;;  %2607 = vmatprep.mubr.bf16.mxu0 %v4360_v4  ;;  %v3905_v4 = vld [vmem:[%s5337_s1 + $0x7cc] ss:$16 sps:$4 sm:$0xff]  }
  0xe9   : > { %2700 = vmatprep.mubr.bf16.mxu1 %v4362_v5  ;;  %v3900_v5 = vld [vmem:[%s5337_s1 + $0x5c8] ss:$16 sps:$4 sm:$0xff]  }
  0xea   : > { %2736 = vmatpush1.bf16.msra.mxu0 %v3888_v51 }
  0xeb   : > { %2829 = vmatpush1.bf16.msra.mxu1 %v3891_v9  ;;  %2737 = vmatprep.subr.bf16.mxu0 %v3896_v14 }
  0xec   : > { %2830 = vmatprep.subr.bf16.mxu1 %v3899_v62 }
  0xed   : > { %2608 = vmatmul.mubr.bf16.gmra.mxu0 %v4388_v16  ;;  %v3911_v16 = vld [vmem:[%s5337_s1 + $0x7ac] ss:$16 sps:$4 sm:$0xff]  }
  0xee   : > { %2701 = vmatmul.mubr.bf16.gmra.mxu1 %v4390_v17  ;;  %2738 = vmatpush2.bf16.msra.mxu0 %v3894_v63  ;;  %v3906_v17 = vld [vmem:[%s5337_s1 + $0x5a8] ss:$16 sps:$4 sm:$0xff]  }
  0xef   : > { %2831 = vmatpush2.bf16.msra.mxu1 %v3897_v15  ;;  %2739 = vmatprep.subr.bf16.mxu0 %v3902_v30 }
  0xf0   : > { %2832 = vmatprep.subr.bf16.mxu1 %v3905_v4  ;;  %2617 = vmatprep.mubr.bf16.mxu0 %v4400_v24  ;;  %v3917_v24 = vld [vmem:[%s5337_s1 + $0x78c] ss:$16 sps:$4 sm:$0xff]  }
  0xf1   : > { %2710 = vmatprep.mubr.bf16.mxu1 %v4402_v25  ;;  %v3912_v25 = vld [vmem:[%s5337_s1 + $0x588] ss:$16 sps:$4 sm:$0xff]  }
  0xf2   : > { %2740 = vmatpush2.bf16.msra.mxu0 %v3900_v5 }
  0xf3   : > { %2833 = vmatpush2.bf16.msra.mxu1 %v3903_v31  ;;  %2741 = vmatprep.subr.bf16.mxu0 %v3908_v36 }
  0xf4   : > { %2834 = vmatprep.subr.bf16.mxu1 %v3911_v16 }
  0xf5   : > { %2618 = vmatmul.mubr.bf16.gmra.mxu0 %v4427_v37  ;;  %v3923_v37 = vld [vmem:[%s5337_s1 + $0x76c] ss:$16 sps:$4 sm:$0xff]  }
  0xf6   : > { %2711 = vmatmul.mubr.bf16.gmra.mxu1 %v4429_v38  ;;  %2742 = vmatpush2.bf16.msra.mxu0 %v3906_v17  ;;  %v3918_v38 = vld [vmem:[%s5337_s1 + $0x568] ss:$16 sps:$4 sm:$0xff]  }
  0xf7   : > { %2835 = vmatpush2.bf16.msra.mxu1 %v3909_v53  ;;  %2743 = vmatprep.subr.bf16.mxu0 %v3914_v55 }
  0xf8   : > { %2836 = vmatprep.subr.bf16.mxu1 %v3917_v24  ;;  %2753 = vmatprep.mubr.bf16.mxu0 %v4440_v46  ;;  %v3929_v46 = vld [vmem:[%s5337_s1 + $0x74c] ss:$16 sps:$4 sm:$0xff]  }
  0xf9   : > { %2846 = vmatprep.mubr.bf16.mxu1 %v4442_v47  ;;  %v3924_v47 = vld [vmem:[%s5337_s1 + $0x548] ss:$16 sps:$4 sm:$0xff]  }
  0xfa   : > { %2744 = vmatpush2.bf16.msra.mxu0 %v3912_v25 }
  0xfb   : > { %2837 = vmatpush2.bf16.msra.mxu1 %v3915_v10  ;;  %2745 = vmatprep.subr.bf16.mxu0 %v3920_v11 }
  0xfc   : > { %2838 = vmatprep.subr.bf16.mxu1 %v3923_v37 }
  0xfe   : > { %2746 = vmatpush2.bf16.msra.mxu0 %v3918_v38 }
  0xff   : > { %2839 = vmatpush2.bf16.msra.mxu1 %v3921_v39  ;;  %2747 = vmatprep.subr.bf16.mxu0 %v3926_v42 }
 0x100   : > { %2840 = vmatprep.subr.bf16.mxu1 %v3929_v46 }
 0x102   : > { %2748 = vmatpush2.bf16.msra.mxu0 %v3924_v47 }
 0x103   : > { %2841 = vmatpush2.bf16.msra.mxu1 %v3927_v18  ;;  %2749 = vmatprep.subr.bf16.mxu0 %v3932_v19 }
 0x104   : > { %2842 = vmatprep.subr.bf16.mxu1 %v3935_v43 }
 0x106   : > { %2750 = vmatpush2.bf16.msra.mxu0 %v3930_v56 }
 0x107   : > { %2843 = vmatpush2.bf16.msra.mxu1 %v3933_v27  ;;  %2751 = vmatprep.subr.bf16.mxu0 %v3938_v28 }
 0x108   : > { %2844 = vmatprep.subr.bf16.mxu1 %v3941_v57 }
 0x10a   : > { %2752 = vmatpush2.bf16.msra.mxu0 %v3936_v59 }
 0x10b   : > { %2845 = vmatpush2.bf16.msra.mxu1 %v3939_v34 }
 0x10d   : > { %v4998_v35 = vpop.f32.mrf.mxu0  ;;  %2754 = vmatmul.mubr.bf16.vlgmr.msra.gmra.mxu0 %v4511_v21 }
 0x10e   : > { %v5000_v2 = vpop.f32.mrf.mxu1  ;;  %2847 = vmatmul.mubr.bf16.vlgmr.msra.gmra.mxu1 %v4513_v22  ;;  %2763 = vmatprep.mubr.bf16.mxu0 %v4528_v32 }
 0x10f   : > { %2856 = vmatprep.mubr.bf16.mxu1 %v4530_v33  ;;  %v5006_v6 = vpop.f32.mrf.mxu0  ;;  %v2291_v11 = vadd.f32 %v5000_v2, %v4998_v35 }
 0x110   : > { %v5008_v44 = vpop.f32.mrf.mxu1 }
 0x111   : > { %v5010_v45 = vpop.f32.mrf.mxu0  ;;  %v2293_v39 = vadd.f32 %v5008_v44, %v5006_v6 }
 0x112   : > { %v5012_v7 = vpop.f32.mrf.mxu1 }
 0x113   : > { %v5014_v8 = vpop.f32.mrf.mxu0  ;;  %v2295_v18 = vadd.f32 %v5012_v7, %v5010_v45 }
 0x114   : > { %v5016_v50 = vpop.f32.mrf.mxu1 }
 0x115   : > { %2764 = vmatmul.mubr.bf16.gmra.mxu0 %v4556_v52  ;;  %v5020_v21 = vpop.f32.mrf.mxu0  ;;  %v2297_v28 = vadd.f32 %v5016_v50, %v5014_v8 }
 0x116   : > { %2857 = vmatmul.mubr.bf16.gmra.mxu1 %v4558_v54  ;;  %v5022_v22 = vpop.f32.mrf.mxu1  ;;  %2773 = vmatprep.mubr.bf16.mxu0 %v4568_v60 }
 0x117   : > { %2866 = vmatprep.mubr.bf16.mxu1 %v4570_v61  ;;  %v5026_v32 = vpop.f32.mrf.mxu0  ;;  %v2301_v2 = vadd.f32 %v5022_v22, %v5020_v21 }
 0x118   : > { %v5028_v33 = vpop.f32.mrf.mxu1 }
 0x119   : > { %v5030_v51 = vpop.f32.mrf.mxu0 }
 0x11a   : > { %v5032_v9 = vpop.f32.mrf.mxu1 }
 0x11b   : > { %v5034_v14 = vpop.f32.mrf.mxu0 }
 0x11c   : > { %v5036_v52 = vpop.f32.mrf.mxu1 }
 0x11d   : > { %2774 = vmatmul.mubr.bf16.gmra.mxu0 %v4596_v12  ;;  %v5040_v54 = vpop.f32.mrf.mxu0 }
 0x11e   : > { %2867 = vmatmul.mubr.bf16.gmra.mxu1 %v4598_v13  ;;  %v5042_v60 = vpop.f32.mrf.mxu1  ;;  %2783 = vmatprep.mubr.bf16.mxu0 %v4608_v26 }
 0x11f   : > { %2876 = vmatprep.mubr.bf16.mxu1 %v4610_v29  ;;  %v5046_v61 = vpop.f32.mrf.mxu0 }
 0x120   : > { %v5048_v62 = vpop.f32.mrf.mxu1 }
 0x121   : > { %v5050_v63 = vpop.f32.mrf.mxu0 }
 0x122   : > { %v5052_v15 = vpop.f32.mrf.mxu1 }
 0x123   : > { %v5054_v30 = vpop.f32.mrf.mxu0 }
 0x124   : > { %v5056_v12 = vpop.f32.mrf.mxu1 }
 0x125   : > { %2784 = vmatmul.mubr.bf16.gmra.mxu0 %v4636_v48  ;;  %v5060_v13 = vpop.f32.mrf.mxu0 }
 0x126   : > { %2877 = vmatmul.mubr.bf16.gmra.mxu1 %v4638_v49  ;;  %v5062_v26 = vpop.f32.mrf.mxu1  ;;  %2793 = vmatprep.mubr.bf16.mxu0 %v4648_v0 }
 0x127   : > { %2886 = vmatprep.mubr.bf16.mxu1 %v4650_v1  ;;  %v5066_v29 = vpop.f32.mrf.mxu0 }
 0x128   : > { %v5068_v4 = vpop.f32.mrf.mxu1 }
 0x129   : > { %v5070_v5 = vpop.f32.mrf.mxu0 }
 0x12a   : > { %v5072_v31 = vpop.f32.mrf.mxu1 }
 0x12b   : > { %v5074_v36 = vpop.f32.mrf.mxu0 }
 0x12c   : > { %v5076_v48 = vpop.f32.mrf.mxu1 }
 0x12d   : > { %2794 = vmatmul.mubr.bf16.gmra.mxu0 %v4676_v20  ;;  %v5082_v49 = vpop.f32.mrf.mxu0 }
 0x12e   : > { %2887 = vmatmul.mubr.bf16.gmra.mxu1 %v4678_v23  ;;  %2803 = vmatprep.mubr.bf16.mxu0 %v4688_v40  ;;  %v5084_v0 = vpop.f32.mrf.mxu1 }
 0x12f   : > { %2896 = vmatprep.mubr.bf16.mxu1 %v4690_v41  ;;  %v5086_v1 = vpop.f32.mrf.mxu0 }
 0x130   : > { %v5088_v16 = vpop.f32.mrf.mxu1 }
 0x131   : > { %v5092_v17 = vpop.f32.mrf.mxu0 }
 0x132   : > { %v5094_v20 = vpop.f32.mrf.mxu1 }
 0x133   : > { %v5096_v23 = vpop.f32.mrf.mxu0 }
 0x134   : > { %v5098_v40 = vpop.f32.mrf.mxu1 }
 0x135   : > { %2804 = vmatmul.mubr.bf16.gmra.mxu0 %v4708_v58  ;;  %v5100_v41 = vpop.f32.mrf.mxu0 }
 0x136   : > { %2897 = vmatmul.mubr.bf16.gmra.mxu1 %v4716_v3  ;;  %v5102_v53 = vpop.f32.mrf.mxu1 }
 0x137   : > { %v5104_v55 = vpop.f32.mrf.mxu0 }
 0x138   : > { %v5106_v24 = vpop.f32.mrf.mxu1 }
 0x139   : > { %v5108_v58 = vpop.f32.mrf.mxu0 }
 0x13a   : > { %v5110_v3 = vpop.f32.mrf.mxu1 }
 0x13b   : > { %v5112_v25 = vpop.f32.mrf.mxu0 }
 0x13c   : > { %v5114_v10 = vpop.f32.mrf.mxu1 }
 0x14d   : > { %v2383_v37 = vpop.f32.mrf.mxu0 }
 0x14e   : > { %v2476_v38 = vpop.f32.mrf.mxu1  ;;  %v2384_v42 = vadd.f32 %v2383_v37, %v2291_v11  ;;  %v2303_v11 = vadd.f32 %v5028_v33, %v5026_v32 }
 0x14f   : > { %v2385_v46 = vpop.f32.mrf.mxu0 }
 0x150   : > { %v2478_v47 = vpop.f32.mrf.mxu1  ;;  %v2477_v19 = vadd.f32 %v2476_v38, %v2384_v42  ;;  %v2386_v43 = vadd.f32 %v2385_v46, %v2293_v39  ;;  %v2305_v39 = vadd.f32 %v5032_v9, %v5030_v51 }
 0x151   : > { %v2387_v56 = vpop.f32.mrf.mxu0 }
 0x152   : > { %v2480_v27 = vpop.f32.mrf.mxu1  ;;  %3054 = vst [vmem:[%s5125_s5] sm:$0xff] %v2477_v19  ;;  %v2479_v57 = vadd.f32 %v2478_v47, %v2386_v43  ;;  %v2388_v59 = vadd.f32 %v2387_v56, %v2295_v18  ;;  %v2307_v47 = vadd.f32 %v5036_v52, %v5034_v14  ;;  %v2311_v43 = vadd.f32 %v5042_v60, %v5040_v54 }
 0x153   : > { %v2389_v34 = vpop.f32.mrf.mxu0 }
 0x154   : > { %v2482_v35 = vpop.f32.mrf.mxu1  ;;  %3055 = vst [vmem:[%s5125_s5 + $0x8] sm:$0xff] %v2479_v57  ;;  %v2481_v6 = vadd.f32 %v2480_v27, %v2388_v59  ;;  %v2390_v44 = vadd.f32 %v2389_v34, %v2297_v28  ;;  %v2313_v28 = vadd.f32 %v5048_v62, %v5046_v61  ;;  %v2315_v34 = vadd.f32 %v5052_v15, %v5050_v63 }
 0x155   : > { %v2393_v45 = vpop.f32.mrf.mxu0 }
 0x156   : > { %v2486_v7 = vpop.f32.mrf.mxu1  ;;  %3058 = vst [vmem:[%s5125_s5 + $0x20] sm:$0xff] %v2481_v6  ;;  %v2483_v8 = vadd.f32 %v2482_v35, %v2390_v44  ;;  %v2394_v50 = vadd.f32 %v2393_v45, %v2301_v2  ;;  %v2317_v6 = vadd.f32 %v5056_v12, %v5054_v30 }
 0x157   : > { %v2395_v37 = vpop.f32.mrf.mxu0 }
 0x158   : > { %v2488_v38 = vpop.f32.mrf.mxu1  ;;  %3059 = vst [vmem:[%s5125_s5 + $0x28] sm:$0xff] %v2483_v8  ;;  %v2396_v21 = vadd.f32 %v2395_v37, %v2303_v11  ;;  %v2487_v22 = vadd.f32 %v2486_v7, %v2394_v50  ;;  %v2321_v7 = vadd.f32 %v5062_v26, %v5060_v13  ;;  %v2323_v50 = vadd.f32 %v5068_v4, %v5066_v29 }
 0x159   : > { %v2397_v42 = vpop.f32.mrf.mxu0 }
 0x15a   : > { %v2490_v46 = vpop.f32.mrf.mxu1  ;;  %3062 = vst [vmem:[%s5125_s5 + $0x40] sm:$0xff] %v2487_v22  ;;  %v2398_v32 = vadd.f32 %v2397_v42, %v2305_v39  ;;  %v2489_v33 = vadd.f32 %v2488_v38, %v2396_v21  ;;  %v2325_v39 = vadd.f32 %v5072_v31, %v5070_v5  ;;  %v2327_v42 = vadd.f32 %v5076_v48, %v5074_v36 }
 0x15b   : > { %v2399_v18 = vpop.f32.mrf.mxu0 }
 0x15c   : > { %v2492_v19 = vpop.f32.mrf.mxu1  ;;  %3063 = vst [vmem:[%s5125_s5 + $0x48] sm:$0xff] %v2489_v33  ;;  %v2400_v51 = vadd.f32 %v2399_v18, %v2307_v47  ;;  %v2491_v9 = vadd.f32 %v2490_v46, %v2398_v32  ;;  %v2331_v32 = vadd.f32 %v5084_v0, %v5082_v49 }
 0x15d   : > { %v2403_v56 = vpop.f32.mrf.mxu0 }
 0x15e   : > { %v2496_v27 = vpop.f32.mrf.mxu1  ;;  %3066 = vst [vmem:[%s5125_s5 + $0x60] sm:$0xff] %v2491_v9  ;;  %v2404_v14 = vadd.f32 %v2403_v56, %v2311_v43  ;;  %v2493_v52 = vadd.f32 %v2492_v19, %v2400_v51  ;;  %v2333_v19 = vadd.f32 %v5088_v16, %v5086_v1  ;;  %v2335_v9 = vadd.f32 %v5094_v20, %v5092_v17 }
 0x15f   : > { %v2405_v57 = vpop.f32.mrf.mxu0 }
 0x160   : > { %v2498_v59 = vpop.f32.mrf.mxu1  ;;  %3067 = vst [vmem:[%s5125_s5 + $0x68] sm:$0xff] %v2493_v52  ;;  %v2406_v54 = vadd.f32 %v2405_v57, %v2313_v28  ;;  %v2497_v60 = vadd.f32 %v2496_v27, %v2404_v14  ;;  %v2337_v28 = vadd.f32 %v5098_v40, %v5096_v23  ;;  %v2341_v57 = vadd.f32 %v5102_v53, %v5100_v41 }
 0x161   : > { %v2407_v35 = vpop.f32.mrf.mxu0 }
 0x162   : > { %v2500_v2 = vpop.f32.mrf.mxu1  ;;  %3070 = vst [vmem:[%s5125_s5 + $0x80] sm:$0xff] %v2497_v60  ;;  %v2408_v61 = vadd.f32 %v2407_v35, %v2315_v34  ;;  %v2499_v62 = vadd.f32 %v2498_v59, %v2406_v54  ;;  %v2343_v54 = vadd.f32 %v5106_v24, %v5104_v55 }
 0x163   : > { %v2409_v44 = vpop.f32.mrf.mxu0 }
 0x164   : > { %v2502_v45 = vpop.f32.mrf.mxu1  ;;  %3071 = vst [vmem:[%s5125_s5 + $0x88] sm:$0xff] %v2499_v62  ;;  %v2410_v63 = vadd.f32 %v2409_v44, %v2317_v6  ;;  %v2501_v15 = vadd.f32 %v2500_v2, %v2408_v61  ;;  %v2345_v2 = vadd.f32 %v5110_v3, %v5108_v58  ;;  %v2347_v62 = vadd.f32 %v5114_v10, %v5112_v25 }
 0x165   : > { %v2413_v11 = vpop.f32.mrf.mxu0 }
 0x166   : > { %v2506_v8 = vpop.f32.mrf.mxu1  ;;  %3074 = vst [vmem:[%s5125_s5 + $0xa0] sm:$0xff] %v2501_v15  ;;  %v2414_v30 = vadd.f32 %v2413_v11, %v2321_v7  ;;  %v2503_v12 = vadd.f32 %v2502_v45, %v2410_v63 }
 0x167   : > { %v2415_v37 = vpop.f32.mrf.mxu0 }
 0x168   : > { %v2508_v38 = vpop.f32.mrf.mxu1  ;;  %3075 = vst [vmem:[%s5125_s5 + $0xa8] sm:$0xff] %v2503_v12  ;;  %v2416_v13 = vadd.f32 %v2415_v37, %v2323_v50  ;;  %v2507_v26 = vadd.f32 %v2506_v8, %v2414_v30 }
 0x169   : > { %v2417_v21 = vpop.f32.mrf.mxu0 }
 0x16a   : > { %v2510_v22 = vpop.f32.mrf.mxu1  ;;  %3078 = vst [vmem:[%s5125_s5 + $0xc0] sm:$0xff] %v2507_v26  ;;  %v2418_v29 = vadd.f32 %v2417_v21, %v2325_v39  ;;  %v2509_v4 = vadd.f32 %v2508_v38, %v2416_v13 }
 0x16b   : > { %v2419_v46 = vpop.f32.mrf.mxu0 }
 0x16c   : > { %v2512_v47 = vpop.f32.mrf.mxu1  ;;  %3079 = vst [vmem:[%s5125_s5 + $0xc8] sm:$0xff] %v2509_v4  ;;  %v2420_v5 = vadd.f32 %v2419_v46, %v2327_v42  ;;  %v2511_v31 = vadd.f32 %v2510_v22, %v2418_v29 }
 0x16d   : > { %v2423_v33 = vpop.f32.mrf.mxu0 }
 0x16e   : > { %v2516_v18 = vpop.f32.mrf.mxu1  ;;  %3082 = vst [vmem:[%s5125_s5 + $0xe0] sm:$0xff] %v2511_v31  ;;  %v2424_v36 = vadd.f32 %v2423_v33, %v2331_v32  ;;  %v2513_v48 = vadd.f32 %v2512_v47, %v2420_v5 }
 0x16f   : > { %v2425_v43 = vpop.f32.mrf.mxu0 }
 0x170   : > { %v2518_v51 = vpop.f32.mrf.mxu1  ;;  %3083 = vst [vmem:[%s5125_s5 + $0xe8] sm:$0xff] %v2513_v48  ;;  %v2426_v49 = vadd.f32 %v2425_v43, %v2333_v19  ;;  %v2517_v0 = vadd.f32 %v2516_v18, %v2424_v36 }
 0x171   : > { %v2427_v56 = vpop.f32.mrf.mxu0 }
 0x172   : > { %v2520_v27 = vpop.f32.mrf.mxu1  ;;  %3086 = vst [vmem:[%s5125_s5 + $0x100] sm:$0xff] %v2517_v0  ;;  %v2428_v1 = vadd.f32 %v2427_v56, %v2335_v9  ;;  %v2519_v16 = vadd.f32 %v2518_v51, %v2426_v49 }
 0x173   : > { %v2429_v14 = vpop.f32.mrf.mxu0 }
 0x174   : > { %v2522_v52 = vpop.f32.mrf.mxu1  ;;  %3087 = vst [vmem:[%s5125_s5 + $0x108] sm:$0xff] %v2519_v16  ;;  %v2430_v17 = vadd.f32 %v2429_v14, %v2337_v28  ;;  %v2521_v20 = vadd.f32 %v2520_v27, %v2428_v1 }
 0x175   : > { %v2433_v59 = vpop.f32.mrf.mxu0 }
 0x176   : > { %v2526_v34 = vpop.f32.mrf.mxu1  ;;  %3090 = vst [vmem:[%s5125_s5 + $0x120] sm:$0xff] %v2521_v20  ;;  %v2434_v23 = vadd.f32 %v2433_v59, %v2341_v57  ;;  %v2523_v40 = vadd.f32 %v2522_v52, %v2430_v17 }
 0x177   : > { %v2435_v60 = vpop.f32.mrf.mxu0 }
 0x178   : > { %v2528_v35 = vpop.f32.mrf.mxu1  ;;  %3091 = vst [vmem:[%s5125_s5 + $0x128] sm:$0xff] %v2523_v40  ;;  %v2436_v41 = vadd.f32 %v2435_v60, %v2343_v54  ;;  %v2527_v53 = vadd.f32 %v2526_v34, %v2434_v23 }
 0x179   : > { %v2437_v6 = vpop.f32.mrf.mxu0 }
 0x17a   : > { %v2530_v61 = vpop.f32.mrf.mxu1  ;;  %3094 = vst [vmem:[%s5125_s5 + $0x140] sm:$0xff] %v2527_v53  ;;  %v2438_v55 = vadd.f32 %v2437_v6, %v2345_v2  ;;  %v2529_v24 = vadd.f32 %v2528_v35, %v2436_v41 }
 0x17b   : > { %v2439_v44 = vpop.f32.mrf.mxu0 }
 0x17c   : > { %v2532_v45 = vpop.f32.mrf.mxu1  ;;  %3095 = vst [vmem:[%s5125_s5 + $0x148] sm:$0xff] %v2529_v24  ;;  %v2440_v7 = vadd.f32 %v2439_v44, %v2347_v62  ;;  %v2531_v63 = vadd.f32 %v2530_v61, %v2438_v55 }
 0x17e   : > { %3098 = vst [vmem:[%s5125_s5 + $0x160] sm:$0xff] %v2531_v63  ;;  %v2533_v15 = vadd.f32 %v2532_v45, %v2440_v7 }
 0x180   : > { %3099 = vst [vmem:[%s5125_s5 + $0x168] sm:$0xff] %v2533_v15 }
 0x18d   : > { %v2569_v58 = vpop.f32.mrf.mxu0 }
 0x18e   : > { %v2662_v3 = vpop.f32.mrf.mxu1 }
 0x18f   : > { %v2571_v11 = vpop.f32.mrf.mxu0  ;;  %v2663_v40 = vadd.f32 %v2662_v3, %v2569_v58 }
 0x190   : > { %v2664_v8 = vpop.f32.mrf.mxu1 }
 0x191   : > { %v2573_v50 = vpop.f32.mrf.mxu0  ;;  %v2665_v2 = vadd.f32 %v2664_v8, %v2571_v11 }
 0x192   : > { %v2666_v30 = vpop.f32.mrf.mxu1 }
 0x193   : > { %v2575_v12 = vpop.f32.mrf.mxu0  ;;  %v2667_v61 = vadd.f32 %v2666_v30, %v2573_v50 }
 0x194   : > { %v2668_v37 = vpop.f32.mrf.mxu1 }
 0x195   : > { %v2579_v25 = vpop.f32.mrf.mxu0  ;;  %v2669_v45 = vadd.f32 %v2668_v37, %v2575_v12 }
 0x196   : > { %v2672_v10 = vpop.f32.mrf.mxu1 }
 0x197   : > { %v2581_v38 = vpop.f32.mrf.mxu0  ;;  %v2673_v3 = vadd.f32 %v2672_v10, %v2579_v25 }
 0x198   : > { %v2674_v39 = vpop.f32.mrf.mxu1 }
 0x199   : > { %v5195_v13 = vpop.f32.mrf.mxu0  ;;  %v2675_v50 = vadd.f32 %v2674_v39, %v2581_v38 }
 0x19a   : > { %v5197_v26 = vpop.f32.mrf.mxu1 }
 0x19b   : > { %v5199_v21 = vpop.f32.mrf.mxu0  ;;  %v2677_v37 = vadd.f32 %v5197_v26, %v5195_v13 }
 0x19c   : > { %v5201_v22 = vpop.f32.mrf.mxu1 }
 0x19d   : > { %v5203_v42 = vpop.f32.mrf.mxu0 }
 0x19e   : > { %v5205_v29 = vpop.f32.mrf.mxu1 }
 0x19f   : > { %v5207_v4 = vpop.f32.mrf.mxu0 }
 0x1a0   : > { %v5209_v46 = vpop.f32.mrf.mxu1 }
 0x1a1   : > { %v5211_v47 = vpop.f32.mrf.mxu0 }
 0x1a2   : > { %v5213_v32 = vpop.f32.mrf.mxu1 }
 0x1a3   : > { %v5215_v5 = vpop.f32.mrf.mxu0 }
 0x1a4   : > { %v5217_v31 = vpop.f32.mrf.mxu1 }
 0x1a5   : > { %v5219_v33 = vpop.f32.mrf.mxu0 }
 0x1a6   : > { %v5221_v18 = vpop.f32.mrf.mxu1 }
 0x1a7   : > { %v5223_v19 = vpop.f32.mrf.mxu0 }
 0x1a8   : > { %v5225_v36 = vpop.f32.mrf.mxu1 }
 0x1a9   : > { %v5227_v48 = vpop.f32.mrf.mxu0 }
 0x1aa   : > { %v5229_v43 = vpop.f32.mrf.mxu1 }
 0x1ab   : > { %v5231_v51 = vpop.f32.mrf.mxu0 }
 0x1ac   : > { %v5233_v9 = vpop.f32.mrf.mxu1 }
 0x1ad   : > { %v5235_v49 = vpop.f32.mrf.mxu0 }
 0x1ae   : > { %v5237_v0 = vpop.f32.mrf.mxu1 }
 0x1af   : > { %v5239_v56 = vpop.f32.mrf.mxu0 }
 0x1b0   : > { %v5241_v27 = vpop.f32.mrf.mxu1 }
 0x1b1   : > { %v5243_v28 = vpop.f32.mrf.mxu0 }
 0x1b2   : > { %v5245_v1 = vpop.f32.mrf.mxu1 }
 0x1b3   : > { %v5247_v16 = vpop.f32.mrf.mxu0 }
 0x1b4   : > { %v5249_v14 = vpop.f32.mrf.mxu1 }
 0x1b5   : > { %v5251_v52 = vpop.f32.mrf.mxu0 }
 0x1b6   : > { %v5253_v57 = vpop.f32.mrf.mxu1 }
 0x1b7   : > { %v5255_v17 = vpop.f32.mrf.mxu0 }
 0x1b8   : > { %v5257_v20 = vpop.f32.mrf.mxu1 }
 0x1b9   : > { %v5259_v59 = vpop.f32.mrf.mxu0 }
 0x1ba   : > { %v5261_v34 = vpop.f32.mrf.mxu1 }
 0x1bb   : > { %v5263_v54 = vpop.f32.mrf.mxu0 }
 0x1bc   : > { %v5265_v23 = vpop.f32.mrf.mxu1 }
 0x1cd   : > { %v2755_v60 = vpop.f32.mrf.mxu0 }
 0x1ce   : > { %v2848_v35 = vpop.f32.mrf.mxu1  ;;  %v2756_v41 = vadd.f32 %v2755_v60, %v2663_v40 }
 0x1cf   : > { %v2757_v53 = vpop.f32.mrf.mxu0 }
 0x1d0   : > { %v2850_v6 = vpop.f32.mrf.mxu1  ;;  %v2849_v62 = vadd.f32 %v2848_v35, %v2756_v41  ;;  %v2758_v55 = vadd.f32 %v2757_v53, %v2665_v2 }
 0x1d1   : > { %v2759_v24 = vpop.f32.mrf.mxu0 }
 0x1d2   : > { %v2852_v44 = vpop.f32.mrf.mxu1  ;;  %3056 = vst [vmem:[%s5125_s5 + $0x10] sm:$0xff] %v2849_v62  ;;  %v2851_v7 = vadd.f32 %v2850_v6, %v2758_v55  ;;  %v2760_v63 = vadd.f32 %v2759_v24, %v2667_v61  ;;  %v2679_v6 = vadd.f32 %v5201_v22, %v5199_v21  ;;  %v2683_v55 = vadd.f32 %v5205_v29, %v5203_v42 }
 0x1d3   : > { %v2761_v15 = vpop.f32.mrf.mxu0 }
 0x1d4   : > { %v2854_v58 = vpop.f32.mrf.mxu1  ;;  %3057 = vst [vmem:[%s5125_s5 + $0x18] sm:$0xff] %v2851_v7  ;;  %v2853_v11 = vadd.f32 %v2852_v44, %v2760_v63  ;;  %v2762_v8 = vadd.f32 %v2761_v15, %v2669_v45  ;;  %v2685_v45 = vadd.f32 %v5209_v46, %v5207_v4  ;;  %v2687_v15 = vadd.f32 %v5213_v32, %v5211_v47 }
 0x1d5   : > { %v2765_v40 = vpop.f32.mrf.mxu0 }
 0x1d6   : > { %v2858_v60 = vpop.f32.mrf.mxu1  ;;  %3060 = vst [vmem:[%s5125_s5 + $0x30] sm:$0xff] %v2853_v11  ;;  %v2855_v30 = vadd.f32 %v2854_v58, %v2762_v8  ;;  %v2766_v35 = vadd.f32 %v2765_v40, %v2673_v3  ;;  %v2689_v11 = vadd.f32 %v5217_v31, %v5215_v5 }
 0x1d7   : > { %v2767_v2 = vpop.f32.mrf.mxu0 }
 0x1d8   : > { %v2860_v12 = vpop.f32.mrf.mxu1  ;;  %3061 = vst [vmem:[%s5125_s5 + $0x38] sm:$0xff] %v2855_v30  ;;  %v2859_v41 = vadd.f32 %v2858_v60, %v2766_v35  ;;  %v2768_v53 = vadd.f32 %v2767_v2, %v2675_v50  ;;  %v2693_v60 = vadd.f32 %v5221_v18, %v5219_v33  ;;  %v2695_v35 = vadd.f32 %v5225_v36, %v5223_v19 }
 0x1d9   : > { %v2769_v25 = vpop.f32.mrf.mxu0 }
 0x1da   : > { %v2862_v10 = vpop.f32.mrf.mxu1  ;;  %3064 = vst [vmem:[%s5125_s5 + $0x50] sm:$0xff] %v2859_v41  ;;  %v2861_v38 = vadd.f32 %v2860_v12, %v2768_v53  ;;  %v2770_v39 = vadd.f32 %v2769_v25, %v2677_v37  ;;  %v2697_v37 = vadd.f32 %v5229_v43, %v5227_v48  ;;  %v2699_v25 = vadd.f32 %v5233_v9, %v5231_v51 }
 0x1db   : > { %v2771_v61 = vpop.f32.mrf.mxu0 }
 0x1dc   : > { %v2864_v62 = vpop.f32.mrf.mxu1  ;;  %3065 = vst [vmem:[%s5125_s5 + $0x58] sm:$0xff] %v2861_v38  ;;  %v2863_v13 = vadd.f32 %v2862_v10, %v2770_v39  ;;  %v2772_v26 = vadd.f32 %v2771_v61, %v2679_v6  ;;  %v2703_v38 = vadd.f32 %v5237_v0, %v5235_v49 }
 0x1dd   : > { %v2775_v24 = vpop.f32.mrf.mxu0 }
 0x1de   : > { %v2868_v44 = vpop.f32.mrf.mxu1  ;;  %3068 = vst [vmem:[%s5125_s5 + $0x70] sm:$0xff] %v2863_v13  ;;  %v2865_v21 = vadd.f32 %v2864_v62, %v2772_v26  ;;  %v2776_v22 = vadd.f32 %v2775_v24, %v2683_v55  ;;  %v2705_v62 = vadd.f32 %v5241_v27, %v5239_v56  ;;  %v2707_v26 = vadd.f32 %v5245_v1, %v5243_v28 }
 0x1df   : > { %v2777_v7 = vpop.f32.mrf.mxu0 }
 0x1e0   : > { %v2870_v63 = vpop.f32.mrf.mxu1  ;;  %3069 = vst [vmem:[%s5125_s5 + $0x78] sm:$0xff] %v2865_v21  ;;  %v2869_v42 = vadd.f32 %v2868_v44, %v2776_v22  ;;  %v2778_v29 = vadd.f32 %v2777_v7, %v2685_v45  ;;  %v2709_v45 = vadd.f32 %v5249_v14, %v5247_v16  ;;  %v2713_v7 = vadd.f32 %v5253_v57, %v5251_v52 }
 0x1e1   : > { %v2779_v58 = vpop.f32.mrf.mxu0 }
 0x1e2   : > { %v2872_v3 = vpop.f32.mrf.mxu1  ;;  %3072 = vst [vmem:[%s5125_s5 + $0x90] sm:$0xff] %v2869_v42  ;;  %v2871_v4 = vadd.f32 %v2870_v63, %v2778_v29  ;;  %v2780_v46 = vadd.f32 %v2779_v58, %v2687_v15  ;;  %v2715_v42 = vadd.f32 %v5257_v20, %v5255_v17 }
 0x1e3   : > { %v2781_v8 = vpop.f32.mrf.mxu0 }
 0x1e4   : > { %v2874_v40 = vpop.f32.mrf.mxu1  ;;  %3073 = vst [vmem:[%s5125_s5 + $0x98] sm:$0xff] %v2871_v4  ;;  %v2873_v47 = vadd.f32 %v2872_v3, %v2780_v46  ;;  %v2782_v32 = vadd.f32 %v2781_v8, %v2689_v11  ;;  %v2717_v3 = vadd.f32 %v5261_v34, %v5259_v59  ;;  %v2719_v46 = vadd.f32 %v5265_v23, %v5263_v54 }
 0x1e5   : > { %v2785_v50 = vpop.f32.mrf.mxu0 }
 0x1e6   : > { %v2878_v30 = vpop.f32.mrf.mxu1  ;;  %3076 = vst [vmem:[%s5125_s5 + $0xb0] sm:$0xff] %v2873_v47  ;;  %v2875_v5 = vadd.f32 %v2874_v40, %v2782_v32  ;;  %v2786_v31 = vadd.f32 %v2785_v50, %v2693_v60 }
 0x1e7   : > { %v2787_v2 = vpop.f32.mrf.mxu0 }
 0x1e8   : > { %v2880_v12 = vpop.f32.mrf.mxu1  ;;  %3077 = vst [vmem:[%s5125_s5 + $0xb8] sm:$0xff] %v2875_v5  ;;  %v2879_v33 = vadd.f32 %v2878_v30, %v2786_v31  ;;  %v2788_v18 = vadd.f32 %v2787_v2, %v2695_v35 }
 0x1e9   : > { %v2789_v41 = vpop.f32.mrf.mxu0 }
 0x1ea   : > { %v2882_v53 = vpop.f32.mrf.mxu1  ;;  %3080 = vst [vmem:[%s5125_s5 + $0xd0] sm:$0xff] %v2879_v33  ;;  %v2881_v19 = vadd.f32 %v2880_v12, %v2788_v18  ;;  %v2790_v36 = vadd.f32 %v2789_v41, %v2697_v37 }
 0x1eb   : > { %v2791_v10 = vpop.f32.mrf.mxu0 }
 0x1ec   : > { %v2884_v6 = vpop.f32.mrf.mxu1  ;;  %3081 = vst [vmem:[%s5125_s5 + $0xd8] sm:$0xff] %v2881_v19  ;;  %v2883_v48 = vadd.f32 %v2882_v53, %v2790_v36  ;;  %v2792_v43 = vadd.f32 %v2791_v10, %v2699_v25 }
 0x1ed   : > { %v2795_v39 = vpop.f32.mrf.mxu0 }
 0x1ee   : > { %v2888_v61 = vpop.f32.mrf.mxu1  ;;  %3084 = vst [vmem:[%s5125_s5 + $0xf0] sm:$0xff] %v2883_v48  ;;  %v2885_v51 = vadd.f32 %v2884_v6, %v2792_v43  ;;  %v2796_v9 = vadd.f32 %v2795_v39, %v2703_v38 }
 0x1ef   : > { %v2797_v55 = vpop.f32.mrf.mxu0 }
 0x1f0   : > { %v2890_v13 = vpop.f32.mrf.mxu1  ;;  %3085 = vst [vmem:[%s5125_s5 + $0xf8] sm:$0xff] %v2885_v51  ;;  %v2889_v49 = vadd.f32 %v2888_v61, %v2796_v9  ;;  %v2798_v0 = vadd.f32 %v2797_v55, %v2705_v62 }
 0x1f1   : > { %v2799_v24 = vpop.f32.mrf.mxu0 }
 0x1f2   : > { %v2892_v44 = vpop.f32.mrf.mxu1  ;;  %3088 = vst [vmem:[%s5125_s5 + $0x110] sm:$0xff] %v2889_v49  ;;  %v2891_v56 = vadd.f32 %v2890_v13, %v2798_v0  ;;  %v2800_v27 = vadd.f32 %v2799_v24, %v2707_v26 }
 0x1f3   : > { %v2801_v21 = vpop.f32.mrf.mxu0 }
 0x1f4   : > { %v2894_v22 = vpop.f32.mrf.mxu1  ;;  %3089 = vst [vmem:[%s5125_s5 + $0x118] sm:$0xff] %v2891_v56  ;;  %v2893_v28 = vadd.f32 %v2892_v44, %v2800_v27  ;;  %v2802_v1 = vadd.f32 %v2801_v21, %v2709_v45 }
 0x1f5   : > { %v2805_v63 = vpop.f32.mrf.mxu0 }
 0x1f6   : > { %v2898_v15 = vpop.f32.mrf.mxu1  ;;  %3092 = vst [vmem:[%s5125_s5 + $0x130] sm:$0xff] %v2893_v28  ;;  %v2895_v16 = vadd.f32 %v2894_v22, %v2802_v1  ;;  %v2806_v14 = vadd.f32 %v2805_v63, %v2713_v7 }
 0x1f7   : > { %v2807_v29 = vpop.f32.mrf.mxu0 }
 0x1f8   : > { %v2900_v58 = vpop.f32.mrf.mxu1  ;;  %3093 = vst [vmem:[%s5125_s5 + $0x138] sm:$0xff] %v2895_v16  ;;  %v2899_v52 = vadd.f32 %v2898_v15, %v2806_v14  ;;  %v2808_v57 = vadd.f32 %v2807_v29, %v2715_v42 }
 0x1f9   : > { %v2809_v11 = vpop.f32.mrf.mxu0 }
 0x1fa   : > { %v2902_v4 = vpop.f32.mrf.mxu1  ;;  %3096 = vst [vmem:[%s5125_s5 + $0x150] sm:$0xff] %v2899_v52  ;;  %v2901_v17 = vadd.f32 %v2900_v58, %v2808_v57  ;;  %v2810_v20 = vadd.f32 %v2809_v11, %v2717_v3 }
 0x1fb   : > { %v2811_v8 = vpop.f32.mrf.mxu0 }
 0x1fc   : > { %3097 = vst [vmem:[%s5125_s5 + $0x158] sm:$0xff] %v2901_v17  ;;  %v2903_v40 = vadd.f32 %v2902_v4, %v2810_v20  ;;  %v2812_v60 = vadd.f32 %v2811_v8, %v2719_v46  ;;  %v2904_v47 = vpop.f32.mrf.mxu1 }
 0x1fe   : > { %3100 = vst [vmem:[%s5125_s5 + $0x170] sm:$0xff] %v2903_v40  ;;  %v2905_v32 = vadd.f32 %v2904_v47, %v2812_v60 }
 0x200   : > { %3101 = vst [vmem:[%s5125_s5 + $0x178] sm:$0xff] %v2905_v32 }
 0x201 PF: > { %s12_s11 = sadd.s32 1, %s3964_s11   ;;  %s5339_s9 = smov %s3960_s10 }
 0x202   : > { %p9_p5 = scmp.ge.s32.totalorder %s12_s11, 4   ;;  %s5340_s10 = smov %s5342_s12 }
 0x204   :  { %11 = sbr.rel (!%p9_p5) target bundleno = 2 (0x2), region = 69 }

// kernel: _lambda_.14
= control target key start
LH: loop header
LB: loop body
LE: loop exit
PB: predicated region body
PF: predicated region fallthrough
CT: control target
= control target key end

     0   :  { %s1375_s0 = inlined_call_operand.vmem [shape: f32[512,128], index: 0, kind: input, shape index: {}]   ;;  %s1376_s1 = inlined_call_operand.vmem [shape: f32[1,128], index: 1, kind: input, shape index: {}]   ;;  %s1377_s2 = inlined_call_operand.vmem [shape: f32[1,128], index: 2, kind: input, shape index: {}]   ;;  %s1378_s3 = inlined_call_operand.vmem [shape: bf16[512,128], index: 3, kind: output, shape index: {}]  }
   0x1   :  { %v14_v0 = vld [vmem:[%s1375_s0] sm:$0xff]  ;;  %v15_v1 = vld [vmem:[%s1375_s0 + $0x8] sm:$0xff]  ;;  %v16_v6 = vld [vmem:[%s1375_s0 + $0x10] sm:$0xff] }
   0x2   :  { %v958_v2 = vld [vmem:[%s1376_s1] ss:$0 sm:$0xff]  ;;  %v17_v7 = vld [vmem:[%s1375_s0 + $0x18] sm:$0xff]  ;;  %v19_v11 = vld [vmem:[%s1375_s0 + $0x28] sm:$0xff] }
   0x3   :  { %v85_v3 = vmul.f32 %v958_v2, %v14_v0  ;;  %v86_v4 = vmul.f32 %v958_v2, %v15_v1  ;;  %v965_v5 = vld [vmem:[%s1377_s2] ss:$0 sm:$0xff]  ;;  %v87_v8 = vmul.f32 %v958_v2, %v16_v6  ;;  %v88_v9 = vmul.f32 %v958_v2, %v17_v7  ;;  %v20_v12 = vld [vmem:[%s1375_s0 + $0x30] sm:$0xff]  ;;  %v21_v17 = vld [vmem:[%s1375_s0 + $0x38] sm:$0xff] }
   0x4   :  { %v18_v10 = vld [vmem:[%s1375_s0 + $0x20] sm:$0xff]  ;;  %v90_v16 = vmul.f32 %v958_v2, %v19_v11  ;;  %v91_v20 = vmul.f32 %v958_v2, %v20_v12  ;;  %v92_v21 = vmul.f32 %v958_v2, %v21_v17  ;;  %v23_v27 = vld [vmem:[%s1375_s0 + $0x48] sm:$0xff]  ;;  %v24_v32 = vld [vmem:[%s1375_s0 + $0x50] sm:$0xff] }
   0x5   :  { %v156_v13 = vadd.f32 %v965_v5, %v85_v3  ;;  %v157_v14 = vadd.f32 %v965_v5, %v86_v4  ;;  %v89_v15 = vmul.f32 %v958_v2, %v18_v10  ;;  %v158_v18 = vadd.f32 %v965_v5, %v87_v8  ;;  %v22_v22 = vld [vmem:[%s1375_s0 + $0x40] sm:$0xff]  ;;  %v25_v33 = vld [vmem:[%s1375_s0 + $0x58] sm:$0xff]  ;;  %v27_v39 = vld [vmem:[%s1375_s0 + $0x68] sm:$0xff] }
   0x6   :  { %v159_v19 = vadd.f32 %v965_v5, %v88_v9  ;;  %v161_v26 = vadd.f32 %v965_v5, %v90_v16  ;;  %v162_v30 = vadd.f32 %v965_v5, %v91_v20  ;;  %v163_v31 = vadd.f32 %v965_v5, %v92_v21  ;;  %v26_v38 = vld [vmem:[%s1375_s0 + $0x60] sm:$0xff]  ;;  %v28_v44 = vld [vmem:[%s1375_s0 + $0x70] sm:$0xff]  ;;  %v29_v49 = vld [vmem:[%s1375_s0 + $0x78] sm:$0xff] }
   0x7   :  { %v220_v23 = vmax.f32 %v156_v13, 0.0  ;;  %v221_v24 = vmax.f32 %v157_v14, 0.0  ;;  %v160_v25 = vadd.f32 %v965_v5, %v89_v15  ;;  %v222_v28 = vmax.f32 %v158_v18, 0.0  ;;  %v30_v54 = vld [vmem:[%s1375_s0 + $0x80] sm:$0xff]  ;;  %v31_v63 = vld [vmem:[%s1375_s0 + $0x88] sm:$0xff]  ;;  %v32_v6 = vld [vmem:[%s1375_s0 + $0x90] sm:$0xff] }
   0x8   :  { %v223_v29 = vmax.f32 %v159_v19, 0.0  ;;  %v225_v36 = vmax.f32 %v161_v26, 0.0  ;;  %v93_v37 = vmul.f32 %v958_v2, %v22_v22  ;;  %v226_v41 = vmax.f32 %v162_v30, 0.0  ;;  %v33_v7 = vld [vmem:[%s1375_s0 + $0x98] sm:$0xff]  ;;  %v34_v12 = vld [vmem:[%s1375_s0 + $0xa0] sm:$0xff]  ;;  %v35_v13 = vld [vmem:[%s1375_s0 + $0xa8] sm:$0xff] }
   0x9   :  { %v741_v34 = vpack.c.bf16 %v221_v24, %v220_v23  ;;  %v224_v35 = vmax.f32 %v160_v25, 0.0  ;;  %v227_v42 = vmax.f32 %v163_v31, 0.0  ;;  %v94_v43 = vmul.f32 %v958_v2, %v23_v27  ;;  %v36_v18 = vld [vmem:[%s1375_s0 + $0xb0] sm:$0xff]  ;;  %v37_v23 = vld [vmem:[%s1375_s0 + $0xb8] sm:$0xff] }
   0xa   :  { %v746_v40 = vpack.c.bf16 %v223_v29, %v222_v28  ;;  %v164_v46 = vadd.f32 %v965_v5, %v93_v37  ;;  %v95_v47 = vmul.f32 %v958_v2, %v24_v32  ;;  %v96_v48 = vmul.f32 %v958_v2, %v25_v33  ;;  %v38_v28 = vld [vmem:[%s1375_s0 + $0xc0] sm:$0xff]  ;;  %v39_v37 = vld [vmem:[%s1375_s0 + $0xc8] sm:$0xff] }
   0xb   :  { %742 = vst [vmem:[%s1378_s3] sm:$0xff] %v741_v34   ;;  %v751_v45 = vpack.c.bf16 %v225_v36, %v224_v35  ;;  %v756_v50 = vpack.c.bf16 %v227_v42, %v226_v41  ;;  %v165_v51 = vadd.f32 %v965_v5, %v94_v43  ;;  %v97_v52 = vmul.f32 %v958_v2, %v26_v38  ;;  %v40_v42 = vld [vmem:[%s1375_s0 + $0xd0] sm:$0xff]  ;;  %v41_v43 = vld [vmem:[%s1375_s0 + $0xd8] sm:$0xff] }
   0xc   :  { %898 = vst [vmem:[%s1378_s3 + $0x8] sm:$0xff] %v746_v40   ;;  %v98_v53 = vmul.f32 %v958_v2, %v27_v39  ;;  %v228_v55 = vmax.f32 %v164_v46, 0.0  ;;  %v166_v56 = vadd.f32 %v965_v5, %v95_v47  ;;  %v167_v57 = vadd.f32 %v965_v5, %v96_v48  ;;  %v42_v48 = vld [vmem:[%s1375_s0 + $0xe0] sm:$0xff] }
   0xd   :  { %899 = vst [vmem:[%s1378_s3 + $0x10] sm:$0xff] %v751_v45   ;;  %v99_v58 = vmul.f32 %v958_v2, %v28_v44  ;;  %900 = vst [vmem:[%s1378_s3 + $0x18] sm:$0xff] %v756_v50   ;;  %v229_v59 = vmax.f32 %v165_v51, 0.0  ;;  %v168_v60 = vadd.f32 %v965_v5, %v97_v52  ;;  %v100_v62 = vmul.f32 %v958_v2, %v29_v49  ;;  %v43_v49 = vld [vmem:[%s1375_s0 + $0xe8] sm:$0xff] }
   0xe   :  { %v169_v61 = vadd.f32 %v965_v5, %v98_v53  ;;  %v230_v0 = vmax.f32 %v166_v56, 0.0  ;;  %v231_v1 = vmax.f32 %v167_v57, 0.0  ;;  %v101_v4 = vmul.f32 %v958_v2, %v30_v54  ;;  %v44_v54 = vld [vmem:[%s1375_s0 + $0xf0] sm:$0xff] }
   0xf   :  { %v170_v3 = vadd.f32 %v965_v5, %v99_v58  ;;  %v761_v8 = vpack.c.bf16 %v229_v59, %v228_v55  ;;  %v232_v9 = vmax.f32 %v168_v60, 0.0  ;;  %v171_v11 = vadd.f32 %v965_v5, %v100_v62  ;;  %v45_v59 = vld [vmem:[%s1375_s0 + $0xf8] sm:$0xff] }
  0x10   :  { %v233_v10 = vmax.f32 %v169_v61, 0.0  ;;  %v766_v14 = vpack.c.bf16 %v231_v1, %v230_v0  ;;  %v102_v16 = vmul.f32 %v958_v2, %v31_v63  ;;  %v172_v17 = vadd.f32 %v965_v5, %v101_v4  ;;  %v46_v0 = vld [vmem:[%s1375_s0 + $0x100] sm:$0xff] }
  0x11   :  { %v234_v15 = vmax.f32 %v170_v3, 0.0  ;;  %901 = vst [vmem:[%s1378_s3 + $0x20] sm:$0xff] %v761_v8   ;;  %v235_v20 = vmax.f32 %v171_v11, 0.0  ;;  %v103_v21 = vmul.f32 %v958_v2, %v32_v6  ;;  %v104_v22 = vmul.f32 %v958_v2, %v33_v7  ;;  %v47_v11 = vld [vmem:[%s1375_s0 + $0x108] sm:$0xff] }
  0x12   :  { %v771_v19 = vpack.c.bf16 %v233_v10, %v232_v9  ;;  %902 = vst [vmem:[%s1378_s3 + $0x28] sm:$0xff] %v766_v14   ;;  %v173_v24 = vadd.f32 %v965_v5, %v102_v16  ;;  %v236_v25 = vmax.f32 %v172_v17, 0.0  ;;  %v105_v26 = vmul.f32 %v958_v2, %v34_v12  ;;  %v48_v16 = vld [vmem:[%s1375_s0 + $0x110] sm:$0xff]  ;;  %v49_v17 = vld [vmem:[%s1375_s0 + $0x118] sm:$0xff] }
  0x13   :  { %v106_v27 = vmul.f32 %v958_v2, %v35_v13  ;;  %v776_v29 = vpack.c.bf16 %v235_v20, %v234_v15  ;;  %v174_v30 = vadd.f32 %v965_v5, %v103_v21  ;;  %v175_v31 = vadd.f32 %v965_v5, %v104_v22  ;;  %v50_v22 = vld [vmem:[%s1375_s0 + $0x120] sm:$0xff] }
  0x14   :  { %903 = vst [vmem:[%s1378_s3 + $0x30] sm:$0xff] %v771_v19   ;;  %v107_v32 = vmul.f32 %v958_v2, %v36_v18  ;;  %v237_v33 = vmax.f32 %v173_v24, 0.0  ;;  %v176_v34 = vadd.f32 %v965_v5, %v105_v26  ;;  %v108_v36 = vmul.f32 %v958_v2, %v37_v23  ;;  %v51_v23 = vld [vmem:[%s1375_s0 + $0x128] sm:$0xff] }
  0x15   :  { %v177_v35 = vadd.f32 %v965_v5, %v106_v27  ;;  %904 = vst [vmem:[%s1378_s3 + $0x38] sm:$0xff] %v776_v29   ;;  %v238_v38 = vmax.f32 %v174_v30, 0.0  ;;  %v239_v39 = vmax.f32 %v175_v31, 0.0  ;;  %v109_v41 = vmul.f32 %v958_v2, %v38_v28  ;;  %v52_v28 = vld [vmem:[%s1375_s0 + $0x130] sm:$0xff] }
  0x16   :  { %v178_v40 = vadd.f32 %v965_v5, %v107_v32  ;;  %v781_v44 = vpack.c.bf16 %v237_v33, %v236_v25  ;;  %v240_v45 = vmax.f32 %v176_v34, 0.0  ;;  %v179_v47 = vadd.f32 %v965_v5, %v108_v36  ;;  %v53_v33 = vld [vmem:[%s1375_s0 + $0x138] sm:$0xff] }
  0x17   :  { %v241_v46 = vmax.f32 %v177_v35, 0.0  ;;  %v786_v50 = vpack.c.bf16 %v239_v39, %v238_v38  ;;  %v110_v52 = vmul.f32 %v958_v2, %v39_v37  ;;  %v180_v53 = vadd.f32 %v965_v5, %v109_v41  ;;  %v54_v38 = vld [vmem:[%s1375_s0 + $0x140] sm:$0xff] }
  0x18   :  { %v242_v51 = vmax.f32 %v178_v40, 0.0  ;;  %905 = vst [vmem:[%s1378_s3 + $0x40] sm:$0xff] %v781_v44   ;;  %v243_v56 = vmax.f32 %v179_v47, 0.0  ;;  %v111_v57 = vmul.f32 %v958_v2, %v40_v42  ;;  %v112_v58 = vmul.f32 %v958_v2, %v41_v43  ;;  %v55_v47 = vld [vmem:[%s1375_s0 + $0x148] sm:$0xff] }
  0x19   :  { %v791_v55 = vpack.c.bf16 %v241_v46, %v240_v45  ;;  %906 = vst [vmem:[%s1378_s3 + $0x48] sm:$0xff] %v786_v50   ;;  %v181_v60 = vadd.f32 %v965_v5, %v110_v52  ;;  %v244_v61 = vmax.f32 %v180_v53, 0.0  ;;  %v113_v62 = vmul.f32 %v958_v2, %v42_v48  ;;  %v56_v52 = vld [vmem:[%s1375_s0 + $0x150] sm:$0xff]  ;;  %v57_v53 = vld [vmem:[%s1375_s0 + $0x158] sm:$0xff] }
  0x1a   :  { %v114_v63 = vmul.f32 %v958_v2, %v43_v49  ;;  %v796_v1 = vpack.c.bf16 %v243_v56, %v242_v51  ;;  %v182_v3 = vadd.f32 %v965_v5, %v111_v57  ;;  %v183_v4 = vadd.f32 %v965_v5, %v112_v58  ;;  %v58_v58 = vld [vmem:[%s1375_s0 + $0x160] sm:$0xff] }
  0x1b   :  { %907 = vst [vmem:[%s1378_s3 + $0x50] sm:$0xff] %v791_v55   ;;  %v115_v6 = vmul.f32 %v958_v2, %v44_v54  ;;  %v245_v7 = vmax.f32 %v181_v60, 0.0  ;;  %v184_v8 = vadd.f32 %v965_v5, %v113_v62  ;;  %v116_v10 = vmul.f32 %v958_v2, %v45_v59  ;;  %v59_v59 = vld [vmem:[%s1375_s0 + $0x168] sm:$0xff] }
  0x1c   :  { %v185_v9 = vadd.f32 %v965_v5, %v114_v63  ;;  %908 = vst [vmem:[%s1378_s3 + $0x58] sm:$0xff] %v796_v1   ;;  %v246_v12 = vmax.f32 %v182_v3, 0.0  ;;  %v247_v13 = vmax.f32 %v183_v4, 0.0  ;;  %v117_v15 = vmul.f32 %v958_v2, %v46_v0  ;;  %v60_v0 = vld [vmem:[%s1375_s0 + $0x170] sm:$0xff] }
  0x1d   :  { %v186_v14 = vadd.f32 %v965_v5, %v115_v6  ;;  %v801_v18 = vpack.c.bf16 %v245_v7, %v244_v61  ;;  %v248_v19 = vmax.f32 %v184_v8, 0.0  ;;  %v187_v21 = vadd.f32 %v965_v5, %v116_v10  ;;  %v61_v7 = vld [vmem:[%s1375_s0 + $0x178] sm:$0xff] }
  0x1e   :  { %v249_v20 = vmax.f32 %v185_v9, 0.0  ;;  %v806_v24 = vpack.c.bf16 %v247_v13, %v246_v12  ;;  %v118_v26 = vmul.f32 %v958_v2, %v47_v11  ;;  %v188_v27 = vadd.f32 %v965_v5, %v117_v15  ;;  %v62_v12 = vld [vmem:[%s1375_s0 + $0x180] sm:$0xff] }
  0x1f   :  { %v250_v25 = vmax.f32 %v186_v14, 0.0  ;;  %909 = vst [vmem:[%s1378_s3 + $0x60] sm:$0xff] %v801_v18   ;;  %v251_v30 = vmax.f32 %v187_v21, 0.0  ;;  %v119_v31 = vmul.f32 %v958_v2, %v48_v16  ;;  %v120_v32 = vmul.f32 %v958_v2, %v49_v17  ;;  %v63_v21 = vld [vmem:[%s1375_s0 + $0x188] sm:$0xff] }
  0x20   :  { %v811_v29 = vpack.c.bf16 %v249_v20, %v248_v19  ;;  %910 = vst [vmem:[%s1378_s3 + $0x68] sm:$0xff] %v806_v24   ;;  %v189_v34 = vadd.f32 %v965_v5, %v118_v26  ;;  %v252_v35 = vmax.f32 %v188_v27, 0.0  ;;  %v121_v36 = vmul.f32 %v958_v2, %v50_v22  ;;  %v64_v26 = vld [vmem:[%s1375_s0 + $0x190] sm:$0xff]  ;;  %v65_v27 = vld [vmem:[%s1375_s0 + $0x198] sm:$0xff] }
  0x21   :  { %v122_v37 = vmul.f32 %v958_v2, %v51_v23  ;;  %v816_v39 = vpack.c.bf16 %v251_v30, %v250_v25  ;;  %v190_v40 = vadd.f32 %v965_v5, %v119_v31  ;;  %v191_v41 = vadd.f32 %v965_v5, %v120_v32  ;;  %v66_v32 = vld [vmem:[%s1375_s0 + $0x1a0] sm:$0xff] }
  0x22   :  { %911 = vst [vmem:[%s1378_s3 + $0x70] sm:$0xff] %v811_v29   ;;  %v123_v42 = vmul.f32 %v958_v2, %v52_v28  ;;  %v253_v43 = vmax.f32 %v189_v34, 0.0  ;;  %v192_v44 = vadd.f32 %v965_v5, %v121_v36  ;;  %v124_v46 = vmul.f32 %v958_v2, %v53_v33  ;;  %v67_v33 = vld [vmem:[%s1375_s0 + $0x1a8] sm:$0xff] }
  0x23   :  { %v193_v45 = vadd.f32 %v965_v5, %v122_v37  ;;  %912 = vst [vmem:[%s1378_s3 + $0x78] sm:$0xff] %v816_v39   ;;  %v254_v48 = vmax.f32 %v190_v40, 0.0  ;;  %v255_v49 = vmax.f32 %v191_v41, 0.0  ;;  %v125_v51 = vmul.f32 %v958_v2, %v54_v38  ;;  %v68_v38 = vld [vmem:[%s1375_s0 + $0x1b0] sm:$0xff] }
  0x24   :  { %v194_v50 = vadd.f32 %v965_v5, %v123_v42  ;;  %v821_v54 = vpack.c.bf16 %v253_v43, %v252_v35  ;;  %v256_v55 = vmax.f32 %v192_v44, 0.0  ;;  %v195_v57 = vadd.f32 %v965_v5, %v124_v46  ;;  %v69_v43 = vld [vmem:[%s1375_s0 + $0x1b8] sm:$0xff] }
  0x25   :  { %v257_v56 = vmax.f32 %v193_v45, 0.0  ;;  %v826_v60 = vpack.c.bf16 %v255_v49, %v254_v48  ;;  %v126_v62 = vmul.f32 %v958_v2, %v55_v47  ;;  %v196_v63 = vadd.f32 %v965_v5, %v125_v51  ;;  %v70_v48 = vld [vmem:[%s1375_s0 + $0x1c0] sm:$0xff] }
  0x26   :  { %v258_v61 = vmax.f32 %v194_v50, 0.0  ;;  %913 = vst [vmem:[%s1378_s3 + $0x80] sm:$0xff] %v821_v54   ;;  %v259_v3 = vmax.f32 %v195_v57, 0.0  ;;  %v127_v4 = vmul.f32 %v958_v2, %v56_v52  ;;  %v128_v6 = vmul.f32 %v958_v2, %v57_v53  ;;  %v71_v57 = vld [vmem:[%s1375_s0 + $0x1c8] sm:$0xff] }
  0x27   :  { %v831_v1 = vpack.c.bf16 %v257_v56, %v256_v55  ;;  %914 = vst [vmem:[%s1378_s3 + $0x88] sm:$0xff] %v826_v60   ;;  %v197_v8 = vadd.f32 %v965_v5, %v126_v62  ;;  %v260_v9 = vmax.f32 %v196_v63, 0.0  ;;  %v129_v10 = vmul.f32 %v958_v2, %v58_v58  ;;  %v72_v62 = vld [vmem:[%s1375_s0 + $0x1d0] sm:$0xff]  ;;  %v73_v63 = vld [vmem:[%s1375_s0 + $0x1d8] sm:$0xff] }
  0x28   :  { %v130_v11 = vmul.f32 %v958_v2, %v59_v59  ;;  %v836_v13 = vpack.c.bf16 %v259_v3, %v258_v61  ;;  %v198_v14 = vadd.f32 %v965_v5, %v127_v4  ;;  %v199_v15 = vadd.f32 %v965_v5, %v128_v6  ;;  %v74_v6 = vld [vmem:[%s1375_s0 + $0x1e0] sm:$0xff] }
  0x29   :  { %915 = vst [vmem:[%s1378_s3 + $0x90] sm:$0xff] %v831_v1   ;;  %v131_v16 = vmul.f32 %v958_v2, %v60_v0  ;;  %v261_v17 = vmax.f32 %v197_v8, 0.0  ;;  %v200_v18 = vadd.f32 %v965_v5, %v129_v10  ;;  %v132_v20 = vmul.f32 %v958_v2, %v61_v7  ;;  %v75_v7 = vld [vmem:[%s1375_s0 + $0x1e8] sm:$0xff] }
  0x2a   :  { %v201_v19 = vadd.f32 %v965_v5, %v130_v11  ;;  %916 = vst [vmem:[%s1378_s3 + $0x98] sm:$0xff] %v836_v13   ;;  %v262_v22 = vmax.f32 %v198_v14, 0.0  ;;  %v263_v23 = vmax.f32 %v199_v15, 0.0  ;;  %v133_v25 = vmul.f32 %v958_v2, %v62_v12  ;;  %v76_v12 = vld [vmem:[%s1375_s0 + $0x1f0] sm:$0xff] }
  0x2b   :  { %v202_v24 = vadd.f32 %v965_v5, %v131_v16  ;;  %v841_v28 = vpack.c.bf16 %v261_v17, %v260_v9  ;;  %v264_v29 = vmax.f32 %v200_v18, 0.0  ;;  %v203_v31 = vadd.f32 %v965_v5, %v132_v20  ;;  %v77_v17 = vld [vmem:[%s1375_s0 + $0x1f8] sm:$0xff] }
  0x2c   :  { %v265_v30 = vmax.f32 %v201_v19, 0.0  ;;  %v846_v34 = vpack.c.bf16 %v263_v23, %v262_v22  ;;  %v134_v36 = vmul.f32 %v958_v2, %v63_v21  ;;  %v204_v37 = vadd.f32 %v965_v5, %v133_v25 }
  0x2d   :  { %v266_v35 = vmax.f32 %v202_v24, 0.0  ;;  %917 = vst [vmem:[%s1378_s3 + $0xa0] sm:$0xff] %v841_v28   ;;  %v267_v40 = vmax.f32 %v203_v31, 0.0  ;;  %v135_v41 = vmul.f32 %v958_v2, %v64_v26  ;;  %v136_v42 = vmul.f32 %v958_v2, %v65_v27 }
  0x2e   :  { %v851_v39 = vpack.c.bf16 %v265_v30, %v264_v29  ;;  %918 = vst [vmem:[%s1378_s3 + $0xa8] sm:$0xff] %v846_v34   ;;  %v205_v44 = vadd.f32 %v965_v5, %v134_v36  ;;  %v268_v45 = vmax.f32 %v204_v37, 0.0  ;;  %v137_v46 = vmul.f32 %v958_v2, %v66_v32 }
  0x2f   :  { %v138_v47 = vmul.f32 %v958_v2, %v67_v33  ;;  %v856_v49 = vpack.c.bf16 %v267_v40, %v266_v35  ;;  %v206_v50 = vadd.f32 %v965_v5, %v135_v41  ;;  %v207_v51 = vadd.f32 %v965_v5, %v136_v42 }
  0x30   :  { %919 = vst [vmem:[%s1378_s3 + $0xb0] sm:$0xff] %v851_v39   ;;  %v139_v52 = vmul.f32 %v958_v2, %v68_v38  ;;  %v269_v53 = vmax.f32 %v205_v44, 0.0  ;;  %v208_v54 = vadd.f32 %v965_v5, %v137_v46  ;;  %v140_v56 = vmul.f32 %v958_v2, %v69_v43 }
  0x31   :  { %v209_v55 = vadd.f32 %v965_v5, %v138_v47  ;;  %920 = vst [vmem:[%s1378_s3 + $0xb8] sm:$0xff] %v856_v49   ;;  %v270_v58 = vmax.f32 %v206_v50, 0.0  ;;  %v271_v59 = vmax.f32 %v207_v51, 0.0  ;;  %v141_v61 = vmul.f32 %v958_v2, %v70_v48 }
  0x32   :  { %v210_v60 = vadd.f32 %v965_v5, %v139_v52  ;;  %v861_v0 = vpack.c.bf16 %v269_v53, %v268_v45  ;;  %v272_v1 = vmax.f32 %v208_v54, 0.0  ;;  %v211_v4 = vadd.f32 %v965_v5, %v140_v56 }
  0x33   :  { %v273_v3 = vmax.f32 %v209_v55, 0.0  ;;  %v866_v8 = vpack.c.bf16 %v271_v59, %v270_v58  ;;  %v142_v10 = vmul.f32 %v958_v2, %v71_v57  ;;  %v212_v11 = vadd.f32 %v965_v5, %v141_v61 }
  0x34   :  { %v274_v9 = vmax.f32 %v210_v60, 0.0  ;;  %921 = vst [vmem:[%s1378_s3 + $0xc0] sm:$0xff] %v861_v0   ;;  %v275_v14 = vmax.f32 %v211_v4, 0.0  ;;  %v143_v15 = vmul.f32 %v958_v2, %v72_v62  ;;  %v144_v16 = vmul.f32 %v958_v2, %v73_v63 }
  0x35   :  { %v871_v13 = vpack.c.bf16 %v273_v3, %v272_v1  ;;  %922 = vst [vmem:[%s1378_s3 + $0xc8] sm:$0xff] %v866_v8   ;;  %v213_v18 = vadd.f32 %v965_v5, %v142_v10  ;;  %v276_v19 = vmax.f32 %v212_v11, 0.0  ;;  %v145_v20 = vmul.f32 %v958_v2, %v74_v6 }
  0x36   :  { %v146_v21 = vmul.f32 %v958_v2, %v75_v7  ;;  %v876_v22 = vpack.c.bf16 %v275_v14, %v274_v9  ;;  %v214_v23 = vadd.f32 %v965_v5, %v143_v15  ;;  %v215_v24 = vadd.f32 %v965_v5, %v144_v16 }
  0x37   :  { %923 = vst [vmem:[%s1378_s3 + $0xd0] sm:$0xff] %v871_v13   ;;  %v147_v25 = vmul.f32 %v958_v2, %v76_v12  ;;  %v277_v26 = vmax.f32 %v213_v18, 0.0  ;;  %v216_v27 = vadd.f32 %v965_v5, %v145_v20  ;;  %v148_v29 = vmul.f32 %v958_v2, %v77_v17 }
  0x38   :  { %v217_v28 = vadd.f32 %v965_v5, %v146_v21  ;;  %924 = vst [vmem:[%s1378_s3 + $0xd8] sm:$0xff] %v876_v22   ;;  %v278_v30 = vmax.f32 %v214_v23, 0.0  ;;  %v279_v31 = vmax.f32 %v215_v24, 0.0 }
  0x39   :  { %v218_v32 = vadd.f32 %v965_v5, %v147_v25  ;;  %v881_v33 = vpack.c.bf16 %v277_v26, %v276_v19  ;;  %v280_v34 = vmax.f32 %v216_v27, 0.0  ;;  %v219_v36 = vadd.f32 %v965_v5, %v148_v29 }
  0x3a   :  { %v281_v35 = vmax.f32 %v217_v28, 0.0  ;;  %v886_v37 = vpack.c.bf16 %v279_v31, %v278_v30 }
  0x3b   :  { %v282_v38 = vmax.f32 %v218_v32, 0.0  ;;  %925 = vst [vmem:[%s1378_s3 + $0xe0] sm:$0xff] %v881_v33   ;;  %v283_v39 = vmax.f32 %v219_v36, 0.0 }
  0x3c   :  { %v891_v2 = vpack.c.bf16 %v281_v35, %v280_v34  ;;  %926 = vst [vmem:[%s1378_s3 + $0xe8] sm:$0xff] %v886_v37  }
  0x3d   :  { %v896_v40 = vpack.c.bf16 %v283_v39, %v282_v38 }
  0x3e   :  { %927 = vst [vmem:[%s1378_s3 + $0xf0] sm:$0xff] %v891_v2  }
  0x3f   :  { %928 = vst [vmem:[%s1378_s3 + $0xf8] sm:$0xff] %v896_v40  }

// kernel: _lambda_.15
= control target key start
LH: loop header
LB: loop body
LE: loop exit
PB: predicated region body
PF: predicated region fallthrough
CT: control target
= control target key end

     0   :  { %s2297_s9 = smov 0   ;;  %s2299_s10 = smov 0   ;;  %s2664_s0 = inlined_call_operand.vmem [shape: bf16[768,512], index: 0, kind: input, shape index: {}]   ;;  %s2665_s1 = inlined_call_operand.vmem [shape: bf16[512,256], index: 1, kind: input, shape index: {}]   ;;  %s2666_s2 = inlined_call_operand.vmem [shape: f32[768,256], index: 2, kind: output, shape index: {}]  }
   0x1   :  { %s2301_s11 = smov 0  }
   0x2 LB: > { %s31_s12 = sadd.s32 1, %s2276_s10  ;;  %p1903_p0 = scmp.ge.s32.totalorder %s2280_s11, 1  ;;  %s2280_s11 = sphi %s2301_s11, %s12_s11   ;;  %s2276_s10 = sphi %s2299_s10, %s2668_s10   ;;  %s2272_s9 = sphi %s2297_s9, %s2667_s9  }
   0x3   : > { %p33_p1 = scmp.ge.s32.totalorder %s31_s12, 3  ;;  %p161_p2 = scmp.lt.s32.totalorder %s2280_s11, 4 }
   0x5   : > { %s2670_s12 = smov (%p33_p1, %s31_s12), 0  ;;  %p162_p3 = pnand %p1903_p0, %p161_p2 }
   0x6   : > { %s1904_s25 = sshll.u32 (!%p162_p3), %s2272_s9, 5 }
   0x7   : > { %165 = sbr.rel (%p162_p3) target bundleno = 400 (0x190), region = 28  ;;  %p205_p4 = scmp.lt.s32.totalorder (!%p162_p3), %s1904_s25, 95 }
   0xc   : > { %v2066_v0 = vld [vmem:[%s2665_s1 + $0x74] ss:$8 sps:$4 sm:$0xff]   ;;  %v2070_v2 = vld [vmem:[%s2665_s1 + $0x70] ss:$8 sps:$4 sm:$0xff]   ;;  %v2072_v4 = vld [vmem:[%s2665_s1 + $0x64] ss:$8 sps:$4 sm:$0xff]  }
   0xd   : > { %v2068_v1 = vld [vmem:[%s2665_s1 + $0x174] ss:$8 sps:$4 sm:$0xff]   ;;  %1139 = vmatprep.subr.bf16.mxu0 %v2066_v0  ;;  %v2071_v3 = vld [vmem:[%s2665_s1 + $0x170] ss:$8 sps:$4 sm:$0xff]   ;;  %v2074_v5 = vld [vmem:[%s2665_s1 + $0x164] ss:$8 sps:$4 sm:$0xff]  }
   0xe   : > { %1332 = vmatprep.subr.bf16.mxu1 %v2068_v1  ;;  %1140 = vmatpush1.bf16.msra.mxu0 %v2070_v2  ;;  %v2076_v6 = vld [vmem:[%s2665_s1 + $0x60] ss:$8 sps:$4 sm:$0xff]   ;;  %v2078_v8 = vld [vmem:[%s2665_s1 + $0x54] ss:$8 sps:$4 sm:$0xff]   ;;  %v2082_v10 = vld [vmem:[%s2665_s1 + $0x50] ss:$8 sps:$4 sm:$0xff]  }
   0xf   : > { %1333 = vmatpush1.bf16.msra.mxu1 %v2071_v3  ;;  %1141 = vmatprep.subr.bf16.mxu0 %v2072_v4  ;;  %v2077_v7 = vld [vmem:[%s2665_s1 + $0x160] ss:$8 sps:$4 sm:$0xff]   ;;  %v2080_v9 = vld [vmem:[%s2665_s1 + $0x154] ss:$8 sps:$4 sm:$0xff]   ;;  %v2083_v11 = vld [vmem:[%s2665_s1 + $0x150] ss:$8 sps:$4 sm:$0xff]  }
  0x10   : > { %1334 = vmatprep.subr.bf16.mxu1 %v2074_v5  ;;  %v2084_v12 = vld [vmem:[%s2665_s1 + $0x44] ss:$8 sps:$4 sm:$0xff]   ;;  %v2088_v14 = vld [vmem:[%s2665_s1 + $0x40] ss:$8 sps:$4 sm:$0xff]   ;;  %v2090_v16 = vld [vmem:[%s2665_s1 + $0x34] ss:$8 sps:$4 sm:$0xff]  }
  0x11   : > { %v2086_v13 = vld [vmem:[%s2665_s1 + $0x144] ss:$8 sps:$4 sm:$0xff]   ;;  %v2089_v15 = vld [vmem:[%s2665_s1 + $0x140] ss:$8 sps:$4 sm:$0xff]   ;;  %v2092_v17 = vld [vmem:[%s2665_s1 + $0x134] ss:$8 sps:$4 sm:$0xff]  }
  0x12   : > { %1142 = vmatpush1.bf16.msra.mxu0 %v2076_v6  ;;  %v2094_v18 = vld [vmem:[%s2665_s1 + $0x30] ss:$8 sps:$4 sm:$0xff]   ;;  %v2096_v20 = vld [vmem:[%s2665_s1 + $0x24] ss:$8 sps:$4 sm:$0xff]   ;;  %v2100_v22 = vld [vmem:[%s2665_s1 + $0x20] ss:$8 sps:$4 sm:$0xff]  }
  0x13   : > { %1335 = vmatpush1.bf16.msra.mxu1 %v2077_v7  ;;  %1143 = vmatprep.subr.bf16.mxu0 %v2078_v8  ;;  %v2095_v19 = vld [vmem:[%s2665_s1 + $0x130] ss:$8 sps:$4 sm:$0xff]   ;;  %v2098_v21 = vld [vmem:[%s2665_s1 + $0x124] ss:$8 sps:$4 sm:$0xff]   ;;  %v2101_v23 = vld [vmem:[%s2665_s1 + $0x120] ss:$8 sps:$4 sm:$0xff]  }
  0x14   : > { %1336 = vmatprep.subr.bf16.mxu1 %v2080_v9  ;;  %v2102_v24 = vld [vmem:[%s2665_s1 + $0x14] ss:$8 sps:$4 sm:$0xff]   ;;  %v2106_v26 = vld [vmem:[%s2665_s1 + $0x10] ss:$8 sps:$4 sm:$0xff]   ;;  %v2108_v28 = vld [vmem:[%s2665_s1 + $0x4] ss:$8 sps:$4 sm:$0xff]  }
  0x15   : > { %v2104_v25 = vld [vmem:[%s2665_s1 + $0x114] ss:$8 sps:$4 sm:$0xff]   ;;  %v2107_v27 = vld [vmem:[%s2665_s1 + $0x110] ss:$8 sps:$4 sm:$0xff]   ;;  %v2110_v29 = vld [vmem:[%s2665_s1 + $0x104] ss:$8 sps:$4 sm:$0xff]  }
  0x16   : > { %1144 = vmatpush1.bf16.msra.mxu0 %v2082_v10  ;;  %v2112_v30 = vld [vmem:[%s2665_s1] ss:$8 sps:$4 sm:$0xff]   ;;  %v2114_v32 = vld [vmem:[%s2665_s1 + $0xf4] ss:$8 sps:$4 sm:$0xff]   ;;  %v2118_v34 = vld [vmem:[%s2665_s1 + $0xf0] ss:$8 sps:$4 sm:$0xff]  }
  0x17   : > { %1337 = vmatpush1.bf16.msra.mxu1 %v2083_v11  ;;  %1145 = vmatprep.subr.bf16.mxu0 %v2084_v12  ;;  %v2113_v31 = vld [vmem:[%s2665_s1 + $0x100] ss:$8 sps:$4 sm:$0xff]   ;;  %v2116_v33 = vld [vmem:[%s2665_s1 + $0x1f4] ss:$8 sps:$4 sm:$0xff]   ;;  %v2119_v35 = vld [vmem:[%s2665_s1 + $0x1f0] ss:$8 sps:$4 sm:$0xff]  }
  0x18   : > { %1338 = vmatprep.subr.bf16.mxu1 %v2086_v13  ;;  %v2120_v36 = vld [vmem:[%s2665_s1 + $0xe4] ss:$8 sps:$4 sm:$0xff]   ;;  %s2672_s25 = smov (!%p205_p4, %s1904_s25), 95  ;;  %v2124_v38 = vld [vmem:[%s2665_s1 + $0xe0] ss:$8 sps:$4 sm:$0xff]  }
  0x19   : > { %v2122_v37 = vld [vmem:[%s2665_s1 + $0x1e4] ss:$8 sps:$4 sm:$0xff]   ;;  %v2125_v39 = vld [vmem:[%s2665_s1 + $0x1e0] ss:$8 sps:$4 sm:$0xff]   ;;  %v2126_v40 = vld [vmem:[%s2665_s1 + $0xd4] ss:$8 sps:$4 sm:$0xff]  }
  0x1a   : > { %1146 = vmatpush1.bf16.msra.mxu0 %v2088_v14  ;;  %v2128_v41 = vld [vmem:[%s2665_s1 + $0x1d4] ss:$8 sps:$4 sm:$0xff]   ;;  %s2040_s26 = sshll.u32 %s2672_s25, 4  ;;  %v2130_v42 = vld [vmem:[%s2665_s1 + $0xd0] ss:$8 sps:$4 sm:$0xff]  }
  0x1b   : > { %1339 = vmatpush1.bf16.msra.mxu1 %v2089_v15  ;;  %1147 = vmatprep.subr.bf16.mxu0 %v2090_v16  ;;  %v2131_v43 = vld [vmem:[%s2665_s1 + $0x1d0] ss:$8 sps:$4 sm:$0xff]   ;;  %v2132_v44 = vld [vmem:[%s2665_s1 + $0xc4] ss:$8 sps:$4 sm:$0xff]   ;;  %s2461_s6 = scalar_lea.vmem %s2664_s0, %s2040_s26  ;;  %v2136_v46 = vld [vmem:[%s2665_s1 + $0xc0] ss:$8 sps:$4 sm:$0xff]   ;;  %s2589_s3 = scalar_lea.vmem %s2666_s2, %s2040_s26 }
  0x1c   : > { %1340 = vmatprep.subr.bf16.mxu1 %v2092_v17  ;;  %v2134_v45 = vld [vmem:[%s2665_s1 + $0x1c4] ss:$8 sps:$4 sm:$0xff]   ;;  %v2137_v47 = vld [vmem:[%s2665_s1 + $0x1c0] ss:$8 sps:$4 sm:$0xff]   ;;  %v2138_v48 = vld [vmem:[%s2665_s1 + $0xb4] ss:$8 sps:$4 sm:$0xff]  }
  0x1d   : > { %v2164_v49 = vld [vmem:[%s2461_s6 + $0x4] ss:$16 sps:$4 sm:$0xff]   ;;  %v2167_v51 = vld [vmem:[%s2461_s6 + $0xc] ss:$16 sps:$4 sm:$0xff]   ;;  %v2142_v52 = vld [vmem:[%s2665_s1 + $0xb0] ss:$8 sps:$4 sm:$0xff]  }
  0x1e   : > { %1148 = vmatpush1.bf16.msra.mxu0 %v2094_v18  ;;  %v2140_v50 = vld [vmem:[%s2665_s1 + $0x1b4] ss:$8 sps:$4 sm:$0xff]   ;;  %1171 = vmatprep.mubr.bf16.mxu0 %v2164_v49  ;;  %v2143_v53 = vld [vmem:[%s2665_s1 + $0x1b0] ss:$8 sps:$4 sm:$0xff]   ;;  %v2144_v54 = vld [vmem:[%s2665_s1 + $0xa4] ss:$8 sps:$4 sm:$0xff]  }
  0x1f   : > { %1341 = vmatpush1.bf16.msra.mxu1 %v2095_v19  ;;  %1149 = vmatprep.subr.bf16.mxu0 %v2096_v20  ;;  %v2146_v55 = vld [vmem:[%s2665_s1 + $0x1a4] ss:$8 sps:$4 sm:$0xff]   ;;  %v2148_v56 = vld [vmem:[%s2665_s1 + $0xa0] ss:$8 sps:$4 sm:$0xff]   ;;  %v2150_v58 = vld [vmem:[%s2665_s1 + $0x94] ss:$8 sps:$4 sm:$0xff]  }
  0x20   : > { %1342 = vmatprep.subr.bf16.mxu1 %v2098_v21  ;;  %1364 = vmatprep.mubr.bf16.mxu1 %v2167_v51  ;;  %v2149_v57 = vld [vmem:[%s2665_s1 + $0x1a0] ss:$8 sps:$4 sm:$0xff]   ;;  %v2152_v59 = vld [vmem:[%s2665_s1 + $0x194] ss:$8 sps:$4 sm:$0xff]   ;;  %v2154_v60 = vld [vmem:[%s2665_s1 + $0x90] ss:$8 sps:$4 sm:$0xff]  }
  0x21   : > { %v2155_v61 = vld [vmem:[%s2665_s1 + $0x190] ss:$8 sps:$4 sm:$0xff]   ;;  %v2156_v62 = vld [vmem:[%s2665_s1 + $0x84] ss:$8 sps:$4 sm:$0xff]   ;;  %v2160_v0 = vld [vmem:[%s2665_s1 + $0x80] ss:$8 sps:$4 sm:$0xff]  }
  0x22   : > { %1150 = vmatpush1.bf16.msra.mxu0 %v2100_v22  ;;  %v2158_v63 = vld [vmem:[%s2665_s1 + $0x184] ss:$8 sps:$4 sm:$0xff]   ;;  %v2161_v1 = vld [vmem:[%s2665_s1 + $0x180] ss:$8 sps:$4 sm:$0xff]  }
  0x23   : > { %1343 = vmatpush1.bf16.msra.mxu1 %v2101_v23  ;;  %1151 = vmatprep.subr.bf16.mxu0 %v2102_v24  ;;  %v2162_v2 = vld [vmem:[%s2461_s6] ss:$16 sps:$4 sm:$0xff]   ;;  %v2165_v3 = vld [vmem:[%s2461_s6 + $0x8] ss:$16 sps:$4 sm:$0xff]   ;;  %v2168_v4 = vld [vmem:[%s2461_s6 + $0x24] ss:$16 sps:$4 sm:$0xff]  }
  0x24   : > { %1344 = vmatprep.subr.bf16.mxu1 %v2104_v25  ;;  %v2170_v5 = vld [vmem:[%s2461_s6 + $0x2c] ss:$16 sps:$4 sm:$0xff]   ;;  %v2172_v6 = vld [vmem:[%s2461_s6 + $0x20] ss:$16 sps:$4 sm:$0xff]   ;;  %v2173_v7 = vld [vmem:[%s2461_s6 + $0x28] ss:$16 sps:$4 sm:$0xff]  }
  0x25   : > { %v2174_v8 = vld [vmem:[%s2461_s6 + $0x44] ss:$16 sps:$4 sm:$0xff]   ;;  %v2176_v9 = vld [vmem:[%s2461_s6 + $0x4c] ss:$16 sps:$4 sm:$0xff]   ;;  %v2178_v10 = vld [vmem:[%s2461_s6 + $0x40] ss:$16 sps:$4 sm:$0xff]  }
  0x26   : > { %1152 = vmatpush1.bf16.msra.mxu0 %v2106_v26  ;;  %v2179_v11 = vld [vmem:[%s2461_s6 + $0x48] ss:$16 sps:$4 sm:$0xff]   ;;  %v2180_v12 = vld [vmem:[%s2461_s6 + $0x64] ss:$16 sps:$4 sm:$0xff]   ;;  %v2182_v13 = vld [vmem:[%s2461_s6 + $0x6c] ss:$16 sps:$4 sm:$0xff]  }
  0x27   : > { %1345 = vmatpush1.bf16.msra.mxu1 %v2107_v27  ;;  %1153 = vmatprep.subr.bf16.mxu0 %v2108_v28  ;;  %v2184_v14 = vld [vmem:[%s2461_s6 + $0x60] ss:$16 sps:$4 sm:$0xff]   ;;  %v2185_v15 = vld [vmem:[%s2461_s6 + $0x68] ss:$16 sps:$4 sm:$0xff]   ;;  %v2186_v16 = vld [vmem:[%s2461_s6 + $0x84] ss:$16 sps:$4 sm:$0xff]  }
  0x28   : > { %1346 = vmatprep.subr.bf16.mxu1 %v2110_v29  ;;  %v2188_v17 = vld [vmem:[%s2461_s6 + $0x8c] ss:$16 sps:$4 sm:$0xff]   ;;  %v2190_v18 = vld [vmem:[%s2461_s6 + $0x80] ss:$16 sps:$4 sm:$0xff]   ;;  %v2191_v19 = vld [vmem:[%s2461_s6 + $0x88] ss:$16 sps:$4 sm:$0xff]  }
  0x29   : > { %v2192_v20 = vld [vmem:[%s2461_s6 + $0xa4] ss:$16 sps:$4 sm:$0xff]   ;;  %v2194_v21 = vld [vmem:[%s2461_s6 + $0xac] ss:$16 sps:$4 sm:$0xff]   ;;  %v2196_v22 = vld [vmem:[%s2461_s6 + $0xa0] ss:$16 sps:$4 sm:$0xff]  }
  0x2a   : > { %1154 = vmatpush1.bf16.msra.mxu0 %v2112_v30  ;;  %v2197_v23 = vld [vmem:[%s2461_s6 + $0xa8] ss:$16 sps:$4 sm:$0xff]   ;;  %v2198_v24 = vld [vmem:[%s2461_s6 + $0xc4] ss:$16 sps:$4 sm:$0xff]   ;;  %v2200_v25 = vld [vmem:[%s2461_s6 + $0xcc] ss:$16 sps:$4 sm:$0xff]  }
  0x2b   : > { %1347 = vmatpush1.bf16.msra.mxu1 %v2113_v31  ;;  %1155 = vmatprep.subr.bf16.mxu0 %v2114_v32  ;;  %v2202_v26 = vld [vmem:[%s2461_s6 + $0xc0] ss:$16 sps:$4 sm:$0xff]   ;;  %v2203_v27 = vld [vmem:[%s2461_s6 + $0xc8] ss:$16 sps:$4 sm:$0xff]   ;;  %v2204_v28 = vld [vmem:[%s2461_s6 + $0xe4] ss:$16 sps:$4 sm:$0xff]  }
  0x2c   : > { %1348 = vmatprep.subr.bf16.mxu1 %v2116_v33  ;;  %v2206_v29 = vld [vmem:[%s2461_s6 + $0xec] ss:$16 sps:$4 sm:$0xff]   ;;  %v2208_v30 = vld [vmem:[%s2461_s6 + $0xe0] ss:$16 sps:$4 sm:$0xff]   ;;  %v2209_v31 = vld [vmem:[%s2461_s6 + $0xe8] ss:$16 sps:$4 sm:$0xff]  }
  0x2d   : > { %v2210_v32 = vld [vmem:[%s2461_s6 + $0x104] ss:$16 sps:$4 sm:$0xff]   ;;  %v2212_v33 = vld [vmem:[%s2461_s6 + $0x10c] ss:$16 sps:$4 sm:$0xff]   ;;  %v2239_v51 = vld [vmem:[%s2461_s6 + $0x188] ss:$16 sps:$4 sm:$0xff]  }
  0x2e   : > { %1156 = vmatpush2.bf16.msra.mxu0 %v2118_v34  ;;  %v2214_v34 = vld [vmem:[%s2461_s6 + $0x100] ss:$16 sps:$4 sm:$0xff]   ;;  %v2236_v49 = vld [vmem:[%s2461_s6 + $0x18c] ss:$16 sps:$4 sm:$0xff]  }
  0x2f   : > { %1349 = vmatpush2.bf16.msra.mxu1 %v2119_v35  ;;  %1157 = vmatprep.subr.bf16.mxu0 %v2120_v36  ;;  %v2215_v35 = vld [vmem:[%s2461_s6 + $0x108] ss:$16 sps:$4 sm:$0xff]   ;;  %v2216_v36 = vld [vmem:[%s2461_s6 + $0x124] ss:$16 sps:$4 sm:$0xff]  }
  0x30   : > { %1350 = vmatprep.subr.bf16.mxu1 %v2122_v37  ;;  %v2218_v37 = vld [vmem:[%s2461_s6 + $0x12c] ss:$16 sps:$4 sm:$0xff]  }
  0x32   : > { %1158 = vmatpush2.bf16.msra.mxu0 %v2124_v38  ;;  %v2220_v38 = vld [vmem:[%s2461_s6 + $0x120] ss:$16 sps:$4 sm:$0xff]  }
  0x33   : > { %1351 = vmatpush2.bf16.msra.mxu1 %v2125_v39  ;;  %1159 = vmatprep.subr.bf16.mxu0 %v2126_v40  ;;  %v2221_v39 = vld [vmem:[%s2461_s6 + $0x128] ss:$16 sps:$4 sm:$0xff]   ;;  %v2222_v40 = vld [vmem:[%s2461_s6 + $0x144] ss:$16 sps:$4 sm:$0xff]  }
  0x34   : > { %1352 = vmatprep.subr.bf16.mxu1 %v2128_v41  ;;  %v2224_v41 = vld [vmem:[%s2461_s6 + $0x14c] ss:$16 sps:$4 sm:$0xff]  }
  0x36   : > { %1160 = vmatpush2.bf16.msra.mxu0 %v2130_v42  ;;  %v2226_v42 = vld [vmem:[%s2461_s6 + $0x140] ss:$16 sps:$4 sm:$0xff]  }
  0x37   : > { %1353 = vmatpush2.bf16.msra.mxu1 %v2131_v43  ;;  %1161 = vmatprep.subr.bf16.mxu0 %v2132_v44  ;;  %v2227_v43 = vld [vmem:[%s2461_s6 + $0x148] ss:$16 sps:$4 sm:$0xff]   ;;  %v2228_v44 = vld [vmem:[%s2461_s6 + $0x164] ss:$16 sps:$4 sm:$0xff]  }
  0x38   : > { %1354 = vmatprep.subr.bf16.mxu1 %v2134_v45  ;;  %v2230_v45 = vld [vmem:[%s2461_s6 + $0x16c] ss:$16 sps:$4 sm:$0xff]  }
  0x3a   : > { %1162 = vmatpush2.bf16.msra.mxu0 %v2136_v46  ;;  %v2232_v46 = vld [vmem:[%s2461_s6 + $0x160] ss:$16 sps:$4 sm:$0xff]  }
  0x3b   : > { %1355 = vmatpush2.bf16.msra.mxu1 %v2137_v47  ;;  %1163 = vmatprep.subr.bf16.mxu0 %v2138_v48  ;;  %v2233_v47 = vld [vmem:[%s2461_s6 + $0x168] ss:$16 sps:$4 sm:$0xff]   ;;  %v2234_v48 = vld [vmem:[%s2461_s6 + $0x184] ss:$16 sps:$4 sm:$0xff]  }
  0x3c   : > { %1356 = vmatprep.subr.bf16.mxu1 %v2140_v50  ;;  %v2238_v50 = vld [vmem:[%s2461_s6 + $0x180] ss:$16 sps:$4 sm:$0xff]  }
  0x3e   : > { %1164 = vmatpush2.bf16.msra.mxu0 %v2142_v52  ;;  %v2240_v52 = vld [vmem:[%s2461_s6 + $0x1a4] ss:$16 sps:$4 sm:$0xff]  }
  0x3f   : > { %1357 = vmatpush2.bf16.msra.mxu1 %v2143_v53  ;;  %1165 = vmatprep.subr.bf16.mxu0 %v2144_v54  ;;  %v2242_v53 = vld [vmem:[%s2461_s6 + $0x1ac] ss:$16 sps:$4 sm:$0xff]   ;;  %v2244_v54 = vld [vmem:[%s2461_s6 + $0x1a0] ss:$16 sps:$4 sm:$0xff]  }
  0x40   : > { %1358 = vmatprep.subr.bf16.mxu1 %v2146_v55  ;;  %v2245_v55 = vld [vmem:[%s2461_s6 + $0x1a8] ss:$16 sps:$4 sm:$0xff]  }
  0x42   : > { %1166 = vmatpush2.bf16.msra.mxu0 %v2148_v56  ;;  %v2246_v56 = vld [vmem:[%s2461_s6 + $0x1c4] ss:$16 sps:$4 sm:$0xff]  }
  0x43   : > { %1359 = vmatpush2.bf16.msra.mxu1 %v2149_v57  ;;  %1167 = vmatprep.subr.bf16.mxu0 %v2150_v58  ;;  %v2248_v57 = vld [vmem:[%s2461_s6 + $0x1cc] ss:$16 sps:$4 sm:$0xff]   ;;  %v2250_v58 = vld [vmem:[%s2461_s6 + $0x1c0] ss:$16 sps:$4 sm:$0xff]  }
  0x44   : > { %1360 = vmatprep.subr.bf16.mxu1 %v2152_v59  ;;  %v2251_v59 = vld [vmem:[%s2461_s6 + $0x1c8] ss:$16 sps:$4 sm:$0xff]  }
  0x46   : > { %1168 = vmatpush2.bf16.msra.mxu0 %v2154_v60  ;;  %v2252_v60 = vld [vmem:[%s2461_s6 + $0x1e4] ss:$16 sps:$4 sm:$0xff]  }
  0x47   : > { %1361 = vmatpush2.bf16.msra.mxu1 %v2155_v61  ;;  %1169 = vmatprep.subr.bf16.mxu0 %v2156_v62  ;;  %v2254_v61 = vld [vmem:[%s2461_s6 + $0x1ec] ss:$16 sps:$4 sm:$0xff]   ;;  %v2256_v62 = vld [vmem:[%s2461_s6 + $0x1e0] ss:$16 sps:$4 sm:$0xff]  }
  0x48   : > { %1362 = vmatprep.subr.bf16.mxu1 %v2158_v63  ;;  %v2257_v63 = vld [vmem:[%s2461_s6 + $0x1e8] ss:$16 sps:$4 sm:$0xff]  }
  0x4a   : > { %1170 = vmatpush2.bf16.msra.mxu0 %v2160_v0 }
  0x4b   : > { %1363 = vmatpush2.bf16.msra.mxu1 %v2161_v1 }
  0x4d   : > { %1172 = vmatmul.mubr.bf16.vlgmr.msra.gmra.mxu0 %v2162_v2 }
  0x4e   : > { %1365 = vmatmul.mubr.bf16.vlgmr.msra.gmra.mxu1 %v2165_v3  ;;  %1181 = vmatprep.mubr.bf16.mxu0 %v2168_v4 }
  0x4f   : > { %1374 = vmatprep.mubr.bf16.mxu1 %v2170_v5 }
  0x55   : > { %1182 = vmatmul.mubr.bf16.gmra.mxu0 %v2172_v6 }
  0x56   : > { %1375 = vmatmul.mubr.bf16.gmra.mxu1 %v2173_v7  ;;  %1191 = vmatprep.mubr.bf16.mxu0 %v2174_v8 }
  0x57   : > { %1384 = vmatprep.mubr.bf16.mxu1 %v2176_v9 }
  0x5d   : > { %1192 = vmatmul.mubr.bf16.gmra.mxu0 %v2178_v10 }
  0x5e   : > { %1385 = vmatmul.mubr.bf16.gmra.mxu1 %v2179_v11  ;;  %1201 = vmatprep.mubr.bf16.mxu0 %v2180_v12 }
  0x5f   : > { %1394 = vmatprep.mubr.bf16.mxu1 %v2182_v13 }
  0x65   : > { %1202 = vmatmul.mubr.bf16.gmra.mxu0 %v2184_v14 }
  0x66   : > { %1395 = vmatmul.mubr.bf16.gmra.mxu1 %v2185_v15  ;;  %1211 = vmatprep.mubr.bf16.mxu0 %v2186_v16 }
  0x67   : > { %1404 = vmatprep.mubr.bf16.mxu1 %v2188_v17 }
  0x6d   : > { %1212 = vmatmul.mubr.bf16.gmra.mxu0 %v2190_v18 }
  0x6e   : > { %1405 = vmatmul.mubr.bf16.gmra.mxu1 %v2191_v19  ;;  %1221 = vmatprep.mubr.bf16.mxu0 %v2192_v20 }
  0x6f   : > { %1414 = vmatprep.mubr.bf16.mxu1 %v2194_v21 }
  0x75   : > { %1222 = vmatmul.mubr.bf16.gmra.mxu0 %v2196_v22 }
  0x76   : > { %1415 = vmatmul.mubr.bf16.gmra.mxu1 %v2197_v23  ;;  %1231 = vmatprep.mubr.bf16.mxu0 %v2198_v24 }
  0x77   : > { %1424 = vmatprep.mubr.bf16.mxu1 %v2200_v25 }
  0x7d   : > { %1232 = vmatmul.mubr.bf16.gmra.mxu0 %v2202_v26 }
  0x7e   : > { %1425 = vmatmul.mubr.bf16.gmra.mxu1 %v2203_v27  ;;  %1241 = vmatprep.mubr.bf16.mxu0 %v2204_v28 }
  0x7f   : > { %1434 = vmatprep.mubr.bf16.mxu1 %v2206_v29 }
  0x85   : > { %1242 = vmatmul.mubr.bf16.gmra.mxu0 %v2208_v30 }
  0x86   : > { %1435 = vmatmul.mubr.bf16.gmra.mxu1 %v2209_v31  ;;  %1251 = vmatprep.mubr.bf16.mxu0 %v2210_v32 }
  0x87   : > { %1444 = vmatprep.mubr.bf16.mxu1 %v2212_v33 }
  0x8d   : > { %1252 = vmatmul.mubr.bf16.gmra.mxu0 %v2214_v34 }
  0x8e   : > { %1445 = vmatmul.mubr.bf16.gmra.mxu1 %v2215_v35  ;;  %1261 = vmatprep.mubr.bf16.mxu0 %v2216_v36 }
  0x8f   : > { %1454 = vmatprep.mubr.bf16.mxu1 %v2218_v37 }
  0x95   : > { %1262 = vmatmul.mubr.bf16.gmra.mxu0 %v2220_v38 }
  0x96   : > { %1455 = vmatmul.mubr.bf16.gmra.mxu1 %v2221_v39  ;;  %1271 = vmatprep.mubr.bf16.mxu0 %v2222_v40 }
  0x97   : > { %1464 = vmatprep.mubr.bf16.mxu1 %v2224_v41 }
  0x9d   : > { %1272 = vmatmul.mubr.bf16.gmra.mxu0 %v2226_v42 }
  0x9e   : > { %1465 = vmatmul.mubr.bf16.gmra.mxu1 %v2227_v43  ;;  %1281 = vmatprep.mubr.bf16.mxu0 %v2228_v44 }
  0x9f   : > { %1474 = vmatprep.mubr.bf16.mxu1 %v2230_v45 }
  0xa5   : > { %1282 = vmatmul.mubr.bf16.gmra.mxu0 %v2232_v46 }
  0xa6   : > { %1475 = vmatmul.mubr.bf16.gmra.mxu1 %v2233_v47  ;;  %1291 = vmatprep.mubr.bf16.mxu0 %v2234_v48 }
  0xa7   : > { %1484 = vmatprep.mubr.bf16.mxu1 %v2236_v49 }
  0xad   : > { %1292 = vmatmul.mubr.bf16.gmra.mxu0 %v2238_v50 }
  0xae   : > { %1485 = vmatmul.mubr.bf16.gmra.mxu1 %v2239_v51  ;;  %1301 = vmatprep.mubr.bf16.mxu0 %v2240_v52 }
  0xaf   : > { %1494 = vmatprep.mubr.bf16.mxu1 %v2242_v53 }
  0xb5   : > { %1302 = vmatmul.mubr.bf16.gmra.mxu0 %v2244_v54 }
  0xb6   : > { %1495 = vmatmul.mubr.bf16.gmra.mxu1 %v2245_v55  ;;  %1311 = vmatprep.mubr.bf16.mxu0 %v2246_v56 }
  0xb7   : > { %1504 = vmatprep.mubr.bf16.mxu1 %v2248_v57 }
  0xbd   : > { %1312 = vmatmul.mubr.bf16.gmra.mxu0 %v2250_v58 }
  0xbe   : > { %1505 = vmatmul.mubr.bf16.gmra.mxu1 %v2251_v59  ;;  %1321 = vmatprep.mubr.bf16.mxu0 %v2252_v60 }
  0xbf   : > { %1514 = vmatprep.mubr.bf16.mxu1 %v2254_v61 }
  0xc5   : > { %1322 = vmatmul.mubr.bf16.gmra.mxu0 %v2256_v62 }
  0xc6   : > { %1515 = vmatmul.mubr.bf16.gmra.mxu1 %v2257_v63 }
 0x10d   : > { %v1173_v0 = vpop.f32.mrf.mxu0 }
 0x10e   : > { %v1366_v1 = vpop.f32.mrf.mxu1 }
 0x10f   : > { %v1367_v2 = vadd.f32 %v1366_v1, %v1173_v0  ;;  %v1175_v3 = vpop.f32.mrf.mxu0 }
 0x110   : > { %v1368_v4 = vpop.f32.mrf.mxu1 }
 0x111   : > { %1720 = vst [vmem:[%s2589_s3] sm:$0xff] %v1367_v2  ;;  %v1369_v5 = vadd.f32 %v1368_v4, %v1175_v3  ;;  %v1177_v6 = vpop.f32.mrf.mxu0 }
 0x112   : > { %v1370_v7 = vpop.f32.mrf.mxu1 }
 0x113   : > { %1721 = vst [vmem:[%s2589_s3 + $0x8] sm:$0xff] %v1369_v5  ;;  %v1371_v8 = vadd.f32 %v1370_v7, %v1177_v6  ;;  %v1179_v9 = vpop.f32.mrf.mxu0 }
 0x114   : > { %v1372_v10 = vpop.f32.mrf.mxu1 }
 0x115   : > { %1722 = vst [vmem:[%s2589_s3 + $0x10] sm:$0xff] %v1371_v8  ;;  %v1373_v11 = vadd.f32 %v1372_v10, %v1179_v9  ;;  %v1183_v12 = vpop.f32.mrf.mxu0 }
 0x116   : > { %v1376_v13 = vpop.f32.mrf.mxu1 }
 0x117   : > { %1723 = vst [vmem:[%s2589_s3 + $0x18] sm:$0xff] %v1373_v11  ;;  %v1377_v14 = vadd.f32 %v1376_v13, %v1183_v12  ;;  %v1185_v15 = vpop.f32.mrf.mxu0 }
 0x118   : > { %v1378_v16 = vpop.f32.mrf.mxu1 }
 0x119   : > { %1724 = vst [vmem:[%s2589_s3 + $0x20] sm:$0xff] %v1377_v14  ;;  %v1379_v17 = vadd.f32 %v1378_v16, %v1185_v15  ;;  %v1187_v18 = vpop.f32.mrf.mxu0 }
 0x11a   : > { %v1380_v19 = vpop.f32.mrf.mxu1 }
 0x11b   : > { %1725 = vst [vmem:[%s2589_s3 + $0x28] sm:$0xff] %v1379_v17  ;;  %v1381_v20 = vadd.f32 %v1380_v19, %v1187_v18  ;;  %v1189_v21 = vpop.f32.mrf.mxu0 }
 0x11c   : > { %v1382_v22 = vpop.f32.mrf.mxu1 }
 0x11d   : > { %1726 = vst [vmem:[%s2589_s3 + $0x30] sm:$0xff] %v1381_v20  ;;  %v1383_v23 = vadd.f32 %v1382_v22, %v1189_v21  ;;  %v1193_v24 = vpop.f32.mrf.mxu0 }
 0x11e   : > { %v1386_v25 = vpop.f32.mrf.mxu1 }
 0x11f   : > { %1727 = vst [vmem:[%s2589_s3 + $0x38] sm:$0xff] %v1383_v23  ;;  %v1387_v26 = vadd.f32 %v1386_v25, %v1193_v24  ;;  %v1195_v27 = vpop.f32.mrf.mxu0 }
 0x120   : > { %v1388_v28 = vpop.f32.mrf.mxu1 }
 0x121   : > { %1728 = vst [vmem:[%s2589_s3 + $0x40] sm:$0xff] %v1387_v26  ;;  %v1389_v29 = vadd.f32 %v1388_v28, %v1195_v27  ;;  %v1197_v30 = vpop.f32.mrf.mxu0 }
 0x122   : > { %v1390_v31 = vpop.f32.mrf.mxu1 }
 0x123   : > { %1729 = vst [vmem:[%s2589_s3 + $0x48] sm:$0xff] %v1389_v29  ;;  %v1391_v32 = vadd.f32 %v1390_v31, %v1197_v30  ;;  %v1199_v33 = vpop.f32.mrf.mxu0 }
 0x124   : > { %v1392_v34 = vpop.f32.mrf.mxu1 }
 0x125   : > { %1730 = vst [vmem:[%s2589_s3 + $0x50] sm:$0xff] %v1391_v32  ;;  %v1393_v35 = vadd.f32 %v1392_v34, %v1199_v33  ;;  %v1203_v36 = vpop.f32.mrf.mxu0 }
 0x126   : > { %v1396_v37 = vpop.f32.mrf.mxu1 }
 0x127   : > { %1731 = vst [vmem:[%s2589_s3 + $0x58] sm:$0xff] %v1393_v35  ;;  %v1397_v38 = vadd.f32 %v1396_v37, %v1203_v36  ;;  %v1205_v39 = vpop.f32.mrf.mxu0 }
 0x128   : > { %v1398_v40 = vpop.f32.mrf.mxu1 }
 0x129   : > { %1732 = vst [vmem:[%s2589_s3 + $0x60] sm:$0xff] %v1397_v38  ;;  %v1399_v41 = vadd.f32 %v1398_v40, %v1205_v39  ;;  %v1207_v42 = vpop.f32.mrf.mxu0 }
 0x12a   : > { %v1400_v43 = vpop.f32.mrf.mxu1 }
 0x12b   : > { %1733 = vst [vmem:[%s2589_s3 + $0x68] sm:$0xff] %v1399_v41  ;;  %v1401_v44 = vadd.f32 %v1400_v43, %v1207_v42  ;;  %v1209_v45 = vpop.f32.mrf.mxu0 }
 0x12c   : > { %v1402_v46 = vpop.f32.mrf.mxu1 }
 0x12d   : > { %1734 = vst [vmem:[%s2589_s3 + $0x70] sm:$0xff] %v1401_v44  ;;  %v1403_v47 = vadd.f32 %v1402_v46, %v1209_v45  ;;  %v1213_v48 = vpop.f32.mrf.mxu0 }
 0x12e   : > { %v1406_v49 = vpop.f32.mrf.mxu1 }
 0x12f   : > { %1735 = vst [vmem:[%s2589_s3 + $0x78] sm:$0xff] %v1403_v47  ;;  %v1407_v50 = vadd.f32 %v1406_v49, %v1213_v48  ;;  %v1215_v51 = vpop.f32.mrf.mxu0 }
 0x130   : > { %v1408_v52 = vpop.f32.mrf.mxu1 }
 0x131   : > { %1736 = vst [vmem:[%s2589_s3 + $0x80] sm:$0xff] %v1407_v50  ;;  %v1409_v53 = vadd.f32 %v1408_v52, %v1215_v51  ;;  %v1217_v54 = vpop.f32.mrf.mxu0 }
 0x132   : > { %v1410_v55 = vpop.f32.mrf.mxu1 }
 0x133   : > { %1737 = vst [vmem:[%s2589_s3 + $0x88] sm:$0xff] %v1409_v53  ;;  %v1411_v56 = vadd.f32 %v1410_v55, %v1217_v54  ;;  %v1219_v57 = vpop.f32.mrf.mxu0 }
 0x134   : > { %v1412_v58 = vpop.f32.mrf.mxu1 }
 0x135   : > { %1738 = vst [vmem:[%s2589_s3 + $0x90] sm:$0xff] %v1411_v56  ;;  %v1413_v59 = vadd.f32 %v1412_v58, %v1219_v57  ;;  %v1223_v60 = vpop.f32.mrf.mxu0 }
 0x136   : > { %v1416_v61 = vpop.f32.mrf.mxu1 }
 0x137   : > { %1739 = vst [vmem:[%s2589_s3 + $0x98] sm:$0xff] %v1413_v59  ;;  %v1417_v62 = vadd.f32 %v1416_v61, %v1223_v60  ;;  %v1225_v63 = vpop.f32.mrf.mxu0 }
 0x138   : > { %v1418_v0 = vpop.f32.mrf.mxu1 }
 0x139   : > { %1740 = vst [vmem:[%s2589_s3 + $0xa0] sm:$0xff] %v1417_v62  ;;  %v1419_v1 = vadd.f32 %v1418_v0, %v1225_v63  ;;  %v1227_v2 = vpop.f32.mrf.mxu0 }
 0x13a   : > { %v1420_v3 = vpop.f32.mrf.mxu1 }
 0x13b   : > { %1741 = vst [vmem:[%s2589_s3 + $0xa8] sm:$0xff] %v1419_v1  ;;  %v1421_v4 = vadd.f32 %v1420_v3, %v1227_v2  ;;  %v1229_v5 = vpop.f32.mrf.mxu0 }
 0x13c   : > { %v1422_v6 = vpop.f32.mrf.mxu1 }
 0x13d   : > { %1742 = vst [vmem:[%s2589_s3 + $0xb0] sm:$0xff] %v1421_v4  ;;  %v1423_v7 = vadd.f32 %v1422_v6, %v1229_v5  ;;  %v1233_v8 = vpop.f32.mrf.mxu0 }
 0x13e   : > { %v1426_v9 = vpop.f32.mrf.mxu1 }
 0x13f   : > { %1743 = vst [vmem:[%s2589_s3 + $0xb8] sm:$0xff] %v1423_v7  ;;  %v1427_v10 = vadd.f32 %v1426_v9, %v1233_v8  ;;  %v1235_v11 = vpop.f32.mrf.mxu0 }
 0x140   : > { %v1428_v12 = vpop.f32.mrf.mxu1 }
 0x141   : > { %1744 = vst [vmem:[%s2589_s3 + $0xc0] sm:$0xff] %v1427_v10  ;;  %v1429_v13 = vadd.f32 %v1428_v12, %v1235_v11  ;;  %v1237_v14 = vpop.f32.mrf.mxu0 }
 0x142   : > { %v1430_v15 = vpop.f32.mrf.mxu1 }
 0x143   : > { %1745 = vst [vmem:[%s2589_s3 + $0xc8] sm:$0xff] %v1429_v13  ;;  %v1431_v16 = vadd.f32 %v1430_v15, %v1237_v14  ;;  %v1239_v17 = vpop.f32.mrf.mxu0 }
 0x144   : > { %v1432_v18 = vpop.f32.mrf.mxu1 }
 0x145   : > { %1746 = vst [vmem:[%s2589_s3 + $0xd0] sm:$0xff] %v1431_v16  ;;  %v1433_v19 = vadd.f32 %v1432_v18, %v1239_v17  ;;  %v1243_v20 = vpop.f32.mrf.mxu0 }
 0x146   : > { %v1436_v21 = vpop.f32.mrf.mxu1 }
 0x147   : > { %1747 = vst [vmem:[%s2589_s3 + $0xd8] sm:$0xff] %v1433_v19  ;;  %v1437_v22 = vadd.f32 %v1436_v21, %v1243_v20  ;;  %v1245_v23 = vpop.f32.mrf.mxu0 }
 0x148   : > { %v1438_v24 = vpop.f32.mrf.mxu1 }
 0x149   : > { %1748 = vst [vmem:[%s2589_s3 + $0xe0] sm:$0xff] %v1437_v22  ;;  %v1439_v25 = vadd.f32 %v1438_v24, %v1245_v23  ;;  %v1247_v26 = vpop.f32.mrf.mxu0 }
 0x14a   : > { %v1440_v27 = vpop.f32.mrf.mxu1 }
 0x14b   : > { %1749 = vst [vmem:[%s2589_s3 + $0xe8] sm:$0xff] %v1439_v25  ;;  %v1441_v28 = vadd.f32 %v1440_v27, %v1247_v26  ;;  %v1249_v29 = vpop.f32.mrf.mxu0 }
 0x14c   : > { %v1442_v30 = vpop.f32.mrf.mxu1 }
 0x14d   : > { %1750 = vst [vmem:[%s2589_s3 + $0xf0] sm:$0xff] %v1441_v28  ;;  %v1443_v31 = vadd.f32 %v1442_v30, %v1249_v29  ;;  %v1253_v32 = vpop.f32.mrf.mxu0 }
 0x14e   : > { %v1446_v33 = vpop.f32.mrf.mxu1 }
 0x14f   : > { %1751 = vst [vmem:[%s2589_s3 + $0xf8] sm:$0xff] %v1443_v31  ;;  %v1447_v34 = vadd.f32 %v1446_v33, %v1253_v32  ;;  %v1255_v35 = vpop.f32.mrf.mxu0 }
 0x150   : > { %v1448_v36 = vpop.f32.mrf.mxu1 }
 0x151   : > { %1752 = vst [vmem:[%s2589_s3 + $0x100] sm:$0xff] %v1447_v34  ;;  %v1449_v37 = vadd.f32 %v1448_v36, %v1255_v35  ;;  %v1257_v38 = vpop.f32.mrf.mxu0 }
 0x152   : > { %v1450_v39 = vpop.f32.mrf.mxu1 }
 0x153   : > { %1753 = vst [vmem:[%s2589_s3 + $0x108] sm:$0xff] %v1449_v37  ;;  %v1451_v40 = vadd.f32 %v1450_v39, %v1257_v38  ;;  %v1259_v41 = vpop.f32.mrf.mxu0 }
 0x154   : > { %v1452_v42 = vpop.f32.mrf.mxu1 }
 0x155   : > { %1754 = vst [vmem:[%s2589_s3 + $0x110] sm:$0xff] %v1451_v40  ;;  %v1453_v43 = vadd.f32 %v1452_v42, %v1259_v41  ;;  %v1263_v44 = vpop.f32.mrf.mxu0 }
 0x156   : > { %v1456_v45 = vpop.f32.mrf.mxu1 }
 0x157   : > { %1755 = vst [vmem:[%s2589_s3 + $0x118] sm:$0xff] %v1453_v43  ;;  %v1457_v46 = vadd.f32 %v1456_v45, %v1263_v44  ;;  %v1265_v47 = vpop.f32.mrf.mxu0 }
 0x158   : > { %v1458_v48 = vpop.f32.mrf.mxu1 }
 0x159   : > { %1756 = vst [vmem:[%s2589_s3 + $0x120] sm:$0xff] %v1457_v46  ;;  %v1459_v49 = vadd.f32 %v1458_v48, %v1265_v47  ;;  %v1267_v50 = vpop.f32.mrf.mxu0 }
 0x15a   : > { %v1460_v51 = vpop.f32.mrf.mxu1 }
 0x15b   : > { %1757 = vst [vmem:[%s2589_s3 + $0x128] sm:$0xff] %v1459_v49  ;;  %v1461_v52 = vadd.f32 %v1460_v51, %v1267_v50  ;;  %v1269_v53 = vpop.f32.mrf.mxu0 }
 0x15c   : > { %v1462_v54 = vpop.f32.mrf.mxu1 }
 0x15d   : > { %1758 = vst [vmem:[%s2589_s3 + $0x130] sm:$0xff] %v1461_v52  ;;  %v1463_v55 = vadd.f32 %v1462_v54, %v1269_v53  ;;  %v1273_v56 = vpop.f32.mrf.mxu0 }
 0x15e   : > { %v1466_v57 = vpop.f32.mrf.mxu1 }
 0x15f   : > { %1759 = vst [vmem:[%s2589_s3 + $0x138] sm:$0xff] %v1463_v55  ;;  %v1467_v58 = vadd.f32 %v1466_v57, %v1273_v56  ;;  %v1275_v59 = vpop.f32.mrf.mxu0 }
 0x160   : > { %v1468_v60 = vpop.f32.mrf.mxu1 }
 0x161   : > { %1760 = vst [vmem:[%s2589_s3 + $0x140] sm:$0xff] %v1467_v58  ;;  %v1469_v61 = vadd.f32 %v1468_v60, %v1275_v59  ;;  %v1277_v62 = vpop.f32.mrf.mxu0 }
 0x162   : > { %v1470_v63 = vpop.f32.mrf.mxu1 }
 0x163   : > { %1761 = vst [vmem:[%s2589_s3 + $0x148] sm:$0xff] %v1469_v61  ;;  %v1471_v0 = vadd.f32 %v1470_v63, %v1277_v62  ;;  %v1279_v1 = vpop.f32.mrf.mxu0 }
 0x164   : > { %v1472_v2 = vpop.f32.mrf.mxu1 }
 0x165   : > { %1762 = vst [vmem:[%s2589_s3 + $0x150] sm:$0xff] %v1471_v0  ;;  %v1473_v3 = vadd.f32 %v1472_v2, %v1279_v1  ;;  %v1283_v4 = vpop.f32.mrf.mxu0 }
 0x166   : > { %v1476_v5 = vpop.f32.mrf.mxu1 }
 0x167   : > { %1763 = vst [vmem:[%s2589_s3 + $0x158] sm:$0xff] %v1473_v3  ;;  %v1477_v6 = vadd.f32 %v1476_v5, %v1283_v4  ;;  %v1285_v7 = vpop.f32.mrf.mxu0 }
 0x168   : > { %v1478_v8 = vpop.f32.mrf.mxu1 }
 0x169   : > { %1764 = vst [vmem:[%s2589_s3 + $0x160] sm:$0xff] %v1477_v6  ;;  %v1479_v9 = vadd.f32 %v1478_v8, %v1285_v7  ;;  %v1287_v10 = vpop.f32.mrf.mxu0 }
 0x16a   : > { %v1480_v11 = vpop.f32.mrf.mxu1 }
 0x16b   : > { %1765 = vst [vmem:[%s2589_s3 + $0x168] sm:$0xff] %v1479_v9  ;;  %v1481_v12 = vadd.f32 %v1480_v11, %v1287_v10  ;;  %v1289_v13 = vpop.f32.mrf.mxu0 }
 0x16c   : > { %v1482_v14 = vpop.f32.mrf.mxu1 }
 0x16d   : > { %1766 = vst [vmem:[%s2589_s3 + $0x170] sm:$0xff] %v1481_v12  ;;  %v1483_v15 = vadd.f32 %v1482_v14, %v1289_v13  ;;  %v1293_v16 = vpop.f32.mrf.mxu0 }
 0x16e   : > { %v1486_v17 = vpop.f32.mrf.mxu1 }
 0x16f   : > { %1767 = vst [vmem:[%s2589_s3 + $0x178] sm:$0xff] %v1483_v15  ;;  %v1487_v18 = vadd.f32 %v1486_v17, %v1293_v16  ;;  %v1295_v19 = vpop.f32.mrf.mxu0 }
 0x170   : > { %v1488_v20 = vpop.f32.mrf.mxu1 }
 0x171   : > { %1768 = vst [vmem:[%s2589_s3 + $0x180] sm:$0xff] %v1487_v18  ;;  %v1489_v21 = vadd.f32 %v1488_v20, %v1295_v19  ;;  %v1297_v22 = vpop.f32.mrf.mxu0 }
 0x172   : > { %v1490_v23 = vpop.f32.mrf.mxu1 }
 0x173   : > { %1769 = vst [vmem:[%s2589_s3 + $0x188] sm:$0xff] %v1489_v21  ;;  %v1491_v24 = vadd.f32 %v1490_v23, %v1297_v22  ;;  %v1299_v25 = vpop.f32.mrf.mxu0 }
 0x174   : > { %v1492_v26 = vpop.f32.mrf.mxu1 }
 0x175   : > { %1770 = vst [vmem:[%s2589_s3 + $0x190] sm:$0xff] %v1491_v24  ;;  %v1493_v27 = vadd.f32 %v1492_v26, %v1299_v25  ;;  %v1303_v28 = vpop.f32.mrf.mxu0 }
 0x176   : > { %v1496_v29 = vpop.f32.mrf.mxu1 }
 0x177   : > { %1771 = vst [vmem:[%s2589_s3 + $0x198] sm:$0xff] %v1493_v27  ;;  %v1497_v30 = vadd.f32 %v1496_v29, %v1303_v28  ;;  %v1305_v31 = vpop.f32.mrf.mxu0 }
 0x178   : > { %v1498_v32 = vpop.f32.mrf.mxu1 }
 0x179   : > { %1772 = vst [vmem:[%s2589_s3 + $0x1a0] sm:$0xff] %v1497_v30  ;;  %v1499_v33 = vadd.f32 %v1498_v32, %v1305_v31  ;;  %v1307_v34 = vpop.f32.mrf.mxu0 }
 0x17a   : > { %v1500_v35 = vpop.f32.mrf.mxu1 }
 0x17b   : > { %1773 = vst [vmem:[%s2589_s3 + $0x1a8] sm:$0xff] %v1499_v33  ;;  %v1501_v36 = vadd.f32 %v1500_v35, %v1307_v34  ;;  %v1309_v37 = vpop.f32.mrf.mxu0 }
 0x17c   : > { %v1502_v38 = vpop.f32.mrf.mxu1 }
 0x17d   : > { %1774 = vst [vmem:[%s2589_s3 + $0x1b0] sm:$0xff] %v1501_v36  ;;  %v1503_v39 = vadd.f32 %v1502_v38, %v1309_v37  ;;  %v1313_v40 = vpop.f32.mrf.mxu0 }
 0x17e   : > { %v1506_v41 = vpop.f32.mrf.mxu1 }
 0x17f   : > { %1775 = vst [vmem:[%s2589_s3 + $0x1b8] sm:$0xff] %v1503_v39  ;;  %v1507_v42 = vadd.f32 %v1506_v41, %v1313_v40  ;;  %v1315_v43 = vpop.f32.mrf.mxu0 }
 0x180   : > { %v1508_v44 = vpop.f32.mrf.mxu1 }
 0x181   : > { %1776 = vst [vmem:[%s2589_s3 + $0x1c0] sm:$0xff] %v1507_v42  ;;  %v1509_v45 = vadd.f32 %v1508_v44, %v1315_v43  ;;  %v1317_v46 = vpop.f32.mrf.mxu0 }
 0x182   : > { %v1510_v47 = vpop.f32.mrf.mxu1 }
 0x183   : > { %1777 = vst [vmem:[%s2589_s3 + $0x1c8] sm:$0xff] %v1509_v45  ;;  %v1511_v48 = vadd.f32 %v1510_v47, %v1317_v46  ;;  %v1319_v49 = vpop.f32.mrf.mxu0 }
 0x184   : > { %v1512_v50 = vpop.f32.mrf.mxu1 }
 0x185   : > { %1778 = vst [vmem:[%s2589_s3 + $0x1d0] sm:$0xff] %v1511_v48  ;;  %v1513_v51 = vadd.f32 %v1512_v50, %v1319_v49  ;;  %v1323_v52 = vpop.f32.mrf.mxu0 }
 0x186   : > { %v1516_v53 = vpop.f32.mrf.mxu1 }
 0x187   : > { %1779 = vst [vmem:[%s2589_s3 + $0x1d8] sm:$0xff] %v1513_v51  ;;  %v1517_v54 = vadd.f32 %v1516_v53, %v1323_v52  ;;  %v1325_v55 = vpop.f32.mrf.mxu0 }
 0x188   : > { %v1518_v56 = vpop.f32.mrf.mxu1 }
 0x189   : > { %1780 = vst [vmem:[%s2589_s3 + $0x1e0] sm:$0xff] %v1517_v54  ;;  %v1519_v57 = vadd.f32 %v1518_v56, %v1325_v55  ;;  %v1327_v58 = vpop.f32.mrf.mxu0 }
 0x18a   : > { %v1520_v59 = vpop.f32.mrf.mxu1 }
 0x18b   : > { %1781 = vst [vmem:[%s2589_s3 + $0x1e8] sm:$0xff] %v1519_v57  ;;  %v1521_v60 = vadd.f32 %v1520_v59, %v1327_v58  ;;  %v1329_v61 = vpop.f32.mrf.mxu0 }
 0x18c   : > { %v1522_v62 = vpop.f32.mrf.mxu1 }
 0x18d   : > { %1782 = vst [vmem:[%s2589_s3 + $0x1f0] sm:$0xff] %v1521_v60  ;;  %v1523_v63 = vadd.f32 %v1522_v62, %v1329_v61 }
 0x18f   : > { %1783 = vst [vmem:[%s2589_s3 + $0x1f8] sm:$0xff] %v1523_v63 }
 0x190 PF: > { %s12_s11 = sadd.s32 1, %s2280_s11   ;;  %s2667_s9 = smov %s2276_s10 }
 0x191   : > { %p9_p5 = scmp.ge.s32.totalorder %s12_s11, 5   ;;  %s2668_s10 = smov %s2670_s12 }
 0x193   :  { %11 = sbr.rel (!%p9_p5) target bundleno = 2 (0x2), region = 69 }

// kernel: tile.13
= control target key start
LH: loop header
LB: loop body
LE: loop exit
PB: predicated region body
PF: predicated region fallthrough
CT: control target
= control target key end

     0   :  { %s22_s0 = inlined_call_operand.vmem [shape: f32[64], index: 0, kind: input, shape index: {}]   ;;  %s23_s1 = inlined_call_operand.vmem [shape: f32[2,64], index: 1, kind: output, shape index: {}]  }
   0x1   :  { %v4_v0 = vld [vmem:[%s22_s0] ss:$0 sm:$0xff] }
   0x2   :  { %5 = vst [vmem:[%s23_s1] sm:$0x3] %v4_v0 }

// kernel: tile.14
= control target key start
LH: loop header
LB: loop body
LE: loop exit
PB: predicated region body
PF: predicated region fallthrough
CT: control target
= control target key end

     0   :  { %vm8_vm0 = vcmask 523264   ;;  %vm14_vm1 = vcmask 1048064   ;;  %s42_s0 = inlined_call_operand.vmem [shape: f32[2,64], index: 0, kind: input, shape index: {}]   ;;  %s43_s1 = inlined_call_operand.vmem [shape: f32[1,128], index: 1, kind: output, shape index: {}]  }
   0x1   :  { %v5_v0 = vld [vmem:[%s42_s0] sm:$0x3]  ;;  %s25_s0 = smov 64  }
   0x2   :  { %6 = vst [vmem:[#allocation1] sm:$0x3] %v5_v0 }
   0x9   :  { %v11_v1 = vld [vmem:[#allocation1 + $0x1] sm:$0x1]   ;;  %v7_v2 = vld [vmem:[#allocation1] sm:$0x1]  }
   0xa   :  { %12 = vrot.lane.b32.xlu0 %v11_v1, %s25_s0  ;;  %9 = vst.msk [vmem:[#allocation0] sm:$0x1] %vm8_vm0, %v7_v2  }
  0x7c   :  { %v13_v3 = vpop.permute.xlu0 %12  }
  0x7d   :  { %15 = vst.msk [vmem:[#allocation0] sm:$0x1] %vm14_vm1, %v13_v3  }
  0x84   :  { %v20_v4 = vld [vmem:[#allocation0] sm:$0x1] }
  0x85   :  { %23 = vst [vmem:[%s43_s1] sm:$0x1] %v20_v4 }

// kernel: _lambda_.16
= control target key start
LH: loop header
LB: loop body
LE: loop exit
PB: predicated region body
PF: predicated region fallthrough
CT: control target
= control target key end

     0   :  { %s2699_s0 = inlined_call_operand.vmem [shape: f32[1024,128], index: 0, kind: input, shape index: {}]   ;;  %s2700_s1 = inlined_call_operand.vmem [shape: f32[1,128], index: 1, kind: input, shape index: {}]   ;;  %s2701_s2 = inlined_call_operand.vmem [shape: f32[1,128], index: 2, kind: input, shape index: {}]   ;;  %s2702_s3 = inlined_call_operand.vmem [shape: bf16[1024,128], index: 3, kind: output, shape index: {}]  }
   0x1   :  { %v14_v0 = vld [vmem:[%s2699_s0] sm:$0xff]  ;;  %v15_v1 = vld [vmem:[%s2699_s0 + $0x8] sm:$0xff]  ;;  %v16_v6 = vld [vmem:[%s2699_s0 + $0x10] sm:$0xff] }
   0x2   :  { %v1856_v2 = vld [vmem:[%s2700_s1] ss:$0 sm:$0xff]  ;;  %v17_v7 = vld [vmem:[%s2699_s0 + $0x18] sm:$0xff]  ;;  %v19_v11 = vld [vmem:[%s2699_s0 + $0x28] sm:$0xff] }
   0x3   :  { %v149_v3 = vmul.f32 %v1856_v2, %v14_v0  ;;  %v150_v4 = vmul.f32 %v1856_v2, %v15_v1  ;;  %v1863_v5 = vld [vmem:[%s2701_s2] ss:$0 sm:$0xff]  ;;  %v151_v8 = vmul.f32 %v1856_v2, %v16_v6  ;;  %v152_v9 = vmul.f32 %v1856_v2, %v17_v7  ;;  %v20_v12 = vld [vmem:[%s2699_s0 + $0x30] sm:$0xff]  ;;  %v21_v17 = vld [vmem:[%s2699_s0 + $0x38] sm:$0xff] }
   0x4   :  { %v18_v10 = vld [vmem:[%s2699_s0 + $0x20] sm:$0xff]  ;;  %v154_v16 = vmul.f32 %v1856_v2, %v19_v11  ;;  %v155_v20 = vmul.f32 %v1856_v2, %v20_v12  ;;  %v156_v21 = vmul.f32 %v1856_v2, %v21_v17  ;;  %v23_v27 = vld [vmem:[%s2699_s0 + $0x48] sm:$0xff]  ;;  %v24_v32 = vld [vmem:[%s2699_s0 + $0x50] sm:$0xff] }
   0x5   :  { %v284_v13 = vadd.f32 %v1863_v5, %v149_v3  ;;  %v285_v14 = vadd.f32 %v1863_v5, %v150_v4  ;;  %v153_v15 = vmul.f32 %v1856_v2, %v18_v10  ;;  %v286_v18 = vadd.f32 %v1863_v5, %v151_v8  ;;  %v22_v22 = vld [vmem:[%s2699_s0 + $0x40] sm:$0xff]  ;;  %v25_v33 = vld [vmem:[%s2699_s0 + $0x58] sm:$0xff]  ;;  %v27_v39 = vld [vmem:[%s2699_s0 + $0x68] sm:$0xff] }
   0x6   :  { %v287_v19 = vadd.f32 %v1863_v5, %v152_v9  ;;  %v289_v26 = vadd.f32 %v1863_v5, %v154_v16  ;;  %v290_v30 = vadd.f32 %v1863_v5, %v155_v20  ;;  %v291_v31 = vadd.f32 %v1863_v5, %v156_v21  ;;  %v26_v38 = vld [vmem:[%s2699_s0 + $0x60] sm:$0xff]  ;;  %v28_v44 = vld [vmem:[%s2699_s0 + $0x70] sm:$0xff]  ;;  %v29_v49 = vld [vmem:[%s2699_s0 + $0x78] sm:$0xff] }
   0x7   :  { %v412_v23 = vmax.f32 %v284_v13, 0.0  ;;  %v413_v24 = vmax.f32 %v285_v14, 0.0  ;;  %v288_v25 = vadd.f32 %v1863_v5, %v153_v15  ;;  %v414_v28 = vmax.f32 %v286_v18, 0.0  ;;  %v30_v54 = vld [vmem:[%s2699_s0 + $0x80] sm:$0xff]  ;;  %v31_v63 = vld [vmem:[%s2699_s0 + $0x88] sm:$0xff]  ;;  %v32_v6 = vld [vmem:[%s2699_s0 + $0x90] sm:$0xff] }
   0x8   :  { %v415_v29 = vmax.f32 %v287_v19, 0.0  ;;  %v417_v36 = vmax.f32 %v289_v26, 0.0  ;;  %v157_v37 = vmul.f32 %v1856_v2, %v22_v22  ;;  %v418_v41 = vmax.f32 %v290_v30, 0.0  ;;  %v33_v7 = vld [vmem:[%s2699_s0 + $0x98] sm:$0xff]  ;;  %v34_v12 = vld [vmem:[%s2699_s0 + $0xa0] sm:$0xff]  ;;  %v35_v13 = vld [vmem:[%s2699_s0 + $0xa8] sm:$0xff] }
   0x9   :  { %v1445_v34 = vpack.c.bf16 %v413_v24, %v412_v23  ;;  %v416_v35 = vmax.f32 %v288_v25, 0.0  ;;  %v419_v42 = vmax.f32 %v291_v31, 0.0  ;;  %v158_v43 = vmul.f32 %v1856_v2, %v23_v27  ;;  %v36_v18 = vld [vmem:[%s2699_s0 + $0xb0] sm:$0xff]  ;;  %v37_v23 = vld [vmem:[%s2699_s0 + $0xb8] sm:$0xff] }
   0xa   :  { %v1450_v40 = vpack.c.bf16 %v415_v29, %v414_v28  ;;  %v292_v46 = vadd.f32 %v1863_v5, %v157_v37  ;;  %v159_v47 = vmul.f32 %v1856_v2, %v24_v32  ;;  %v160_v48 = vmul.f32 %v1856_v2, %v25_v33  ;;  %v38_v28 = vld [vmem:[%s2699_s0 + $0xc0] sm:$0xff]  ;;  %v39_v37 = vld [vmem:[%s2699_s0 + $0xc8] sm:$0xff] }
   0xb   :  { %1446 = vst [vmem:[%s2702_s3] sm:$0xff] %v1445_v34   ;;  %v1455_v45 = vpack.c.bf16 %v417_v36, %v416_v35  ;;  %v1460_v50 = vpack.c.bf16 %v419_v42, %v418_v41  ;;  %v293_v51 = vadd.f32 %v1863_v5, %v158_v43  ;;  %v161_v52 = vmul.f32 %v1856_v2, %v26_v38  ;;  %v40_v42 = vld [vmem:[%s2699_s0 + $0xd0] sm:$0xff]  ;;  %v41_v43 = vld [vmem:[%s2699_s0 + $0xd8] sm:$0xff] }
   0xc   :  { %1762 = vst [vmem:[%s2702_s3 + $0x8] sm:$0xff] %v1450_v40   ;;  %v162_v53 = vmul.f32 %v1856_v2, %v27_v39  ;;  %v420_v55 = vmax.f32 %v292_v46, 0.0  ;;  %v294_v56 = vadd.f32 %v1863_v5, %v159_v47  ;;  %v295_v57 = vadd.f32 %v1863_v5, %v160_v48  ;;  %v42_v48 = vld [vmem:[%s2699_s0 + $0xe0] sm:$0xff] }
   0xd   :  { %1763 = vst [vmem:[%s2702_s3 + $0x10] sm:$0xff] %v1455_v45   ;;  %v163_v58 = vmul.f32 %v1856_v2, %v28_v44  ;;  %1764 = vst [vmem:[%s2702_s3 + $0x18] sm:$0xff] %v1460_v50   ;;  %v421_v59 = vmax.f32 %v293_v51, 0.0  ;;  %v296_v60 = vadd.f32 %v1863_v5, %v161_v52  ;;  %v164_v62 = vmul.f32 %v1856_v2, %v29_v49  ;;  %v43_v49 = vld [vmem:[%s2699_s0 + $0xe8] sm:$0xff] }
   0xe   :  { %v297_v61 = vadd.f32 %v1863_v5, %v162_v53  ;;  %v422_v0 = vmax.f32 %v294_v56, 0.0  ;;  %v423_v1 = vmax.f32 %v295_v57, 0.0  ;;  %v165_v4 = vmul.f32 %v1856_v2, %v30_v54  ;;  %v44_v54 = vld [vmem:[%s2699_s0 + $0xf0] sm:$0xff] }
   0xf   :  { %v298_v3 = vadd.f32 %v1863_v5, %v163_v58  ;;  %v1465_v8 = vpack.c.bf16 %v421_v59, %v420_v55  ;;  %v424_v9 = vmax.f32 %v296_v60, 0.0  ;;  %v299_v11 = vadd.f32 %v1863_v5, %v164_v62  ;;  %v45_v59 = vld [vmem:[%s2699_s0 + $0xf8] sm:$0xff] }
  0x10   :  { %v425_v10 = vmax.f32 %v297_v61, 0.0  ;;  %v1470_v14 = vpack.c.bf16 %v423_v1, %v422_v0  ;;  %v166_v16 = vmul.f32 %v1856_v2, %v31_v63  ;;  %v300_v17 = vadd.f32 %v1863_v5, %v165_v4  ;;  %v46_v0 = vld [vmem:[%s2699_s0 + $0x100] sm:$0xff] }
  0x11   :  { %v426_v15 = vmax.f32 %v298_v3, 0.0  ;;  %1765 = vst [vmem:[%s2702_s3 + $0x20] sm:$0xff] %v1465_v8   ;;  %v427_v20 = vmax.f32 %v299_v11, 0.0  ;;  %v167_v21 = vmul.f32 %v1856_v2, %v32_v6  ;;  %v168_v22 = vmul.f32 %v1856_v2, %v33_v7  ;;  %v47_v11 = vld [vmem:[%s2699_s0 + $0x108] sm:$0xff] }
  0x12   :  { %v1475_v19 = vpack.c.bf16 %v425_v10, %v424_v9  ;;  %1766 = vst [vmem:[%s2702_s3 + $0x28] sm:$0xff] %v1470_v14   ;;  %v301_v24 = vadd.f32 %v1863_v5, %v166_v16  ;;  %v428_v25 = vmax.f32 %v300_v17, 0.0  ;;  %v169_v26 = vmul.f32 %v1856_v2, %v34_v12  ;;  %v48_v16 = vld [vmem:[%s2699_s0 + $0x110] sm:$0xff]  ;;  %v49_v17 = vld [vmem:[%s2699_s0 + $0x118] sm:$0xff] }
  0x13   :  { %v170_v27 = vmul.f32 %v1856_v2, %v35_v13  ;;  %v1480_v29 = vpack.c.bf16 %v427_v20, %v426_v15  ;;  %v302_v30 = vadd.f32 %v1863_v5, %v167_v21  ;;  %v303_v31 = vadd.f32 %v1863_v5, %v168_v22  ;;  %v50_v22 = vld [vmem:[%s2699_s0 + $0x120] sm:$0xff] }
  0x14   :  { %1767 = vst [vmem:[%s2702_s3 + $0x30] sm:$0xff] %v1475_v19   ;;  %v171_v32 = vmul.f32 %v1856_v2, %v36_v18  ;;  %v429_v33 = vmax.f32 %v301_v24, 0.0  ;;  %v304_v34 = vadd.f32 %v1863_v5, %v169_v26  ;;  %v172_v36 = vmul.f32 %v1856_v2, %v37_v23  ;;  %v51_v23 = vld [vmem:[%s2699_s0 + $0x128] sm:$0xff] }
  0x15   :  { %v305_v35 = vadd.f32 %v1863_v5, %v170_v27  ;;  %1768 = vst [vmem:[%s2702_s3 + $0x38] sm:$0xff] %v1480_v29   ;;  %v430_v38 = vmax.f32 %v302_v30, 0.0  ;;  %v431_v39 = vmax.f32 %v303_v31, 0.0  ;;  %v173_v41 = vmul.f32 %v1856_v2, %v38_v28  ;;  %v52_v28 = vld [vmem:[%s2699_s0 + $0x130] sm:$0xff] }
  0x16   :  { %v306_v40 = vadd.f32 %v1863_v5, %v171_v32  ;;  %v1485_v44 = vpack.c.bf16 %v429_v33, %v428_v25  ;;  %v432_v45 = vmax.f32 %v304_v34, 0.0  ;;  %v307_v47 = vadd.f32 %v1863_v5, %v172_v36  ;;  %v53_v33 = vld [vmem:[%s2699_s0 + $0x138] sm:$0xff] }
  0x17   :  { %v433_v46 = vmax.f32 %v305_v35, 0.0  ;;  %v1490_v50 = vpack.c.bf16 %v431_v39, %v430_v38  ;;  %v174_v52 = vmul.f32 %v1856_v2, %v39_v37  ;;  %v308_v53 = vadd.f32 %v1863_v5, %v173_v41  ;;  %v54_v38 = vld [vmem:[%s2699_s0 + $0x140] sm:$0xff] }
  0x18   :  { %v434_v51 = vmax.f32 %v306_v40, 0.0  ;;  %1769 = vst [vmem:[%s2702_s3 + $0x40] sm:$0xff] %v1485_v44   ;;  %v435_v56 = vmax.f32 %v307_v47, 0.0  ;;  %v175_v57 = vmul.f32 %v1856_v2, %v40_v42  ;;  %v176_v58 = vmul.f32 %v1856_v2, %v41_v43  ;;  %v55_v47 = vld [vmem:[%s2699_s0 + $0x148] sm:$0xff] }
  0x19   :  { %v1495_v55 = vpack.c.bf16 %v433_v46, %v432_v45  ;;  %1770 = vst [vmem:[%s2702_s3 + $0x48] sm:$0xff] %v1490_v50   ;;  %v309_v60 = vadd.f32 %v1863_v5, %v174_v52  ;;  %v436_v61 = vmax.f32 %v308_v53, 0.0  ;;  %v177_v62 = vmul.f32 %v1856_v2, %v42_v48  ;;  %v56_v52 = vld [vmem:[%s2699_s0 + $0x150] sm:$0xff]  ;;  %v57_v53 = vld [vmem:[%s2699_s0 + $0x158] sm:$0xff] }
  0x1a   :  { %v178_v63 = vmul.f32 %v1856_v2, %v43_v49  ;;  %v1500_v1 = vpack.c.bf16 %v435_v56, %v434_v51  ;;  %v310_v3 = vadd.f32 %v1863_v5, %v175_v57  ;;  %v311_v4 = vadd.f32 %v1863_v5, %v176_v58  ;;  %v58_v58 = vld [vmem:[%s2699_s0 + $0x160] sm:$0xff] }
  0x1b   :  { %1771 = vst [vmem:[%s2702_s3 + $0x50] sm:$0xff] %v1495_v55   ;;  %v179_v6 = vmul.f32 %v1856_v2, %v44_v54  ;;  %v437_v7 = vmax.f32 %v309_v60, 0.0  ;;  %v312_v8 = vadd.f32 %v1863_v5, %v177_v62  ;;  %v180_v10 = vmul.f32 %v1856_v2, %v45_v59  ;;  %v59_v59 = vld [vmem:[%s2699_s0 + $0x168] sm:$0xff] }
  0x1c   :  { %v313_v9 = vadd.f32 %v1863_v5, %v178_v63  ;;  %1772 = vst [vmem:[%s2702_s3 + $0x58] sm:$0xff] %v1500_v1   ;;  %v438_v12 = vmax.f32 %v310_v3, 0.0  ;;  %v439_v13 = vmax.f32 %v311_v4, 0.0  ;;  %v181_v15 = vmul.f32 %v1856_v2, %v46_v0  ;;  %v60_v0 = vld [vmem:[%s2699_s0 + $0x170] sm:$0xff] }
  0x1d   :  { %v314_v14 = vadd.f32 %v1863_v5, %v179_v6  ;;  %v1505_v18 = vpack.c.bf16 %v437_v7, %v436_v61  ;;  %v440_v19 = vmax.f32 %v312_v8, 0.0  ;;  %v315_v21 = vadd.f32 %v1863_v5, %v180_v10  ;;  %v61_v7 = vld [vmem:[%s2699_s0 + $0x178] sm:$0xff] }
  0x1e   :  { %v441_v20 = vmax.f32 %v313_v9, 0.0  ;;  %v1510_v24 = vpack.c.bf16 %v439_v13, %v438_v12  ;;  %v182_v26 = vmul.f32 %v1856_v2, %v47_v11  ;;  %v316_v27 = vadd.f32 %v1863_v5, %v181_v15  ;;  %v62_v12 = vld [vmem:[%s2699_s0 + $0x180] sm:$0xff] }
  0x1f   :  { %v442_v25 = vmax.f32 %v314_v14, 0.0  ;;  %1773 = vst [vmem:[%s2702_s3 + $0x60] sm:$0xff] %v1505_v18   ;;  %v443_v30 = vmax.f32 %v315_v21, 0.0  ;;  %v183_v31 = vmul.f32 %v1856_v2, %v48_v16  ;;  %v184_v32 = vmul.f32 %v1856_v2, %v49_v17  ;;  %v63_v21 = vld [vmem:[%s2699_s0 + $0x188] sm:$0xff] }
  0x20   :  { %v1515_v29 = vpack.c.bf16 %v441_v20, %v440_v19  ;;  %1774 = vst [vmem:[%s2702_s3 + $0x68] sm:$0xff] %v1510_v24   ;;  %v317_v34 = vadd.f32 %v1863_v5, %v182_v26  ;;  %v444_v35 = vmax.f32 %v316_v27, 0.0  ;;  %v185_v36 = vmul.f32 %v1856_v2, %v50_v22  ;;  %v64_v26 = vld [vmem:[%s2699_s0 + $0x190] sm:$0xff]  ;;  %v65_v27 = vld [vmem:[%s2699_s0 + $0x198] sm:$0xff] }
  0x21   :  { %v186_v37 = vmul.f32 %v1856_v2, %v51_v23  ;;  %v1520_v39 = vpack.c.bf16 %v443_v30, %v442_v25  ;;  %v318_v40 = vadd.f32 %v1863_v5, %v183_v31  ;;  %v319_v41 = vadd.f32 %v1863_v5, %v184_v32  ;;  %v66_v32 = vld [vmem:[%s2699_s0 + $0x1a0] sm:$0xff] }
  0x22   :  { %1775 = vst [vmem:[%s2702_s3 + $0x70] sm:$0xff] %v1515_v29   ;;  %v187_v42 = vmul.f32 %v1856_v2, %v52_v28  ;;  %v445_v43 = vmax.f32 %v317_v34, 0.0  ;;  %v320_v44 = vadd.f32 %v1863_v5, %v185_v36  ;;  %v188_v46 = vmul.f32 %v1856_v2, %v53_v33  ;;  %v67_v33 = vld [vmem:[%s2699_s0 + $0x1a8] sm:$0xff] }
  0x23   :  { %v321_v45 = vadd.f32 %v1863_v5, %v186_v37  ;;  %1776 = vst [vmem:[%s2702_s3 + $0x78] sm:$0xff] %v1520_v39   ;;  %v446_v48 = vmax.f32 %v318_v40, 0.0  ;;  %v447_v49 = vmax.f32 %v319_v41, 0.0  ;;  %v189_v51 = vmul.f32 %v1856_v2, %v54_v38  ;;  %v68_v38 = vld [vmem:[%s2699_s0 + $0x1b0] sm:$0xff] }
  0x24   :  { %v322_v50 = vadd.f32 %v1863_v5, %v187_v42  ;;  %v1525_v54 = vpack.c.bf16 %v445_v43, %v444_v35  ;;  %v448_v55 = vmax.f32 %v320_v44, 0.0  ;;  %v323_v57 = vadd.f32 %v1863_v5, %v188_v46  ;;  %v69_v43 = vld [vmem:[%s2699_s0 + $0x1b8] sm:$0xff] }
  0x25   :  { %v449_v56 = vmax.f32 %v321_v45, 0.0  ;;  %v1530_v60 = vpack.c.bf16 %v447_v49, %v446_v48  ;;  %v190_v62 = vmul.f32 %v1856_v2, %v55_v47  ;;  %v324_v63 = vadd.f32 %v1863_v5, %v189_v51  ;;  %v70_v48 = vld [vmem:[%s2699_s0 + $0x1c0] sm:$0xff] }
  0x26   :  { %v450_v61 = vmax.f32 %v322_v50, 0.0  ;;  %1777 = vst [vmem:[%s2702_s3 + $0x80] sm:$0xff] %v1525_v54   ;;  %v451_v3 = vmax.f32 %v323_v57, 0.0  ;;  %v191_v4 = vmul.f32 %v1856_v2, %v56_v52  ;;  %v192_v6 = vmul.f32 %v1856_v2, %v57_v53  ;;  %v71_v57 = vld [vmem:[%s2699_s0 + $0x1c8] sm:$0xff] }
  0x27   :  { %v1535_v1 = vpack.c.bf16 %v449_v56, %v448_v55  ;;  %1778 = vst [vmem:[%s2702_s3 + $0x88] sm:$0xff] %v1530_v60   ;;  %v325_v8 = vadd.f32 %v1863_v5, %v190_v62  ;;  %v452_v9 = vmax.f32 %v324_v63, 0.0  ;;  %v193_v10 = vmul.f32 %v1856_v2, %v58_v58  ;;  %v72_v62 = vld [vmem:[%s2699_s0 + $0x1d0] sm:$0xff]  ;;  %v73_v63 = vld [vmem:[%s2699_s0 + $0x1d8] sm:$0xff] }
  0x28   :  { %v194_v11 = vmul.f32 %v1856_v2, %v59_v59  ;;  %v1540_v13 = vpack.c.bf16 %v451_v3, %v450_v61  ;;  %v326_v14 = vadd.f32 %v1863_v5, %v191_v4  ;;  %v327_v15 = vadd.f32 %v1863_v5, %v192_v6  ;;  %v74_v6 = vld [vmem:[%s2699_s0 + $0x1e0] sm:$0xff] }
  0x29   :  { %1779 = vst [vmem:[%s2702_s3 + $0x90] sm:$0xff] %v1535_v1   ;;  %v195_v16 = vmul.f32 %v1856_v2, %v60_v0  ;;  %v453_v17 = vmax.f32 %v325_v8, 0.0  ;;  %v328_v18 = vadd.f32 %v1863_v5, %v193_v10  ;;  %v196_v20 = vmul.f32 %v1856_v2, %v61_v7  ;;  %v75_v7 = vld [vmem:[%s2699_s0 + $0x1e8] sm:$0xff] }
  0x2a   :  { %v329_v19 = vadd.f32 %v1863_v5, %v194_v11  ;;  %1780 = vst [vmem:[%s2702_s3 + $0x98] sm:$0xff] %v1540_v13   ;;  %v454_v22 = vmax.f32 %v326_v14, 0.0  ;;  %v455_v23 = vmax.f32 %v327_v15, 0.0  ;;  %v197_v25 = vmul.f32 %v1856_v2, %v62_v12  ;;  %v76_v12 = vld [vmem:[%s2699_s0 + $0x1f0] sm:$0xff] }
  0x2b   :  { %v330_v24 = vadd.f32 %v1863_v5, %v195_v16  ;;  %v1545_v28 = vpack.c.bf16 %v453_v17, %v452_v9  ;;  %v456_v29 = vmax.f32 %v328_v18, 0.0  ;;  %v331_v31 = vadd.f32 %v1863_v5, %v196_v20  ;;  %v77_v17 = vld [vmem:[%s2699_s0 + $0x1f8] sm:$0xff] }
  0x2c   :  { %v457_v30 = vmax.f32 %v329_v19, 0.0  ;;  %v1550_v34 = vpack.c.bf16 %v455_v23, %v454_v22  ;;  %v198_v36 = vmul.f32 %v1856_v2, %v63_v21  ;;  %v332_v37 = vadd.f32 %v1863_v5, %v197_v25  ;;  %v78_v22 = vld [vmem:[%s2699_s0 + $0x200] sm:$0xff] }
  0x2d   :  { %v458_v35 = vmax.f32 %v330_v24, 0.0  ;;  %1781 = vst [vmem:[%s2702_s3 + $0xa0] sm:$0xff] %v1545_v28   ;;  %v459_v40 = vmax.f32 %v331_v31, 0.0  ;;  %v199_v41 = vmul.f32 %v1856_v2, %v64_v26  ;;  %v200_v42 = vmul.f32 %v1856_v2, %v65_v27  ;;  %v79_v31 = vld [vmem:[%s2699_s0 + $0x208] sm:$0xff] }
  0x2e   :  { %v1555_v39 = vpack.c.bf16 %v457_v30, %v456_v29  ;;  %1782 = vst [vmem:[%s2702_s3 + $0xa8] sm:$0xff] %v1550_v34   ;;  %v333_v44 = vadd.f32 %v1863_v5, %v198_v36  ;;  %v460_v45 = vmax.f32 %v332_v37, 0.0  ;;  %v201_v46 = vmul.f32 %v1856_v2, %v66_v32  ;;  %v80_v36 = vld [vmem:[%s2699_s0 + $0x210] sm:$0xff]  ;;  %v81_v37 = vld [vmem:[%s2699_s0 + $0x218] sm:$0xff] }
  0x2f   :  { %v202_v47 = vmul.f32 %v1856_v2, %v67_v33  ;;  %v1560_v49 = vpack.c.bf16 %v459_v40, %v458_v35  ;;  %v334_v50 = vadd.f32 %v1863_v5, %v199_v41  ;;  %v335_v51 = vadd.f32 %v1863_v5, %v200_v42  ;;  %v82_v42 = vld [vmem:[%s2699_s0 + $0x220] sm:$0xff] }
  0x30   :  { %1783 = vst [vmem:[%s2702_s3 + $0xb0] sm:$0xff] %v1555_v39   ;;  %v203_v52 = vmul.f32 %v1856_v2, %v68_v38  ;;  %v461_v53 = vmax.f32 %v333_v44, 0.0  ;;  %v336_v54 = vadd.f32 %v1863_v5, %v201_v46  ;;  %v204_v56 = vmul.f32 %v1856_v2, %v69_v43  ;;  %v83_v43 = vld [vmem:[%s2699_s0 + $0x228] sm:$0xff] }
  0x31   :  { %v337_v55 = vadd.f32 %v1863_v5, %v202_v47  ;;  %1784 = vst [vmem:[%s2702_s3 + $0xb8] sm:$0xff] %v1560_v49   ;;  %v462_v58 = vmax.f32 %v334_v50, 0.0  ;;  %v463_v59 = vmax.f32 %v335_v51, 0.0  ;;  %v205_v61 = vmul.f32 %v1856_v2, %v70_v48  ;;  %v84_v48 = vld [vmem:[%s2699_s0 + $0x230] sm:$0xff] }
  0x32   :  { %v338_v60 = vadd.f32 %v1863_v5, %v203_v52  ;;  %v1565_v0 = vpack.c.bf16 %v461_v53, %v460_v45  ;;  %v464_v1 = vmax.f32 %v336_v54, 0.0  ;;  %v339_v4 = vadd.f32 %v1863_v5, %v204_v56  ;;  %v85_v53 = vld [vmem:[%s2699_s0 + $0x238] sm:$0xff] }
  0x33   :  { %v465_v3 = vmax.f32 %v337_v55, 0.0  ;;  %v1570_v8 = vpack.c.bf16 %v463_v59, %v462_v58  ;;  %v206_v10 = vmul.f32 %v1856_v2, %v71_v57  ;;  %v340_v11 = vadd.f32 %v1863_v5, %v205_v61  ;;  %v86_v58 = vld [vmem:[%s2699_s0 + $0x240] sm:$0xff] }
  0x34   :  { %v466_v9 = vmax.f32 %v338_v60, 0.0  ;;  %1785 = vst [vmem:[%s2702_s3 + $0xc0] sm:$0xff] %v1565_v0   ;;  %v467_v14 = vmax.f32 %v339_v4, 0.0  ;;  %v207_v15 = vmul.f32 %v1856_v2, %v72_v62  ;;  %v208_v16 = vmul.f32 %v1856_v2, %v73_v63  ;;  %v87_v4 = vld [vmem:[%s2699_s0 + $0x248] sm:$0xff] }
  0x35   :  { %v1575_v13 = vpack.c.bf16 %v465_v3, %v464_v1  ;;  %1786 = vst [vmem:[%s2702_s3 + $0xc8] sm:$0xff] %v1570_v8   ;;  %v341_v18 = vadd.f32 %v1863_v5, %v206_v10  ;;  %v468_v19 = vmax.f32 %v340_v11, 0.0  ;;  %v209_v20 = vmul.f32 %v1856_v2, %v74_v6  ;;  %v88_v10 = vld [vmem:[%s2699_s0 + $0x250] sm:$0xff]  ;;  %v89_v11 = vld [vmem:[%s2699_s0 + $0x258] sm:$0xff] }
  0x36   :  { %v210_v21 = vmul.f32 %v1856_v2, %v75_v7  ;;  %v1580_v23 = vpack.c.bf16 %v467_v14, %v466_v9  ;;  %v342_v24 = vadd.f32 %v1863_v5, %v207_v15  ;;  %v343_v25 = vadd.f32 %v1863_v5, %v208_v16  ;;  %v90_v16 = vld [vmem:[%s2699_s0 + $0x260] sm:$0xff] }
  0x37   :  { %1787 = vst [vmem:[%s2702_s3 + $0xd0] sm:$0xff] %v1575_v13   ;;  %v211_v26 = vmul.f32 %v1856_v2, %v76_v12  ;;  %v469_v27 = vmax.f32 %v341_v18, 0.0  ;;  %v344_v28 = vadd.f32 %v1863_v5, %v209_v20  ;;  %v212_v30 = vmul.f32 %v1856_v2, %v77_v17  ;;  %v91_v17 = vld [vmem:[%s2699_s0 + $0x268] sm:$0xff] }
  0x38   :  { %v345_v29 = vadd.f32 %v1863_v5, %v210_v21  ;;  %1788 = vst [vmem:[%s2702_s3 + $0xd8] sm:$0xff] %v1580_v23   ;;  %v470_v32 = vmax.f32 %v342_v24, 0.0  ;;  %v471_v33 = vmax.f32 %v343_v25, 0.0  ;;  %v213_v35 = vmul.f32 %v1856_v2, %v78_v22  ;;  %v92_v22 = vld [vmem:[%s2699_s0 + $0x270] sm:$0xff] }
  0x39   :  { %v346_v34 = vadd.f32 %v1863_v5, %v211_v26  ;;  %v1585_v38 = vpack.c.bf16 %v469_v27, %v468_v19  ;;  %v472_v39 = vmax.f32 %v344_v28, 0.0  ;;  %v347_v41 = vadd.f32 %v1863_v5, %v212_v30  ;;  %v93_v27 = vld [vmem:[%s2699_s0 + $0x278] sm:$0xff] }
  0x3a   :  { %v473_v40 = vmax.f32 %v345_v29, 0.0  ;;  %v1590_v44 = vpack.c.bf16 %v471_v33, %v470_v32  ;;  %v214_v46 = vmul.f32 %v1856_v2, %v79_v31  ;;  %v348_v47 = vadd.f32 %v1863_v5, %v213_v35  ;;  %v94_v32 = vld [vmem:[%s2699_s0 + $0x280] sm:$0xff] }
  0x3b   :  { %v474_v45 = vmax.f32 %v346_v34, 0.0  ;;  %1789 = vst [vmem:[%s2702_s3 + $0xe0] sm:$0xff] %v1585_v38   ;;  %v475_v50 = vmax.f32 %v347_v41, 0.0  ;;  %v215_v51 = vmul.f32 %v1856_v2, %v80_v36  ;;  %v216_v52 = vmul.f32 %v1856_v2, %v81_v37  ;;  %v95_v41 = vld [vmem:[%s2699_s0 + $0x288] sm:$0xff] }
  0x3c   :  { %v1595_v49 = vpack.c.bf16 %v473_v40, %v472_v39  ;;  %1790 = vst [vmem:[%s2702_s3 + $0xe8] sm:$0xff] %v1590_v44   ;;  %v349_v54 = vadd.f32 %v1863_v5, %v214_v46  ;;  %v476_v55 = vmax.f32 %v348_v47, 0.0  ;;  %v217_v56 = vmul.f32 %v1856_v2, %v82_v42  ;;  %v96_v46 = vld [vmem:[%s2699_s0 + $0x290] sm:$0xff]  ;;  %v97_v47 = vld [vmem:[%s2699_s0 + $0x298] sm:$0xff] }
  0x3d   :  { %v218_v57 = vmul.f32 %v1856_v2, %v83_v43  ;;  %v1600_v59 = vpack.c.bf16 %v475_v50, %v474_v45  ;;  %v350_v60 = vadd.f32 %v1863_v5, %v215_v51  ;;  %v351_v61 = vadd.f32 %v1863_v5, %v216_v52  ;;  %v98_v52 = vld [vmem:[%s2699_s0 + $0x2a0] sm:$0xff] }
  0x3e   :  { %1791 = vst [vmem:[%s2702_s3 + $0xf0] sm:$0xff] %v1595_v49   ;;  %v219_v62 = vmul.f32 %v1856_v2, %v84_v48  ;;  %v477_v63 = vmax.f32 %v349_v54, 0.0  ;;  %v352_v0 = vadd.f32 %v1863_v5, %v217_v56  ;;  %v220_v3 = vmul.f32 %v1856_v2, %v85_v53  ;;  %v99_v53 = vld [vmem:[%s2699_s0 + $0x2a8] sm:$0xff] }
  0x3f   :  { %v353_v1 = vadd.f32 %v1863_v5, %v218_v57  ;;  %1792 = vst [vmem:[%s2702_s3 + $0xf8] sm:$0xff] %v1600_v59   ;;  %v478_v6 = vmax.f32 %v350_v60, 0.0  ;;  %v479_v7 = vmax.f32 %v351_v61, 0.0  ;;  %v221_v9 = vmul.f32 %v1856_v2, %v86_v58  ;;  %v100_v58 = vld [vmem:[%s2699_s0 + $0x2b0] sm:$0xff] }
  0x40   :  { %v354_v8 = vadd.f32 %v1863_v5, %v219_v62  ;;  %v1605_v12 = vpack.c.bf16 %v477_v63, %v476_v55  ;;  %v480_v13 = vmax.f32 %v352_v0, 0.0  ;;  %v355_v15 = vadd.f32 %v1863_v5, %v220_v3  ;;  %v101_v63 = vld [vmem:[%s2699_s0 + $0x2b8] sm:$0xff] }
  0x41   :  { %v481_v14 = vmax.f32 %v353_v1, 0.0  ;;  %v1610_v18 = vpack.c.bf16 %v479_v7, %v478_v6  ;;  %v222_v20 = vmul.f32 %v1856_v2, %v87_v4  ;;  %v356_v21 = vadd.f32 %v1863_v5, %v221_v9  ;;  %v102_v6 = vld [vmem:[%s2699_s0 + $0x2c0] sm:$0xff] }
  0x42   :  { %v482_v19 = vmax.f32 %v354_v8, 0.0  ;;  %1793 = vst [vmem:[%s2702_s3 + $0x100] sm:$0xff] %v1605_v12   ;;  %v483_v24 = vmax.f32 %v355_v15, 0.0  ;;  %v223_v25 = vmul.f32 %v1856_v2, %v88_v10  ;;  %v224_v26 = vmul.f32 %v1856_v2, %v89_v11  ;;  %v103_v15 = vld [vmem:[%s2699_s0 + $0x2c8] sm:$0xff] }
  0x43   :  { %v1615_v23 = vpack.c.bf16 %v481_v14, %v480_v13  ;;  %1794 = vst [vmem:[%s2702_s3 + $0x108] sm:$0xff] %v1610_v18   ;;  %v357_v28 = vadd.f32 %v1863_v5, %v222_v20  ;;  %v484_v29 = vmax.f32 %v356_v21, 0.0  ;;  %v225_v30 = vmul.f32 %v1856_v2, %v90_v16  ;;  %v104_v20 = vld [vmem:[%s2699_s0 + $0x2d0] sm:$0xff]  ;;  %v105_v21 = vld [vmem:[%s2699_s0 + $0x2d8] sm:$0xff] }
  0x44   :  { %v226_v31 = vmul.f32 %v1856_v2, %v91_v17  ;;  %v1620_v33 = vpack.c.bf16 %v483_v24, %v482_v19  ;;  %v358_v34 = vadd.f32 %v1863_v5, %v223_v25  ;;  %v359_v35 = vadd.f32 %v1863_v5, %v224_v26  ;;  %v106_v26 = vld [vmem:[%s2699_s0 + $0x2e0] sm:$0xff] }
  0x45   :  { %1795 = vst [vmem:[%s2702_s3 + $0x110] sm:$0xff] %v1615_v23   ;;  %v227_v36 = vmul.f32 %v1856_v2, %v92_v22  ;;  %v485_v37 = vmax.f32 %v357_v28, 0.0  ;;  %v360_v38 = vadd.f32 %v1863_v5, %v225_v30  ;;  %v228_v40 = vmul.f32 %v1856_v2, %v93_v27  ;;  %v107_v27 = vld [vmem:[%s2699_s0 + $0x2e8] sm:$0xff] }
  0x46   :  { %v361_v39 = vadd.f32 %v1863_v5, %v226_v31  ;;  %1796 = vst [vmem:[%s2702_s3 + $0x118] sm:$0xff] %v1620_v33   ;;  %v486_v42 = vmax.f32 %v358_v34, 0.0  ;;  %v487_v43 = vmax.f32 %v359_v35, 0.0  ;;  %v229_v45 = vmul.f32 %v1856_v2, %v94_v32  ;;  %v108_v32 = vld [vmem:[%s2699_s0 + $0x2f0] sm:$0xff] }
  0x47   :  { %v362_v44 = vadd.f32 %v1863_v5, %v227_v36  ;;  %v1625_v48 = vpack.c.bf16 %v485_v37, %v484_v29  ;;  %v488_v49 = vmax.f32 %v360_v38, 0.0  ;;  %v363_v51 = vadd.f32 %v1863_v5, %v228_v40  ;;  %v109_v37 = vld [vmem:[%s2699_s0 + $0x2f8] sm:$0xff] }
  0x48   :  { %v489_v50 = vmax.f32 %v361_v39, 0.0  ;;  %v1630_v54 = vpack.c.bf16 %v487_v43, %v486_v42  ;;  %v230_v56 = vmul.f32 %v1856_v2, %v95_v41  ;;  %v364_v57 = vadd.f32 %v1863_v5, %v229_v45  ;;  %v110_v42 = vld [vmem:[%s2699_s0 + $0x300] sm:$0xff] }
  0x49   :  { %v490_v55 = vmax.f32 %v362_v44, 0.0  ;;  %1797 = vst [vmem:[%s2702_s3 + $0x120] sm:$0xff] %v1625_v48   ;;  %v491_v60 = vmax.f32 %v363_v51, 0.0  ;;  %v231_v61 = vmul.f32 %v1856_v2, %v96_v46  ;;  %v232_v62 = vmul.f32 %v1856_v2, %v97_v47  ;;  %v111_v51 = vld [vmem:[%s2699_s0 + $0x308] sm:$0xff] }
  0x4a   :  { %v1635_v59 = vpack.c.bf16 %v489_v50, %v488_v49  ;;  %1798 = vst [vmem:[%s2702_s3 + $0x128] sm:$0xff] %v1630_v54   ;;  %v365_v0 = vadd.f32 %v1863_v5, %v230_v56  ;;  %v492_v1 = vmax.f32 %v364_v57, 0.0  ;;  %v233_v3 = vmul.f32 %v1856_v2, %v98_v52  ;;  %v112_v56 = vld [vmem:[%s2699_s0 + $0x310] sm:$0xff]  ;;  %v113_v57 = vld [vmem:[%s2699_s0 + $0x318] sm:$0xff] }
  0x4b   :  { %v234_v4 = vmul.f32 %v1856_v2, %v99_v53  ;;  %v1640_v7 = vpack.c.bf16 %v491_v60, %v490_v55  ;;  %v366_v8 = vadd.f32 %v1863_v5, %v231_v61  ;;  %v367_v9 = vadd.f32 %v1863_v5, %v232_v62  ;;  %v114_v62 = vld [vmem:[%s2699_s0 + $0x320] sm:$0xff] }
  0x4c   :  { %1799 = vst [vmem:[%s2702_s3 + $0x130] sm:$0xff] %v1635_v59   ;;  %v235_v10 = vmul.f32 %v1856_v2, %v100_v58  ;;  %v493_v11 = vmax.f32 %v365_v0, 0.0  ;;  %v368_v12 = vadd.f32 %v1863_v5, %v233_v3  ;;  %v236_v14 = vmul.f32 %v1856_v2, %v101_v63  ;;  %v115_v63 = vld [vmem:[%s2699_s0 + $0x328] sm:$0xff] }
  0x4d   :  { %v369_v13 = vadd.f32 %v1863_v5, %v234_v4  ;;  %1800 = vst [vmem:[%s2702_s3 + $0x138] sm:$0xff] %v1640_v7   ;;  %v494_v16 = vmax.f32 %v366_v8, 0.0  ;;  %v495_v17 = vmax.f32 %v367_v9, 0.0  ;;  %v237_v19 = vmul.f32 %v1856_v2, %v102_v6  ;;  %v116_v6 = vld [vmem:[%s2699_s0 + $0x330] sm:$0xff] }
  0x4e   :  { %v370_v18 = vadd.f32 %v1863_v5, %v235_v10  ;;  %v1645_v22 = vpack.c.bf16 %v493_v11, %v492_v1  ;;  %v496_v23 = vmax.f32 %v368_v12, 0.0  ;;  %v371_v25 = vadd.f32 %v1863_v5, %v236_v14  ;;  %v117_v11 = vld [vmem:[%s2699_s0 + $0x338] sm:$0xff] }
  0x4f   :  { %v497_v24 = vmax.f32 %v369_v13, 0.0  ;;  %v1650_v28 = vpack.c.bf16 %v495_v17, %v494_v16  ;;  %v238_v30 = vmul.f32 %v1856_v2, %v103_v15  ;;  %v372_v31 = vadd.f32 %v1863_v5, %v237_v19  ;;  %v118_v16 = vld [vmem:[%s2699_s0 + $0x340] sm:$0xff] }
  0x50   :  { %v498_v29 = vmax.f32 %v370_v18, 0.0  ;;  %1801 = vst [vmem:[%s2702_s3 + $0x140] sm:$0xff] %v1645_v22   ;;  %v499_v34 = vmax.f32 %v371_v25, 0.0  ;;  %v239_v35 = vmul.f32 %v1856_v2, %v104_v20  ;;  %v240_v36 = vmul.f32 %v1856_v2, %v105_v21  ;;  %v119_v25 = vld [vmem:[%s2699_s0 + $0x348] sm:$0xff] }
  0x51   :  { %v1655_v33 = vpack.c.bf16 %v497_v24, %v496_v23  ;;  %1802 = vst [vmem:[%s2702_s3 + $0x148] sm:$0xff] %v1650_v28   ;;  %v373_v38 = vadd.f32 %v1863_v5, %v238_v30  ;;  %v500_v39 = vmax.f32 %v372_v31, 0.0  ;;  %v241_v40 = vmul.f32 %v1856_v2, %v106_v26  ;;  %v120_v30 = vld [vmem:[%s2699_s0 + $0x350] sm:$0xff]  ;;  %v121_v31 = vld [vmem:[%s2699_s0 + $0x358] sm:$0xff] }
  0x52   :  { %v242_v41 = vmul.f32 %v1856_v2, %v107_v27  ;;  %v1660_v43 = vpack.c.bf16 %v499_v34, %v498_v29  ;;  %v374_v44 = vadd.f32 %v1863_v5, %v239_v35  ;;  %v375_v45 = vadd.f32 %v1863_v5, %v240_v36  ;;  %v2536_v35 = vld [vmem:[%s2701_s2] ss:$0 sm:$0xff]  ;;  %v123_v36 = vld [vmem:[%s2699_s0 + $0x368] sm:$0xff] }
  0x53   :  { %1803 = vst [vmem:[%s2702_s3 + $0x150] sm:$0xff] %v1655_v33   ;;  %v243_v46 = vmul.f32 %v1856_v2, %v108_v32  ;;  %v501_v47 = vmax.f32 %v373_v38, 0.0  ;;  %v376_v48 = vadd.f32 %v1863_v5, %v241_v40  ;;  %v244_v50 = vmul.f32 %v1856_v2, %v109_v37 }
  0x54   :  { %v377_v49 = vadd.f32 %v1863_v5, %v242_v41  ;;  %1804 = vst [vmem:[%s2702_s3 + $0x158] sm:$0xff] %v1660_v43   ;;  %v502_v52 = vmax.f32 %v374_v44, 0.0  ;;  %v503_v53 = vmax.f32 %v375_v45, 0.0  ;;  %v245_v55 = vmul.f32 %v1856_v2, %v110_v42  ;;  %v124_v42 = vld [vmem:[%s2699_s0 + $0x370] sm:$0xff] }
  0x55   :  { %v378_v54 = vadd.f32 %v1863_v5, %v243_v46  ;;  %v1665_v58 = vpack.c.bf16 %v501_v47, %v500_v39  ;;  %v504_v59 = vmax.f32 %v376_v48, 0.0  ;;  %v379_v61 = vadd.f32 %v1863_v5, %v244_v50  ;;  %v2548_v39 = vld [vmem:[%s2700_s1] ss:$0 sm:$0xff]  ;;  %v125_v47 = vld [vmem:[%s2699_s0 + $0x378] sm:$0xff] }
  0x56   :  { %v505_v60 = vmax.f32 %v377_v49, 0.0  ;;  %v1670_v0 = vpack.c.bf16 %v503_v53, %v502_v52  ;;  %v246_v3 = vmul.f32 %v1856_v2, %v111_v51  ;;  %v380_v4 = vadd.f32 %v1863_v5, %v245_v55  ;;  %v126_v52 = vld [vmem:[%s2699_s0 + $0x380] sm:$0xff] }
  0x57   :  { %v506_v1 = vmax.f32 %v378_v54, 0.0  ;;  %1805 = vst [vmem:[%s2702_s3 + $0x160] sm:$0xff] %v1665_v58   ;;  %v507_v8 = vmax.f32 %v379_v61, 0.0  ;;  %v247_v9 = vmul.f32 %v1856_v2, %v112_v56  ;;  %v248_v10 = vmul.f32 %v1856_v2, %v113_v57  ;;  %v127_v61 = vld [vmem:[%s2699_s0 + $0x388] sm:$0xff] }
  0x58   :  { %v1675_v7 = vpack.c.bf16 %v505_v60, %v504_v59  ;;  %1806 = vst [vmem:[%s2702_s3 + $0x168] sm:$0xff] %v1670_v0   ;;  %v381_v12 = vadd.f32 %v1863_v5, %v246_v3  ;;  %v508_v13 = vmax.f32 %v380_v4, 0.0  ;;  %v249_v14 = vmul.f32 %v1856_v2, %v114_v62  ;;  %v128_v3 = vld [vmem:[%s2699_s0 + $0x390] sm:$0xff]  ;;  %v129_v4 = vld [vmem:[%s2699_s0 + $0x398] sm:$0xff] }
  0x59   :  { %v250_v15 = vmul.f32 %v1856_v2, %v115_v63  ;;  %v1680_v17 = vpack.c.bf16 %v507_v8, %v506_v1  ;;  %v382_v18 = vadd.f32 %v1863_v5, %v247_v9  ;;  %v383_v19 = vadd.f32 %v1863_v5, %v248_v10  ;;  %v130_v10 = vld [vmem:[%s2699_s0 + $0x3a0] sm:$0xff] }
  0x5a   :  { %1807 = vst [vmem:[%s2702_s3 + $0x170] sm:$0xff] %v1675_v7   ;;  %v251_v20 = vmul.f32 %v1856_v2, %v116_v6  ;;  %v509_v21 = vmax.f32 %v381_v12, 0.0  ;;  %v384_v22 = vadd.f32 %v1863_v5, %v249_v14  ;;  %v252_v24 = vmul.f32 %v1856_v2, %v117_v11  ;;  %v131_v11 = vld [vmem:[%s2699_s0 + $0x3a8] sm:$0xff] }
  0x5b   :  { %v385_v23 = vadd.f32 %v1863_v5, %v250_v15  ;;  %1808 = vst [vmem:[%s2702_s3 + $0x178] sm:$0xff] %v1680_v17   ;;  %v510_v26 = vmax.f32 %v382_v18, 0.0  ;;  %v511_v27 = vmax.f32 %v383_v19, 0.0  ;;  %v253_v29 = vmul.f32 %v1856_v2, %v118_v16  ;;  %v122_v2 = vld [vmem:[%s2699_s0 + $0x360] sm:$0xff]  ;;  %v132_v16 = vld [vmem:[%s2699_s0 + $0x3b0] sm:$0xff] }
  0x5c   :  { %v386_v28 = vadd.f32 %v1863_v5, %v251_v20  ;;  %v1685_v32 = vpack.c.bf16 %v509_v21, %v508_v13  ;;  %v512_v33 = vmax.f32 %v384_v22, 0.0  ;;  %v387_v5 = vadd.f32 %v2536_v35, %v252_v24  ;;  %v133_v21 = vld [vmem:[%s2699_s0 + $0x3b8] sm:$0xff] }
  0x5d   :  { %v513_v34 = vmax.f32 %v385_v23, 0.0  ;;  %v1690_v37 = vpack.c.bf16 %v511_v27, %v510_v26  ;;  %v254_v40 = vmul.f32 %v2548_v39, %v119_v25  ;;  %v388_v41 = vadd.f32 %v2536_v35, %v253_v29  ;;  %v134_v26 = vld [vmem:[%s2699_s0 + $0x3c0] sm:$0xff] }
  0x5e   :  { %v514_v38 = vmax.f32 %v386_v28, 0.0  ;;  %1809 = vst [vmem:[%s2702_s3 + $0x180] sm:$0xff] %v1685_v32   ;;  %v515_v44 = vmax.f32 %v387_v5, 0.0  ;;  %v255_v45 = vmul.f32 %v2548_v39, %v120_v30  ;;  %v256_v46 = vmul.f32 %v2548_v39, %v121_v31  ;;  %v135_v5 = vld [vmem:[%s2699_s0 + $0x3c8] sm:$0xff] }
  0x5f   :  { %v1695_v43 = vpack.c.bf16 %v513_v34, %v512_v33  ;;  %1810 = vst [vmem:[%s2702_s3 + $0x188] sm:$0xff] %v1690_v37   ;;  %v389_v48 = vadd.f32 %v2536_v35, %v254_v40  ;;  %v516_v49 = vmax.f32 %v388_v41, 0.0  ;;  %v257_v50 = vmul.f32 %v2548_v39, %v122_v2  ;;  %v136_v40 = vld [vmem:[%s2699_s0 + $0x3d0] sm:$0xff]  ;;  %v137_v41 = vld [vmem:[%s2699_s0 + $0x3d8] sm:$0xff] }
  0x60   :  { %v258_v51 = vmul.f32 %v2548_v39, %v123_v36  ;;  %v1700_v53 = vpack.c.bf16 %v515_v44, %v514_v38  ;;  %v390_v54 = vadd.f32 %v2536_v35, %v255_v45  ;;  %v391_v55 = vadd.f32 %v2536_v35, %v256_v46  ;;  %v138_v46 = vld [vmem:[%s2699_s0 + $0x3e0] sm:$0xff] }
  0x61   :  { %1811 = vst [vmem:[%s2702_s3 + $0x190] sm:$0xff] %v1695_v43   ;;  %v259_v56 = vmul.f32 %v2548_v39, %v124_v42  ;;  %v517_v57 = vmax.f32 %v389_v48, 0.0  ;;  %v392_v58 = vadd.f32 %v2536_v35, %v257_v50  ;;  %v260_v60 = vmul.f32 %v2548_v39, %v125_v47  ;;  %v139_v47 = vld [vmem:[%s2699_s0 + $0x3e8] sm:$0xff] }
  0x62   :  { %v393_v59 = vadd.f32 %v2536_v35, %v258_v51  ;;  %1812 = vst [vmem:[%s2702_s3 + $0x198] sm:$0xff] %v1700_v53   ;;  %v518_v62 = vmax.f32 %v390_v54, 0.0  ;;  %v519_v63 = vmax.f32 %v391_v55, 0.0  ;;  %v261_v1 = vmul.f32 %v2548_v39, %v126_v52  ;;  %v140_v52 = vld [vmem:[%s2699_s0 + $0x3f0] sm:$0xff] }
  0x63   :  { %v394_v0 = vadd.f32 %v2536_v35, %v259_v56  ;;  %v1705_v6 = vpack.c.bf16 %v517_v57, %v516_v49  ;;  %v520_v7 = vmax.f32 %v392_v58, 0.0  ;;  %v395_v9 = vadd.f32 %v2536_v35, %v260_v60  ;;  %v141_v57 = vld [vmem:[%s2699_s0 + $0x3f8] sm:$0xff] }
  0x64   :  { %v521_v8 = vmax.f32 %v393_v59, 0.0  ;;  %v1710_v12 = vpack.c.bf16 %v519_v63, %v518_v62  ;;  %v262_v14 = vmul.f32 %v2548_v39, %v127_v61  ;;  %v396_v15 = vadd.f32 %v2536_v35, %v261_v1 }
  0x65   :  { %v522_v13 = vmax.f32 %v394_v0, 0.0  ;;  %1813 = vst [vmem:[%s2702_s3 + $0x1a0] sm:$0xff] %v1705_v6   ;;  %v523_v18 = vmax.f32 %v395_v9, 0.0  ;;  %v263_v19 = vmul.f32 %v2548_v39, %v128_v3  ;;  %v264_v20 = vmul.f32 %v2548_v39, %v129_v4 }
  0x66   :  { %v1715_v17 = vpack.c.bf16 %v521_v8, %v520_v7  ;;  %1814 = vst [vmem:[%s2702_s3 + $0x1a8] sm:$0xff] %v1710_v12   ;;  %v397_v22 = vadd.f32 %v2536_v35, %v262_v14  ;;  %v524_v23 = vmax.f32 %v396_v15, 0.0  ;;  %v265_v24 = vmul.f32 %v2548_v39, %v130_v10 }
  0x67   :  { %v266_v25 = vmul.f32 %v2548_v39, %v131_v11  ;;  %v1720_v27 = vpack.c.bf16 %v523_v18, %v522_v13  ;;  %v398_v28 = vadd.f32 %v2536_v35, %v263_v19  ;;  %v399_v29 = vadd.f32 %v2536_v35, %v264_v20 }
  0x68   :  { %1815 = vst [vmem:[%s2702_s3 + $0x1b0] sm:$0xff] %v1715_v17   ;;  %v267_v30 = vmul.f32 %v2548_v39, %v132_v16  ;;  %v525_v31 = vmax.f32 %v397_v22, 0.0  ;;  %v400_v32 = vadd.f32 %v2536_v35, %v265_v24  ;;  %v268_v34 = vmul.f32 %v2548_v39, %v133_v21 }
  0x69   :  { %v401_v33 = vadd.f32 %v2536_v35, %v266_v25  ;;  %1816 = vst [vmem:[%s2702_s3 + $0x1b8] sm:$0xff] %v1720_v27   ;;  %v526_v2 = vmax.f32 %v398_v28, 0.0  ;;  %v527_v36 = vmax.f32 %v399_v29, 0.0  ;;  %v269_v38 = vmul.f32 %v2548_v39, %v134_v26 }
  0x6a   :  { %v402_v37 = vadd.f32 %v2536_v35, %v267_v30  ;;  %v1725_v42 = vpack.c.bf16 %v525_v31, %v524_v23  ;;  %v528_v43 = vmax.f32 %v400_v32, 0.0  ;;  %v403_v45 = vadd.f32 %v2536_v35, %v268_v34 }
  0x6b   :  { %v529_v44 = vmax.f32 %v401_v33, 0.0  ;;  %v1730_v48 = vpack.c.bf16 %v527_v36, %v526_v2  ;;  %v270_v50 = vmul.f32 %v2548_v39, %v135_v5  ;;  %v404_v51 = vadd.f32 %v2536_v35, %v269_v38 }
  0x6c   :  { %v530_v49 = vmax.f32 %v402_v37, 0.0  ;;  %1817 = vst [vmem:[%s2702_s3 + $0x1c0] sm:$0xff] %v1725_v42   ;;  %v531_v54 = vmax.f32 %v403_v45, 0.0  ;;  %v271_v55 = vmul.f32 %v2548_v39, %v136_v40  ;;  %v272_v56 = vmul.f32 %v2548_v39, %v137_v41 }
  0x6d   :  { %v1735_v53 = vpack.c.bf16 %v529_v44, %v528_v43  ;;  %1818 = vst [vmem:[%s2702_s3 + $0x1c8] sm:$0xff] %v1730_v48   ;;  %v405_v58 = vadd.f32 %v2536_v35, %v270_v50  ;;  %v532_v59 = vmax.f32 %v404_v51, 0.0  ;;  %v273_v60 = vmul.f32 %v2548_v39, %v138_v46 }
  0x6e   :  { %v274_v61 = vmul.f32 %v2548_v39, %v139_v47  ;;  %v1740_v62 = vpack.c.bf16 %v531_v54, %v530_v49  ;;  %v406_v63 = vadd.f32 %v2536_v35, %v271_v55  ;;  %v407_v0 = vadd.f32 %v2536_v35, %v272_v56 }
  0x6f   :  { %1819 = vst [vmem:[%s2702_s3 + $0x1d0] sm:$0xff] %v1735_v53   ;;  %v275_v1 = vmul.f32 %v2548_v39, %v140_v52  ;;  %v533_v3 = vmax.f32 %v405_v58, 0.0  ;;  %v408_v4 = vadd.f32 %v2536_v35, %v273_v60  ;;  %v276_v7 = vmul.f32 %v2548_v39, %v141_v57 }
  0x70   :  { %v409_v6 = vadd.f32 %v2536_v35, %v274_v61  ;;  %1820 = vst [vmem:[%s2702_s3 + $0x1d8] sm:$0xff] %v1740_v62   ;;  %v534_v8 = vmax.f32 %v406_v63, 0.0  ;;  %v535_v9 = vmax.f32 %v407_v0, 0.0 }
  0x71   :  { %v410_v10 = vadd.f32 %v2536_v35, %v275_v1  ;;  %v1745_v11 = vpack.c.bf16 %v533_v3, %v532_v59  ;;  %v536_v12 = vmax.f32 %v408_v4, 0.0  ;;  %v411_v14 = vadd.f32 %v2536_v35, %v276_v7 }
  0x72   :  { %v537_v13 = vmax.f32 %v409_v6, 0.0  ;;  %v1750_v15 = vpack.c.bf16 %v535_v9, %v534_v8 }
  0x73   :  { %v538_v16 = vmax.f32 %v410_v10, 0.0  ;;  %1821 = vst [vmem:[%s2702_s3 + $0x1e0] sm:$0xff] %v1745_v11   ;;  %v539_v17 = vmax.f32 %v411_v14, 0.0 }
  0x74   :  { %v1755_v39 = vpack.c.bf16 %v537_v13, %v536_v12  ;;  %1822 = vst [vmem:[%s2702_s3 + $0x1e8] sm:$0xff] %v1750_v15  }
  0x75   :  { %v1760_v18 = vpack.c.bf16 %v539_v17, %v538_v16 }
  0x76   :  { %1823 = vst [vmem:[%s2702_s3 + $0x1f0] sm:$0xff] %v1755_v39  }
  0x77   :  { %1824 = vst [vmem:[%s2702_s3 + $0x1f8] sm:$0xff] %v1760_v18  }

// kernel: _lambda_.17
= control target key start
LH: loop header
LB: loop body
LE: loop exit
PB: predicated region body
PF: predicated region fallthrough
CT: control target
= control target key end

     0   :  { %s1422_s9 = smov 0   ;;  %s1424_s10 = smov 0   ;;  %s1578_s0 = inlined_call_operand.vmem [shape: bf16[2304,256], index: 0, kind: input, shape index: {}]   ;;  %s1579_s1 = inlined_call_operand.vmem [shape: bf16[256,128], index: 1, kind: input, shape index: {}]   ;;  %s1580_s2 = inlined_call_operand.vmem [shape: f32[2304,128], index: 2, kind: output, shape index: {}]  }
   0x1   :  { %s1426_s11 = smov 0  }
   0x2 LB: > { %s31_s12 = sadd.s32 1, %s1401_s10  ;;  %p1046_p0 = scmp.ge.s32.totalorder %s1405_s11, 1  ;;  %s1405_s11 = sphi %s1426_s11, %s12_s11   ;;  %s1401_s10 = sphi %s1424_s10, %s1582_s10   ;;  %s1397_s9 = sphi %s1422_s9, %s1581_s9  }
   0x3   : > { %p33_p1 = scmp.ge.s32.totalorder %s31_s12, 9  ;;  %p158_p2 = scmp.lt.s32.totalorder %s1405_s11, 10 }
   0x5   : > { %s1584_s12 = smov (%p33_p1, %s31_s12), 0  ;;  %p159_p3 = pnand %p1046_p0, %p158_p2 }
   0x6   : > { %s1047_s15 = sshll.u32 (!%p159_p3), %s1397_s9, 5 }
   0x7   : > { %162 = sbr.rel (%p159_p3) target bundleno = 318 (0x13e), region = 28  ;;  %p198_p4 = scmp.lt.s32.totalorder (!%p159_p3), %s1047_s15, 287 }
   0xc   : > { %v1255_v0 = vld [vmem:[%s1579_s1 + $0x78] sm:$0xff]   ;;  %v1257_v2 = vld [vmem:[%s1579_s1 + $0x70] sm:$0xff]   ;;  %v1259_v4 = vld [vmem:[%s1579_s1 + $0x68] sm:$0xff]   ;;  %s1586_s15 = smov (!%p198_p4, %s1047_s15), 287 }
   0xd   : > { %v1256_v1 = vld [vmem:[%s1579_s1 + $0x38] sm:$0xff]   ;;  %1103 = vmatprep.subr.bf16.mxu0 %v1255_v0  ;;  %1215 = vmatprep.subr.bf16.mxu1 %v1255_v0  ;;  %v1258_v3 = vld [vmem:[%s1579_s1 + $0x30] sm:$0xff]   ;;  %v1260_v5 = vld [vmem:[%s1579_s1 + $0x28] sm:$0xff]   ;;  %s1102_s30 = sshll.u32 %s1586_s15, 3 }
   0xe   : > { %1104 = vmatpush3.bf16.msra.mxu0 %v1256_v1  ;;  %1223 = vmatpush3.bf16.msra.mxu1 %v1256_v1  ;;  %v1261_v6 = vld [vmem:[%s1579_s1 + $0x60] sm:$0xff]   ;;  %v1263_v8 = vld [vmem:[%s1579_s1 + $0x58] sm:$0xff]   ;;  %s1475_s7 = scalar_lea.vmem %s1578_s0, %s1102_s30  ;;  %v1265_v10 = vld [vmem:[%s1579_s1 + $0x50] sm:$0xff]   ;;  %s1535_s28 = scalar_lea.vmem %s1580_s2, %s1102_s30 }
   0xf   : > { %1105 = vmatprep.subr.bf16.mxu0 %v1257_v2  ;;  %1216 = vmatprep.subr.bf16.mxu1 %v1257_v2  ;;  %v1262_v7 = vld [vmem:[%s1579_s1 + $0x20] sm:$0xff]   ;;  %v1264_v9 = vld [vmem:[%s1579_s1 + $0x18] sm:$0xff]   ;;  %v1266_v13 = vld [vmem:[%s1579_s1 + $0x10] sm:$0xff]  }
  0x10   : > { %v1273_v11 = vld [vmem:[%s1475_s7 + $0x4] ss:$8 sps:$4 sm:$0xff]   ;;  %v1271_v18 = vld [vmem:[%s1475_s7] ss:$8 sps:$4 sm:$0xff]   ;;  %v1277_v20 = vld [vmem:[%s1475_s7 + $0x14] ss:$8 sps:$4 sm:$0xff]  }
  0x11   : > { %v1276_v12 = vld [vmem:[%s1475_s7 + $0x84] ss:$8 sps:$4 sm:$0xff]   ;;  %647 = vmatprep.mubr.bf16.mxu0 %v1273_v11  ;;  %v1274_v19 = vld [vmem:[%s1475_s7 + $0x80] ss:$8 sps:$4 sm:$0xff]   ;;  %v1279_v21 = vld [vmem:[%s1475_s7 + $0x94] ss:$8 sps:$4 sm:$0xff]  }
  0x12   : > { %1106 = vmatpush3.bf16.msra.mxu0 %v1258_v3  ;;  %1224 = vmatpush3.bf16.msra.mxu1 %v1258_v3  ;;  %v1267_v14 = vld [vmem:[%s1579_s1 + $0x48] sm:$0xff]   ;;  %v1269_v16 = vld [vmem:[%s1579_s1 + $0x40] sm:$0xff]   ;;  %v1281_v22 = vld [vmem:[%s1475_s7 + $0x10] ss:$8 sps:$4 sm:$0xff]  }
  0x13   : > { %1107 = vmatprep.subr.bf16.mxu0 %v1259_v4  ;;  %1217 = vmatprep.subr.bf16.mxu1 %v1259_v4  ;;  %v1268_v15 = vld [vmem:[%s1579_s1 + $0x8] sm:$0xff]   ;;  %v1270_v17 = vld [vmem:[%s1579_s1] sm:$0xff]   ;;  %v1282_v23 = vld [vmem:[%s1475_s7 + $0x90] ss:$8 sps:$4 sm:$0xff]  }
  0x14   : > { %711 = vmatprep.mubr.bf16.mxu1 %v1276_v12  ;;  %v1283_v24 = vld [vmem:[%s1475_s7 + $0x24] ss:$8 sps:$4 sm:$0xff]   ;;  %v1287_v26 = vld [vmem:[%s1475_s7 + $0x20] ss:$8 sps:$4 sm:$0xff]   ;;  %v1289_v28 = vld [vmem:[%s1475_s7 + $0x34] ss:$8 sps:$4 sm:$0xff]  }
  0x15   : > { %v1285_v25 = vld [vmem:[%s1475_s7 + $0xa4] ss:$8 sps:$4 sm:$0xff]   ;;  %v1288_v27 = vld [vmem:[%s1475_s7 + $0xa0] ss:$8 sps:$4 sm:$0xff]   ;;  %v1291_v29 = vld [vmem:[%s1475_s7 + $0xb4] ss:$8 sps:$4 sm:$0xff]  }
  0x16   : > { %1108 = vmatpush3.bf16.msra.mxu0 %v1260_v5  ;;  %1225 = vmatpush3.bf16.msra.mxu1 %v1260_v5  ;;  %v1293_v30 = vld [vmem:[%s1475_s7 + $0x30] ss:$8 sps:$4 sm:$0xff]   ;;  %v1295_v32 = vld [vmem:[%s1475_s7 + $0x44] ss:$8 sps:$4 sm:$0xff]   ;;  %v1299_v34 = vld [vmem:[%s1475_s7 + $0x40] ss:$8 sps:$4 sm:$0xff]  }
  0x17   : > { %1109 = vmatprep.subr.bf16.mxu0 %v1261_v6  ;;  %1218 = vmatprep.subr.bf16.mxu1 %v1261_v6  ;;  %v1294_v31 = vld [vmem:[%s1475_s7 + $0xb0] ss:$8 sps:$4 sm:$0xff]   ;;  %v1297_v33 = vld [vmem:[%s1475_s7 + $0xc4] ss:$8 sps:$4 sm:$0xff]   ;;  %v1300_v35 = vld [vmem:[%s1475_s7 + $0xc0] ss:$8 sps:$4 sm:$0xff]  }
  0x18   : > { %v1301_v36 = vld [vmem:[%s1475_s7 + $0x54] ss:$8 sps:$4 sm:$0xff]   ;;  %v1305_v38 = vld [vmem:[%s1475_s7 + $0x50] ss:$8 sps:$4 sm:$0xff]   ;;  %v1307_v40 = vld [vmem:[%s1475_s7 + $0x64] ss:$8 sps:$4 sm:$0xff]  }
  0x19   : > { %v1303_v37 = vld [vmem:[%s1475_s7 + $0xd4] ss:$8 sps:$4 sm:$0xff]   ;;  %v1306_v39 = vld [vmem:[%s1475_s7 + $0xd0] ss:$8 sps:$4 sm:$0xff]   ;;  %v1309_v41 = vld [vmem:[%s1475_s7 + $0xe4] ss:$8 sps:$4 sm:$0xff]  }
  0x1a   : > { %1110 = vmatpush3.bf16.msra.mxu0 %v1262_v7  ;;  %1226 = vmatpush3.bf16.msra.mxu1 %v1262_v7  ;;  %v1311_v42 = vld [vmem:[%s1475_s7 + $0x60] ss:$8 sps:$4 sm:$0xff]   ;;  %v1313_v44 = vld [vmem:[%s1475_s7 + $0x74] ss:$8 sps:$4 sm:$0xff]   ;;  %v1317_v46 = vld [vmem:[%s1475_s7 + $0x70] ss:$8 sps:$4 sm:$0xff]  }
  0x1b   : > { %1111 = vmatprep.subr.bf16.mxu0 %v1263_v8  ;;  %1219 = vmatprep.subr.bf16.mxu1 %v1263_v8  ;;  %v1312_v43 = vld [vmem:[%s1475_s7 + $0xe0] ss:$8 sps:$4 sm:$0xff]   ;;  %v1315_v45 = vld [vmem:[%s1475_s7 + $0xf4] ss:$8 sps:$4 sm:$0xff]   ;;  %v1318_v47 = vld [vmem:[%s1475_s7 + $0xf0] ss:$8 sps:$4 sm:$0xff]  }
  0x1e   : > { %1112 = vmatpush3.bf16.msra.mxu0 %v1264_v9  ;;  %1227 = vmatpush3.bf16.msra.mxu1 %v1264_v9 }
  0x1f   : > { %1113 = vmatprep.subr.bf16.mxu0 %v1265_v10  ;;  %1220 = vmatprep.subr.bf16.mxu1 %v1265_v10 }
  0x22   : > { %1114 = vmatpush3.bf16.msra.mxu0 %v1266_v13  ;;  %1228 = vmatpush3.bf16.msra.mxu1 %v1266_v13 }
  0x23   : > { %1115 = vmatprep.subr.bf16.mxu0 %v1267_v14  ;;  %1221 = vmatprep.subr.bf16.mxu1 %v1267_v14 }
  0x26   : > { %1116 = vmatpush3.bf16.msra.mxu0 %v1268_v15  ;;  %1229 = vmatpush3.bf16.msra.mxu1 %v1268_v15 }
  0x27   : > { %1117 = vmatprep.subr.bf16.mxu0 %v1269_v16  ;;  %1222 = vmatprep.subr.bf16.mxu1 %v1269_v16 }
  0x2a   : > { %1118 = vmatpush3.bf16.msra.mxu0 %v1270_v17  ;;  %1230 = vmatpush3.bf16.msra.mxu1 %v1270_v17 }
  0x2d   : > { %648 = vmatmul.mubr.bf16.vlgmr.msra.gmra.mxu0 %v1271_v18  ;;  %712 = vmatmul.mubr.bf16.vlgmr.msra.gmra.mxu1 %v1274_v19 }
  0x2e   : > { %655 = vmatprep.mubr.bf16.mxu0 %v1277_v20  ;;  %719 = vmatprep.mubr.bf16.mxu1 %v1279_v21 }
  0x35   : > { %656 = vmatmul.mubr.bf16.gmra.mxu0 %v1281_v22  ;;  %720 = vmatmul.mubr.bf16.gmra.mxu1 %v1282_v23 }
  0x36   : > { %663 = vmatprep.mubr.bf16.mxu0 %v1283_v24  ;;  %727 = vmatprep.mubr.bf16.mxu1 %v1285_v25 }
  0x3d   : > { %664 = vmatmul.mubr.bf16.gmra.mxu0 %v1287_v26  ;;  %728 = vmatmul.mubr.bf16.gmra.mxu1 %v1288_v27 }
  0x3e   : > { %671 = vmatprep.mubr.bf16.mxu0 %v1289_v28  ;;  %735 = vmatprep.mubr.bf16.mxu1 %v1291_v29 }
  0x45   : > { %672 = vmatmul.mubr.bf16.gmra.mxu0 %v1293_v30  ;;  %736 = vmatmul.mubr.bf16.gmra.mxu1 %v1294_v31 }
  0x46   : > { %679 = vmatprep.mubr.bf16.mxu0 %v1295_v32  ;;  %743 = vmatprep.mubr.bf16.mxu1 %v1297_v33 }
  0x4d   : > { %680 = vmatmul.mubr.bf16.gmra.mxu0 %v1299_v34  ;;  %744 = vmatmul.mubr.bf16.gmra.mxu1 %v1300_v35 }
  0x4e   : > { %687 = vmatprep.mubr.bf16.mxu0 %v1301_v36  ;;  %751 = vmatprep.mubr.bf16.mxu1 %v1303_v37 }
  0x55   : > { %688 = vmatmul.mubr.bf16.gmra.mxu0 %v1305_v38  ;;  %752 = vmatmul.mubr.bf16.gmra.mxu1 %v1306_v39 }
  0x56   : > { %695 = vmatprep.mubr.bf16.mxu0 %v1307_v40  ;;  %759 = vmatprep.mubr.bf16.mxu1 %v1309_v41 }
  0x5d   : > { %696 = vmatmul.mubr.bf16.gmra.mxu0 %v1311_v42  ;;  %760 = vmatmul.mubr.bf16.gmra.mxu1 %v1312_v43 }
  0x5e   : > { %703 = vmatprep.mubr.bf16.mxu0 %v1313_v44  ;;  %767 = vmatprep.mubr.bf16.mxu1 %v1315_v45 }
  0x65   : > { %704 = vmatmul.mubr.bf16.gmra.mxu0 %v1317_v46  ;;  %768 = vmatmul.mubr.bf16.gmra.mxu1 %v1318_v47 }
  0xed   : > { %v1119_v48 = vpop.f32.mrf.mxu0  ;;  %v1167_v49 = vpop.f32.mrf.mxu1 }
  0xef   : > { %v1120_v50 = vpop.f32.mrf.mxu0  ;;  %v1168_v51 = vpop.f32.mrf.mxu1 }
  0xf0   : > { %v1121_v52 = vadd.f32 %v1120_v50, %v1119_v48  ;;  %v1169_v53 = vadd.f32 %v1168_v51, %v1167_v49 }
  0xf1   : > { %v1122_v54 = vpop.f32.mrf.mxu0  ;;  %v1170_v55 = vpop.f32.mrf.mxu1 }
  0xf2   : > { %1319 = vtanh.f32 %v1121_v52 }
  0xf3   : > { %1321 = vtanh.f32 %v1169_v53  ;;  %v1123_v56 = vpop.f32.mrf.mxu0  ;;  %v1171_v57 = vpop.f32.mrf.mxu1 }
  0xf4   : > { %v1124_v58 = vadd.f32 %v1123_v56, %v1122_v54  ;;  %v1172_v59 = vadd.f32 %v1171_v57, %v1170_v55 }
  0xf5   : > { %v1125_v60 = vpop.f32.mrf.mxu0  ;;  %v1173_v61 = vpop.f32.mrf.mxu1 }
  0xf6   : > { %1323 = vtanh.f32 %v1124_v58 }
  0xf7   : > { %1325 = vtanh.f32 %v1172_v59  ;;  %v1126_v62 = vpop.f32.mrf.mxu0  ;;  %v1174_v63 = vpop.f32.mrf.mxu1 }
  0xf8   : > { %v1127_v0 = vadd.f32 %v1126_v62, %v1125_v60  ;;  %v1175_v1 = vadd.f32 %v1174_v63, %v1173_v61 }
  0xf9   : > { %v1128_v2 = vpop.f32.mrf.mxu0  ;;  %v1176_v3 = vpop.f32.mrf.mxu1 }
  0xfa   : > { %1327 = vtanh.f32 %v1127_v0 }
  0xfb   : > { %1329 = vtanh.f32 %v1175_v1  ;;  %v1129_v4 = vpop.f32.mrf.mxu0  ;;  %v1177_v5 = vpop.f32.mrf.mxu1 }
  0xfc   : > { %v1130_v6 = vadd.f32 %v1129_v4, %v1128_v2  ;;  %v1178_v7 = vadd.f32 %v1177_v5, %v1176_v3 }
  0xfd   : > { %v1131_v8 = vpop.f32.mrf.mxu0  ;;  %v1179_v9 = vpop.f32.mrf.mxu1 }
  0xfe   : > { %1331 = vtanh.f32 %v1130_v6 }
  0xff   : > { %v1320_v10 = vpop.eup %1319  ;;  %1333 = vtanh.f32 %v1178_v7  ;;  %v1132_v11 = vpop.f32.mrf.mxu0 }
 0x100   : > { %v1180_v12 = vpop.f32.mrf.mxu1  ;;  %v1322_v13 = vpop.eup %1321  ;;  %907 = vst [vmem:[%s1535_s28] sm:$0xff] %v1320_v10  ;;  %v1133_v14 = vadd.f32 %v1132_v11, %v1131_v8 }
 0x101   : > { %v1181_v15 = vadd.f32 %v1180_v12, %v1179_v9  ;;  %923 = vst [vmem:[%s1535_s28 + $0x80] sm:$0xff] %v1322_v13  ;;  %v1134_v16 = vpop.f32.mrf.mxu0 }
 0x102   : > { %v1182_v17 = vpop.f32.mrf.mxu1  ;;  %1335 = vtanh.f32 %v1133_v14 }
 0x103   : > { %v1324_v18 = vpop.eup %1323  ;;  %1337 = vtanh.f32 %v1181_v15  ;;  %v1135_v19 = vpop.f32.mrf.mxu0 }
 0x104   : > { %v1183_v20 = vpop.f32.mrf.mxu1  ;;  %v1326_v21 = vpop.eup %1325  ;;  %908 = vst [vmem:[%s1535_s28 + $0x8] sm:$0xff] %v1324_v18  ;;  %v1136_v22 = vadd.f32 %v1135_v19, %v1134_v16 }
 0x105   : > { %v1184_v23 = vadd.f32 %v1183_v20, %v1182_v17  ;;  %924 = vst [vmem:[%s1535_s28 + $0x88] sm:$0xff] %v1326_v21  ;;  %v1137_v24 = vpop.f32.mrf.mxu0 }
 0x106   : > { %v1185_v25 = vpop.f32.mrf.mxu1  ;;  %1339 = vtanh.f32 %v1136_v22 }
 0x107   : > { %v1328_v26 = vpop.eup %1327  ;;  %1341 = vtanh.f32 %v1184_v23  ;;  %v1138_v27 = vpop.f32.mrf.mxu0 }
 0x108   : > { %v1186_v28 = vpop.f32.mrf.mxu1  ;;  %v1330_v29 = vpop.eup %1329  ;;  %909 = vst [vmem:[%s1535_s28 + $0x10] sm:$0xff] %v1328_v26  ;;  %v1139_v30 = vadd.f32 %v1138_v27, %v1137_v24 }
 0x109   : > { %v1187_v31 = vadd.f32 %v1186_v28, %v1185_v25  ;;  %925 = vst [vmem:[%s1535_s28 + $0x90] sm:$0xff] %v1330_v29  ;;  %v1140_v32 = vpop.f32.mrf.mxu0 }
 0x10a   : > { %v1188_v33 = vpop.f32.mrf.mxu1  ;;  %1343 = vtanh.f32 %v1139_v30 }
 0x10b   : > { %v1332_v34 = vpop.eup %1331  ;;  %1345 = vtanh.f32 %v1187_v31  ;;  %v1141_v35 = vpop.f32.mrf.mxu0 }
 0x10c   : > { %v1189_v36 = vpop.f32.mrf.mxu1  ;;  %v1334_v37 = vpop.eup %1333  ;;  %910 = vst [vmem:[%s1535_s28 + $0x18] sm:$0xff] %v1332_v34  ;;  %v1142_v38 = vadd.f32 %v1141_v35, %v1140_v32 }
 0x10d   : > { %v1190_v39 = vadd.f32 %v1189_v36, %v1188_v33  ;;  %926 = vst [vmem:[%s1535_s28 + $0x98] sm:$0xff] %v1334_v37  ;;  %v1143_v40 = vpop.f32.mrf.mxu0 }
 0x10e   : > { %v1191_v41 = vpop.f32.mrf.mxu1  ;;  %1347 = vtanh.f32 %v1142_v38 }
 0x10f   : > { %v1336_v42 = vpop.eup %1335  ;;  %1349 = vtanh.f32 %v1190_v39  ;;  %v1144_v43 = vpop.f32.mrf.mxu0 }
 0x110   : > { %v1192_v44 = vpop.f32.mrf.mxu1  ;;  %v1338_v45 = vpop.eup %1337  ;;  %911 = vst [vmem:[%s1535_s28 + $0x20] sm:$0xff] %v1336_v42  ;;  %v1145_v46 = vadd.f32 %v1144_v43, %v1143_v40 }
 0x111   : > { %v1193_v47 = vadd.f32 %v1192_v44, %v1191_v41  ;;  %927 = vst [vmem:[%s1535_s28 + $0xa0] sm:$0xff] %v1338_v45  ;;  %v1146_v48 = vpop.f32.mrf.mxu0 }
 0x112   : > { %v1194_v49 = vpop.f32.mrf.mxu1  ;;  %1351 = vtanh.f32 %v1145_v46 }
 0x113   : > { %v1340_v50 = vpop.eup %1339  ;;  %1353 = vtanh.f32 %v1193_v47  ;;  %v1147_v51 = vpop.f32.mrf.mxu0 }
 0x114   : > { %v1195_v52 = vpop.f32.mrf.mxu1  ;;  %v1342_v53 = vpop.eup %1341  ;;  %912 = vst [vmem:[%s1535_s28 + $0x28] sm:$0xff] %v1340_v50  ;;  %v1148_v54 = vadd.f32 %v1147_v51, %v1146_v48 }
 0x115   : > { %v1196_v55 = vadd.f32 %v1195_v52, %v1194_v49  ;;  %928 = vst [vmem:[%s1535_s28 + $0xa8] sm:$0xff] %v1342_v53  ;;  %v1149_v56 = vpop.f32.mrf.mxu0 }
 0x116   : > { %v1197_v57 = vpop.f32.mrf.mxu1  ;;  %1355 = vtanh.f32 %v1148_v54 }
 0x117   : > { %v1344_v58 = vpop.eup %1343  ;;  %1357 = vtanh.f32 %v1196_v55  ;;  %v1150_v59 = vpop.f32.mrf.mxu0 }
 0x118   : > { %v1198_v60 = vpop.f32.mrf.mxu1  ;;  %v1346_v61 = vpop.eup %1345  ;;  %913 = vst [vmem:[%s1535_s28 + $0x30] sm:$0xff] %v1344_v58  ;;  %v1151_v62 = vadd.f32 %v1150_v59, %v1149_v56 }
 0x119   : > { %v1199_v63 = vadd.f32 %v1198_v60, %v1197_v57  ;;  %929 = vst [vmem:[%s1535_s28 + $0xb0] sm:$0xff] %v1346_v61  ;;  %v1152_v0 = vpop.f32.mrf.mxu0 }
 0x11a   : > { %v1200_v1 = vpop.f32.mrf.mxu1  ;;  %1359 = vtanh.f32 %v1151_v62 }
 0x11b   : > { %v1348_v2 = vpop.eup %1347  ;;  %1361 = vtanh.f32 %v1199_v63  ;;  %v1153_v3 = vpop.f32.mrf.mxu0 }
 0x11c   : > { %v1201_v4 = vpop.f32.mrf.mxu1  ;;  %v1350_v5 = vpop.eup %1349  ;;  %914 = vst [vmem:[%s1535_s28 + $0x38] sm:$0xff] %v1348_v2  ;;  %v1154_v6 = vadd.f32 %v1153_v3, %v1152_v0 }
 0x11d   : > { %v1202_v7 = vadd.f32 %v1201_v4, %v1200_v1  ;;  %930 = vst [vmem:[%s1535_s28 + $0xb8] sm:$0xff] %v1350_v5  ;;  %v1155_v8 = vpop.f32.mrf.mxu0 }
 0x11e   : > { %v1203_v9 = vpop.f32.mrf.mxu1  ;;  %1363 = vtanh.f32 %v1154_v6 }
 0x11f   : > { %v1352_v10 = vpop.eup %1351  ;;  %1365 = vtanh.f32 %v1202_v7  ;;  %v1156_v11 = vpop.f32.mrf.mxu0 }
 0x120   : > { %v1204_v12 = vpop.f32.mrf.mxu1  ;;  %v1354_v13 = vpop.eup %1353  ;;  %915 = vst [vmem:[%s1535_s28 + $0x40] sm:$0xff] %v1352_v10  ;;  %v1157_v14 = vadd.f32 %v1156_v11, %v1155_v8 }
 0x121   : > { %v1205_v15 = vadd.f32 %v1204_v12, %v1203_v9  ;;  %931 = vst [vmem:[%s1535_s28 + $0xc0] sm:$0xff] %v1354_v13  ;;  %v1158_v16 = vpop.f32.mrf.mxu0 }
 0x122   : > { %v1206_v17 = vpop.f32.mrf.mxu1  ;;  %1367 = vtanh.f32 %v1157_v14 }
 0x123   : > { %v1356_v18 = vpop.eup %1355  ;;  %1369 = vtanh.f32 %v1205_v15  ;;  %v1159_v19 = vpop.f32.mrf.mxu0 }
 0x124   : > { %v1207_v20 = vpop.f32.mrf.mxu1  ;;  %v1358_v21 = vpop.eup %1357  ;;  %916 = vst [vmem:[%s1535_s28 + $0x48] sm:$0xff] %v1356_v18  ;;  %v1160_v22 = vadd.f32 %v1159_v19, %v1158_v16 }
 0x125   : > { %v1208_v23 = vadd.f32 %v1207_v20, %v1206_v17  ;;  %932 = vst [vmem:[%s1535_s28 + $0xc8] sm:$0xff] %v1358_v21  ;;  %v1161_v24 = vpop.f32.mrf.mxu0 }
 0x126   : > { %v1209_v25 = vpop.f32.mrf.mxu1  ;;  %1371 = vtanh.f32 %v1160_v22 }
 0x127   : > { %v1360_v26 = vpop.eup %1359  ;;  %1373 = vtanh.f32 %v1208_v23  ;;  %v1162_v27 = vpop.f32.mrf.mxu0 }
 0x128   : > { %v1210_v28 = vpop.f32.mrf.mxu1  ;;  %v1362_v29 = vpop.eup %1361  ;;  %917 = vst [vmem:[%s1535_s28 + $0x50] sm:$0xff] %v1360_v26  ;;  %v1163_v30 = vadd.f32 %v1162_v27, %v1161_v24 }
 0x129   : > { %v1211_v31 = vadd.f32 %v1210_v28, %v1209_v25  ;;  %933 = vst [vmem:[%s1535_s28 + $0xd0] sm:$0xff] %v1362_v29  ;;  %v1164_v32 = vpop.f32.mrf.mxu0 }
 0x12a   : > { %v1212_v33 = vpop.f32.mrf.mxu1  ;;  %1375 = vtanh.f32 %v1163_v30 }
 0x12b   : > { %v1364_v34 = vpop.eup %1363  ;;  %1377 = vtanh.f32 %v1211_v31  ;;  %v1165_v35 = vpop.f32.mrf.mxu0 }
 0x12c   : > { %v1213_v36 = vpop.f32.mrf.mxu1  ;;  %v1366_v37 = vpop.eup %1365  ;;  %918 = vst [vmem:[%s1535_s28 + $0x58] sm:$0xff] %v1364_v34  ;;  %v1166_v38 = vadd.f32 %v1165_v35, %v1164_v32 }
 0x12d   : > { %v1214_v39 = vadd.f32 %v1213_v36, %v1212_v33  ;;  %934 = vst [vmem:[%s1535_s28 + $0xd8] sm:$0xff] %v1366_v37 }
 0x12e   : > { %1379 = vtanh.f32 %v1166_v38 }
 0x12f   : > { %v1368_v40 = vpop.eup %1367  ;;  %1381 = vtanh.f32 %v1214_v39 }
 0x130   : > { %v1370_v41 = vpop.eup %1369  ;;  %919 = vst [vmem:[%s1535_s28 + $0x60] sm:$0xff] %v1368_v40 }
 0x131   : > { %935 = vst [vmem:[%s1535_s28 + $0xe0] sm:$0xff] %v1370_v41 }
 0x133   : > { %v1372_v42 = vpop.eup %1371 }
 0x134   : > { %v1374_v43 = vpop.eup %1373  ;;  %920 = vst [vmem:[%s1535_s28 + $0x68] sm:$0xff] %v1372_v42 }
 0x135   : > { %936 = vst [vmem:[%s1535_s28 + $0xe8] sm:$0xff] %v1374_v43 }
 0x137   : > { %v1376_v44 = vpop.eup %1375 }
 0x138   : > { %v1378_v45 = vpop.eup %1377  ;;  %921 = vst [vmem:[%s1535_s28 + $0x70] sm:$0xff] %v1376_v44 }
 0x139   : > { %937 = vst [vmem:[%s1535_s28 + $0xf0] sm:$0xff] %v1378_v45 }
 0x13b   : > { %v1380_v46 = vpop.eup %1379 }
 0x13c   : > { %v1382_v47 = vpop.eup %1381  ;;  %922 = vst [vmem:[%s1535_s28 + $0x78] sm:$0xff] %v1380_v46 }
 0x13d   : > { %938 = vst [vmem:[%s1535_s28 + $0xf8] sm:$0xff] %v1382_v47 }
 0x13e PF: > { %s12_s11 = sadd.s32 1, %s1405_s11   ;;  %s1581_s9 = smov %s1401_s10 }
 0x13f   : > { %p9_p5 = scmp.ge.s32.totalorder %s12_s11, 11   ;;  %s1582_s10 = smov %s1584_s12 }
 0x141   :  { %11 = sbr.rel (!%p9_p5) target bundleno = 2 (0x2), region = 69 }

</bundles_post_ra>
